<compile_context>
chip_gen: v6e
topology: v6e:2x2x1
jax: 0.10.0
libtpu: 0.0.40
codegen_flags: <defaults>
</compile_context>

<pallas_src>
import functools

import jax
import jax.numpy as jnp
from jax import lax
from jax.experimental import pallas as pl
from jax.experimental.pallas import tpu as pltpu

# ----------------------------- model hyper-params -----------------------------
SAMPLING_RATE = 400          # synthetic codec model sampling rate
DOWNSAMPLE = 16              # synthetic codec model total downsample rate
CODEC_FRAME_RATE = SAMPLING_RATE // DOWNSAMPLE          # 25 Hz
TARGET_FRAME_RATE = 50                                  # >= 50, multiple of 25
REPLICATE = TARGET_FRAME_RATE // CODEC_FRAME_RATE       # 2
CODE_DIM = 32                # codec model "asr-side" embedding dim
HIDDEN = 32                  # LSTM hidden size (scaled down from 1024)
NUM_CHARS = 32               # vocab size incl. CTC <blank> (= index 0)
GATES = 4 * HIDDEN           # per-direction gate width
PAD_CLASSES = 128            # class dim padded to a full lane group

assert SAMPLING_RATE % DOWNSAMPLE == 0
assert TARGET_FRAME_RATE % CODEC_FRAME_RATE == 0 and TARGET_FRAME_RATE >= 50


# --------------------------- fused forward kernel ------------------------------
def fused_forward_kernel(frames_ref,                      # (1, Tc*Bb, DOWNSAMPLE) bf16
                         w0_ref, b0_ref,                  # (DOWNSAMPLE, 2G) bf16, (1, 2G) f32
                         whh0_ref,                        # (H, 2G) bf16
                         wih1f_ref, wih1b_ref, b1_ref,    # (H, 2G) bf16 x2, (1, 2G) f32
                         whh1_ref,                        # (H, 2G) bf16
                         clswf_ref, clswb_ref, clsb_ref,  # (H, 128) bf16 x2, (1, 128) f32
                         out_ref,                         # (1, Tp*Bb, 128) f32 log-probs
                         gx_sc,                           # (Tp*Bb, 2G) bf16 hoisted input gates
                         *, bblk, t_codec):
    B, H, G = bblk, HIDDEN, GATES
    Tc = t_codec
    Tp = Tc * REPLICATE
    f32, bf16 = jnp.float32, jnp.bfloat16

    # 1) fused codec-encoder + layer-0 input projection, hoisted out of the
    #    recurrence.  One dense bf16 matmul over all frames of this group.
    frames = frames_ref[0]                                          # (Tc*B, DOWNSAMPLE)
    gx_sc[0:Tc * B, :] = (jnp.dot(frames, w0_ref[...],
                                  preferred_element_type=f32)
                          + b0_ref[...]).astype(bf16)

    def bilstm_layer(whh_ref, row_of_t):
        """One bidirectional layer.  gx_sc holds x@W_ih + b for both directions
        (cols [0:G] = fwd gates i|f|g|o, [G:2G] = bwd gates).  Returns the fwd
        and bwd hidden sequences as (Tp*B, H) values (no per-step stores)."""
        whh = whh_ref[...]                                           # (H, 2G) bf16, hoisted
        h = jnp.zeros((2 * B, H), f32)                               # rows [0:B]=fwd, [B:2B]=bwd
        c_f = jnp.zeros((B, H), f32)
        c_b = jnp.zeros((B, H), f32)
        hs_f = [None] * Tp
        hs_b = [None] * Tp

        def cell(g, c_prev):
            i_g = jax.nn.sigmoid(g[:, 0 * H:1 * H])
            f_g = jax.nn.sigmoid(g[:, 1 * H:2 * H])
            g_g = jnp.tanh(g[:, 2 * H:3 * H])
            o_g = jax.nn.sigmoid(g[:, 3 * H:4 * H])
            c_new = f_g * c_prev + i_g * g_g
            return c_new, o_g * jnp.tanh(c_new)

        # TODO(synk): at production sequence lengths replace the full unroll
        # with lax.fori_loop(..., unroll=4-8) + pl.ds/pl.multiple_of offsets.
        for i in range(Tp):                                          # static trip count (demo)
            tb = Tp - 1 - i                                          # bwd-direction time index
            rf, rb = row_of_t(i), row_of_t(tb)
            # single MXU push for both directions (2B = 8 rows = full sublane tile);
            # split whh per direction instead once 2B grows past 8 rows.
            hh = jnp.dot(h.astype(bf16), whh, preferred_element_type=f32)   # (2B, 2G)
            g_f = gx_sc[rf:rf + B, 0:G].astype(f32) + hh[0:B, 0:G]           # (B, G)
            g_b = gx_sc[rb:rb + B, G:2 * G].astype(f32) + hh[B:2 * B, G:2 * G]
            c_f, h_f = cell(g_f, c_f)                                # per-half nonlinearities,
            c_b, h_b = cell(g_b, c_b)                                # no gate concat
            h = jnp.concatenate([h_f, h_b], axis=0)                  # small (2B, H) state slab
            hs_f[i] = h_f
            hs_b[tb] = h_b
        return jnp.concatenate(hs_f, axis=0), jnp.concatenate(hs_b, axis=0)  # (Tp*B, H) each

    # 2) layer 0 — repeat_interleave folded into the gx row index (frame = t // REPLICATE).
    seq_f, seq_b = bilstm_layer(whh0_ref, lambda t: (t // REPLICATE) * B)

    # 3) layer 1 — hoisted input projection; W_ih1 split per direction so the
    #    layer-0 outputs never need to be concatenated along the feature axis.
    # TODO(synk): at HIDDEN=1024 stream W_ih1 / gx through a grid axis instead
    # of keeping them resident (v7x has only 64 MiB VMEM).
    gx_sc[...] = (jnp.dot(seq_f.astype(bf16), wih1f_ref[...], preferred_element_type=f32)
                  + jnp.dot(seq_b.astype(bf16), wih1b_ref[...], preferred_element_type=f32)
                  + b1_ref[...]).astype(bf16)
    seq_f, seq_b = bilstm_layer(whh1_ref, lambda t: t * B)

    # 4) classifier (class dim padded to 128 lanes) + log_softmax, one dense store.
    logits = (jnp.dot(seq_f.astype(bf16), clswf_ref[...], preferred_element_type=f32)
              + jnp.dot(seq_b.astype(bf16), clswb_ref[...], preferred_element_type=f32)
              + clsb_ref[...])                                       # (Tp*B, 128)
    m = jnp.max(logits, axis=-1, keepdims=True)
    z = logits - m
    lse = jnp.log(jnp.sum(jnp.exp(z), axis=-1, keepdims=True))
    out_ref[0] = (z - lse).astype(out_ref.dtype)


def _broadcast_spec(shape):
    zeros = (0,) * len(shape)
    return pl.BlockSpec(shape, lambda g: zeros)


def fused_codec_ctc_head(frames_gtb, dev_params, *, num_groups, bblk, t_codec):
    """frames_gtb: (num_groups, Tc*bblk, DOWNSAMPLE) bf16, rows time-major per group."""
    t_prime = t_codec * REPLICATE
    kernel = functools.partial(fused_forward_kernel, bblk=bblk, t_codec=t_codec)

    weights = [dev_params[k] for k in
               ("w0", "b0", "whh0", "wih1f", "wih1b", "b1", "whh1",
                "cls_wf", "cls_wb", "cls_b")]

    grid_spec = pltpu.PrefetchScalarGridSpec(
        num_scalar_prefetch=0,
        grid=(num_groups,),
        in_specs=[pl.BlockSpec((1, t_codec * bblk, DOWNSAMPLE), lambda g: (g, 0, 0))]
                 + [_broadcast_spec(w.shape) for w in weights],
        out_specs=pl.BlockSpec((1, t_prime * bblk, PAD_CLASSES), lambda g: (g, 0, 0)),
        scratch_shapes=[pltpu.VMEM((t_prime * bblk, 2 * GATES), jnp.bfloat16)],  # gx table
    )
    return pl.pallas_call(
        kernel,
        out_shape=jax.ShapeDtypeStruct((num_groups, t_prime * bblk, PAD_CLASSES),
                                       jnp.float32),
        grid_spec=grid_spec,
        compiler_params=pltpu.CompilerParams(
            dimension_semantics=("parallel",),          # batch groups → both TCs on v7x
            vmem_limit_bytes=32 * 1024 * 1024,          # size to real scratch at prod shapes
        ),
    )(frames_gtb, *weights)


# ----------------------- wrapper-side parameter preparation ----------------------
def prepare_device_params(p):
    """Fold the codec projection into layer 0, split W_ih1 / cls_w per direction,
    pad the class dim to 128 lanes, and cast weight matrices to bf16."""
    f32, bf16 = jnp.float32, jnp.bfloat16
    out = {}
    # exact linear composition: frames @ (codec_w @ W_ih0) + (codec_b @ W_ih0 + b0)
    out["w0"] = (p["codec_w"] @ p["l0_w_ih"]).astype(bf16)                  # (DOWNSAMPLE, 2G)
    out["b0"] = (p["codec_b"] @ p["l0_w_ih"] + p["l0_b"]).astype(f32)       # (1, 2G)
    out["whh0"] = p["l0_w_hh"].astype(bf16)
    out["wih1f"] = p["l1_w_ih"][:HIDDEN].astype(bf16)                       # fwd half of (2H, 2G)
    out["wih1b"] = p["l1_w_ih"][HIDDEN:].astype(bf16)                       # bwd half
    out["b1"] = p["l1_b"].astype(f32)
    out["whh1"] = p["l1_w_hh"].astype(bf16)
    cls_wf = jnp.zeros((HIDDEN, PAD_CLASSES), f32).at[:, :NUM_CHARS].set(p["cls_w"][:HIDDEN])
    cls_wb = jnp.zeros((HIDDEN, PAD_CLASSES), f32).at[:, :NUM_CHARS].set(p["cls_w"][HIDDEN:])
    cls_b = jnp.full((1, PAD_CLASSES), -1e30, f32).at[:, :NUM_CHARS].set(p["cls_b"])
    out["cls_wf"] = cls_wf.astype(bf16)
    out["cls_wb"] = cls_wb.astype(bf16)
    out["cls_b"] = cls_b                                                    # f32 (padding = -1e30)
    return out


# ------------------------------- CTC loss (JAX) ---------------------------------
# TODO(synk): CTC forward DP (data-dependent gather + sequential recursion) is
# kept in plain JAX rather than a Pallas kernel.
def ctc_loss_mean(log_probs, labels, input_lengths, label_lengths, blank=0):
    """nn.CTCLoss(blank=0, zero_infinity=True), reduction='mean' semantics."""
    T, B, _ = log_probs.shape
    L = labels.shape[1]
    S = 2 * L + 1
    NEG = -jnp.inf

    ext = jnp.full((B, S), blank, dtype=jnp.int32).at[:, 1::2].set(labels.astype(jnp.int32))
    lp_ext = jnp.take_along_axis(
        log_probs, jnp.broadcast_to(ext[None], (T, B, S)), axis=2)          # (T,B,S)

    s_idx = jnp.arange(S)
    ext_m2 = jnp.concatenate([jnp.full((B, 2), blank, jnp.int32), ext[:, :-2]], axis=1)
    allow_skip = (s_idx[None, :] >= 2) & (ext != blank) & (ext != ext_m2)

    alpha0 = jnp.full((B, S), NEG)
    alpha0 = alpha0.at[:, 0].set(lp_ext[0, :, 0])
    alpha0 = alpha0.at[:, 1].set(jnp.where(label_lengths > 0, lp_ext[0, :, 1], NEG))

    def step(alpha, inp):
        lp_t, t = inp
        a1 = alpha
        a2 = jnp.concatenate([jnp.full((B, 1), NEG), alpha[:, :-1]], axis=1)
        a3 = jnp.concatenate([jnp.full((B, 2), NEG), alpha[:, :-2]], axis=1)
        a3 = jnp.where(allow_skip, a3, NEG)
        new = jnp.logaddexp(jnp.logaddexp(a1, a2), a3) + lp_t
        valid = (t < input_lengths)[:, None]
        return jnp.where(valid, new, alpha), None

    alpha_final, _ = lax.scan(step, alpha0, (lp_ext[1:], jnp.arange(1, T)))

    b_idx = jnp.arange(B)
    s_last = 2 * label_lengths
    a_last = alpha_final[b_idx, s_last]
    a_prev = jnp.where(label_lengths > 0,
                       alpha_final[b_idx, jnp.maximum(s_last - 1, 0)], NEG)
    loss = -jnp.logaddexp(a_last, a_prev)
    loss = jnp.where(jnp.isinf(loss), 0.0, loss)     # zero_infinity=True
    loss = loss / jnp.maximum(label_lengths, 1).astype(loss.dtype)
    return jnp.mean(loss)


# --------------------------------- forward --------------------------------------
def codec_for_ctc_forward(params, x, labels, input_lengths, label_lengths, *, num_groups=2):
    """Mirrors CodecForCTC.forward. Returns (loss, log_probs, predict_label_lengths)."""
    B, _, length = x.shape                       # NCW waveform, channels = 1
    Tc = length // DOWNSAMPLE
    Tp = Tc * REPLICATE
    if B % num_groups != 0:
        num_groups = 1
    bblk = B // num_groups

    dev = prepare_device_params(params)

    # Layout plumbing only: per-group time-major frame rows (t_codec*bblk + b)
    # so every per-timestep read in the kernel is a contiguous row block.
    frames = x.reshape(B, Tc, DOWNSAMPLE)
    frames = frames.reshape(num_groups, bblk, Tc, DOWNSAMPLE)
    frames = jnp.transpose(frames, (0, 2, 1, 3)).reshape(num_groups, Tc * bblk, DOWNSAMPLE)
    frames = frames.astype(jnp.bfloat16)

    out = fused_codec_ctc_head(frames, dev, num_groups=num_groups, bblk=bblk, t_codec=Tc)
    lp = out.reshape(num_groups, Tp, bblk, PAD_CLASSES)
    lp = jnp.transpose(lp, (1, 0, 2, 3)).reshape(Tp, B, PAD_CLASSES)
    log_probs = lp[:, :, :NUM_CHARS]             # drop padded (never-used) classes

    # literal PyTorch formula: input_lengths * replicate_times // downsample_rate
    predict_label_lengths = input_lengths * REPLICATE // DOWNSAMPLE
    loss = ctc_loss_mean(log_probs, labels, predict_label_lengths, label_lengths)
    return loss, log_probs, predict_label_lengths


# ------------------------- pure-JAX reference (checking) -------------------------
def reference_forward(params, x):
    """Same math in plain JAX (PyTorch structure). Weights are rounded through
    bf16 so the check validates the kernel structure, not the dtype choice."""
    q = lambda w: w.astype(jnp.bfloat16).astype(jnp.float32)
    B, _, length = x.shape
    Tc = length // DOWNSAMPLE
    frames = x.reshape(B, Tc, DOWNSAMPLE)
    zq = jnp.einsum("btk,kd->btd", frames, q(params["codec_w"])) + params["codec_b"][0]
    h_seq = jnp.repeat(zq, REPLICATE, axis=1)                    # (B, Tp, code_dim)
    for layer in range(2):
        w_ih = q(params[f"l{layer}_w_ih"])
        w_hh = q(params[f"l{layer}_w_hh"])
        b = params[f"l{layer}_b"][0]
        outs = []
        for col0, rev in ((0, False), (GATES, True)):
            wi = w_ih[:, col0:col0 + GATES]
            wh = w_hh[:, col0:col0 + GATES]
            bb = b[col0:col0 + GATES]
            seq = h_seq[:, ::-1] if rev else h_seq

            def cell(carry, x_t, wi=wi, wh=wh, bb=bb):
                h, c = carry
                gates = x_t @ wi + h @ wh + bb
                i_g = jax.nn.sigmoid(gates[:, 0:HIDDEN])
                f_g = jax.nn.sigmoid(gates[:, HIDDEN:2 * HIDDEN])
                g_g = jnp.tanh(gates[:, 2 * HIDDEN:3 * HIDDEN])
                o_g = jax.nn.sigmoid(gates[:, 3 * HIDDEN:4 * HIDDEN])
                c = f_g * c + i_g * g_g
                h = o_g * jnp.tanh(c)
                return (h, c), h

            init = (jnp.zeros((B, HIDDEN), jnp.float32),
                    jnp.zeros((B, HIDDEN), jnp.float32))
            _, ys = lax.scan(cell, init, jnp.transpose(seq, (1, 0, 2)))  # (Tp, B, H)
            ys = jnp.transpose(ys, (1, 0, 2))
            outs.append(ys[:, ::-1] if rev else ys)
        h_seq = jnp.concatenate(outs, axis=-1)                    # (B, Tp, 2H)
    logits = h_seq @ q(params["cls_w"]) + params["cls_b"][0]      # (B, Tp, C)
    return jax.nn.log_softmax(jnp.transpose(logits, (1, 0, 2)), axis=2)


# ------------------------------ parameter init ----------------------------------
def init_params(key):
    ks = iter(jax.random.split(key, 12))
    p = {}
    p["codec_w"] = 0.1 * jax.random.normal(next(ks), (DOWNSAMPLE, CODE_DIM), jnp.float32)
    p["codec_b"] = 0.1 * jax.random.normal(next(ks), (1, CODE_DIM), jnp.float32)
    for layer in range(2):
        d_in = CODE_DIM if layer == 0 else 2 * HIDDEN
        # column layout: [fwd i|f|g|o (4H) | bwd i|f|g|o (4H)]; b = b_ih + b_hh
        p[f"l{layer}_w_ih"] = 0.1 * jax.random.normal(next(ks), (d_in, 2 * GATES), jnp.float32)
        p[f"l{layer}_w_hh"] = 0.1 * jax.random.normal(next(ks), (HIDDEN, 2 * GATES), jnp.float32)
        p[f"l{layer}_b"] = 0.1 * jax.random.normal(next(ks), (1, 2 * GATES), jnp.float32)
    p["cls_w"] = 0.1 * jax.random.normal(next(ks), (2 * HIDDEN, NUM_CHARS), jnp.float32)
    p["cls_b"] = 0.1 * jax.random.normal(next(ks), (1, NUM_CHARS), jnp.float32)
    return p


# ----------------------------------- main ----------------------------------------
if __name__ == "__main__":
    key = jax.random.PRNGKey(0)
    k_param, k_x, k_lab = jax.random.split(key, 3)

    B = 8                                          # 2 groups × 4 → 2B=8 rows fill sublanes
    LENGTH = 128                                   # waveform samples → Tc=8, Tp=16
    LMAX = 5                                       # max label length

    params = init_params(k_param)
    x = jax.random.normal(k_x, (B, 1, LENGTH), jnp.float32)          # (B, C=1, L)
    labels = jax.random.randint(k_lab, (B, LMAX), 1, NUM_CHARS).astype(jnp.int32)
    input_lengths = jnp.array([128, 96, 128, 112, 128, 96, 128, 112], dtype=jnp.int32)
    label_lengths = jnp.array([5, 3, 4, 5, 2, 3, 5, 4], dtype=jnp.int32)

    fwd = jax.jit(codec_for_ctc_forward)
    loss, log_probs, pred_lens = fwd(params, x, labels, input_lengths, label_lengths)
    jax.block_until_ready((loss, log_probs, pred_lens))

    # correctness check against the pure-JAX reference (bf16-rounded weights)
    ref_lp = jax.jit(reference_forward)(params, x)
    max_err = float(jnp.max(jnp.abs(log_probs - ref_lp)))
    assert max_err < 5e-2, f"log_probs mismatch vs reference: max abs err = {max_err}"

    assert log_probs.shape == (LENGTH // DOWNSAMPLE * REPLICATE, B, NUM_CHARS)
    assert bool(jnp.isfinite(loss))
    print("KERNEL_OK")
</pallas_src>

<mosaic_0001>
module attributes {stable_mosaic.version = 11 : i64} {
  func.func @fused_forward_kernel(%arg0: i32, %arg1: memref<1x32x16xbf16, #tpu.memory_space<vmem>>, %arg2: memref<16x256xbf16, #tpu.memory_space<vmem>>, %arg3: memref<1x256xf32, #tpu.memory_space<vmem>>, %arg4: memref<32x256xbf16, #tpu.memory_space<vmem>>, %arg5: memref<32x256xbf16, #tpu.memory_space<vmem>>, %arg6: memref<32x256xbf16, #tpu.memory_space<vmem>>, %arg7: memref<1x256xf32, #tpu.memory_space<vmem>>, %arg8: memref<32x256xbf16, #tpu.memory_space<vmem>>, %arg9: memref<32x128xbf16, #tpu.memory_space<vmem>>, %arg10: memref<32x128xbf16, #tpu.memory_space<vmem>>, %arg11: memref<1x128xf32, #tpu.memory_space<vmem>>, %arg12: memref<1x64x128xf32, #tpu.memory_space<vmem>>, %arg13: memref<64x256xbf16, #tpu.memory_space<vmem>>) attributes {dimension_semantics = [#tpu.dimension_semantics<parallel>], iteration_bounds = array<i64: 2>, scalar_prefetch = 0 : i64, scratch_operands = 1 : i64, tpu.core_type = #tpu.core_type<tc>, window_params = [{transform_indices = @transform_0, window_bounds = array<i64: 1, 32, 16>}, {pipeline_mode = #tpu.pipeline_mode<synchronous>, transform_indices = @transform_1, window_bounds = array<i64: 16, 256>}, {pipeline_mode = #tpu.pipeline_mode<synchronous>, transform_indices = @transform_2, window_bounds = array<i64: 1, 256>}, {pipeline_mode = #tpu.pipeline_mode<synchronous>, transform_indices = @transform_3, window_bounds = array<i64: 32, 256>}, {pipeline_mode = #tpu.pipeline_mode<synchronous>, transform_indices = @transform_4, window_bounds = array<i64: 32, 256>}, {pipeline_mode = #tpu.pipeline_mode<synchronous>, transform_indices = @transform_5, window_bounds = array<i64: 32, 256>}, {pipeline_mode = #tpu.pipeline_mode<synchronous>, transform_indices = @transform_6, window_bounds = array<i64: 1, 256>}, {pipeline_mode = #tpu.pipeline_mode<synchronous>, transform_indices = @transform_7, window_bounds = array<i64: 32, 256>}, {pipeline_mode = #tpu.pipeline_mode<synchronous>, transform_indices = @transform_8, window_bounds = array<i64: 32, 128>}, {pipeline_mode = #tpu.pipeline_mode<synchronous>, transform_indices = @transform_9, window_bounds = array<i64: 32, 128>}, {pipeline_mode = #tpu.pipeline_mode<synchronous>, transform_indices = @transform_10, window_bounds = array<i64: 1, 128>}, {transform_indices = @transform_11, window_bounds = array<i64: 1, 64, 128>}]} {
    %c0 = arith.constant 0 : index
    %c0_0 = arith.constant 0 : index
    %c0_1 = arith.constant 0 : index
    %0 = vector.load %arg1[%c0, %c0_0, %c0_1] : memref<1x32x16xbf16, #tpu.memory_space<vmem>>, vector<1x32x16xbf16>
    %1 = vector.shape_cast %0 : vector<1x32x16xbf16> to vector<32x16xbf16>
    %c0_2 = arith.constant 0 : index
    %c0_3 = arith.constant 0 : index
    %2 = vector.load %arg2[%c0_2, %c0_3] : memref<16x256xbf16, #tpu.memory_space<vmem>>, vector<16x256xbf16>
    %cst = arith.constant dense<0.000000e+00> : vector<32x256xf32>
    %3 = tpu.matmul %1, %2, %cst {dimension_numbers = #tpu.dot_dimension_numbers<[1], [0], [0], [1], [0, 0, 1, 1], [], []>} : vector<32x16xbf16>, vector<16x256xbf16>, vector<32x256xf32> -> vector<32x256xf32>
    %c0_4 = arith.constant 0 : index
    %c0_5 = arith.constant 0 : index
    %4 = vector.load %arg3[%c0_4, %c0_5] : memref<1x256xf32, #tpu.memory_space<vmem>>, vector<1x256xf32>
    %5 = vector.broadcast %4 : vector<1x256xf32> to vector<32x256xf32>
    %6 = arith.addf %3, %5 : vector<32x256xf32>
    %7 = arith.truncf %6 : vector<32x256xf32> to vector<32x256xbf16>
    %c0_6 = arith.constant 0 : index
    %c0_7 = arith.constant 0 : index
    %8 = vector.load %arg13[%c0_6, %c0_7] : memref<64x256xbf16, #tpu.memory_space<vmem>>, vector<32x256xbf16>
    tpu.vector_store %arg13[%c0_6, %c0_7], %7 {strides = array<i32>} : memref<64x256xbf16, #tpu.memory_space<vmem>>, vector<32x256xbf16>,
    %c0_8 = arith.constant 0 : index
    %c0_9 = arith.constant 0 : index
    %9 = vector.load %arg4[%c0_8, %c0_9] : memref<32x256xbf16, #tpu.memory_space<vmem>>, vector<32x256xbf16>
    %cst_10 = arith.constant 0.000000e+00 : f32
    %10 = vector.broadcast %cst_10 : f32 to vector<8x32xf32>
    %cst_11 = arith.constant 0.000000e+00 : f32
    %11 = vector.broadcast %cst_11 : f32 to vector<4x32xf32>
    %cst_12 = arith.constant 0.000000e+00 : f32
    %12 = vector.broadcast %cst_12 : f32 to vector<4x32xf32>
    %13 = arith.truncf %10 : vector<8x32xf32> to vector<8x32xbf16>
    %cst_13 = arith.constant dense<0.000000e+00> : vector<8x256xf32>
    %14 = tpu.matmul %13, %9, %cst_13 {dimension_numbers = #tpu.dot_dimension_numbers<[1], [0], [0], [1], [0, 0, 1, 1], [], []>} : vector<8x32xbf16>, vector<32x256xbf16>, vector<8x256xf32> -> vector<8x256xf32>
    %c0_14 = arith.constant 0 : index
    %c0_15 = arith.constant 0 : index
    %15 = vector.load %arg13[%c0_14, %c0_15] : memref<64x256xbf16, #tpu.memory_space<vmem>>, vector<4x128xbf16>
    %16 = arith.extf %15 : vector<4x128xbf16> to vector<4x128xf32>
    %17 = vector.extract_strided_slice %14 {offsets = [0, 0], sizes = [4, 128], strides = [1, 1]} : vector<8x256xf32> to vector<4x128xf32>
    %18 = arith.addf %16, %17 : vector<4x128xf32>
    %c28 = arith.constant 28 : index
    %c128 = arith.constant 128 : index
    %19 = vector.load %arg13[%c28, %c128] : memref<64x256xbf16, #tpu.memory_space<vmem>>, vector<4x128xbf16>
    %20 = arith.extf %19 : vector<4x128xbf16> to vector<4x128xf32>
    %21 = vector.extract_strided_slice %14 {offsets = [4, 128], sizes = [4, 128], strides = [1, 1]} : vector<8x256xf32> to vector<4x128xf32>
    %22 = arith.addf %20, %21 : vector<4x128xf32>
    %23 = vector.extract_strided_slice %18 {offsets = [0, 0], sizes = [4, 32], strides = [1, 1]} : vector<4x128xf32> to vector<4x32xf32>
    %24 = arith.negf %23 : vector<4x32xf32>
    %25 = math.exp %24 : vector<4x32xf32>
    %cst_16 = arith.constant 1.000000e+00 : f32
    %26 = vector.broadcast %cst_16 : f32 to vector<4x32xf32>
    %27 = arith.addf %26, %25 : vector<4x32xf32>
    %28 = arith.divf %26, %27 : vector<4x32xf32>
    %29 = vector.extract_strided_slice %18 {offsets = [0, 32], sizes = [4, 32], strides = [1, 1]} : vector<4x128xf32> to vector<4x32xf32>
    %30 = arith.negf %29 : vector<4x32xf32>
    %31 = math.exp %30 : vector<4x32xf32>
    %cst_17 = arith.constant 1.000000e+00 : f32
    %32 = vector.broadcast %cst_17 : f32 to vector<4x32xf32>
    %33 = arith.addf %32, %31 : vector<4x32xf32>
    %34 = arith.divf %32, %33 : vector<4x32xf32>
    %35 = vector.extract_strided_slice %18 {offsets = [0, 64], sizes = [4, 32], strides = [1, 1]} : vector<4x128xf32> to vector<4x32xf32>
    %36 = math.tanh %35 : vector<4x32xf32>
    %37 = vector.extract_strided_slice %18 {offsets = [0, 96], sizes = [4, 32], strides = [1, 1]} : vector<4x128xf32> to vector<4x32xf32>
    %38 = arith.negf %37 : vector<4x32xf32>
    %39 = math.exp %38 : vector<4x32xf32>
    %cst_18 = arith.constant 1.000000e+00 : f32
    %40 = vector.broadcast %cst_18 : f32 to vector<4x32xf32>
    %41 = arith.addf %40, %39 : vector<4x32xf32>
    %42 = arith.divf %40, %41 : vector<4x32xf32>
    %43 = arith.mulf %34, %11 : vector<4x32xf32>
    %44 = arith.mulf %28, %36 : vector<4x32xf32>
    %45 = arith.addf %43, %44 : vector<4x32xf32>
    %46 = math.tanh %45 : vector<4x32xf32>
    %47 = arith.mulf %42, %46 : vector<4x32xf32>
    %48 = vector.extract_strided_slice %22 {offsets = [0, 0], sizes = [4, 32], strides = [1, 1]} : vector<4x128xf32> to vector<4x32xf32>
    %49 = arith.negf %48 : vector<4x32xf32>
    %50 = math.exp %49 : vector<4x32xf32>
    %cst_19 = arith.constant 1.000000e+00 : f32
    %51 = vector.broadcast %cst_19 : f32 to vector<4x32xf32>
    %52 = arith.addf %51, %50 : vector<4x32xf32>
    %53 = arith.divf %51, %52 : vector<4x32xf32>
    %54 = vector.extract_strided_slice %22 {offsets = [0, 32], sizes = [4, 32], strides = [1, 1]} : vector<4x128xf32> to vector<4x32xf32>
    %55 = arith.negf %54 : vector<4x32xf32>
    %56 = math.exp %55 : vector<4x32xf32>
    %cst_20 = arith.constant 1.000000e+00 : f32
    %57 = vector.broadcast %cst_20 : f32 to vector<4x32xf32>
    %58 = arith.addf %57, %56 : vector<4x32xf32>
    %59 = arith.divf %57, %58 : vector<4x32xf32>
    %60 = vector.extract_strided_slice %22 {offsets = [0, 64], sizes = [4, 32], strides = [1, 1]} : vector<4x128xf32> to vector<4x32xf32>
    %61 = math.tanh %60 : vector<4x32xf32>
    %62 = vector.extract_strided_slice %22 {offsets = [0, 96], sizes = [4, 32], strides = [1, 1]} : vector<4x128xf32> to vector<4x32xf32>
    %63 = arith.negf %62 : vector<4x32xf32>
    %64 = math.exp %63 : vector<4x32xf32>
    %cst_21 = arith.constant 1.000000e+00 : f32
    %65 = vector.broadcast %cst_21 : f32 to vector<4x32xf32>
    %66 = arith.addf %65, %64 : vector<4x32xf32>
    %67 = arith.divf %65, %66 : vector<4x32xf32>
    %68 = arith.mulf %59, %12 : vector<4x32xf32>
    %69 = arith.mulf %53, %61 : vector<4x32xf32>
    %70 = arith.addf %68, %69 : vector<4x32xf32>
    %71 = math.tanh %70 : vector<4x32xf32>
    %72 = arith.mulf %67, %71 : vector<4x32xf32>
    %73 = tpu.concatenate %47, %72 in 0 : vector<4x32xf32>, vector<4x32xf32> -> vector<8x32xf32>
    %74 = arith.truncf %73 : vector<8x32xf32> to vector<8x32xbf16>
    %cst_22 = arith.constant dense<0.000000e+00> : vector<8x256xf32>
    %75 = tpu.matmul %74, %9, %cst_22 {dimension_numbers = #tpu.dot_dimension_numbers<[1], [0], [0], [1], [0, 0, 1, 1], [], []>} : vector<8x32xbf16>, vector<32x256xbf16>, vector<8x256xf32> -> vector<8x256xf32>
    %c0_23 = arith.constant 0 : index
    %c0_24 = arith.constant 0 : index
    %76 = vector.load %arg13[%c0_23, %c0_24] : memref<64x256xbf16, #tpu.memory_space<vmem>>, vector<4x128xbf16>
    %77 = arith.extf %76 : vector<4x128xbf16> to vector<4x128xf32>
    %78 = vector.extract_strided_slice %75 {offsets = [0, 0], sizes = [4, 128], strides = [1, 1]} : vector<8x256xf32> to vector<4x128xf32>
    %79 = arith.addf %77, %78 : vector<4x128xf32>
    %c28_25 = arith.constant 28 : index
    %c128_26 = arith.constant 128 : index
    %80 = vector.load %arg13[%c28_25, %c128_26] : memref<64x256xbf16, #tpu.memory_space<vmem>>, vector<4x128xbf16>
    %81 = arith.extf %80 : vector<4x128xbf16> to vector<4x128xf32>
    %82 = vector.extract_strided_slice %75 {offsets = [4, 128], sizes = [4, 128], strides = [1, 1]} : vector<8x256xf32> to vector<4x128xf32>
    %83 = arith.addf %81, %82 : vector<4x128xf32>
    %84 = vector.extract_strided_slice %79 {offsets = [0, 0], sizes = [4, 32], strides = [1, 1]} : vector<4x128xf32> to vector<4x32xf32>
    %85 = arith.negf %84 : vector<4x32xf32>
    %86 = math.exp %85 : vector<4x32xf32>
    %cst_27 = arith.constant 1.000000e+00 : f32
    %87 = vector.broadcast %cst_27 : f32 to vector<4x32xf32>
    %88 = arith.addf %87, %86 : vector<4x32xf32>
    %89 = arith.divf %87, %88 : vector<4x32xf32>
    %90 = vector.extract_strided_slice %79 {offsets = [0, 32], sizes = [4, 32], strides = [1, 1]} : vector<4x128xf32> to vector<4x32xf32>
    %91 = arith.negf %90 : vector<4x32xf32>
    %92 = math.exp %91 : vector<4x32xf32>
    %cst_28 = arith.constant 1.000000e+00 : f32
    %93 = vector.broadcast %cst_28 : f32 to vector<4x32xf32>
    %94 = arith.addf %93, %92 : vector<4x32xf32>
    %95 = arith.divf %93, %94 : vector<4x32xf32>
    %96 = vector.extract_strided_slice %79 {offsets = [0, 64], sizes = [4, 32], strides = [1, 1]} : vector<4x128xf32> to vector<4x32xf32>
    %97 = math.tanh %96 : vector<4x32xf32>
    %98 = vector.extract_strided_slice %79 {offsets = [0, 96], sizes = [4, 32], strides = [1, 1]} : vector<4x128xf32> to vector<4x32xf32>
    %99 = arith.negf %98 : vector<4x32xf32>
    %100 = math.exp %99 : vector<4x32xf32>
    %cst_29 = arith.constant 1.000000e+00 : f32
    %101 = vector.broadcast %cst_29 : f32 to vector<4x32xf32>
    %102 = arith.addf %101, %100 : vector<4x32xf32>
    %103 = arith.divf %101, %102 : vector<4x32xf32>
    %104 = arith.mulf %95, %45 : vector<4x32xf32>
    %105 = arith.mulf %89, %97 : vector<4x32xf32>
    %106 = arith.addf %104, %105 : vector<4x32xf32>
    %107 = math.tanh %106 : vector<4x32xf32>
    %108 = arith.mulf %103, %107 : vector<4x32xf32>
    %109 = vector.extract_strided_slice %83 {offsets = [0, 0], sizes = [4, 32], strides = [1, 1]} : vector<4x128xf32> to vector<4x32xf32>
    %110 = arith.negf %109 : vector<4x32xf32>
    %111 = math.exp %110 : vector<4x32xf32>
    %cst_30 = arith.constant 1.000000e+00 : f32
    %112 = vector.broadcast %cst_30 : f32 to vector<4x32xf32>
    %113 = arith.addf %112, %111 : vector<4x32xf32>
    %114 = arith.divf %112, %113 : vector<4x32xf32>
    %115 = vector.extract_strided_slice %83 {offsets = [0, 32], sizes = [4, 32], strides = [1, 1]} : vector<4x128xf32> to vector<4x32xf32>
    %116 = arith.negf %115 : vector<4x32xf32>
    %117 = math.exp %116 : vector<4x32xf32>
    %cst_31 = arith.constant 1.000000e+00 : f32
    %118 = vector.broadcast %cst_31 : f32 to vector<4x32xf32>
    %119 = arith.addf %118, %117 : vector<4x32xf32>
    %120 = arith.divf %118, %119 : vector<4x32xf32>
    %121 = vector.extract_strided_slice %83 {offsets = [0, 64], sizes = [4, 32], strides = [1, 1]} : vector<4x128xf32> to vector<4x32xf32>
    %122 = math.tanh %121 : vector<4x32xf32>
    %123 = vector.extract_strided_slice %83 {offsets = [0, 96], sizes = [4, 32], strides = [1, 1]} : vector<4x128xf32> to vector<4x32xf32>
    %124 = arith.negf %123 : vector<4x32xf32>
    %125 = math.exp %124 : vector<4x32xf32>
    %cst_32 = arith.constant 1.000000e+00 : f32
    %126 = vector.broadcast %cst_32 : f32 to vector<4x32xf32>
    %127 = arith.addf %126, %125 : vector<4x32xf32>
    %128 = arith.divf %126, %127 : vector<4x32xf32>
    %129 = arith.mulf %120, %70 : vector<4x32xf32>
    %130 = arith.mulf %114, %122 : vector<4x32xf32>
    %131 = arith.addf %129, %130 : vector<4x32xf32>
    %132 = math.tanh %131 : vector<4x32xf32>
    %133 = arith.mulf %128, %132 : vector<4x32xf32>
    %134 = tpu.concatenate %108, %133 in 0 : vector<4x32xf32>, vector<4x32xf32> -> vector<8x32xf32>
    %135 = arith.truncf %134 : vector<8x32xf32> to vector<8x32xbf16>
    %cst_33 = arith.constant dense<0.000000e+00> : vector<8x256xf32>
    %136 = tpu.matmul %135, %9, %cst_33 {dimension_numbers = #tpu.dot_dimension_numbers<[1], [0], [0], [1], [0, 0, 1, 1], [], []>} : vector<8x32xbf16>, vector<32x256xbf16>, vector<8x256xf32> -> vector<8x256xf32>
    %c4 = arith.constant 4 : index
    %c0_34 = arith.constant 0 : index
    %137 = vector.load %arg13[%c4, %c0_34] : memref<64x256xbf16, #tpu.memory_space<vmem>>, vector<4x128xbf16>
    %138 = arith.extf %137 : vector<4x128xbf16> to vector<4x128xf32>
    %139 = vector.extract_strided_slice %136 {offsets = [0, 0], sizes = [4, 128], strides = [1, 1]} : vector<8x256xf32> to vector<4x128xf32>
    %140 = arith.addf %138, %139 : vector<4x128xf32>
    %c24 = arith.constant 24 : index
    %c128_35 = arith.constant 128 : index
    %141 = vector.load %arg13[%c24, %c128_35] : memref<64x256xbf16, #tpu.memory_space<vmem>>, vector<4x128xbf16>
    %142 = arith.extf %141 : vector<4x128xbf16> to vector<4x128xf32>
    %143 = vector.extract_strided_slice %136 {offsets = [4, 128], sizes = [4, 128], strides = [1, 1]} : vector<8x256xf32> to vector<4x128xf32>
    %144 = arith.addf %142, %143 : vector<4x128xf32>
    %145 = vector.extract_strided_slice %140 {offsets = [0, 0], sizes = [4, 32], strides = [1, 1]} : vector<4x128xf32> to vector<4x32xf32>
    %146 = arith.negf %145 : vector<4x32xf32>
    %147 = math.exp %146 : vector<4x32xf32>
    %cst_36 = arith.constant 1.000000e+00 : f32
    %148 = vector.broadcast %cst_36 : f32 to vector<4x32xf32>
    %149 = arith.addf %148, %147 : vector<4x32xf32>
    %150 = arith.divf %148, %149 : vector<4x32xf32>
    %151 = vector.extract_strided_slice %140 {offsets = [0, 32], sizes = [4, 32], strides = [1, 1]} : vector<4x128xf32> to vector<4x32xf32>
    %152 = arith.negf %151 : vector<4x32xf32>
    %153 = math.exp %152 : vector<4x32xf32>
    %cst_37 = arith.constant 1.000000e+00 : f32
    %154 = vector.broadcast %cst_37 : f32 to vector<4x32xf32>
    %155 = arith.addf %154, %153 : vector<4x32xf32>
    %156 = arith.divf %154, %155 : vector<4x32xf32>
    %157 = vector.extract_strided_slice %140 {offsets = [0, 64], sizes = [4, 32], strides = [1, 1]} : vector<4x128xf32> to vector<4x32xf32>
    %158 = math.tanh %157 : vector<4x32xf32>
    %159 = vector.extract_strided_slice %140 {offsets = [0, 96], sizes = [4, 32], strides = [1, 1]} : vector<4x128xf32> to vector<4x32xf32>
    %160 = arith.negf %159 : vector<4x32xf32>
    %161 = math.exp %160 : vector<4x32xf32>
    %cst_38 = arith.constant 1.000000e+00 : f32
    %162 = vector.broadcast %cst_38 : f32 to vector<4x32xf32>
    %163 = arith.addf %162, %161 : vector<4x32xf32>
    %164 = arith.divf %162, %163 : vector<4x32xf32>
    %165 = arith.mulf %156, %106 : vector<4x32xf32>
    %166 = arith.mulf %150, %158 : vector<4x32xf32>
    %167 = arith.addf %165, %166 : vector<4x32xf32>
    %168 = math.tanh %167 : vector<4x32xf32>
    %169 = arith.mulf %164, %168 : vector<4x32xf32>
    %170 = vector.extract_strided_slice %144 {offsets = [0, 0], sizes = [4, 32], strides = [1, 1]} : vector<4x128xf32> to vector<4x32xf32>
    %171 = arith.negf %170 : vector<4x32xf32>
    %172 = math.exp %171 : vector<4x32xf32>
    %cst_39 = arith.constant 1.000000e+00 : f32
    %173 = vector.broadcast %cst_39 : f32 to vector<4x32xf32>
    %174 = arith.addf %173, %172 : vector<4x32xf32>
    %175 = arith.divf %173, %174 : vector<4x32xf32>
    %176 = vector.extract_strided_slice %144 {offsets = [0, 32], sizes = [4, 32], strides = [1, 1]} : vector<4x128xf32> to vector<4x32xf32>
    %177 = arith.negf %176 : vector<4x32xf32>
    %178 = math.exp %177 : vector<4x32xf32>
    %cst_40 = arith.constant 1.000000e+00 : f32
    %179 = vector.broadcast %cst_40 : f32 to vector<4x32xf32>
    %180 = arith.addf %179, %178 : vector<4x32xf32>
    %181 = arith.divf %179, %180 : vector<4x32xf32>
    %182 = vector.extract_strided_slice %144 {offsets = [0, 64], sizes = [4, 32], strides = [1, 1]} : vector<4x128xf32> to vector<4x32xf32>
    %183 = math.tanh %182 : vector<4x32xf32>
    %184 = vector.extract_strided_slice %144 {offsets = [0, 96], sizes = [4, 32], strides = [1, 1]} : vector<4x128xf32> to vector<4x32xf32>
    %185 = arith.negf %184 : vector<4x32xf32>
    %186 = math.exp %185 : vector<4x32xf32>
    %cst_41 = arith.constant 1.000000e+00 : f32
    %187 = vector.broadcast %cst_41 : f32 to vector<4x32xf32>
    %188 = arith.addf %187, %186 : vector<4x32xf32>
    %189 = arith.divf %187, %188 : vector<4x32xf32>
    %190 = arith.mulf %181, %131 : vector<4x32xf32>
    %191 = arith.mulf %175, %183 : vector<4x32xf32>
    %192 = arith.addf %190, %191 : vector<4x32xf32>
    %193 = math.tanh %192 : vector<4x32xf32>
    %194 = arith.mulf %189, %193 : vector<4x32xf32>
    %195 = tpu.concatenate %169, %194 in 0 : vector<4x32xf32>, vector<4x32xf32> -> vector<8x32xf32>
    %196 = arith.truncf %195 : vector<8x32xf32> to vector<8x32xbf16>
    %cst_42 = arith.constant dense<0.000000e+00> : vector<8x256xf32>
    %197 = tpu.matmul %196, %9, %cst_42 {dimension_numbers = #tpu.dot_dimension_numbers<[1], [0], [0], [1], [0, 0, 1, 1], [], []>} : vector<8x32xbf16>, vector<32x256xbf16>, vector<8x256xf32> -> vector<8x256xf32>
    %c4_43 = arith.constant 4 : index
    %c0_44 = arith.constant 0 : index
    %198 = vector.load %arg13[%c4_43, %c0_44] : memref<64x256xbf16, #tpu.memory_space<vmem>>, vector<4x128xbf16>
    %199 = arith.extf %198 : vector<4x128xbf16> to vector<4x128xf32>
    %200 = vector.extract_strided_slice %197 {offsets = [0, 0], sizes = [4, 128], strides = [1, 1]} : vector<8x256xf32> to vector<4x128xf32>
    %201 = arith.addf %199, %200 : vector<4x128xf32>
    %c24_45 = arith.constant 24 : index
    %c128_46 = arith.constant 128 : index
    %202 = vector.load %arg13[%c24_45, %c128_46] : memref<64x256xbf16, #tpu.memory_space<vmem>>, vector<4x128xbf16>
    %203 = arith.extf %202 : vector<4x128xbf16> to vector<4x128xf32>
    %204 = vector.extract_strided_slice %197 {offsets = [4, 128], sizes = [4, 128], strides = [1, 1]} : vector<8x256xf32> to vector<4x128xf32>
    %205 = arith.addf %203, %204 : vector<4x128xf32>
    %206 = vector.extract_strided_slice %201 {offsets = [0, 0], sizes = [4, 32], strides = [1, 1]} : vector<4x128xf32> to vector<4x32xf32>
    %207 = arith.negf %206 : vector<4x32xf32>
    %208 = math.exp %207 : vector<4x32xf32>
    %cst_47 = arith.constant 1.000000e+00 : f32
    %209 = vector.broadcast %cst_47 : f32 to vector<4x32xf32>
    %210 = arith.addf %209, %208 : vector<4x32xf32>
    %211 = arith.divf %209, %210 : vector<4x32xf32>
    %212 = vector.extract_strided_slice %201 {offsets = [0, 32], sizes = [4, 32], strides = [1, 1]} : vector<4x128xf32> to vector<4x32xf32>
    %213 = arith.negf %212 : vector<4x32xf32>
    %214 = math.exp %213 : vector<4x32xf32>
    %cst_48 = arith.constant 1.000000e+00 : f32
    %215 = vector.broadcast %cst_48 : f32 to vector<4x32xf32>
    %216 = arith.addf %215, %214 : vector<4x32xf32>
    %217 = arith.divf %215, %216 : vector<4x32xf32>
    %218 = vector.extract_strided_slice %201 {offsets = [0, 64], sizes = [4, 32], strides = [1, 1]} : vector<4x128xf32> to vector<4x32xf32>
    %219 = math.tanh %218 : vector<4x32xf32>
    %220 = vector.extract_strided_slice %201 {offsets = [0, 96], sizes = [4, 32], strides = [1, 1]} : vector<4x128xf32> to vector<4x32xf32>
    %221 = arith.negf %220 : vector<4x32xf32>
    %222 = math.exp %221 : vector<4x32xf32>
    %cst_49 = arith.constant 1.000000e+00 : f32
    %223 = vector.broadcast %cst_49 : f32 to vector<4x32xf32>
    %224 = arith.addf %223, %222 : vector<4x32xf32>
    %225 = arith.divf %223, %224 : vector<4x32xf32>
    %226 = arith.mulf %217, %167 : vector<4x32xf32>
    %227 = arith.mulf %211, %219 : vector<4x32xf32>
    %228 = arith.addf %226, %227 : vector<4x32xf32>
    %229 = math.tanh %228 : vector<4x32xf32>
    %230 = arith.mulf %225, %229 : vector<4x32xf32>
    %231 = vector.extract_strided_slice %205 {offsets = [0, 0], sizes = [4, 32], strides = [1, 1]} : vector<4x128xf32> to vector<4x32xf32>
    %232 = arith.negf %231 : vector<4x32xf32>
    %233 = math.exp %232 : vector<4x32xf32>
    %cst_50 = arith.constant 1.000000e+00 : f32
    %234 = vector.broadcast %cst_50 : f32 to vector<4x32xf32>
    %235 = arith.addf %234, %233 : vector<4x32xf32>
    %236 = arith.divf %234, %235 : vector<4x32xf32>
    %237 = vector.extract_strided_slice %205 {offsets = [0, 32], sizes = [4, 32], strides = [1, 1]} : vector<4x128xf32> to vector<4x32xf32>
    %238 = arith.negf %237 : vector<4x32xf32>
    %239 = math.exp %238 : vector<4x32xf32>
    %cst_51 = arith.constant 1.000000e+00 : f32
    %240 = vector.broadcast %cst_51 : f32 to vector<4x32xf32>
    %241 = arith.addf %240, %239 : vector<4x32xf32>
    %242 = arith.divf %240, %241 : vector<4x32xf32>
    %243 = vector.extract_strided_slice %205 {offsets = [0, 64], sizes = [4, 32], strides = [1, 1]} : vector<4x128xf32> to vector<4x32xf32>
    %244 = math.tanh %243 : vector<4x32xf32>
    %245 = vector.extract_strided_slice %205 {offsets = [0, 96], sizes = [4, 32], strides = [1, 1]} : vector<4x128xf32> to vector<4x32xf32>
    %246 = arith.negf %245 : vector<4x32xf32>
    %247 = math.exp %246 : vector<4x32xf32>
    %cst_52 = arith.constant 1.000000e+00 : f32
    %248 = vector.broadcast %cst_52 : f32 to vector<4x32xf32>
    %249 = arith.addf %248, %247 : vector<4x32xf32>
    %250 = arith.divf %248, %249 : vector<4x32xf32>
    %251 = arith.mulf %242, %192 : vector<4x32xf32>
    %252 = arith.mulf %236, %244 : vector<4x32xf32>
    %253 = arith.addf %251, %252 : vector<4x32xf32>
    %254 = math.tanh %253 : vector<4x32xf32>
    %255 = arith.mulf %250, %254 : vector<4x32xf32>
    %256 = tpu.concatenate %230, %255 in 0 : vector<4x32xf32>, vector<4x32xf32> -> vector<8x32xf32>
    %257 = arith.truncf %256 : vector<8x32xf32> to vector<8x32xbf16>
    %cst_53 = arith.constant dense<0.000000e+00> : vector<8x256xf32>
    %258 = tpu.matmul %257, %9, %cst_53 {dimension_numbers = #tpu.dot_dimension_numbers<[1], [0], [0], [1], [0, 0, 1, 1], [], []>} : vector<8x32xbf16>, vector<32x256xbf16>, vector<8x256xf32> -> vector<8x256xf32>
    %c8 = arith.constant 8 : index
    %c0_54 = arith.constant 0 : index
    %259 = vector.load %arg13[%c8, %c0_54] : memref<64x256xbf16, #tpu.memory_space<vmem>>, vector<4x128xbf16>
    %260 = arith.extf %259 : vector<4x128xbf16> to vector<4x128xf32>
    %261 = vector.extract_strided_slice %258 {offsets = [0, 0], sizes = [4, 128], strides = [1, 1]} : vector<8x256xf32> to vector<4x128xf32>
    %262 = arith.addf %260, %261 : vector<4x128xf32>
    %c20 = arith.constant 20 : index
    %c128_55 = arith.constant 128 : index
    %263 = vector.load %arg13[%c20, %c128_55] : memref<64x256xbf16, #tpu.memory_space<vmem>>, vector<4x128xbf16>
    %264 = arith.extf %263 : vector<4x128xbf16> to vector<4x128xf32>
    %265 = vector.extract_strided_slice %258 {offsets = [4, 128], sizes = [4, 128], strides = [1, 1]} : vector<8x256xf32> to vector<4x128xf32>
    %266 = arith.addf %264, %265 : vector<4x128xf32>
    %267 = vector.extract_strided_slice %262 {offsets = [0, 0], sizes = [4, 32], strides = [1, 1]} : vector<4x128xf32> to vector<4x32xf32>
    %268 = arith.negf %267 : vector<4x32xf32>
    %269 = math.exp %268 : vector<4x32xf32>
    %cst_56 = arith.constant 1.000000e+00 : f32
    %270 = vector.broadcast %cst_56 : f32 to vector<4x32xf32>
    %271 = arith.addf %270, %269 : vector<4x32xf32>
    %272 = arith.divf %270, %271 : vector<4x32xf32>
    %273 = vector.extract_strided_slice %262 {offsets = [0, 32], sizes = [4, 32], strides = [1, 1]} : vector<4x128xf32> to vector<4x32xf32>
    %274 = arith.negf %273 : vector<4x32xf32>
    %275 = math.exp %274 : vector<4x32xf32>
    %cst_57 = arith.constant 1.000000e+00 : f32
    %276 = vector.broadcast %cst_57 : f32 to vector<4x32xf32>
    %277 = arith.addf %276, %275 : vector<4x32xf32>
    %278 = arith.divf %276, %277 : vector<4x32xf32>
    %279 = vector.extract_strided_slice %262 {offsets = [0, 64], sizes = [4, 32], strides = [1, 1]} : vector<4x128xf32> to vector<4x32xf32>
    %280 = math.tanh %279 : vector<4x32xf32>
    %281 = vector.extract_strided_slice %262 {offsets = [0, 96], sizes = [4, 32], strides = [1, 1]} : vector<4x128xf32> to vector<4x32xf32>
    %282 = arith.negf %281 : vector<4x32xf32>
    %283 = math.exp %282 : vector<4x32xf32>
    %cst_58 = arith.constant 1.000000e+00 : f32
    %284 = vector.broadcast %cst_58 : f32 to vector<4x32xf32>
    %285 = arith.addf %284, %283 : vector<4x32xf32>
    %286 = arith.divf %284, %285 : vector<4x32xf32>
    %287 = arith.mulf %278, %228 : vector<4x32xf32>
    %288 = arith.mulf %272, %280 : vector<4x32xf32>
    %289 = arith.addf %287, %288 : vector<4x32xf32>
    %290 = math.tanh %289 : vector<4x32xf32>
    %291 = arith.mulf %286, %290 : vector<4x32xf32>
    %292 = vector.extract_strided_slice %266 {offsets = [0, 0], sizes = [4, 32], strides = [1, 1]} : vector<4x128xf32> to vector<4x32xf32>
    %293 = arith.negf %292 : vector<4x32xf32>
    %294 = math.exp %293 : vector<4x32xf32>
    %cst_59 = arith.constant 1.000000e+00 : f32
    %295 = vector.broadcast %cst_59 : f32 to vector<4x32xf32>
    %296 = arith.addf %295, %294 : vector<4x32xf32>
    %297 = arith.divf %295, %296 : vector<4x32xf32>
    %298 = vector.extract_strided_slice %266 {offsets = [0, 32], sizes = [4, 32], strides = [1, 1]} : vector<4x128xf32> to vector<4x32xf32>
    %299 = arith.negf %298 : vector<4x32xf32>
    %300 = math.exp %299 : vector<4x32xf32>
    %cst_60 = arith.constant 1.000000e+00 : f32
    %301 = vector.broadcast %cst_60 : f32 to vector<4x32xf32>
    %302 = arith.addf %301, %300 : vector<4x32xf32>
    %303 = arith.divf %301, %302 : vector<4x32xf32>
    %304 = vector.extract_strided_slice %266 {offsets = [0, 64], sizes = [4, 32], strides = [1, 1]} : vector<4x128xf32> to vector<4x32xf32>
    %305 = math.tanh %304 : vector<4x32xf32>
    %306 = vector.extract_strided_slice %266 {offsets = [0, 96], sizes = [4, 32], strides = [1, 1]} : vector<4x128xf32> to vector<4x32xf32>
    %307 = arith.negf %306 : vector<4x32xf32>
    %308 = math.exp %307 : vector<4x32xf32>
    %cst_61 = arith.constant 1.000000e+00 : f32
    %309 = vector.broadcast %cst_61 : f32 to vector<4x32xf32>
    %310 = arith.addf %309, %308 : vector<4x32xf32>
    %311 = arith.divf %309, %310 : vector<4x32xf32>
    %312 = arith.mulf %303, %253 : vector<4x32xf32>
    %313 = arith.mulf %297, %305 : vector<4x32xf32>
    %314 = arith.addf %312, %313 : vector<4x32xf32>
    %315 = math.tanh %314 : vector<4x32xf32>
    %316 = arith.mulf %311, %315 : vector<4x32xf32>
    %317 = tpu.concatenate %291, %316 in 0 : vector<4x32xf32>, vector<4x32xf32> -> vector<8x32xf32>
    %318 = arith.truncf %317 : vector<8x32xf32> to vector<8x32xbf16>
    %cst_62 = arith.constant dense<0.000000e+00> : vector<8x256xf32>
    %319 = tpu.matmul %318, %9, %cst_62 {dimension_numbers = #tpu.dot_dimension_numbers<[1], [0], [0], [1], [0, 0, 1, 1], [], []>} : vector<8x32xbf16>, vector<32x256xbf16>, vector<8x256xf32> -> vector<8x256xf32>
    %c8_63 = arith.constant 8 : index
    %c0_64 = arith.constant 0 : index
    %320 = vector.load %arg13[%c8_63, %c0_64] : memref<64x256xbf16, #tpu.memory_space<vmem>>, vector<4x128xbf16>
    %321 = arith.extf %320 : vector<4x128xbf16> to vector<4x128xf32>
    %322 = vector.extract_strided_slice %319 {offsets = [0, 0], sizes = [4, 128], strides = [1, 1]} : vector<8x256xf32> to vector<4x128xf32>
    %323 = arith.addf %321, %322 : vector<4x128xf32>
    %c20_65 = arith.constant 20 : index
    %c128_66 = arith.constant 128 : index
    %324 = vector.load %arg13[%c20_65, %c128_66] : memref<64x256xbf16, #tpu.memory_space<vmem>>, vector<4x128xbf16>
    %325 = arith.extf %324 : vector<4x128xbf16> to vector<4x128xf32>
    %326 = vector.extract_strided_slice %319 {offsets = [4, 128], sizes = [4, 128], strides = [1, 1]} : vector<8x256xf32> to vector<4x128xf32>
    %327 = arith.addf %325, %326 : vector<4x128xf32>
    %328 = vector.extract_strided_slice %323 {offsets = [0, 0], sizes = [4, 32], strides = [1, 1]} : vector<4x128xf32> to vector<4x32xf32>
    %329 = arith.negf %328 : vector<4x32xf32>
    %330 = math.exp %329 : vector<4x32xf32>
    %cst_67 = arith.constant 1.000000e+00 : f32
    %331 = vector.broadcast %cst_67 : f32 to vector<4x32xf32>
    %332 = arith.addf %331, %330 : vector<4x32xf32>
    %333 = arith.divf %331, %332 : vector<4x32xf32>
    %334 = vector.extract_strided_slice %323 {offsets = [0, 32], sizes = [4, 32], strides = [1, 1]} : vector<4x128xf32> to vector<4x32xf32>
    %335 = arith.negf %334 : vector<4x32xf32>
    %336 = math.exp %335 : vector<4x32xf32>
    %cst_68 = arith.constant 1.000000e+00 : f32
    %337 = vector.broadcast %cst_68 : f32 to vector<4x32xf32>
    %338 = arith.addf %337, %336 : vector<4x32xf32>
    %339 = arith.divf %337, %338 : vector<4x32xf32>
    %340 = vector.extract_strided_slice %323 {offsets = [0, 64], sizes = [4, 32], strides = [1, 1]} : vector<4x128xf32> to vector<4x32xf32>
    %341 = math.tanh %340 : vector<4x32xf32>
    %342 = vector.extract_strided_slice %323 {offsets = [0, 96], sizes = [4, 32], strides = [1, 1]} : vector<4x128xf32> to vector<4x32xf32>
    %343 = arith.negf %342 : vector<4x32xf32>
    %344 = math.exp %343 : vector<4x32xf32>
    %cst_69 = arith.constant 1.000000e+00 : f32
    %345 = vector.broadcast %cst_69 : f32 to vector<4x32xf32>
    %346 = arith.addf %345, %344 : vector<4x32xf32>
    %347 = arith.divf %345, %346 : vector<4x32xf32>
    %348 = arith.mulf %339, %289 : vector<4x32xf32>
    %349 = arith.mulf %333, %341 : vector<4x32xf32>
    %350 = arith.addf %348, %349 : vector<4x32xf32>
    %351 = math.tanh %350 : vector<4x32xf32>
    %352 = arith.mulf %347, %351 : vector<4x32xf32>
    %353 = vector.extract_strided_slice %327 {offsets = [0, 0], sizes = [4, 32], strides = [1, 1]} : vector<4x128xf32> to vector<4x32xf32>
    %354 = arith.negf %353 : vector<4x32xf32>
    %355 = math.exp %354 : vector<4x32xf32>
    %cst_70 = arith.constant 1.000000e+00 : f32
    %356 = vector.broadcast %cst_70 : f32 to vector<4x32xf32>
    %357 = arith.addf %356, %355 : vector<4x32xf32>
    %358 = arith.divf %356, %357 : vector<4x32xf32>
    %359 = vector.extract_strided_slice %327 {offsets = [0, 32], sizes = [4, 32], strides = [1, 1]} : vector<4x128xf32> to vector<4x32xf32>
    %360 = arith.negf %359 : vector<4x32xf32>
    %361 = math.exp %360 : vector<4x32xf32>
    %cst_71 = arith.constant 1.000000e+00 : f32
    %362 = vector.broadcast %cst_71 : f32 to vector<4x32xf32>
    %363 = arith.addf %362, %361 : vector<4x32xf32>
    %364 = arith.divf %362, %363 : vector<4x32xf32>
    %365 = vector.extract_strided_slice %327 {offsets = [0, 64], sizes = [4, 32], strides = [1, 1]} : vector<4x128xf32> to vector<4x32xf32>
    %366 = math.tanh %365 : vector<4x32xf32>
    %367 = vector.extract_strided_slice %327 {offsets = [0, 96], sizes = [4, 32], strides = [1, 1]} : vector<4x128xf32> to vector<4x32xf32>
    %368 = arith.negf %367 : vector<4x32xf32>
    %369 = math.exp %368 : vector<4x32xf32>
    %cst_72 = arith.constant 1.000000e+00 : f32
    %370 = vector.broadcast %cst_72 : f32 to vector<4x32xf32>
    %371 = arith.addf %370, %369 : vector<4x32xf32>
    %372 = arith.divf %370, %371 : vector<4x32xf32>
    %373 = arith.mulf %364, %314 : vector<4x32xf32>
    %374 = arith.mulf %358, %366 : vector<4x32xf32>
    %375 = arith.addf %373, %374 : vector<4x32xf32>
    %376 = math.tanh %375 : vector<4x32xf32>
    %377 = arith.mulf %372, %376 : vector<4x32xf32>
    %378 = tpu.concatenate %352, %377 in 0 : vector<4x32xf32>, vector<4x32xf32> -> vector<8x32xf32>
    %379 = arith.truncf %378 : vector<8x32xf32> to vector<8x32xbf16>
    %cst_73 = arith.constant dense<0.000000e+00> : vector<8x256xf32>
    %380 = tpu.matmul %379, %9, %cst_73 {dimension_numbers = #tpu.dot_dimension_numbers<[1], [0], [0], [1], [0, 0, 1, 1], [], []>} : vector<8x32xbf16>, vector<32x256xbf16>, vector<8x256xf32> -> vector<8x256xf32>
    %c12 = arith.constant 12 : index
    %c0_74 = arith.constant 0 : index
    %381 = vector.load %arg13[%c12, %c0_74] : memref<64x256xbf16, #tpu.memory_space<vmem>>, vector<4x128xbf16>
    %382 = arith.extf %381 : vector<4x128xbf16> to vector<4x128xf32>
    %383 = vector.extract_strided_slice %380 {offsets = [0, 0], sizes = [4, 128], strides = [1, 1]} : vector<8x256xf32> to vector<4x128xf32>
    %384 = arith.addf %382, %383 : vector<4x128xf32>
    %c16 = arith.constant 16 : index
    %c128_75 = arith.constant 128 : index
    %385 = vector.load %arg13[%c16, %c128_75] : memref<64x256xbf16, #tpu.memory_space<vmem>>, vector<4x128xbf16>
    %386 = arith.extf %385 : vector<4x128xbf16> to vector<4x128xf32>
    %387 = vector.extract_strided_slice %380 {offsets = [4, 128], sizes = [4, 128], strides = [1, 1]} : vector<8x256xf32> to vector<4x128xf32>
    %388 = arith.addf %386, %387 : vector<4x128xf32>
    %389 = vector.extract_strided_slice %384 {offsets = [0, 0], sizes = [4, 32], strides = [1, 1]} : vector<4x128xf32> to vector<4x32xf32>
    %390 = arith.negf %389 : vector<4x32xf32>
    %391 = math.exp %390 : vector<4x32xf32>
    %cst_76 = arith.constant 1.000000e+00 : f32
    %392 = vector.broadcast %cst_76 : f32 to vector<4x32xf32>
    %393 = arith.addf %392, %391 : vector<4x32xf32>
    %394 = arith.divf %392, %393 : vector<4x32xf32>
    %395 = vector.extract_strided_slice %384 {offsets = [0, 32], sizes = [4, 32], strides = [1, 1]} : vector<4x128xf32> to vector<4x32xf32>
    %396 = arith.negf %395 : vector<4x32xf32>
    %397 = math.exp %396 : vector<4x32xf32>
    %cst_77 = arith.constant 1.000000e+00 : f32
    %398 = vector.broadcast %cst_77 : f32 to vector<4x32xf32>
    %399 = arith.addf %398, %397 : vector<4x32xf32>
    %400 = arith.divf %398, %399 : vector<4x32xf32>
    %401 = vector.extract_strided_slice %384 {offsets = [0, 64], sizes = [4, 32], strides = [1, 1]} : vector<4x128xf32> to vector<4x32xf32>
    %402 = math.tanh %401 : vector<4x32xf32>
    %403 = vector.extract_strided_slice %384 {offsets = [0, 96], sizes = [4, 32], strides = [1, 1]} : vector<4x128xf32> to vector<4x32xf32>
    %404 = arith.negf %403 : vector<4x32xf32>
    %405 = math.exp %404 : vector<4x32xf32>
    %cst_78 = arith.constant 1.000000e+00 : f32
    %406 = vector.broadcast %cst_78 : f32 to vector<4x32xf32>
    %407 = arith.addf %406, %405 : vector<4x32xf32>
    %408 = arith.divf %406, %407 : vector<4x32xf32>
    %409 = arith.mulf %400, %350 : vector<4x32xf32>
    %410 = arith.mulf %394, %402 : vector<4x32xf32>
    %411 = arith.addf %409, %410 : vector<4x32xf32>
    %412 = math.tanh %411 : vector<4x32xf32>
    %413 = arith.mulf %408, %412 : vector<4x32xf32>
    %414 = vector.extract_strided_slice %388 {offsets = [0, 0], sizes = [4, 32], strides = [1, 1]} : vector<4x128xf32> to vector<4x32xf32>
    %415 = arith.negf %414 : vector<4x32xf32>
    %416 = math.exp %415 : vector<4x32xf32>
    %cst_79 = arith.constant 1.000000e+00 : f32
    %417 = vector.broadcast %cst_79 : f32 to vector<4x32xf32>
    %418 = arith.addf %417, %416 : vector<4x32xf32>
    %419 = arith.divf %417, %418 : vector<4x32xf32>
    %420 = vector.extract_strided_slice %388 {offsets = [0, 32], sizes = [4, 32], strides = [1, 1]} : vector<4x128xf32> to vector<4x32xf32>
    %421 = arith.negf %420 : vector<4x32xf32>
    %422 = math.exp %421 : vector<4x32xf32>
    %cst_80 = arith.constant 1.000000e+00 : f32
    %423 = vector.broadcast %cst_80 : f32 to vector<4x32xf32>
    %424 = arith.addf %423, %422 : vector<4x32xf32>
    %425 = arith.divf %423, %424 : vector<4x32xf32>
    %426 = vector.extract_strided_slice %388 {offsets = [0, 64], sizes = [4, 32], strides = [1, 1]} : vector<4x128xf32> to vector<4x32xf32>
    %427 = math.tanh %426 : vector<4x32xf32>
    %428 = vector.extract_strided_slice %388 {offsets = [0, 96], sizes = [4, 32], strides = [1, 1]} : vector<4x128xf32> to vector<4x32xf32>
    %429 = arith.negf %428 : vector<4x32xf32>
    %430 = math.exp %429 : vector<4x32xf32>
    %cst_81 = arith.constant 1.000000e+00 : f32
    %431 = vector.broadcast %cst_81 : f32 to vector<4x32xf32>
    %432 = arith.addf %431, %430 : vector<4x32xf32>
    %433 = arith.divf %431, %432 : vector<4x32xf32>
    %434 = arith.mulf %425, %375 : vector<4x32xf32>
    %435 = arith.mulf %419, %427 : vector<4x32xf32>
    %436 = arith.addf %434, %435 : vector<4x32xf32>
    %437 = math.tanh %436 : vector<4x32xf32>
    %438 = arith.mulf %433, %437 : vector<4x32xf32>
    %439 = tpu.concatenate %413, %438 in 0 : vector<4x32xf32>, vector<4x32xf32> -> vector<8x32xf32>
    %440 = arith.truncf %439 : vector<8x32xf32> to vector<8x32xbf16>
    %cst_82 = arith.constant dense<0.000000e+00> : vector<8x256xf32>
    %441 = tpu.matmul %440, %9, %cst_82 {dimension_numbers = #tpu.dot_dimension_numbers<[1], [0], [0], [1], [0, 0, 1, 1], [], []>} : vector<8x32xbf16>, vector<32x256xbf16>, vector<8x256xf32> -> vector<8x256xf32>
    %c12_83 = arith.constant 12 : index
    %c0_84 = arith.constant 0 : index
    %442 = vector.load %arg13[%c12_83, %c0_84] : memref<64x256xbf16, #tpu.memory_space<vmem>>, vector<4x128xbf16>
    %443 = arith.extf %442 : vector<4x128xbf16> to vector<4x128xf32>
    %444 = vector.extract_strided_slice %441 {offsets = [0, 0], sizes = [4, 128], strides = [1, 1]} : vector<8x256xf32> to vector<4x128xf32>
    %445 = arith.addf %443, %444 : vector<4x128xf32>
    %c16_85 = arith.constant 16 : index
    %c128_86 = arith.constant 128 : index
    %446 = vector.load %arg13[%c16_85, %c128_86] : memref<64x256xbf16, #tpu.memory_space<vmem>>, vector<4x128xbf16>
    %447 = arith.extf %446 : vector<4x128xbf16> to vector<4x128xf32>
    %448 = vector.extract_strided_slice %441 {offsets = [4, 128], sizes = [4, 128], strides = [1, 1]} : vector<8x256xf32> to vector<4x128xf32>
    %449 = arith.addf %447, %448 : vector<4x128xf32>
    %450 = vector.extract_strided_slice %445 {offsets = [0, 0], sizes = [4, 32], strides = [1, 1]} : vector<4x128xf32> to vector<4x32xf32>
    %451 = arith.negf %450 : vector<4x32xf32>
    %452 = math.exp %451 : vector<4x32xf32>
    %cst_87 = arith.constant 1.000000e+00 : f32
    %453 = vector.broadcast %cst_87 : f32 to vector<4x32xf32>
    %454 = arith.addf %453, %452 : vector<4x32xf32>
    %455 = arith.divf %453, %454 : vector<4x32xf32>
    %456 = vector.extract_strided_slice %445 {offsets = [0, 32], sizes = [4, 32], strides = [1, 1]} : vector<4x128xf32> to vector<4x32xf32>
    %457 = arith.negf %456 : vector<4x32xf32>
    %458 = math.exp %457 : vector<4x32xf32>
    %cst_88 = arith.constant 1.000000e+00 : f32
    %459 = vector.broadcast %cst_88 : f32 to vector<4x32xf32>
    %460 = arith.addf %459, %458 : vector<4x32xf32>
    %461 = arith.divf %459, %460 : vector<4x32xf32>
    %462 = vector.extract_strided_slice %445 {offsets = [0, 64], sizes = [4, 32], strides = [1, 1]} : vector<4x128xf32> to vector<4x32xf32>
    %463 = math.tanh %462 : vector<4x32xf32>
    %464 = vector.extract_strided_slice %445 {offsets = [0, 96], sizes = [4, 32], strides = [1, 1]} : vector<4x128xf32> to vector<4x32xf32>
    %465 = arith.negf %464 : vector<4x32xf32>
    %466 = math.exp %465 : vector<4x32xf32>
    %cst_89 = arith.constant 1.000000e+00 : f32
    %467 = vector.broadcast %cst_89 : f32 to vector<4x32xf32>
    %468 = arith.addf %467, %466 : vector<4x32xf32>
    %469 = arith.divf %467, %468 : vector<4x32xf32>
    %470 = arith.mulf %461, %411 : vector<4x32xf32>
    %471 = arith.mulf %455, %463 : vector<4x32xf32>
    %472 = arith.addf %470, %471 : vector<4x32xf32>
    %473 = math.tanh %472 : vector<4x32xf32>
    %474 = arith.mulf %469, %473 : vector<4x32xf32>
    %475 = vector.extract_strided_slice %449 {offsets = [0, 0], sizes = [4, 32], strides = [1, 1]} : vector<4x128xf32> to vector<4x32xf32>
    %476 = arith.negf %475 : vector<4x32xf32>
    %477 = math.exp %476 : vector<4x32xf32>
    %cst_90 = arith.constant 1.000000e+00 : f32
    %478 = vector.broadcast %cst_90 : f32 to vector<4x32xf32>
    %479 = arith.addf %478, %477 : vector<4x32xf32>
    %480 = arith.divf %478, %479 : vector<4x32xf32>
    %481 = vector.extract_strided_slice %449 {offsets = [0, 32], sizes = [4, 32], strides = [1, 1]} : vector<4x128xf32> to vector<4x32xf32>
    %482 = arith.negf %481 : vector<4x32xf32>
    %483 = math.exp %482 : vector<4x32xf32>
    %cst_91 = arith.constant 1.000000e+00 : f32
    %484 = vector.broadcast %cst_91 : f32 to vector<4x32xf32>
    %485 = arith.addf %484, %483 : vector<4x32xf32>
    %486 = arith.divf %484, %485 : vector<4x32xf32>
    %487 = vector.extract_strided_slice %449 {offsets = [0, 64], sizes = [4, 32], strides = [1, 1]} : vector<4x128xf32> to vector<4x32xf32>
    %488 = math.tanh %487 : vector<4x32xf32>
    %489 = vector.extract_strided_slice %449 {offsets = [0, 96], sizes = [4, 32], strides = [1, 1]} : vector<4x128xf32> to vector<4x32xf32>
    %490 = arith.negf %489 : vector<4x32xf32>
    %491 = math.exp %490 : vector<4x32xf32>
    %cst_92 = arith.constant 1.000000e+00 : f32
    %492 = vector.broadcast %cst_92 : f32 to vector<4x32xf32>
    %493 = arith.addf %492, %491 : vector<4x32xf32>
    %494 = arith.divf %492, %493 : vector<4x32xf32>
    %495 = arith.mulf %486, %436 : vector<4x32xf32>
    %496 = arith.mulf %480, %488 : vector<4x32xf32>
    %497 = arith.addf %495, %496 : vector<4x32xf32>
    %498 = math.tanh %497 : vector<4x32xf32>
    %499 = arith.mulf %494, %498 : vector<4x32xf32>
    %500 = tpu.concatenate %474, %499 in 0 : vector<4x32xf32>, vector<4x32xf32> -> vector<8x32xf32>
    %501 = arith.truncf %500 : vector<8x32xf32> to vector<8x32xbf16>
    %cst_93 = arith.constant dense<0.000000e+00> : vector<8x256xf32>
    %502 = tpu.matmul %501, %9, %cst_93 {dimension_numbers = #tpu.dot_dimension_numbers<[1], [0], [0], [1], [0, 0, 1, 1], [], []>} : vector<8x32xbf16>, vector<32x256xbf16>, vector<8x256xf32> -> vector<8x256xf32>
    %c16_94 = arith.constant 16 : index
    %c0_95 = arith.constant 0 : index
    %503 = vector.load %arg13[%c16_94, %c0_95] : memref<64x256xbf16, #tpu.memory_space<vmem>>, vector<4x128xbf16>
    %504 = arith.extf %503 : vector<4x128xbf16> to vector<4x128xf32>
    %505 = vector.extract_strided_slice %502 {offsets = [0, 0], sizes = [4, 128], strides = [1, 1]} : vector<8x256xf32> to vector<4x128xf32>
    %506 = arith.addf %504, %505 : vector<4x128xf32>
    %c12_96 = arith.constant 12 : index
    %c128_97 = arith.constant 128 : index
    %507 = vector.load %arg13[%c12_96, %c128_97] : memref<64x256xbf16, #tpu.memory_space<vmem>>, vector<4x128xbf16>
    %508 = arith.extf %507 : vector<4x128xbf16> to vector<4x128xf32>
    %509 = vector.extract_strided_slice %502 {offsets = [4, 128], sizes = [4, 128], strides = [1, 1]} : vector<8x256xf32> to vector<4x128xf32>
    %510 = arith.addf %508, %509 : vector<4x128xf32>
    %511 = vector.extract_strided_slice %506 {offsets = [0, 0], sizes = [4, 32], strides = [1, 1]} : vector<4x128xf32> to vector<4x32xf32>
    %512 = arith.negf %511 : vector<4x32xf32>
    %513 = math.exp %512 : vector<4x32xf32>
    %cst_98 = arith.constant 1.000000e+00 : f32
    %514 = vector.broadcast %cst_98 : f32 to vector<4x32xf32>
    %515 = arith.addf %514, %513 : vector<4x32xf32>
    %516 = arith.divf %514, %515 : vector<4x32xf32>
    %517 = vector.extract_strided_slice %506 {offsets = [0, 32], sizes = [4, 32], strides = [1, 1]} : vector<4x128xf32> to vector<4x32xf32>
    %518 = arith.negf %517 : vector<4x32xf32>
    %519 = math.exp %518 : vector<4x32xf32>
    %cst_99 = arith.constant 1.000000e+00 : f32
    %520 = vector.broadcast %cst_99 : f32 to vector<4x32xf32>
    %521 = arith.addf %520, %519 : vector<4x32xf32>
    %522 = arith.divf %520, %521 : vector<4x32xf32>
    %523 = vector.extract_strided_slice %506 {offsets = [0, 64], sizes = [4, 32], strides = [1, 1]} : vector<4x128xf32> to vector<4x32xf32>
    %524 = math.tanh %523 : vector<4x32xf32>
    %525 = vector.extract_strided_slice %506 {offsets = [0, 96], sizes = [4, 32], strides = [1, 1]} : vector<4x128xf32> to vector<4x32xf32>
    %526 = arith.negf %525 : vector<4x32xf32>
    %527 = math.exp %526 : vector<4x32xf32>
    %cst_100 = arith.constant 1.000000e+00 : f32
    %528 = vector.broadcast %cst_100 : f32 to vector<4x32xf32>
    %529 = arith.addf %528, %527 : vector<4x32xf32>
    %530 = arith.divf %528, %529 : vector<4x32xf32>
    %531 = arith.mulf %522, %472 : vector<4x32xf32>
    %532 = arith.mulf %516, %524 : vector<4x32xf32>
    %533 = arith.addf %531, %532 : vector<4x32xf32>
    %534 = math.tanh %533 : vector<4x32xf32>
    %535 = arith.mulf %530, %534 : vector<4x32xf32>
    %536 = vector.extract_strided_slice %510 {offsets = [0, 0], sizes = [4, 32], strides = [1, 1]} : vector<4x128xf32> to vector<4x32xf32>
    %537 = arith.negf %536 : vector<4x32xf32>
    %538 = math.exp %537 : vector<4x32xf32>
    %cst_101 = arith.constant 1.000000e+00 : f32
    %539 = vector.broadcast %cst_101 : f32 to vector<4x32xf32>
    %540 = arith.addf %539, %538 : vector<4x32xf32>
    %541 = arith.divf %539, %540 : vector<4x32xf32>
    %542 = vector.extract_strided_slice %510 {offsets = [0, 32], sizes = [4, 32], strides = [1, 1]} : vector<4x128xf32> to vector<4x32xf32>
    %543 = arith.negf %542 : vector<4x32xf32>
    %544 = math.exp %543 : vector<4x32xf32>
    %cst_102 = arith.constant 1.000000e+00 : f32
    %545 = vector.broadcast %cst_102 : f32 to vector<4x32xf32>
    %546 = arith.addf %545, %544 : vector<4x32xf32>
    %547 = arith.divf %545, %546 : vector<4x32xf32>
    %548 = vector.extract_strided_slice %510 {offsets = [0, 64], sizes = [4, 32], strides = [1, 1]} : vector<4x128xf32> to vector<4x32xf32>
    %549 = math.tanh %548 : vector<4x32xf32>
    %550 = vector.extract_strided_slice %510 {offsets = [0, 96], sizes = [4, 32], strides = [1, 1]} : vector<4x128xf32> to vector<4x32xf32>
    %551 = arith.negf %550 : vector<4x32xf32>
    %552 = math.exp %551 : vector<4x32xf32>
    %cst_103 = arith.constant 1.000000e+00 : f32
    %553 = vector.broadcast %cst_103 : f32 to vector<4x32xf32>
    %554 = arith.addf %553, %552 : vector<4x32xf32>
    %555 = arith.divf %553, %554 : vector<4x32xf32>
    %556 = arith.mulf %547, %497 : vector<4x32xf32>
    %557 = arith.mulf %541, %549 : vector<4x32xf32>
    %558 = arith.addf %556, %557 : vector<4x32xf32>
    %559 = math.tanh %558 : vector<4x32xf32>
    %560 = arith.mulf %555, %559 : vector<4x32xf32>
    %561 = tpu.concatenate %535, %560 in 0 : vector<4x32xf32>, vector<4x32xf32> -> vector<8x32xf32>
    %562 = arith.truncf %561 : vector<8x32xf32> to vector<8x32xbf16>
    %cst_104 = arith.constant dense<0.000000e+00> : vector<8x256xf32>
    %563 = tpu.matmul %562, %9, %cst_104 {dimension_numbers = #tpu.dot_dimension_numbers<[1], [0], [0], [1], [0, 0, 1, 1], [], []>} : vector<8x32xbf16>, vector<32x256xbf16>, vector<8x256xf32> -> vector<8x256xf32>
    %c16_105 = arith.constant 16 : index
    %c0_106 = arith.constant 0 : index
    %564 = vector.load %arg13[%c16_105, %c0_106] : memref<64x256xbf16, #tpu.memory_space<vmem>>, vector<4x128xbf16>
    %565 = arith.extf %564 : vector<4x128xbf16> to vector<4x128xf32>
    %566 = vector.extract_strided_slice %563 {offsets = [0, 0], sizes = [4, 128], strides = [1, 1]} : vector<8x256xf32> to vector<4x128xf32>
    %567 = arith.addf %565, %566 : vector<4x128xf32>
    %c12_107 = arith.constant 12 : index
    %c128_108 = arith.constant 128 : index
    %568 = vector.load %arg13[%c12_107, %c128_108] : memref<64x256xbf16, #tpu.memory_space<vmem>>, vector<4x128xbf16>
    %569 = arith.extf %568 : vector<4x128xbf16> to vector<4x128xf32>
    %570 = vector.extract_strided_slice %563 {offsets = [4, 128], sizes = [4, 128], strides = [1, 1]} : vector<8x256xf32> to vector<4x128xf32>
    %571 = arith.addf %569, %570 : vector<4x128xf32>
    %572 = vector.extract_strided_slice %567 {offsets = [0, 0], sizes = [4, 32], strides = [1, 1]} : vector<4x128xf32> to vector<4x32xf32>
    %573 = arith.negf %572 : vector<4x32xf32>
    %574 = math.exp %573 : vector<4x32xf32>
    %cst_109 = arith.constant 1.000000e+00 : f32
    %575 = vector.broadcast %cst_109 : f32 to vector<4x32xf32>
    %576 = arith.addf %575, %574 : vector<4x32xf32>
    %577 = arith.divf %575, %576 : vector<4x32xf32>
    %578 = vector.extract_strided_slice %567 {offsets = [0, 32], sizes = [4, 32], strides = [1, 1]} : vector<4x128xf32> to vector<4x32xf32>
    %579 = arith.negf %578 : vector<4x32xf32>
    %580 = math.exp %579 : vector<4x32xf32>
    %cst_110 = arith.constant 1.000000e+00 : f32
    %581 = vector.broadcast %cst_110 : f32 to vector<4x32xf32>
    %582 = arith.addf %581, %580 : vector<4x32xf32>
    %583 = arith.divf %581, %582 : vector<4x32xf32>
    %584 = vector.extract_strided_slice %567 {offsets = [0, 64], sizes = [4, 32], strides = [1, 1]} : vector<4x128xf32> to vector<4x32xf32>
    %585 = math.tanh %584 : vector<4x32xf32>
    %586 = vector.extract_strided_slice %567 {offsets = [0, 96], sizes = [4, 32], strides = [1, 1]} : vector<4x128xf32> to vector<4x32xf32>
    %587 = arith.negf %586 : vector<4x32xf32>
    %588 = math.exp %587 : vector<4x32xf32>
    %cst_111 = arith.constant 1.000000e+00 : f32
    %589 = vector.broadcast %cst_111 : f32 to vector<4x32xf32>
    %590 = arith.addf %589, %588 : vector<4x32xf32>
    %591 = arith.divf %589, %590 : vector<4x32xf32>
    %592 = arith.mulf %583, %533 : vector<4x32xf32>
    %593 = arith.mulf %577, %585 : vector<4x32xf32>
    %594 = arith.addf %592, %593 : vector<4x32xf32>
    %595 = math.tanh %594 : vector<4x32xf32>
    %596 = arith.mulf %591, %595 : vector<4x32xf32>
    %597 = vector.extract_strided_slice %571 {offsets = [0, 0], sizes = [4, 32], strides = [1, 1]} : vector<4x128xf32> to vector<4x32xf32>
    %598 = arith.negf %597 : vector<4x32xf32>
    %599 = math.exp %598 : vector<4x32xf32>
    %cst_112 = arith.constant 1.000000e+00 : f32
    %600 = vector.broadcast %cst_112 : f32 to vector<4x32xf32>
    %601 = arith.addf %600, %599 : vector<4x32xf32>
    %602 = arith.divf %600, %601 : vector<4x32xf32>
    %603 = vector.extract_strided_slice %571 {offsets = [0, 32], sizes = [4, 32], strides = [1, 1]} : vector<4x128xf32> to vector<4x32xf32>
    %604 = arith.negf %603 : vector<4x32xf32>
    %605 = math.exp %604 : vector<4x32xf32>
    %cst_113 = arith.constant 1.000000e+00 : f32
    %606 = vector.broadcast %cst_113 : f32 to vector<4x32xf32>
    %607 = arith.addf %606, %605 : vector<4x32xf32>
    %608 = arith.divf %606, %607 : vector<4x32xf32>
    %609 = vector.extract_strided_slice %571 {offsets = [0, 64], sizes = [4, 32], strides = [1, 1]} : vector<4x128xf32> to vector<4x32xf32>
    %610 = math.tanh %609 : vector<4x32xf32>
    %611 = vector.extract_strided_slice %571 {offsets = [0, 96], sizes = [4, 32], strides = [1, 1]} : vector<4x128xf32> to vector<4x32xf32>
    %612 = arith.negf %611 : vector<4x32xf32>
    %613 = math.exp %612 : vector<4x32xf32>
    %cst_114 = arith.constant 1.000000e+00 : f32
    %614 = vector.broadcast %cst_114 : f32 to vector<4x32xf32>
    %615 = arith.addf %614, %613 : vector<4x32xf32>
    %616 = arith.divf %614, %615 : vector<4x32xf32>
    %617 = arith.mulf %608, %558 : vector<4x32xf32>
    %618 = arith.mulf %602, %610 : vector<4x32xf32>
    %619 = arith.addf %617, %618 : vector<4x32xf32>
    %620 = math.tanh %619 : vector<4x32xf32>
    %621 = arith.mulf %616, %620 : vector<4x32xf32>
    %622 = tpu.concatenate %596, %621 in 0 : vector<4x32xf32>, vector<4x32xf32> -> vector<8x32xf32>
    %623 = arith.truncf %622 : vector<8x32xf32> to vector<8x32xbf16>
    %cst_115 = arith.constant dense<0.000000e+00> : vector<8x256xf32>
    %624 = tpu.matmul %623, %9, %cst_115 {dimension_numbers = #tpu.dot_dimension_numbers<[1], [0], [0], [1], [0, 0, 1, 1], [], []>} : vector<8x32xbf16>, vector<32x256xbf16>, vector<8x256xf32> -> vector<8x256xf32>
    %c20_116 = arith.constant 20 : index
    %c0_117 = arith.constant 0 : index
    %625 = vector.load %arg13[%c20_116, %c0_117] : memref<64x256xbf16, #tpu.memory_space<vmem>>, vector<4x128xbf16>
    %626 = arith.extf %625 : vector<4x128xbf16> to vector<4x128xf32>
    %627 = vector.extract_strided_slice %624 {offsets = [0, 0], sizes = [4, 128], strides = [1, 1]} : vector<8x256xf32> to vector<4x128xf32>
    %628 = arith.addf %626, %627 : vector<4x128xf32>
    %c8_118 = arith.constant 8 : index
    %c128_119 = arith.constant 128 : index
    %629 = vector.load %arg13[%c8_118, %c128_119] : memref<64x256xbf16, #tpu.memory_space<vmem>>, vector<4x128xbf16>
    %630 = arith.extf %629 : vector<4x128xbf16> to vector<4x128xf32>
    %631 = vector.extract_strided_slice %624 {offsets = [4, 128], sizes = [4, 128], strides = [1, 1]} : vector<8x256xf32> to vector<4x128xf32>
    %632 = arith.addf %630, %631 : vector<4x128xf32>
    %633 = vector.extract_strided_slice %628 {offsets = [0, 0], sizes = [4, 32], strides = [1, 1]} : vector<4x128xf32> to vector<4x32xf32>
    %634 = arith.negf %633 : vector<4x32xf32>
    %635 = math.exp %634 : vector<4x32xf32>
    %cst_120 = arith.constant 1.000000e+00 : f32
    %636 = vector.broadcast %cst_120 : f32 to vector<4x32xf32>
    %637 = arith.addf %636, %635 : vector<4x32xf32>
    %638 = arith.divf %636, %637 : vector<4x32xf32>
    %639 = vector.extract_strided_slice %628 {offsets = [0, 32], sizes = [4, 32], strides = [1, 1]} : vector<4x128xf32> to vector<4x32xf32>
    %640 = arith.negf %639 : vector<4x32xf32>
    %641 = math.exp %640 : vector<4x32xf32>
    %cst_121 = arith.constant 1.000000e+00 : f32
    %642 = vector.broadcast %cst_121 : f32 to vector<4x32xf32>
    %643 = arith.addf %642, %641 : vector<4x32xf32>
    %644 = arith.divf %642, %643 : vector<4x32xf32>
    %645 = vector.extract_strided_slice %628 {offsets = [0, 64], sizes = [4, 32], strides = [1, 1]} : vector<4x128xf32> to vector<4x32xf32>
    %646 = math.tanh %645 : vector<4x32xf32>
    %647 = vector.extract_strided_slice %628 {offsets = [0, 96], sizes = [4, 32], strides = [1, 1]} : vector<4x128xf32> to vector<4x32xf32>
    %648 = arith.negf %647 : vector<4x32xf32>
    %649 = math.exp %648 : vector<4x32xf32>
    %cst_122 = arith.constant 1.000000e+00 : f32
    %650 = vector.broadcast %cst_122 : f32 to vector<4x32xf32>
    %651 = arith.addf %650, %649 : vector<4x32xf32>
    %652 = arith.divf %650, %651 : vector<4x32xf32>
    %653 = arith.mulf %644, %594 : vector<4x32xf32>
    %654 = arith.mulf %638, %646 : vector<4x32xf32>
    %655 = arith.addf %653, %654 : vector<4x32xf32>
    %656 = math.tanh %655 : vector<4x32xf32>
    %657 = arith.mulf %652, %656 : vector<4x32xf32>
    %658 = vector.extract_strided_slice %632 {offsets = [0, 0], sizes = [4, 32], strides = [1, 1]} : vector<4x128xf32> to vector<4x32xf32>
    %659 = arith.negf %658 : vector<4x32xf32>
    %660 = math.exp %659 : vector<4x32xf32>
    %cst_123 = arith.constant 1.000000e+00 : f32
    %661 = vector.broadcast %cst_123 : f32 to vector<4x32xf32>
    %662 = arith.addf %661, %660 : vector<4x32xf32>
    %663 = arith.divf %661, %662 : vector<4x32xf32>
    %664 = vector.extract_strided_slice %632 {offsets = [0, 32], sizes = [4, 32], strides = [1, 1]} : vector<4x128xf32> to vector<4x32xf32>
    %665 = arith.negf %664 : vector<4x32xf32>
    %666 = math.exp %665 : vector<4x32xf32>
    %cst_124 = arith.constant 1.000000e+00 : f32
    %667 = vector.broadcast %cst_124 : f32 to vector<4x32xf32>
    %668 = arith.addf %667, %666 : vector<4x32xf32>
    %669 = arith.divf %667, %668 : vector<4x32xf32>
    %670 = vector.extract_strided_slice %632 {offsets = [0, 64], sizes = [4, 32], strides = [1, 1]} : vector<4x128xf32> to vector<4x32xf32>
    %671 = math.tanh %670 : vector<4x32xf32>
    %672 = vector.extract_strided_slice %632 {offsets = [0, 96], sizes = [4, 32], strides = [1, 1]} : vector<4x128xf32> to vector<4x32xf32>
    %673 = arith.negf %672 : vector<4x32xf32>
    %674 = math.exp %673 : vector<4x32xf32>
    %cst_125 = arith.constant 1.000000e+00 : f32
    %675 = vector.broadcast %cst_125 : f32 to vector<4x32xf32>
    %676 = arith.addf %675, %674 : vector<4x32xf32>
    %677 = arith.divf %675, %676 : vector<4x32xf32>
    %678 = arith.mulf %669, %619 : vector<4x32xf32>
    %679 = arith.mulf %663, %671 : vector<4x32xf32>
    %680 = arith.addf %678, %679 : vector<4x32xf32>
    %681 = math.tanh %680 : vector<4x32xf32>
    %682 = arith.mulf %677, %681 : vector<4x32xf32>
    %683 = tpu.concatenate %657, %682 in 0 : vector<4x32xf32>, vector<4x32xf32> -> vector<8x32xf32>
    %684 = arith.truncf %683 : vector<8x32xf32> to vector<8x32xbf16>
    %cst_126 = arith.constant dense<0.000000e+00> : vector<8x256xf32>
    %685 = tpu.matmul %684, %9, %cst_126 {dimension_numbers = #tpu.dot_dimension_numbers<[1], [0], [0], [1], [0, 0, 1, 1], [], []>} : vector<8x32xbf16>, vector<32x256xbf16>, vector<8x256xf32> -> vector<8x256xf32>
    %c20_127 = arith.constant 20 : index
    %c0_128 = arith.constant 0 : index
    %686 = vector.load %arg13[%c20_127, %c0_128] : memref<64x256xbf16, #tpu.memory_space<vmem>>, vector<4x128xbf16>
    %687 = arith.extf %686 : vector<4x128xbf16> to vector<4x128xf32>
    %688 = vector.extract_strided_slice %685 {offsets = [0, 0], sizes = [4, 128], strides = [1, 1]} : vector<8x256xf32> to vector<4x128xf32>
    %689 = arith.addf %687, %688 : vector<4x128xf32>
    %c8_129 = arith.constant 8 : index
    %c128_130 = arith.constant 128 : index
    %690 = vector.load %arg13[%c8_129, %c128_130] : memref<64x256xbf16, #tpu.memory_space<vmem>>, vector<4x128xbf16>
    %691 = arith.extf %690 : vector<4x128xbf16> to vector<4x128xf32>
    %692 = vector.extract_strided_slice %685 {offsets = [4, 128], sizes = [4, 128], strides = [1, 1]} : vector<8x256xf32> to vector<4x128xf32>
    %693 = arith.addf %691, %692 : vector<4x128xf32>
    %694 = vector.extract_strided_slice %689 {offsets = [0, 0], sizes = [4, 32], strides = [1, 1]} : vector<4x128xf32> to vector<4x32xf32>
    %695 = arith.negf %694 : vector<4x32xf32>
    %696 = math.exp %695 : vector<4x32xf32>
    %cst_131 = arith.constant 1.000000e+00 : f32
    %697 = vector.broadcast %cst_131 : f32 to vector<4x32xf32>
    %698 = arith.addf %697, %696 : vector<4x32xf32>
    %699 = arith.divf %697, %698 : vector<4x32xf32>
    %700 = vector.extract_strided_slice %689 {offsets = [0, 32], sizes = [4, 32], strides = [1, 1]} : vector<4x128xf32> to vector<4x32xf32>
    %701 = arith.negf %700 : vector<4x32xf32>
    %702 = math.exp %701 : vector<4x32xf32>
    %cst_132 = arith.constant 1.000000e+00 : f32
    %703 = vector.broadcast %cst_132 : f32 to vector<4x32xf32>
    %704 = arith.addf %703, %702 : vector<4x32xf32>
    %705 = arith.divf %703, %704 : vector<4x32xf32>
    %706 = vector.extract_strided_slice %689 {offsets = [0, 64], sizes = [4, 32], strides = [1, 1]} : vector<4x128xf32> to vector<4x32xf32>
    %707 = math.tanh %706 : vector<4x32xf32>
    %708 = vector.extract_strided_slice %689 {offsets = [0, 96], sizes = [4, 32], strides = [1, 1]} : vector<4x128xf32> to vector<4x32xf32>
    %709 = arith.negf %708 : vector<4x32xf32>
    %710 = math.exp %709 : vector<4x32xf32>
    %cst_133 = arith.constant 1.000000e+00 : f32
    %711 = vector.broadcast %cst_133 : f32 to vector<4x32xf32>
    %712 = arith.addf %711, %710 : vector<4x32xf32>
    %713 = arith.divf %711, %712 : vector<4x32xf32>
    %714 = arith.mulf %705, %655 : vector<4x32xf32>
    %715 = arith.mulf %699, %707 : vector<4x32xf32>
    %716 = arith.addf %714, %715 : vector<4x32xf32>
    %717 = math.tanh %716 : vector<4x32xf32>
    %718 = arith.mulf %713, %717 : vector<4x32xf32>
    %719 = vector.extract_strided_slice %693 {offsets = [0, 0], sizes = [4, 32], strides = [1, 1]} : vector<4x128xf32> to vector<4x32xf32>
    %720 = arith.negf %719 : vector<4x32xf32>
    %721 = math.exp %720 : vector<4x32xf32>
    %cst_134 = arith.constant 1.000000e+00 : f32
    %722 = vector.broadcast %cst_134 : f32 to vector<4x32xf32>
    %723 = arith.addf %722, %721 : vector<4x32xf32>
    %724 = arith.divf %722, %723 : vector<4x32xf32>
    %725 = vector.extract_strided_slice %693 {offsets = [0, 32], sizes = [4, 32], strides = [1, 1]} : vector<4x128xf32> to vector<4x32xf32>
    %726 = arith.negf %725 : vector<4x32xf32>
    %727 = math.exp %726 : vector<4x32xf32>
    %cst_135 = arith.constant 1.000000e+00 : f32
    %728 = vector.broadcast %cst_135 : f32 to vector<4x32xf32>
    %729 = arith.addf %728, %727 : vector<4x32xf32>
    %730 = arith.divf %728, %729 : vector<4x32xf32>
    %731 = vector.extract_strided_slice %693 {offsets = [0, 64], sizes = [4, 32], strides = [1, 1]} : vector<4x128xf32> to vector<4x32xf32>
    %732 = math.tanh %731 : vector<4x32xf32>
    %733 = vector.extract_strided_slice %693 {offsets = [0, 96], sizes = [4, 32], strides = [1, 1]} : vector<4x128xf32> to vector<4x32xf32>
    %734 = arith.negf %733 : vector<4x32xf32>
    %735 = math.exp %734 : vector<4x32xf32>
    %cst_136 = arith.constant 1.000000e+00 : f32
    %736 = vector.broadcast %cst_136 : f32 to vector<4x32xf32>
    %737 = arith.addf %736, %735 : vector<4x32xf32>
    %738 = arith.divf %736, %737 : vector<4x32xf32>
    %739 = arith.mulf %730, %680 : vector<4x32xf32>
    %740 = arith.mulf %724, %732 : vector<4x32xf32>
    %741 = arith.addf %739, %740 : vector<4x32xf32>
    %742 = math.tanh %741 : vector<4x32xf32>
    %743 = arith.mulf %738, %742 : vector<4x32xf32>
    %744 = tpu.concatenate %718, %743 in 0 : vector<4x32xf32>, vector<4x32xf32> -> vector<8x32xf32>
    %745 = arith.truncf %744 : vector<8x32xf32> to vector<8x32xbf16>
    %cst_137 = arith.constant dense<0.000000e+00> : vector<8x256xf32>
    %746 = tpu.matmul %745, %9, %cst_137 {dimension_numbers = #tpu.dot_dimension_numbers<[1], [0], [0], [1], [0, 0, 1, 1], [], []>} : vector<8x32xbf16>, vector<32x256xbf16>, vector<8x256xf32> -> vector<8x256xf32>
    %c24_138 = arith.constant 24 : index
    %c0_139 = arith.constant 0 : index
    %747 = vector.load %arg13[%c24_138, %c0_139] : memref<64x256xbf16, #tpu.memory_space<vmem>>, vector<4x128xbf16>
    %748 = arith.extf %747 : vector<4x128xbf16> to vector<4x128xf32>
    %749 = vector.extract_strided_slice %746 {offsets = [0, 0], sizes = [4, 128], strides = [1, 1]} : vector<8x256xf32> to vector<4x128xf32>
    %750 = arith.addf %748, %749 : vector<4x128xf32>
    %c4_140 = arith.constant 4 : index
    %c128_141 = arith.constant 128 : index
    %751 = vector.load %arg13[%c4_140, %c128_141] : memref<64x256xbf16, #tpu.memory_space<vmem>>, vector<4x128xbf16>
    %752 = arith.extf %751 : vector<4x128xbf16> to vector<4x128xf32>
    %753 = vector.extract_strided_slice %746 {offsets = [4, 128], sizes = [4, 128], strides = [1, 1]} : vector<8x256xf32> to vector<4x128xf32>
    %754 = arith.addf %752, %753 : vector<4x128xf32>
    %755 = vector.extract_strided_slice %750 {offsets = [0, 0], sizes = [4, 32], strides = [1, 1]} : vector<4x128xf32> to vector<4x32xf32>
    %756 = arith.negf %755 : vector<4x32xf32>
    %757 = math.exp %756 : vector<4x32xf32>
    %cst_142 = arith.constant 1.000000e+00 : f32
    %758 = vector.broadcast %cst_142 : f32 to vector<4x32xf32>
    %759 = arith.addf %758, %757 : vector<4x32xf32>
    %760 = arith.divf %758, %759 : vector<4x32xf32>
    %761 = vector.extract_strided_slice %750 {offsets = [0, 32], sizes = [4, 32], strides = [1, 1]} : vector<4x128xf32> to vector<4x32xf32>
    %762 = arith.negf %761 : vector<4x32xf32>
    %763 = math.exp %762 : vector<4x32xf32>
    %cst_143 = arith.constant 1.000000e+00 : f32
    %764 = vector.broadcast %cst_143 : f32 to vector<4x32xf32>
    %765 = arith.addf %764, %763 : vector<4x32xf32>
    %766 = arith.divf %764, %765 : vector<4x32xf32>
    %767 = vector.extract_strided_slice %750 {offsets = [0, 64], sizes = [4, 32], strides = [1, 1]} : vector<4x128xf32> to vector<4x32xf32>
    %768 = math.tanh %767 : vector<4x32xf32>
    %769 = vector.extract_strided_slice %750 {offsets = [0, 96], sizes = [4, 32], strides = [1, 1]} : vector<4x128xf32> to vector<4x32xf32>
    %770 = arith.negf %769 : vector<4x32xf32>
    %771 = math.exp %770 : vector<4x32xf32>
    %cst_144 = arith.constant 1.000000e+00 : f32
    %772 = vector.broadcast %cst_144 : f32 to vector<4x32xf32>
    %773 = arith.addf %772, %771 : vector<4x32xf32>
    %774 = arith.divf %772, %773 : vector<4x32xf32>
    %775 = arith.mulf %766, %716 : vector<4x32xf32>
    %776 = arith.mulf %760, %768 : vector<4x32xf32>
    %777 = arith.addf %775, %776 : vector<4x32xf32>
    %778 = math.tanh %777 : vector<4x32xf32>
    %779 = arith.mulf %774, %778 : vector<4x32xf32>
    %780 = vector.extract_strided_slice %754 {offsets = [0, 0], sizes = [4, 32], strides = [1, 1]} : vector<4x128xf32> to vector<4x32xf32>
    %781 = arith.negf %780 : vector<4x32xf32>
    %782 = math.exp %781 : vector<4x32xf32>
    %cst_145 = arith.constant 1.000000e+00 : f32
    %783 = vector.broadcast %cst_145 : f32 to vector<4x32xf32>
    %784 = arith.addf %783, %782 : vector<4x32xf32>
    %785 = arith.divf %783, %784 : vector<4x32xf32>
    %786 = vector.extract_strided_slice %754 {offsets = [0, 32], sizes = [4, 32], strides = [1, 1]} : vector<4x128xf32> to vector<4x32xf32>
    %787 = arith.negf %786 : vector<4x32xf32>
    %788 = math.exp %787 : vector<4x32xf32>
    %cst_146 = arith.constant 1.000000e+00 : f32
    %789 = vector.broadcast %cst_146 : f32 to vector<4x32xf32>
    %790 = arith.addf %789, %788 : vector<4x32xf32>
    %791 = arith.divf %789, %790 : vector<4x32xf32>
    %792 = vector.extract_strided_slice %754 {offsets = [0, 64], sizes = [4, 32], strides = [1, 1]} : vector<4x128xf32> to vector<4x32xf32>
    %793 = math.tanh %792 : vector<4x32xf32>
    %794 = vector.extract_strided_slice %754 {offsets = [0, 96], sizes = [4, 32], strides = [1, 1]} : vector<4x128xf32> to vector<4x32xf32>
    %795 = arith.negf %794 : vector<4x32xf32>
    %796 = math.exp %795 : vector<4x32xf32>
    %cst_147 = arith.constant 1.000000e+00 : f32
    %797 = vector.broadcast %cst_147 : f32 to vector<4x32xf32>
    %798 = arith.addf %797, %796 : vector<4x32xf32>
    %799 = arith.divf %797, %798 : vector<4x32xf32>
    %800 = arith.mulf %791, %741 : vector<4x32xf32>
    %801 = arith.mulf %785, %793 : vector<4x32xf32>
    %802 = arith.addf %800, %801 : vector<4x32xf32>
    %803 = math.tanh %802 : vector<4x32xf32>
    %804 = arith.mulf %799, %803 : vector<4x32xf32>
    %805 = tpu.concatenate %779, %804 in 0 : vector<4x32xf32>, vector<4x32xf32> -> vector<8x32xf32>
    %806 = arith.truncf %805 : vector<8x32xf32> to vector<8x32xbf16>
    %cst_148 = arith.constant dense<0.000000e+00> : vector<8x256xf32>
    %807 = tpu.matmul %806, %9, %cst_148 {dimension_numbers = #tpu.dot_dimension_numbers<[1], [0], [0], [1], [0, 0, 1, 1], [], []>} : vector<8x32xbf16>, vector<32x256xbf16>, vector<8x256xf32> -> vector<8x256xf32>
    %c24_149 = arith.constant 24 : index
    %c0_150 = arith.constant 0 : index
    %808 = vector.load %arg13[%c24_149, %c0_150] : memref<64x256xbf16, #tpu.memory_space<vmem>>, vector<4x128xbf16>
    %809 = arith.extf %808 : vector<4x128xbf16> to vector<4x128xf32>
    %810 = vector.extract_strided_slice %807 {offsets = [0, 0], sizes = [4, 128], strides = [1, 1]} : vector<8x256xf32> to vector<4x128xf32>
    %811 = arith.addf %809, %810 : vector<4x128xf32>
    %c4_151 = arith.constant 4 : index
    %c128_152 = arith.constant 128 : index
    %812 = vector.load %arg13[%c4_151, %c128_152] : memref<64x256xbf16, #tpu.memory_space<vmem>>, vector<4x128xbf16>
    %813 = arith.extf %812 : vector<4x128xbf16> to vector<4x128xf32>
    %814 = vector.extract_strided_slice %807 {offsets = [4, 128], sizes = [4, 128], strides = [1, 1]} : vector<8x256xf32> to vector<4x128xf32>
    %815 = arith.addf %813, %814 : vector<4x128xf32>
    %816 = vector.extract_strided_slice %811 {offsets = [0, 0], sizes = [4, 32], strides = [1, 1]} : vector<4x128xf32> to vector<4x32xf32>
    %817 = arith.negf %816 : vector<4x32xf32>
    %818 = math.exp %817 : vector<4x32xf32>
    %cst_153 = arith.constant 1.000000e+00 : f32
    %819 = vector.broadcast %cst_153 : f32 to vector<4x32xf32>
    %820 = arith.addf %819, %818 : vector<4x32xf32>
    %821 = arith.divf %819, %820 : vector<4x32xf32>
    %822 = vector.extract_strided_slice %811 {offsets = [0, 32], sizes = [4, 32], strides = [1, 1]} : vector<4x128xf32> to vector<4x32xf32>
    %823 = arith.negf %822 : vector<4x32xf32>
    %824 = math.exp %823 : vector<4x32xf32>
    %cst_154 = arith.constant 1.000000e+00 : f32
    %825 = vector.broadcast %cst_154 : f32 to vector<4x32xf32>
    %826 = arith.addf %825, %824 : vector<4x32xf32>
    %827 = arith.divf %825, %826 : vector<4x32xf32>
    %828 = vector.extract_strided_slice %811 {offsets = [0, 64], sizes = [4, 32], strides = [1, 1]} : vector<4x128xf32> to vector<4x32xf32>
    %829 = math.tanh %828 : vector<4x32xf32>
    %830 = vector.extract_strided_slice %811 {offsets = [0, 96], sizes = [4, 32], strides = [1, 1]} : vector<4x128xf32> to vector<4x32xf32>
    %831 = arith.negf %830 : vector<4x32xf32>
    %832 = math.exp %831 : vector<4x32xf32>
    %cst_155 = arith.constant 1.000000e+00 : f32
    %833 = vector.broadcast %cst_155 : f32 to vector<4x32xf32>
    %834 = arith.addf %833, %832 : vector<4x32xf32>
    %835 = arith.divf %833, %834 : vector<4x32xf32>
    %836 = arith.mulf %827, %777 : vector<4x32xf32>
    %837 = arith.mulf %821, %829 : vector<4x32xf32>
    %838 = arith.addf %836, %837 : vector<4x32xf32>
    %839 = math.tanh %838 : vector<4x32xf32>
    %840 = arith.mulf %835, %839 : vector<4x32xf32>
    %841 = vector.extract_strided_slice %815 {offsets = [0, 0], sizes = [4, 32], strides = [1, 1]} : vector<4x128xf32> to vector<4x32xf32>
    %842 = arith.negf %841 : vector<4x32xf32>
    %843 = math.exp %842 : vector<4x32xf32>
    %cst_156 = arith.constant 1.000000e+00 : f32
    %844 = vector.broadcast %cst_156 : f32 to vector<4x32xf32>
    %845 = arith.addf %844, %843 : vector<4x32xf32>
    %846 = arith.divf %844, %845 : vector<4x32xf32>
    %847 = vector.extract_strided_slice %815 {offsets = [0, 32], sizes = [4, 32], strides = [1, 1]} : vector<4x128xf32> to vector<4x32xf32>
    %848 = arith.negf %847 : vector<4x32xf32>
    %849 = math.exp %848 : vector<4x32xf32>
    %cst_157 = arith.constant 1.000000e+00 : f32
    %850 = vector.broadcast %cst_157 : f32 to vector<4x32xf32>
    %851 = arith.addf %850, %849 : vector<4x32xf32>
    %852 = arith.divf %850, %851 : vector<4x32xf32>
    %853 = vector.extract_strided_slice %815 {offsets = [0, 64], sizes = [4, 32], strides = [1, 1]} : vector<4x128xf32> to vector<4x32xf32>
    %854 = math.tanh %853 : vector<4x32xf32>
    %855 = vector.extract_strided_slice %815 {offsets = [0, 96], sizes = [4, 32], strides = [1, 1]} : vector<4x128xf32> to vector<4x32xf32>
    %856 = arith.negf %855 : vector<4x32xf32>
    %857 = math.exp %856 : vector<4x32xf32>
    %cst_158 = arith.constant 1.000000e+00 : f32
    %858 = vector.broadcast %cst_158 : f32 to vector<4x32xf32>
    %859 = arith.addf %858, %857 : vector<4x32xf32>
    %860 = arith.divf %858, %859 : vector<4x32xf32>
    %861 = arith.mulf %852, %802 : vector<4x32xf32>
    %862 = arith.mulf %846, %854 : vector<4x32xf32>
    %863 = arith.addf %861, %862 : vector<4x32xf32>
    %864 = math.tanh %863 : vector<4x32xf32>
    %865 = arith.mulf %860, %864 : vector<4x32xf32>
    %866 = tpu.concatenate %840, %865 in 0 : vector<4x32xf32>, vector<4x32xf32> -> vector<8x32xf32>
    %867 = arith.truncf %866 : vector<8x32xf32> to vector<8x32xbf16>
    %cst_159 = arith.constant dense<0.000000e+00> : vector<8x256xf32>
    %868 = tpu.matmul %867, %9, %cst_159 {dimension_numbers = #tpu.dot_dimension_numbers<[1], [0], [0], [1], [0, 0, 1, 1], [], []>} : vector<8x32xbf16>, vector<32x256xbf16>, vector<8x256xf32> -> vector<8x256xf32>
    %c28_160 = arith.constant 28 : index
    %c0_161 = arith.constant 0 : index
    %869 = vector.load %arg13[%c28_160, %c0_161] : memref<64x256xbf16, #tpu.memory_space<vmem>>, vector<4x128xbf16>
    %870 = arith.extf %869 : vector<4x128xbf16> to vector<4x128xf32>
    %871 = vector.extract_strided_slice %868 {offsets = [0, 0], sizes = [4, 128], strides = [1, 1]} : vector<8x256xf32> to vector<4x128xf32>
    %872 = arith.addf %870, %871 : vector<4x128xf32>
    %c0_162 = arith.constant 0 : index
    %c128_163 = arith.constant 128 : index
    %873 = vector.load %arg13[%c0_162, %c128_163] : memref<64x256xbf16, #tpu.memory_space<vmem>>, vector<4x128xbf16>
    %874 = arith.extf %873 : vector<4x128xbf16> to vector<4x128xf32>
    %875 = vector.extract_strided_slice %868 {offsets = [4, 128], sizes = [4, 128], strides = [1, 1]} : vector<8x256xf32> to vector<4x128xf32>
    %876 = arith.addf %874, %875 : vector<4x128xf32>
    %877 = vector.extract_strided_slice %872 {offsets = [0, 0], sizes = [4, 32], strides = [1, 1]} : vector<4x128xf32> to vector<4x32xf32>
    %878 = arith.negf %877 : vector<4x32xf32>
    %879 = math.exp %878 : vector<4x32xf32>
    %cst_164 = arith.constant 1.000000e+00 : f32
    %880 = vector.broadcast %cst_164 : f32 to vector<4x32xf32>
    %881 = arith.addf %880, %879 : vector<4x32xf32>
    %882 = arith.divf %880, %881 : vector<4x32xf32>
    %883 = vector.extract_strided_slice %872 {offsets = [0, 32], sizes = [4, 32], strides = [1, 1]} : vector<4x128xf32> to vector<4x32xf32>
    %884 = arith.negf %883 : vector<4x32xf32>
    %885 = math.exp %884 : vector<4x32xf32>
    %cst_165 = arith.constant 1.000000e+00 : f32
    %886 = vector.broadcast %cst_165 : f32 to vector<4x32xf32>
    %887 = arith.addf %886, %885 : vector<4x32xf32>
    %888 = arith.divf %886, %887 : vector<4x32xf32>
    %889 = vector.extract_strided_slice %872 {offsets = [0, 64], sizes = [4, 32], strides = [1, 1]} : vector<4x128xf32> to vector<4x32xf32>
    %890 = math.tanh %889 : vector<4x32xf32>
    %891 = vector.extract_strided_slice %872 {offsets = [0, 96], sizes = [4, 32], strides = [1, 1]} : vector<4x128xf32> to vector<4x32xf32>
    %892 = arith.negf %891 : vector<4x32xf32>
    %893 = math.exp %892 : vector<4x32xf32>
    %cst_166 = arith.constant 1.000000e+00 : f32
    %894 = vector.broadcast %cst_166 : f32 to vector<4x32xf32>
    %895 = arith.addf %894, %893 : vector<4x32xf32>
    %896 = arith.divf %894, %895 : vector<4x32xf32>
    %897 = arith.mulf %888, %838 : vector<4x32xf32>
    %898 = arith.mulf %882, %890 : vector<4x32xf32>
    %899 = arith.addf %897, %898 : vector<4x32xf32>
    %900 = math.tanh %899 : vector<4x32xf32>
    %901 = arith.mulf %896, %900 : vector<4x32xf32>
    %902 = vector.extract_strided_slice %876 {offsets = [0, 0], sizes = [4, 32], strides = [1, 1]} : vector<4x128xf32> to vector<4x32xf32>
    %903 = arith.negf %902 : vector<4x32xf32>
    %904 = math.exp %903 : vector<4x32xf32>
    %cst_167 = arith.constant 1.000000e+00 : f32
    %905 = vector.broadcast %cst_167 : f32 to vector<4x32xf32>
    %906 = arith.addf %905, %904 : vector<4x32xf32>
    %907 = arith.divf %905, %906 : vector<4x32xf32>
    %908 = vector.extract_strided_slice %876 {offsets = [0, 32], sizes = [4, 32], strides = [1, 1]} : vector<4x128xf32> to vector<4x32xf32>
    %909 = arith.negf %908 : vector<4x32xf32>
    %910 = math.exp %909 : vector<4x32xf32>
    %cst_168 = arith.constant 1.000000e+00 : f32
    %911 = vector.broadcast %cst_168 : f32 to vector<4x32xf32>
    %912 = arith.addf %911, %910 : vector<4x32xf32>
    %913 = arith.divf %911, %912 : vector<4x32xf32>
    %914 = vector.extract_strided_slice %876 {offsets = [0, 64], sizes = [4, 32], strides = [1, 1]} : vector<4x128xf32> to vector<4x32xf32>
    %915 = math.tanh %914 : vector<4x32xf32>
    %916 = vector.extract_strided_slice %876 {offsets = [0, 96], sizes = [4, 32], strides = [1, 1]} : vector<4x128xf32> to vector<4x32xf32>
    %917 = arith.negf %916 : vector<4x32xf32>
    %918 = math.exp %917 : vector<4x32xf32>
    %cst_169 = arith.constant 1.000000e+00 : f32
    %919 = vector.broadcast %cst_169 : f32 to vector<4x32xf32>
    %920 = arith.addf %919, %918 : vector<4x32xf32>
    %921 = arith.divf %919, %920 : vector<4x32xf32>
    %922 = arith.mulf %913, %863 : vector<4x32xf32>
    %923 = arith.mulf %907, %915 : vector<4x32xf32>
    %924 = arith.addf %922, %923 : vector<4x32xf32>
    %925 = math.tanh %924 : vector<4x32xf32>
    %926 = arith.mulf %921, %925 : vector<4x32xf32>
    %927 = tpu.concatenate %901, %926 in 0 : vector<4x32xf32>, vector<4x32xf32> -> vector<8x32xf32>
    %928 = arith.truncf %927 : vector<8x32xf32> to vector<8x32xbf16>
    %cst_170 = arith.constant dense<0.000000e+00> : vector<8x256xf32>
    %929 = tpu.matmul %928, %9, %cst_170 {dimension_numbers = #tpu.dot_dimension_numbers<[1], [0], [0], [1], [0, 0, 1, 1], [], []>} : vector<8x32xbf16>, vector<32x256xbf16>, vector<8x256xf32> -> vector<8x256xf32>
    %c28_171 = arith.constant 28 : index
    %c0_172 = arith.constant 0 : index
    %930 = vector.load %arg13[%c28_171, %c0_172] : memref<64x256xbf16, #tpu.memory_space<vmem>>, vector<4x128xbf16>
    %931 = arith.extf %930 : vector<4x128xbf16> to vector<4x128xf32>
    %932 = vector.extract_strided_slice %929 {offsets = [0, 0], sizes = [4, 128], strides = [1, 1]} : vector<8x256xf32> to vector<4x128xf32>
    %933 = arith.addf %931, %932 : vector<4x128xf32>
    %c0_173 = arith.constant 0 : index
    %c128_174 = arith.constant 128 : index
    %934 = vector.load %arg13[%c0_173, %c128_174] : memref<64x256xbf16, #tpu.memory_space<vmem>>, vector<4x128xbf16>
    %935 = arith.extf %934 : vector<4x128xbf16> to vector<4x128xf32>
    %936 = vector.extract_strided_slice %929 {offsets = [4, 128], sizes = [4, 128], strides = [1, 1]} : vector<8x256xf32> to vector<4x128xf32>
    %937 = arith.addf %935, %936 : vector<4x128xf32>
    %938 = vector.extract_strided_slice %933 {offsets = [0, 0], sizes = [4, 32], strides = [1, 1]} : vector<4x128xf32> to vector<4x32xf32>
    %939 = arith.negf %938 : vector<4x32xf32>
    %940 = math.exp %939 : vector<4x32xf32>
    %cst_175 = arith.constant 1.000000e+00 : f32
    %941 = vector.broadcast %cst_175 : f32 to vector<4x32xf32>
    %942 = arith.addf %941, %940 : vector<4x32xf32>
    %943 = arith.divf %941, %942 : vector<4x32xf32>
    %944 = vector.extract_strided_slice %933 {offsets = [0, 32], sizes = [4, 32], strides = [1, 1]} : vector<4x128xf32> to vector<4x32xf32>
    %945 = arith.negf %944 : vector<4x32xf32>
    %946 = math.exp %945 : vector<4x32xf32>
    %cst_176 = arith.constant 1.000000e+00 : f32
    %947 = vector.broadcast %cst_176 : f32 to vector<4x32xf32>
    %948 = arith.addf %947, %946 : vector<4x32xf32>
    %949 = arith.divf %947, %948 : vector<4x32xf32>
    %950 = vector.extract_strided_slice %933 {offsets = [0, 64], sizes = [4, 32], strides = [1, 1]} : vector<4x128xf32> to vector<4x32xf32>
    %951 = math.tanh %950 : vector<4x32xf32>
    %952 = vector.extract_strided_slice %933 {offsets = [0, 96], sizes = [4, 32], strides = [1, 1]} : vector<4x128xf32> to vector<4x32xf32>
    %953 = arith.negf %952 : vector<4x32xf32>
    %954 = math.exp %953 : vector<4x32xf32>
    %cst_177 = arith.constant 1.000000e+00 : f32
    %955 = vector.broadcast %cst_177 : f32 to vector<4x32xf32>
    %956 = arith.addf %955, %954 : vector<4x32xf32>
    %957 = arith.divf %955, %956 : vector<4x32xf32>
    %958 = arith.mulf %949, %899 : vector<4x32xf32>
    %959 = arith.mulf %943, %951 : vector<4x32xf32>
    %960 = arith.addf %958, %959 : vector<4x32xf32>
    %961 = math.tanh %960 : vector<4x32xf32>
    %962 = arith.mulf %957, %961 : vector<4x32xf32>
    %963 = vector.extract_strided_slice %937 {offsets = [0, 0], sizes = [4, 32], strides = [1, 1]} : vector<4x128xf32> to vector<4x32xf32>
    %964 = arith.negf %963 : vector<4x32xf32>
    %965 = math.exp %964 : vector<4x32xf32>
    %cst_178 = arith.constant 1.000000e+00 : f32
    %966 = vector.broadcast %cst_178 : f32 to vector<4x32xf32>
    %967 = arith.addf %966, %965 : vector<4x32xf32>
    %968 = arith.divf %966, %967 : vector<4x32xf32>
    %969 = vector.extract_strided_slice %937 {offsets = [0, 32], sizes = [4, 32], strides = [1, 1]} : vector<4x128xf32> to vector<4x32xf32>
    %970 = arith.negf %969 : vector<4x32xf32>
    %971 = math.exp %970 : vector<4x32xf32>
    %cst_179 = arith.constant 1.000000e+00 : f32
    %972 = vector.broadcast %cst_179 : f32 to vector<4x32xf32>
    %973 = arith.addf %972, %971 : vector<4x32xf32>
    %974 = arith.divf %972, %973 : vector<4x32xf32>
    %975 = vector.extract_strided_slice %937 {offsets = [0, 64], sizes = [4, 32], strides = [1, 1]} : vector<4x128xf32> to vector<4x32xf32>
    %976 = math.tanh %975 : vector<4x32xf32>
    %977 = vector.extract_strided_slice %937 {offsets = [0, 96], sizes = [4, 32], strides = [1, 1]} : vector<4x128xf32> to vector<4x32xf32>
    %978 = arith.negf %977 : vector<4x32xf32>
    %979 = math.exp %978 : vector<4x32xf32>
    %cst_180 = arith.constant 1.000000e+00 : f32
    %980 = vector.broadcast %cst_180 : f32 to vector<4x32xf32>
    %981 = arith.addf %980, %979 : vector<4x32xf32>
    %982 = arith.divf %980, %981 : vector<4x32xf32>
    %983 = arith.mulf %974, %924 : vector<4x32xf32>
    %984 = arith.mulf %968, %976 : vector<4x32xf32>
    %985 = arith.addf %983, %984 : vector<4x32xf32>
    %986 = math.tanh %985 : vector<4x32xf32>
    %987 = arith.mulf %982, %986 : vector<4x32xf32>
    %988 = tpu.concatenate %47, %108, %169, %230, %291, %352, %413, %474, %535, %596, %657, %718, %779, %840, %901, %962 in 0 : vector<4x32xf32>, vector<4x32xf32>, vector<4x32xf32>, vector<4x32xf32>, vector<4x32xf32>, vector<4x32xf32>, vector<4x32xf32>, vector<4x32xf32>, vector<4x32xf32>, vector<4x32xf32>, vector<4x32xf32>, vector<4x32xf32>, vector<4x32xf32>, vector<4x32xf32>, vector<4x32xf32>, vector<4x32xf32> -> vector<64x32xf32>
    %989 = tpu.concatenate %987, %926, %865, %804, %743, %682, %621, %560, %499, %438, %377, %316, %255, %194, %133, %72 in 0 : vector<4x32xf32>, vector<4x32xf32>, vector<4x32xf32>, vector<4x32xf32>, vector<4x32xf32>, vector<4x32xf32>, vector<4x32xf32>, vector<4x32xf32>, vector<4x32xf32>, vector<4x32xf32>, vector<4x32xf32>, vector<4x32xf32>, vector<4x32xf32>, vector<4x32xf32>, vector<4x32xf32>, vector<4x32xf32> -> vector<64x32xf32>
    %990 = arith.truncf %988 : vector<64x32xf32> to vector<64x32xbf16>
    %c0_181 = arith.constant 0 : index
    %c0_182 = arith.constant 0 : index
    %991 = vector.load %arg5[%c0_181, %c0_182] : memref<32x256xbf16, #tpu.memory_space<vmem>>, vector<32x256xbf16>
    %cst_183 = arith.constant dense<0.000000e+00> : vector<64x256xf32>
    %992 = tpu.matmul %990, %991, %cst_183 {dimension_numbers = #tpu.dot_dimension_numbers<[1], [0], [0], [1], [0, 0, 1, 1], [], []>} : vector<64x32xbf16>, vector<32x256xbf16>, vector<64x256xf32> -> vector<64x256xf32>
    %993 = arith.truncf %989 : vector<64x32xf32> to vector<64x32xbf16>
    %c0_184 = arith.constant 0 : index
    %c0_185 = arith.constant 0 : index
    %994 = vector.load %arg6[%c0_184, %c0_185] : memref<32x256xbf16, #tpu.memory_space<vmem>>, vector<32x256xbf16>
    %cst_186 = arith.constant dense<0.000000e+00> : vector<64x256xf32>
    %995 = tpu.matmul %993, %994, %cst_186 {dimension_numbers = #tpu.dot_dimension_numbers<[1], [0], [0], [1], [0, 0, 1, 1], [], []>} : vector<64x32xbf16>, vector<32x256xbf16>, vector<64x256xf32> -> vector<64x256xf32>
    %996 = arith.addf %992, %995 : vector<64x256xf32>
    %c0_187 = arith.constant 0 : index
    %c0_188 = arith.constant 0 : index
    %997 = vector.load %arg7[%c0_187, %c0_188] : memref<1x256xf32, #tpu.memory_space<vmem>>, vector<1x256xf32>
    %998 = vector.broadcast %997 : vector<1x256xf32> to vector<64x256xf32>
    %999 = arith.addf %996, %998 : vector<64x256xf32>
    %1000 = arith.truncf %999 : vector<64x256xf32> to vector<64x256xbf16>
    %c0_189 = arith.constant 0 : index
    %c0_190 = arith.constant 0 : index
    %1001 = vector.load %arg13[%c0_189, %c0_190] : memref<64x256xbf16, #tpu.memory_space<vmem>>, vector<64x256xbf16>
    tpu.vector_store %arg13[%c0_189, %c0_190], %1000 {strides = array<i32>} : memref<64x256xbf16, #tpu.memory_space<vmem>>, vector<64x256xbf16>,
    %c0_191 = arith.constant 0 : index
    %c0_192 = arith.constant 0 : index
    %1002 = vector.load %arg8[%c0_191, %c0_192] : memref<32x256xbf16, #tpu.memory_space<vmem>>, vector<32x256xbf16>
    %cst_193 = arith.constant 0.000000e+00 : f32
    %1003 = vector.broadcast %cst_193 : f32 to vector<8x32xf32>
    %cst_194 = arith.constant 0.000000e+00 : f32
    %1004 = vector.broadcast %cst_194 : f32 to vector<4x32xf32>
    %cst_195 = arith.constant 0.000000e+00 : f32
    %1005 = vector.broadcast %cst_195 : f32 to vector<4x32xf32>
    %1006 = arith.truncf %1003 : vector<8x32xf32> to vector<8x32xbf16>
    %cst_196 = arith.constant dense<0.000000e+00> : vector<8x256xf32>
    %1007 = tpu.matmul %1006, %1002, %cst_196 {dimension_numbers = #tpu.dot_dimension_numbers<[1], [0], [0], [1], [0, 0, 1, 1], [], []>} : vector<8x32xbf16>, vector<32x256xbf16>, vector<8x256xf32> -> vector<8x256xf32>
    %c0_197 = arith.constant 0 : index
    %c0_198 = arith.constant 0 : index
    %1008 = vector.load %arg13[%c0_197, %c0_198] : memref<64x256xbf16, #tpu.memory_space<vmem>>, vector<4x128xbf16>
    %1009 = arith.extf %1008 : vector<4x128xbf16> to vector<4x128xf32>
    %1010 = vector.extract_strided_slice %1007 {offsets = [0, 0], sizes = [4, 128], strides = [1, 1]} : vector<8x256xf32> to vector<4x128xf32>
    %1011 = arith.addf %1009, %1010 : vector<4x128xf32>
    %c60 = arith.constant 60 : index
    %c128_199 = arith.constant 128 : index
    %1012 = vector.load %arg13[%c60, %c128_199] : memref<64x256xbf16, #tpu.memory_space<vmem>>, vector<4x128xbf16>
    %1013 = arith.extf %1012 : vector<4x128xbf16> to vector<4x128xf32>
    %1014 = vector.extract_strided_slice %1007 {offsets = [4, 128], sizes = [4, 128], strides = [1, 1]} : vector<8x256xf32> to vector<4x128xf32>
    %1015 = arith.addf %1013, %1014 : vector<4x128xf32>
    %1016 = vector.extract_strided_slice %1011 {offsets = [0, 0], sizes = [4, 32], strides = [1, 1]} : vector<4x128xf32> to vector<4x32xf32>
    %1017 = arith.negf %1016 : vector<4x32xf32>
    %1018 = math.exp %1017 : vector<4x32xf32>
    %cst_200 = arith.constant 1.000000e+00 : f32
    %1019 = vector.broadcast %cst_200 : f32 to vector<4x32xf32>
    %1020 = arith.addf %1019, %1018 : vector<4x32xf32>
    %1021 = arith.divf %1019, %1020 : vector<4x32xf32>
    %1022 = vector.extract_strided_slice %1011 {offsets = [0, 32], sizes = [4, 32], strides = [1, 1]} : vector<4x128xf32> to vector<4x32xf32>
    %1023 = arith.negf %1022 : vector<4x32xf32>
    %1024 = math.exp %1023 : vector<4x32xf32>
    %cst_201 = arith.constant 1.000000e+00 : f32
    %1025 = vector.broadcast %cst_201 : f32 to vector<4x32xf32>
    %1026 = arith.addf %1025, %1024 : vector<4x32xf32>
    %1027 = arith.divf %1025, %1026 : vector<4x32xf32>
    %1028 = vector.extract_strided_slice %1011 {offsets = [0, 64], sizes = [4, 32], strides = [1, 1]} : vector<4x128xf32> to vector<4x32xf32>
    %1029 = math.tanh %1028 : vector<4x32xf32>
    %1030 = vector.extract_strided_slice %1011 {offsets = [0, 96], sizes = [4, 32], strides = [1, 1]} : vector<4x128xf32> to vector<4x32xf32>
    %1031 = arith.negf %1030 : vector<4x32xf32>
    %1032 = math.exp %1031 : vector<4x32xf32>
    %cst_202 = arith.constant 1.000000e+00 : f32
    %1033 = vector.broadcast %cst_202 : f32 to vector<4x32xf32>
    %1034 = arith.addf %1033, %1032 : vector<4x32xf32>
    %1035 = arith.divf %1033, %1034 : vector<4x32xf32>
    %1036 = arith.mulf %1027, %1004 : vector<4x32xf32>
    %1037 = arith.mulf %1021, %1029 : vector<4x32xf32>
    %1038 = arith.addf %1036, %1037 : vector<4x32xf32>
    %1039 = math.tanh %1038 : vector<4x32xf32>
    %1040 = arith.mulf %1035, %1039 : vector<4x32xf32>
    %1041 = vector.extract_strided_slice %1015 {offsets = [0, 0], sizes = [4, 32], strides = [1, 1]} : vector<4x128xf32> to vector<4x32xf32>
    %1042 = arith.negf %1041 : vector<4x32xf32>
    %1043 = math.exp %1042 : vector<4x32xf32>
    %cst_203 = arith.constant 1.000000e+00 : f32
    %1044 = vector.broadcast %cst_203 : f32 to vector<4x32xf32>
    %1045 = arith.addf %1044, %1043 : vector<4x32xf32>
    %1046 = arith.divf %1044, %1045 : vector<4x32xf32>
    %1047 = vector.extract_strided_slice %1015 {offsets = [0, 32], sizes = [4, 32], strides = [1, 1]} : vector<4x128xf32> to vector<4x32xf32>
    %1048 = arith.negf %1047 : vector<4x32xf32>
    %1049 = math.exp %1048 : vector<4x32xf32>
    %cst_204 = arith.constant 1.000000e+00 : f32
    %1050 = vector.broadcast %cst_204 : f32 to vector<4x32xf32>
    %1051 = arith.addf %1050, %1049 : vector<4x32xf32>
    %1052 = arith.divf %1050, %1051 : vector<4x32xf32>
    %1053 = vector.extract_strided_slice %1015 {offsets = [0, 64], sizes = [4, 32], strides = [1, 1]} : vector<4x128xf32> to vector<4x32xf32>
    %1054 = math.tanh %1053 : vector<4x32xf32>
    %1055 = vector.extract_strided_slice %1015 {offsets = [0, 96], sizes = [4, 32], strides = [1, 1]} : vector<4x128xf32> to vector<4x32xf32>
    %1056 = arith.negf %1055 : vector<4x32xf32>
    %1057 = math.exp %1056 : vector<4x32xf32>
    %cst_205 = arith.constant 1.000000e+00 : f32
    %1058 = vector.broadcast %cst_205 : f32 to vector<4x32xf32>
    %1059 = arith.addf %1058, %1057 : vector<4x32xf32>
    %1060 = arith.divf %1058, %1059 : vector<4x32xf32>
    %1061 = arith.mulf %1052, %1005 : vector<4x32xf32>
    %1062 = arith.mulf %1046, %1054 : vector<4x32xf32>
    %1063 = arith.addf %1061, %1062 : vector<4x32xf32>
    %1064 = math.tanh %1063 : vector<4x32xf32>
    %1065 = arith.mulf %1060, %1064 : vector<4x32xf32>
    %1066 = tpu.concatenate %1040, %1065 in 0 : vector<4x32xf32>, vector<4x32xf32> -> vector<8x32xf32>
    %1067 = arith.truncf %1066 : vector<8x32xf32> to vector<8x32xbf16>
    %cst_206 = arith.constant dense<0.000000e+00> : vector<8x256xf32>
    %1068 = tpu.matmul %1067, %1002, %cst_206 {dimension_numbers = #tpu.dot_dimension_numbers<[1], [0], [0], [1], [0, 0, 1, 1], [], []>} : vector<8x32xbf16>, vector<32x256xbf16>, vector<8x256xf32> -> vector<8x256xf32>
    %c4_207 = arith.constant 4 : index
    %c0_208 = arith.constant 0 : index
    %1069 = vector.load %arg13[%c4_207, %c0_208] : memref<64x256xbf16, #tpu.memory_space<vmem>>, vector<4x128xbf16>
    %1070 = arith.extf %1069 : vector<4x128xbf16> to vector<4x128xf32>
    %1071 = vector.extract_strided_slice %1068 {offsets = [0, 0], sizes = [4, 128], strides = [1, 1]} : vector<8x256xf32> to vector<4x128xf32>
    %1072 = arith.addf %1070, %1071 : vector<4x128xf32>
    %c56 = arith.constant 56 : index
    %c128_209 = arith.constant 128 : index
    %1073 = vector.load %arg13[%c56, %c128_209] : memref<64x256xbf16, #tpu.memory_space<vmem>>, vector<4x128xbf16>
    %1074 = arith.extf %1073 : vector<4x128xbf16> to vector<4x128xf32>
    %1075 = vector.extract_strided_slice %1068 {offsets = [4, 128], sizes = [4, 128], strides = [1, 1]} : vector<8x256xf32> to vector<4x128xf32>
    %1076 = arith.addf %1074, %1075 : vector<4x128xf32>
    %1077 = vector.extract_strided_slice %1072 {offsets = [0, 0], sizes = [4, 32], strides = [1, 1]} : vector<4x128xf32> to vector<4x32xf32>
    %1078 = arith.negf %1077 : vector<4x32xf32>
    %1079 = math.exp %1078 : vector<4x32xf32>
    %cst_210 = arith.constant 1.000000e+00 : f32
    %1080 = vector.broadcast %cst_210 : f32 to vector<4x32xf32>
    %1081 = arith.addf %1080, %1079 : vector<4x32xf32>
    %1082 = arith.divf %1080, %1081 : vector<4x32xf32>
    %1083 = vector.extract_strided_slice %1072 {offsets = [0, 32], sizes = [4, 32], strides = [1, 1]} : vector<4x128xf32> to vector<4x32xf32>
    %1084 = arith.negf %1083 : vector<4x32xf32>
    %1085 = math.exp %1084 : vector<4x32xf32>
    %cst_211 = arith.constant 1.000000e+00 : f32
    %1086 = vector.broadcast %cst_211 : f32 to vector<4x32xf32>
    %1087 = arith.addf %1086, %1085 : vector<4x32xf32>
    %1088 = arith.divf %1086, %1087 : vector<4x32xf32>
    %1089 = vector.extract_strided_slice %1072 {offsets = [0, 64], sizes = [4, 32], strides = [1, 1]} : vector<4x128xf32> to vector<4x32xf32>
    %1090 = math.tanh %1089 : vector<4x32xf32>
    %1091 = vector.extract_strided_slice %1072 {offsets = [0, 96], sizes = [4, 32], strides = [1, 1]} : vector<4x128xf32> to vector<4x32xf32>
    %1092 = arith.negf %1091 : vector<4x32xf32>
    %1093 = math.exp %1092 : vector<4x32xf32>
    %cst_212 = arith.constant 1.000000e+00 : f32
    %1094 = vector.broadcast %cst_212 : f32 to vector<4x32xf32>
    %1095 = arith.addf %1094, %1093 : vector<4x32xf32>
    %1096 = arith.divf %1094, %1095 : vector<4x32xf32>
    %1097 = arith.mulf %1088, %1038 : vector<4x32xf32>
    %1098 = arith.mulf %1082, %1090 : vector<4x32xf32>
    %1099 = arith.addf %1097, %1098 : vector<4x32xf32>
    %1100 = math.tanh %1099 : vector<4x32xf32>
    %1101 = arith.mulf %1096, %1100 : vector<4x32xf32>
    %1102 = vector.extract_strided_slice %1076 {offsets = [0, 0], sizes = [4, 32], strides = [1, 1]} : vector<4x128xf32> to vector<4x32xf32>
    %1103 = arith.negf %1102 : vector<4x32xf32>
    %1104 = math.exp %1103 : vector<4x32xf32>
    %cst_213 = arith.constant 1.000000e+00 : f32
    %1105 = vector.broadcast %cst_213 : f32 to vector<4x32xf32>
    %1106 = arith.addf %1105, %1104 : vector<4x32xf32>
    %1107 = arith.divf %1105, %1106 : vector<4x32xf32>
    %1108 = vector.extract_strided_slice %1076 {offsets = [0, 32], sizes = [4, 32], strides = [1, 1]} : vector<4x128xf32> to vector<4x32xf32>
    %1109 = arith.negf %1108 : vector<4x32xf32>
    %1110 = math.exp %1109 : vector<4x32xf32>
    %cst_214 = arith.constant 1.000000e+00 : f32
    %1111 = vector.broadcast %cst_214 : f32 to vector<4x32xf32>
    %1112 = arith.addf %1111, %1110 : vector<4x32xf32>
    %1113 = arith.divf %1111, %1112 : vector<4x32xf32>
    %1114 = vector.extract_strided_slice %1076 {offsets = [0, 64], sizes = [4, 32], strides = [1, 1]} : vector<4x128xf32> to vector<4x32xf32>
    %1115 = math.tanh %1114 : vector<4x32xf32>
    %1116 = vector.extract_strided_slice %1076 {offsets = [0, 96], sizes = [4, 32], strides = [1, 1]} : vector<4x128xf32> to vector<4x32xf32>
    %1117 = arith.negf %1116 : vector<4x32xf32>
    %1118 = math.exp %1117 : vector<4x32xf32>
    %cst_215 = arith.constant 1.000000e+00 : f32
    %1119 = vector.broadcast %cst_215 : f32 to vector<4x32xf32>
    %1120 = arith.addf %1119, %1118 : vector<4x32xf32>
    %1121 = arith.divf %1119, %1120 : vector<4x32xf32>
    %1122 = arith.mulf %1113, %1063 : vector<4x32xf32>
    %1123 = arith.mulf %1107, %1115 : vector<4x32xf32>
    %1124 = arith.addf %1122, %1123 : vector<4x32xf32>
    %1125 = math.tanh %1124 : vector<4x32xf32>
    %1126 = arith.mulf %1121, %1125 : vector<4x32xf32>
    %1127 = tpu.concatenate %1101, %1126 in 0 : vector<4x32xf32>, vector<4x32xf32> -> vector<8x32xf32>
    %1128 = arith.truncf %1127 : vector<8x32xf32> to vector<8x32xbf16>
    %cst_216 = arith.constant dense<0.000000e+00> : vector<8x256xf32>
    %1129 = tpu.matmul %1128, %1002, %cst_216 {dimension_numbers = #tpu.dot_dimension_numbers<[1], [0], [0], [1], [0, 0, 1, 1], [], []>} : vector<8x32xbf16>, vector<32x256xbf16>, vector<8x256xf32> -> vector<8x256xf32>
    %c8_217 = arith.constant 8 : index
    %c0_218 = arith.constant 0 : index
    %1130 = vector.load %arg13[%c8_217, %c0_218] : memref<64x256xbf16, #tpu.memory_space<vmem>>, vector<4x128xbf16>
    %1131 = arith.extf %1130 : vector<4x128xbf16> to vector<4x128xf32>
    %1132 = vector.extract_strided_slice %1129 {offsets = [0, 0], sizes = [4, 128], strides = [1, 1]} : vector<8x256xf32> to vector<4x128xf32>
    %1133 = arith.addf %1131, %1132 : vector<4x128xf32>
    %c52 = arith.constant 52 : index
    %c128_219 = arith.constant 128 : index
    %1134 = vector.load %arg13[%c52, %c128_219] : memref<64x256xbf16, #tpu.memory_space<vmem>>, vector<4x128xbf16>
    %1135 = arith.extf %1134 : vector<4x128xbf16> to vector<4x128xf32>
    %1136 = vector.extract_strided_slice %1129 {offsets = [4, 128], sizes = [4, 128], strides = [1, 1]} : vector<8x256xf32> to vector<4x128xf32>
    %1137 = arith.addf %1135, %1136 : vector<4x128xf32>
    %1138 = vector.extract_strided_slice %1133 {offsets = [0, 0], sizes = [4, 32], strides = [1, 1]} : vector<4x128xf32> to vector<4x32xf32>
    %1139 = arith.negf %1138 : vector<4x32xf32>
    %1140 = math.exp %1139 : vector<4x32xf32>
    %cst_220 = arith.constant 1.000000e+00 : f32
    %1141 = vector.broadcast %cst_220 : f32 to vector<4x32xf32>
    %1142 = arith.addf %1141, %1140 : vector<4x32xf32>
    %1143 = arith.divf %1141, %1142 : vector<4x32xf32>
    %1144 = vector.extract_strided_slice %1133 {offsets = [0, 32], sizes = [4, 32], strides = [1, 1]} : vector<4x128xf32> to vector<4x32xf32>
    %1145 = arith.negf %1144 : vector<4x32xf32>
    %1146 = math.exp %1145 : vector<4x32xf32>
    %cst_221 = arith.constant 1.000000e+00 : f32
    %1147 = vector.broadcast %cst_221 : f32 to vector<4x32xf32>
    %1148 = arith.addf %1147, %1146 : vector<4x32xf32>
    %1149 = arith.divf %1147, %1148 : vector<4x32xf32>
    %1150 = vector.extract_strided_slice %1133 {offsets = [0, 64], sizes = [4, 32], strides = [1, 1]} : vector<4x128xf32> to vector<4x32xf32>
    %1151 = math.tanh %1150 : vector<4x32xf32>
    %1152 = vector.extract_strided_slice %1133 {offsets = [0, 96], sizes = [4, 32], strides = [1, 1]} : vector<4x128xf32> to vector<4x32xf32>
    %1153 = arith.negf %1152 : vector<4x32xf32>
    %1154 = math.exp %1153 : vector<4x32xf32>
    %cst_222 = arith.constant 1.000000e+00 : f32
    %1155 = vector.broadcast %cst_222 : f32 to vector<4x32xf32>
    %1156 = arith.addf %1155, %1154 : vector<4x32xf32>
    %1157 = arith.divf %1155, %1156 : vector<4x32xf32>
    %1158 = arith.mulf %1149, %1099 : vector<4x32xf32>
    %1159 = arith.mulf %1143, %1151 : vector<4x32xf32>
    %1160 = arith.addf %1158, %1159 : vector<4x32xf32>
    %1161 = math.tanh %1160 : vector<4x32xf32>
    %1162 = arith.mulf %1157, %1161 : vector<4x32xf32>
    %1163 = vector.extract_strided_slice %1137 {offsets = [0, 0], sizes = [4, 32], strides = [1, 1]} : vector<4x128xf32> to vector<4x32xf32>
    %1164 = arith.negf %1163 : vector<4x32xf32>
    %1165 = math.exp %1164 : vector<4x32xf32>
    %cst_223 = arith.constant 1.000000e+00 : f32
    %1166 = vector.broadcast %cst_223 : f32 to vector<4x32xf32>
    %1167 = arith.addf %1166, %1165 : vector<4x32xf32>
    %1168 = arith.divf %1166, %1167 : vector<4x32xf32>
    %1169 = vector.extract_strided_slice %1137 {offsets = [0, 32], sizes = [4, 32], strides = [1, 1]} : vector<4x128xf32> to vector<4x32xf32>
    %1170 = arith.negf %1169 : vector<4x32xf32>
    %1171 = math.exp %1170 : vector<4x32xf32>
    %cst_224 = arith.constant 1.000000e+00 : f32
    %1172 = vector.broadcast %cst_224 : f32 to vector<4x32xf32>
    %1173 = arith.addf %1172, %1171 : vector<4x32xf32>
    %1174 = arith.divf %1172, %1173 : vector<4x32xf32>
    %1175 = vector.extract_strided_slice %1137 {offsets = [0, 64], sizes = [4, 32], strides = [1, 1]} : vector<4x128xf32> to vector<4x32xf32>
    %1176 = math.tanh %1175 : vector<4x32xf32>
    %1177 = vector.extract_strided_slice %1137 {offsets = [0, 96], sizes = [4, 32], strides = [1, 1]} : vector<4x128xf32> to vector<4x32xf32>
    %1178 = arith.negf %1177 : vector<4x32xf32>
    %1179 = math.exp %1178 : vector<4x32xf32>
    %cst_225 = arith.constant 1.000000e+00 : f32
    %1180 = vector.broadcast %cst_225 : f32 to vector<4x32xf32>
    %1181 = arith.addf %1180, %1179 : vector<4x32xf32>
    %1182 = arith.divf %1180, %1181 : vector<4x32xf32>
    %1183 = arith.mulf %1174, %1124 : vector<4x32xf32>
    %1184 = arith.mulf %1168, %1176 : vector<4x32xf32>
    %1185 = arith.addf %1183, %1184 : vector<4x32xf32>
    %1186 = math.tanh %1185 : vector<4x32xf32>
    %1187 = arith.mulf %1182, %1186 : vector<4x32xf32>
    %1188 = tpu.concatenate %1162, %1187 in 0 : vector<4x32xf32>, vector<4x32xf32> -> vector<8x32xf32>
    %1189 = arith.truncf %1188 : vector<8x32xf32> to vector<8x32xbf16>
    %cst_226 = arith.constant dense<0.000000e+00> : vector<8x256xf32>
    %1190 = tpu.matmul %1189, %1002, %cst_226 {dimension_numbers = #tpu.dot_dimension_numbers<[1], [0], [0], [1], [0, 0, 1, 1], [], []>} : vector<8x32xbf16>, vector<32x256xbf16>, vector<8x256xf32> -> vector<8x256xf32>
    %c12_227 = arith.constant 12 : index
    %c0_228 = arith.constant 0 : index
    %1191 = vector.load %arg13[%c12_227, %c0_228] : memref<64x256xbf16, #tpu.memory_space<vmem>>, vector<4x128xbf16>
    %1192 = arith.extf %1191 : vector<4x128xbf16> to vector<4x128xf32>
    %1193 = vector.extract_strided_slice %1190 {offsets = [0, 0], sizes = [4, 128], strides = [1, 1]} : vector<8x256xf32> to vector<4x128xf32>
    %1194 = arith.addf %1192, %1193 : vector<4x128xf32>
    %c48 = arith.constant 48 : index
    %c128_229 = arith.constant 128 : index
    %1195 = vector.load %arg13[%c48, %c128_229] : memref<64x256xbf16, #tpu.memory_space<vmem>>, vector<4x128xbf16>
    %1196 = arith.extf %1195 : vector<4x128xbf16> to vector<4x128xf32>
    %1197 = vector.extract_strided_slice %1190 {offsets = [4, 128], sizes = [4, 128], strides = [1, 1]} : vector<8x256xf32> to vector<4x128xf32>
    %1198 = arith.addf %1196, %1197 : vector<4x128xf32>
    %1199 = vector.extract_strided_slice %1194 {offsets = [0, 0], sizes = [4, 32], strides = [1, 1]} : vector<4x128xf32> to vector<4x32xf32>
    %1200 = arith.negf %1199 : vector<4x32xf32>
    %1201 = math.exp %1200 : vector<4x32xf32>
    %cst_230 = arith.constant 1.000000e+00 : f32
    %1202 = vector.broadcast %cst_230 : f32 to vector<4x32xf32>
    %1203 = arith.addf %1202, %1201 : vector<4x32xf32>
    %1204 = arith.divf %1202, %1203 : vector<4x32xf32>
    %1205 = vector.extract_strided_slice %1194 {offsets = [0, 32], sizes = [4, 32], strides = [1, 1]} : vector<4x128xf32> to vector<4x32xf32>
    %1206 = arith.negf %1205 : vector<4x32xf32>
    %1207 = math.exp %1206 : vector<4x32xf32>
    %cst_231 = arith.constant 1.000000e+00 : f32
    %1208 = vector.broadcast %cst_231 : f32 to vector<4x32xf32>
    %1209 = arith.addf %1208, %1207 : vector<4x32xf32>
    %1210 = arith.divf %1208, %1209 : vector<4x32xf32>
    %1211 = vector.extract_strided_slice %1194 {offsets = [0, 64], sizes = [4, 32], strides = [1, 1]} : vector<4x128xf32> to vector<4x32xf32>
    %1212 = math.tanh %1211 : vector<4x32xf32>
    %1213 = vector.extract_strided_slice %1194 {offsets = [0, 96], sizes = [4, 32], strides = [1, 1]} : vector<4x128xf32> to vector<4x32xf32>
    %1214 = arith.negf %1213 : vector<4x32xf32>
    %1215 = math.exp %1214 : vector<4x32xf32>
    %cst_232 = arith.constant 1.000000e+00 : f32
    %1216 = vector.broadcast %cst_232 : f32 to vector<4x32xf32>
    %1217 = arith.addf %1216, %1215 : vector<4x32xf32>
    %1218 = arith.divf %1216, %1217 : vector<4x32xf32>
    %1219 = arith.mulf %1210, %1160 : vector<4x32xf32>
    %1220 = arith.mulf %1204, %1212 : vector<4x32xf32>
    %1221 = arith.addf %1219, %1220 : vector<4x32xf32>
    %1222 = math.tanh %1221 : vector<4x32xf32>
    %1223 = arith.mulf %1218, %1222 : vector<4x32xf32>
    %1224 = vector.extract_strided_slice %1198 {offsets = [0, 0], sizes = [4, 32], strides = [1, 1]} : vector<4x128xf32> to vector<4x32xf32>
    %1225 = arith.negf %1224 : vector<4x32xf32>
    %1226 = math.exp %1225 : vector<4x32xf32>
    %cst_233 = arith.constant 1.000000e+00 : f32
    %1227 = vector.broadcast %cst_233 : f32 to vector<4x32xf32>
    %1228 = arith.addf %1227, %1226 : vector<4x32xf32>
    %1229 = arith.divf %1227, %1228 : vector<4x32xf32>
    %1230 = vector.extract_strided_slice %1198 {offsets = [0, 32], sizes = [4, 32], strides = [1, 1]} : vector<4x128xf32> to vector<4x32xf32>
    %1231 = arith.negf %1230 : vector<4x32xf32>
    %1232 = math.exp %1231 : vector<4x32xf32>
    %cst_234 = arith.constant 1.000000e+00 : f32
    %1233 = vector.broadcast %cst_234 : f32 to vector<4x32xf32>
    %1234 = arith.addf %1233, %1232 : vector<4x32xf32>
    %1235 = arith.divf %1233, %1234 : vector<4x32xf32>
    %1236 = vector.extract_strided_slice %1198 {offsets = [0, 64], sizes = [4, 32], strides = [1, 1]} : vector<4x128xf32> to vector<4x32xf32>
    %1237 = math.tanh %1236 : vector<4x32xf32>
    %1238 = vector.extract_strided_slice %1198 {offsets = [0, 96], sizes = [4, 32], strides = [1, 1]} : vector<4x128xf32> to vector<4x32xf32>
    %1239 = arith.negf %1238 : vector<4x32xf32>
    %1240 = math.exp %1239 : vector<4x32xf32>
    %cst_235 = arith.constant 1.000000e+00 : f32
    %1241 = vector.broadcast %cst_235 : f32 to vector<4x32xf32>
    %1242 = arith.addf %1241, %1240 : vector<4x32xf32>
    %1243 = arith.divf %1241, %1242 : vector<4x32xf32>
    %1244 = arith.mulf %1235, %1185 : vector<4x32xf32>
    %1245 = arith.mulf %1229, %1237 : vector<4x32xf32>
    %1246 = arith.addf %1244, %1245 : vector<4x32xf32>
    %1247 = math.tanh %1246 : vector<4x32xf32>
    %1248 = arith.mulf %1243, %1247 : vector<4x32xf32>
    %1249 = tpu.concatenate %1223, %1248 in 0 : vector<4x32xf32>, vector<4x32xf32> -> vector<8x32xf32>
    %1250 = arith.truncf %1249 : vector<8x32xf32> to vector<8x32xbf16>
    %cst_236 = arith.constant dense<0.000000e+00> : vector<8x256xf32>
    %1251 = tpu.matmul %1250, %1002, %cst_236 {dimension_numbers = #tpu.dot_dimension_numbers<[1], [0], [0], [1], [0, 0, 1, 1], [], []>} : vector<8x32xbf16>, vector<32x256xbf16>, vector<8x256xf32> -> vector<8x256xf32>
    %c16_237 = arith.constant 16 : index
    %c0_238 = arith.constant 0 : index
    %1252 = vector.load %arg13[%c16_237, %c0_238] : memref<64x256xbf16, #tpu.memory_space<vmem>>, vector<4x128xbf16>
    %1253 = arith.extf %1252 : vector<4x128xbf16> to vector<4x128xf32>
    %1254 = vector.extract_strided_slice %1251 {offsets = [0, 0], sizes = [4, 128], strides = [1, 1]} : vector<8x256xf32> to vector<4x128xf32>
    %1255 = arith.addf %1253, %1254 : vector<4x128xf32>
    %c44 = arith.constant 44 : index
    %c128_239 = arith.constant 128 : index
    %1256 = vector.load %arg13[%c44, %c128_239] : memref<64x256xbf16, #tpu.memory_space<vmem>>, vector<4x128xbf16>
    %1257 = arith.extf %1256 : vector<4x128xbf16> to vector<4x128xf32>
    %1258 = vector.extract_strided_slice %1251 {offsets = [4, 128], sizes = [4, 128], strides = [1, 1]} : vector<8x256xf32> to vector<4x128xf32>
    %1259 = arith.addf %1257, %1258 : vector<4x128xf32>
    %1260 = vector.extract_strided_slice %1255 {offsets = [0, 0], sizes = [4, 32], strides = [1, 1]} : vector<4x128xf32> to vector<4x32xf32>
    %1261 = arith.negf %1260 : vector<4x32xf32>
    %1262 = math.exp %1261 : vector<4x32xf32>
    %cst_240 = arith.constant 1.000000e+00 : f32
    %1263 = vector.broadcast %cst_240 : f32 to vector<4x32xf32>
    %1264 = arith.addf %1263, %1262 : vector<4x32xf32>
    %1265 = arith.divf %1263, %1264 : vector<4x32xf32>
    %1266 = vector.extract_strided_slice %1255 {offsets = [0, 32], sizes = [4, 32], strides = [1, 1]} : vector<4x128xf32> to vector<4x32xf32>
    %1267 = arith.negf %1266 : vector<4x32xf32>
    %1268 = math.exp %1267 : vector<4x32xf32>
    %cst_241 = arith.constant 1.000000e+00 : f32
    %1269 = vector.broadcast %cst_241 : f32 to vector<4x32xf32>
    %1270 = arith.addf %1269, %1268 : vector<4x32xf32>
    %1271 = arith.divf %1269, %1270 : vector<4x32xf32>
    %1272 = vector.extract_strided_slice %1255 {offsets = [0, 64], sizes = [4, 32], strides = [1, 1]} : vector<4x128xf32> to vector<4x32xf32>
    %1273 = math.tanh %1272 : vector<4x32xf32>
    %1274 = vector.extract_strided_slice %1255 {offsets = [0, 96], sizes = [4, 32], strides = [1, 1]} : vector<4x128xf32> to vector<4x32xf32>
    %1275 = arith.negf %1274 : vector<4x32xf32>
    %1276 = math.exp %1275 : vector<4x32xf32>
    %cst_242 = arith.constant 1.000000e+00 : f32
    %1277 = vector.broadcast %cst_242 : f32 to vector<4x32xf32>
    %1278 = arith.addf %1277, %1276 : vector<4x32xf32>
    %1279 = arith.divf %1277, %1278 : vector<4x32xf32>
    %1280 = arith.mulf %1271, %1221 : vector<4x32xf32>
    %1281 = arith.mulf %1265, %1273 : vector<4x32xf32>
    %1282 = arith.addf %1280, %1281 : vector<4x32xf32>
    %1283 = math.tanh %1282 : vector<4x32xf32>
    %1284 = arith.mulf %1279, %1283 : vector<4x32xf32>
    %1285 = vector.extract_strided_slice %1259 {offsets = [0, 0], sizes = [4, 32], strides = [1, 1]} : vector<4x128xf32> to vector<4x32xf32>
    %1286 = arith.negf %1285 : vector<4x32xf32>
    %1287 = math.exp %1286 : vector<4x32xf32>
    %cst_243 = arith.constant 1.000000e+00 : f32
    %1288 = vector.broadcast %cst_243 : f32 to vector<4x32xf32>
    %1289 = arith.addf %1288, %1287 : vector<4x32xf32>
    %1290 = arith.divf %1288, %1289 : vector<4x32xf32>
    %1291 = vector.extract_strided_slice %1259 {offsets = [0, 32], sizes = [4, 32], strides = [1, 1]} : vector<4x128xf32> to vector<4x32xf32>
    %1292 = arith.negf %1291 : vector<4x32xf32>
    %1293 = math.exp %1292 : vector<4x32xf32>
    %cst_244 = arith.constant 1.000000e+00 : f32
    %1294 = vector.broadcast %cst_244 : f32 to vector<4x32xf32>
    %1295 = arith.addf %1294, %1293 : vector<4x32xf32>
    %1296 = arith.divf %1294, %1295 : vector<4x32xf32>
    %1297 = vector.extract_strided_slice %1259 {offsets = [0, 64], sizes = [4, 32], strides = [1, 1]} : vector<4x128xf32> to vector<4x32xf32>
    %1298 = math.tanh %1297 : vector<4x32xf32>
    %1299 = vector.extract_strided_slice %1259 {offsets = [0, 96], sizes = [4, 32], strides = [1, 1]} : vector<4x128xf32> to vector<4x32xf32>
    %1300 = arith.negf %1299 : vector<4x32xf32>
    %1301 = math.exp %1300 : vector<4x32xf32>
    %cst_245 = arith.constant 1.000000e+00 : f32
    %1302 = vector.broadcast %cst_245 : f32 to vector<4x32xf32>
    %1303 = arith.addf %1302, %1301 : vector<4x32xf32>
    %1304 = arith.divf %1302, %1303 : vector<4x32xf32>
    %1305 = arith.mulf %1296, %1246 : vector<4x32xf32>
    %1306 = arith.mulf %1290, %1298 : vector<4x32xf32>
    %1307 = arith.addf %1305, %1306 : vector<4x32xf32>
    %1308 = math.tanh %1307 : vector<4x32xf32>
    %1309 = arith.mulf %1304, %1308 : vector<4x32xf32>
    %1310 = tpu.concatenate %1284, %1309 in 0 : vector<4x32xf32>, vector<4x32xf32> -> vector<8x32xf32>
    %1311 = arith.truncf %1310 : vector<8x32xf32> to vector<8x32xbf16>
    %cst_246 = arith.constant dense<0.000000e+00> : vector<8x256xf32>
    %1312 = tpu.matmul %1311, %1002, %cst_246 {dimension_numbers = #tpu.dot_dimension_numbers<[1], [0], [0], [1], [0, 0, 1, 1], [], []>} : vector<8x32xbf16>, vector<32x256xbf16>, vector<8x256xf32> -> vector<8x256xf32>
    %c20_247 = arith.constant 20 : index
    %c0_248 = arith.constant 0 : index
    %1313 = vector.load %arg13[%c20_247, %c0_248] : memref<64x256xbf16, #tpu.memory_space<vmem>>, vector<4x128xbf16>
    %1314 = arith.extf %1313 : vector<4x128xbf16> to vector<4x128xf32>
    %1315 = vector.extract_strided_slice %1312 {offsets = [0, 0], sizes = [4, 128], strides = [1, 1]} : vector<8x256xf32> to vector<4x128xf32>
    %1316 = arith.addf %1314, %1315 : vector<4x128xf32>
    %c40 = arith.constant 40 : index
    %c128_249 = arith.constant 128 : index
    %1317 = vector.load %arg13[%c40, %c128_249] : memref<64x256xbf16, #tpu.memory_space<vmem>>, vector<4x128xbf16>
    %1318 = arith.extf %1317 : vector<4x128xbf16> to vector<4x128xf32>
    %1319 = vector.extract_strided_slice %1312 {offsets = [4, 128], sizes = [4, 128], strides = [1, 1]} : vector<8x256xf32> to vector<4x128xf32>
    %1320 = arith.addf %1318, %1319 : vector<4x128xf32>
    %1321 = vector.extract_strided_slice %1316 {offsets = [0, 0], sizes = [4, 32], strides = [1, 1]} : vector<4x128xf32> to vector<4x32xf32>
    %1322 = arith.negf %1321 : vector<4x32xf32>
    %1323 = math.exp %1322 : vector<4x32xf32>
    %cst_250 = arith.constant 1.000000e+00 : f32
    %1324 = vector.broadcast %cst_250 : f32 to vector<4x32xf32>
    %1325 = arith.addf %1324, %1323 : vector<4x32xf32>
    %1326 = arith.divf %1324, %1325 : vector<4x32xf32>
    %1327 = vector.extract_strided_slice %1316 {offsets = [0, 32], sizes = [4, 32], strides = [1, 1]} : vector<4x128xf32> to vector<4x32xf32>
    %1328 = arith.negf %1327 : vector<4x32xf32>
    %1329 = math.exp %1328 : vector<4x32xf32>
    %cst_251 = arith.constant 1.000000e+00 : f32
    %1330 = vector.broadcast %cst_251 : f32 to vector<4x32xf32>
    %1331 = arith.addf %1330, %1329 : vector<4x32xf32>
    %1332 = arith.divf %1330, %1331 : vector<4x32xf32>
    %1333 = vector.extract_strided_slice %1316 {offsets = [0, 64], sizes = [4, 32], strides = [1, 1]} : vector<4x128xf32> to vector<4x32xf32>
    %1334 = math.tanh %1333 : vector<4x32xf32>
    %1335 = vector.extract_strided_slice %1316 {offsets = [0, 96], sizes = [4, 32], strides = [1, 1]} : vector<4x128xf32> to vector<4x32xf32>
    %1336 = arith.negf %1335 : vector<4x32xf32>
    %1337 = math.exp %1336 : vector<4x32xf32>
    %cst_252 = arith.constant 1.000000e+00 : f32
    %1338 = vector.broadcast %cst_252 : f32 to vector<4x32xf32>
    %1339 = arith.addf %1338, %1337 : vector<4x32xf32>
    %1340 = arith.divf %1338, %1339 : vector<4x32xf32>
    %1341 = arith.mulf %1332, %1282 : vector<4x32xf32>
    %1342 = arith.mulf %1326, %1334 : vector<4x32xf32>
    %1343 = arith.addf %1341, %1342 : vector<4x32xf32>
    %1344 = math.tanh %1343 : vector<4x32xf32>
    %1345 = arith.mulf %1340, %1344 : vector<4x32xf32>
    %1346 = vector.extract_strided_slice %1320 {offsets = [0, 0], sizes = [4, 32], strides = [1, 1]} : vector<4x128xf32> to vector<4x32xf32>
    %1347 = arith.negf %1346 : vector<4x32xf32>
    %1348 = math.exp %1347 : vector<4x32xf32>
    %cst_253 = arith.constant 1.000000e+00 : f32
    %1349 = vector.broadcast %cst_253 : f32 to vector<4x32xf32>
    %1350 = arith.addf %1349, %1348 : vector<4x32xf32>
    %1351 = arith.divf %1349, %1350 : vector<4x32xf32>
    %1352 = vector.extract_strided_slice %1320 {offsets = [0, 32], sizes = [4, 32], strides = [1, 1]} : vector<4x128xf32> to vector<4x32xf32>
    %1353 = arith.negf %1352 : vector<4x32xf32>
    %1354 = math.exp %1353 : vector<4x32xf32>
    %cst_254 = arith.constant 1.000000e+00 : f32
    %1355 = vector.broadcast %cst_254 : f32 to vector<4x32xf32>
    %1356 = arith.addf %1355, %1354 : vector<4x32xf32>
    %1357 = arith.divf %1355, %1356 : vector<4x32xf32>
    %1358 = vector.extract_strided_slice %1320 {offsets = [0, 64], sizes = [4, 32], strides = [1, 1]} : vector<4x128xf32> to vector<4x32xf32>
    %1359 = math.tanh %1358 : vector<4x32xf32>
    %1360 = vector.extract_strided_slice %1320 {offsets = [0, 96], sizes = [4, 32], strides = [1, 1]} : vector<4x128xf32> to vector<4x32xf32>
    %1361 = arith.negf %1360 : vector<4x32xf32>
    %1362 = math.exp %1361 : vector<4x32xf32>
    %cst_255 = arith.constant 1.000000e+00 : f32
    %1363 = vector.broadcast %cst_255 : f32 to vector<4x32xf32>
    %1364 = arith.addf %1363, %1362 : vector<4x32xf32>
    %1365 = arith.divf %1363, %1364 : vector<4x32xf32>
    %1366 = arith.mulf %1357, %1307 : vector<4x32xf32>
    %1367 = arith.mulf %1351, %1359 : vector<4x32xf32>
    %1368 = arith.addf %1366, %1367 : vector<4x32xf32>
    %1369 = math.tanh %1368 : vector<4x32xf32>
    %1370 = arith.mulf %1365, %1369 : vector<4x32xf32>
    %1371 = tpu.concatenate %1345, %1370 in 0 : vector<4x32xf32>, vector<4x32xf32> -> vector<8x32xf32>
    %1372 = arith.truncf %1371 : vector<8x32xf32> to vector<8x32xbf16>
    %cst_256 = arith.constant dense<0.000000e+00> : vector<8x256xf32>
    %1373 = tpu.matmul %1372, %1002, %cst_256 {dimension_numbers = #tpu.dot_dimension_numbers<[1], [0], [0], [1], [0, 0, 1, 1], [], []>} : vector<8x32xbf16>, vector<32x256xbf16>, vector<8x256xf32> -> vector<8x256xf32>
    %c24_257 = arith.constant 24 : index
    %c0_258 = arith.constant 0 : index
    %1374 = vector.load %arg13[%c24_257, %c0_258] : memref<64x256xbf16, #tpu.memory_space<vmem>>, vector<4x128xbf16>
    %1375 = arith.extf %1374 : vector<4x128xbf16> to vector<4x128xf32>
    %1376 = vector.extract_strided_slice %1373 {offsets = [0, 0], sizes = [4, 128], strides = [1, 1]} : vector<8x256xf32> to vector<4x128xf32>
    %1377 = arith.addf %1375, %1376 : vector<4x128xf32>
    %c36 = arith.constant 36 : index
    %c128_259 = arith.constant 128 : index
    %1378 = vector.load %arg13[%c36, %c128_259] : memref<64x256xbf16, #tpu.memory_space<vmem>>, vector<4x128xbf16>
    %1379 = arith.extf %1378 : vector<4x128xbf16> to vector<4x128xf32>
    %1380 = vector.extract_strided_slice %1373 {offsets = [4, 128], sizes = [4, 128], strides = [1, 1]} : vector<8x256xf32> to vector<4x128xf32>
    %1381 = arith.addf %1379, %1380 : vector<4x128xf32>
    %1382 = vector.extract_strided_slice %1377 {offsets = [0, 0], sizes = [4, 32], strides = [1, 1]} : vector<4x128xf32> to vector<4x32xf32>
    %1383 = arith.negf %1382 : vector<4x32xf32>
    %1384 = math.exp %1383 : vector<4x32xf32>
    %cst_260 = arith.constant 1.000000e+00 : f32
    %1385 = vector.broadcast %cst_260 : f32 to vector<4x32xf32>
    %1386 = arith.addf %1385, %1384 : vector<4x32xf32>
    %1387 = arith.divf %1385, %1386 : vector<4x32xf32>
    %1388 = vector.extract_strided_slice %1377 {offsets = [0, 32], sizes = [4, 32], strides = [1, 1]} : vector<4x128xf32> to vector<4x32xf32>
    %1389 = arith.negf %1388 : vector<4x32xf32>
    %1390 = math.exp %1389 : vector<4x32xf32>
    %cst_261 = arith.constant 1.000000e+00 : f32
    %1391 = vector.broadcast %cst_261 : f32 to vector<4x32xf32>
    %1392 = arith.addf %1391, %1390 : vector<4x32xf32>
    %1393 = arith.divf %1391, %1392 : vector<4x32xf32>
    %1394 = vector.extract_strided_slice %1377 {offsets = [0, 64], sizes = [4, 32], strides = [1, 1]} : vector<4x128xf32> to vector<4x32xf32>
    %1395 = math.tanh %1394 : vector<4x32xf32>
    %1396 = vector.extract_strided_slice %1377 {offsets = [0, 96], sizes = [4, 32], strides = [1, 1]} : vector<4x128xf32> to vector<4x32xf32>
    %1397 = arith.negf %1396 : vector<4x32xf32>
    %1398 = math.exp %1397 : vector<4x32xf32>
    %cst_262 = arith.constant 1.000000e+00 : f32
    %1399 = vector.broadcast %cst_262 : f32 to vector<4x32xf32>
    %1400 = arith.addf %1399, %1398 : vector<4x32xf32>
    %1401 = arith.divf %1399, %1400 : vector<4x32xf32>
    %1402 = arith.mulf %1393, %1343 : vector<4x32xf32>
    %1403 = arith.mulf %1387, %1395 : vector<4x32xf32>
    %1404 = arith.addf %1402, %1403 : vector<4x32xf32>
    %1405 = math.tanh %1404 : vector<4x32xf32>
    %1406 = arith.mulf %1401, %1405 : vector<4x32xf32>
    %1407 = vector.extract_strided_slice %1381 {offsets = [0, 0], sizes = [4, 32], strides = [1, 1]} : vector<4x128xf32> to vector<4x32xf32>
    %1408 = arith.negf %1407 : vector<4x32xf32>
    %1409 = math.exp %1408 : vector<4x32xf32>
    %cst_263 = arith.constant 1.000000e+00 : f32
    %1410 = vector.broadcast %cst_263 : f32 to vector<4x32xf32>
    %1411 = arith.addf %1410, %1409 : vector<4x32xf32>
    %1412 = arith.divf %1410, %1411 : vector<4x32xf32>
    %1413 = vector.extract_strided_slice %1381 {offsets = [0, 32], sizes = [4, 32], strides = [1, 1]} : vector<4x128xf32> to vector<4x32xf32>
    %1414 = arith.negf %1413 : vector<4x32xf32>
    %1415 = math.exp %1414 : vector<4x32xf32>
    %cst_264 = arith.constant 1.000000e+00 : f32
    %1416 = vector.broadcast %cst_264 : f32 to vector<4x32xf32>
    %1417 = arith.addf %1416, %1415 : vector<4x32xf32>
    %1418 = arith.divf %1416, %1417 : vector<4x32xf32>
    %1419 = vector.extract_strided_slice %1381 {offsets = [0, 64], sizes = [4, 32], strides = [1, 1]} : vector<4x128xf32> to vector<4x32xf32>
    %1420 = math.tanh %1419 : vector<4x32xf32>
    %1421 = vector.extract_strided_slice %1381 {offsets = [0, 96], sizes = [4, 32], strides = [1, 1]} : vector<4x128xf32> to vector<4x32xf32>
    %1422 = arith.negf %1421 : vector<4x32xf32>
    %1423 = math.exp %1422 : vector<4x32xf32>
    %cst_265 = arith.constant 1.000000e+00 : f32
    %1424 = vector.broadcast %cst_265 : f32 to vector<4x32xf32>
    %1425 = arith.addf %1424, %1423 : vector<4x32xf32>
    %1426 = arith.divf %1424, %1425 : vector<4x32xf32>
    %1427 = arith.mulf %1418, %1368 : vector<4x32xf32>
    %1428 = arith.mulf %1412, %1420 : vector<4x32xf32>
    %1429 = arith.addf %1427, %1428 : vector<4x32xf32>
    %1430 = math.tanh %1429 : vector<4x32xf32>
    %1431 = arith.mulf %1426, %1430 : vector<4x32xf32>
    %1432 = tpu.concatenate %1406, %1431 in 0 : vector<4x32xf32>, vector<4x32xf32> -> vector<8x32xf32>
    %1433 = arith.truncf %1432 : vector<8x32xf32> to vector<8x32xbf16>
    %cst_266 = arith.constant dense<0.000000e+00> : vector<8x256xf32>
    %1434 = tpu.matmul %1433, %1002, %cst_266 {dimension_numbers = #tpu.dot_dimension_numbers<[1], [0], [0], [1], [0, 0, 1, 1], [], []>} : vector<8x32xbf16>, vector<32x256xbf16>, vector<8x256xf32> -> vector<8x256xf32>
    %c28_267 = arith.constant 28 : index
    %c0_268 = arith.constant 0 : index
    %1435 = vector.load %arg13[%c28_267, %c0_268] : memref<64x256xbf16, #tpu.memory_space<vmem>>, vector<4x128xbf16>
    %1436 = arith.extf %1435 : vector<4x128xbf16> to vector<4x128xf32>
    %1437 = vector.extract_strided_slice %1434 {offsets = [0, 0], sizes = [4, 128], strides = [1, 1]} : vector<8x256xf32> to vector<4x128xf32>
    %1438 = arith.addf %1436, %1437 : vector<4x128xf32>
    %c32 = arith.constant 32 : index
    %c128_269 = arith.constant 128 : index
    %1439 = vector.load %arg13[%c32, %c128_269] : memref<64x256xbf16, #tpu.memory_space<vmem>>, vector<4x128xbf16>
    %1440 = arith.extf %1439 : vector<4x128xbf16> to vector<4x128xf32>
    %1441 = vector.extract_strided_slice %1434 {offsets = [4, 128], sizes = [4, 128], strides = [1, 1]} : vector<8x256xf32> to vector<4x128xf32>
    %1442 = arith.addf %1440, %1441 : vector<4x128xf32>
    %1443 = vector.extract_strided_slice %1438 {offsets = [0, 0], sizes = [4, 32], strides = [1, 1]} : vector<4x128xf32> to vector<4x32xf32>
    %1444 = arith.negf %1443 : vector<4x32xf32>
    %1445 = math.exp %1444 : vector<4x32xf32>
    %cst_270 = arith.constant 1.000000e+00 : f32
    %1446 = vector.broadcast %cst_270 : f32 to vector<4x32xf32>
    %1447 = arith.addf %1446, %1445 : vector<4x32xf32>
    %1448 = arith.divf %1446, %1447 : vector<4x32xf32>
    %1449 = vector.extract_strided_slice %1438 {offsets = [0, 32], sizes = [4, 32], strides = [1, 1]} : vector<4x128xf32> to vector<4x32xf32>
    %1450 = arith.negf %1449 : vector<4x32xf32>
    %1451 = math.exp %1450 : vector<4x32xf32>
    %cst_271 = arith.constant 1.000000e+00 : f32
    %1452 = vector.broadcast %cst_271 : f32 to vector<4x32xf32>
    %1453 = arith.addf %1452, %1451 : vector<4x32xf32>
    %1454 = arith.divf %1452, %1453 : vector<4x32xf32>
    %1455 = vector.extract_strided_slice %1438 {offsets = [0, 64], sizes = [4, 32], strides = [1, 1]} : vector<4x128xf32> to vector<4x32xf32>
    %1456 = math.tanh %1455 : vector<4x32xf32>
    %1457 = vector.extract_strided_slice %1438 {offsets = [0, 96], sizes = [4, 32], strides = [1, 1]} : vector<4x128xf32> to vector<4x32xf32>
    %1458 = arith.negf %1457 : vector<4x32xf32>
    %1459 = math.exp %1458 : vector<4x32xf32>
    %cst_272 = arith.constant 1.000000e+00 : f32
    %1460 = vector.broadcast %cst_272 : f32 to vector<4x32xf32>
    %1461 = arith.addf %1460, %1459 : vector<4x32xf32>
    %1462 = arith.divf %1460, %1461 : vector<4x32xf32>
    %1463 = arith.mulf %1454, %1404 : vector<4x32xf32>
    %1464 = arith.mulf %1448, %1456 : vector<4x32xf32>
    %1465 = arith.addf %1463, %1464 : vector<4x32xf32>
    %1466 = math.tanh %1465 : vector<4x32xf32>
    %1467 = arith.mulf %1462, %1466 : vector<4x32xf32>
    %1468 = vector.extract_strided_slice %1442 {offsets = [0, 0], sizes = [4, 32], strides = [1, 1]} : vector<4x128xf32> to vector<4x32xf32>
    %1469 = arith.negf %1468 : vector<4x32xf32>
    %1470 = math.exp %1469 : vector<4x32xf32>
    %cst_273 = arith.constant 1.000000e+00 : f32
    %1471 = vector.broadcast %cst_273 : f32 to vector<4x32xf32>
    %1472 = arith.addf %1471, %1470 : vector<4x32xf32>
    %1473 = arith.divf %1471, %1472 : vector<4x32xf32>
    %1474 = vector.extract_strided_slice %1442 {offsets = [0, 32], sizes = [4, 32], strides = [1, 1]} : vector<4x128xf32> to vector<4x32xf32>
    %1475 = arith.negf %1474 : vector<4x32xf32>
    %1476 = math.exp %1475 : vector<4x32xf32>
    %cst_274 = arith.constant 1.000000e+00 : f32
    %1477 = vector.broadcast %cst_274 : f32 to vector<4x32xf32>
    %1478 = arith.addf %1477, %1476 : vector<4x32xf32>
    %1479 = arith.divf %1477, %1478 : vector<4x32xf32>
    %1480 = vector.extract_strided_slice %1442 {offsets = [0, 64], sizes = [4, 32], strides = [1, 1]} : vector<4x128xf32> to vector<4x32xf32>
    %1481 = math.tanh %1480 : vector<4x32xf32>
    %1482 = vector.extract_strided_slice %1442 {offsets = [0, 96], sizes = [4, 32], strides = [1, 1]} : vector<4x128xf32> to vector<4x32xf32>
    %1483 = arith.negf %1482 : vector<4x32xf32>
    %1484 = math.exp %1483 : vector<4x32xf32>
    %cst_275 = arith.constant 1.000000e+00 : f32
    %1485 = vector.broadcast %cst_275 : f32 to vector<4x32xf32>
    %1486 = arith.addf %1485, %1484 : vector<4x32xf32>
    %1487 = arith.divf %1485, %1486 : vector<4x32xf32>
    %1488 = arith.mulf %1479, %1429 : vector<4x32xf32>
    %1489 = arith.mulf %1473, %1481 : vector<4x32xf32>
    %1490 = arith.addf %1488, %1489 : vector<4x32xf32>
    %1491 = math.tanh %1490 : vector<4x32xf32>
    %1492 = arith.mulf %1487, %1491 : vector<4x32xf32>
    %1493 = tpu.concatenate %1467, %1492 in 0 : vector<4x32xf32>, vector<4x32xf32> -> vector<8x32xf32>
    %1494 = arith.truncf %1493 : vector<8x32xf32> to vector<8x32xbf16>
    %cst_276 = arith.constant dense<0.000000e+00> : vector<8x256xf32>
    %1495 = tpu.matmul %1494, %1002, %cst_276 {dimension_numbers = #tpu.dot_dimension_numbers<[1], [0], [0], [1], [0, 0, 1, 1], [], []>} : vector<8x32xbf16>, vector<32x256xbf16>, vector<8x256xf32> -> vector<8x256xf32>
    %c32_277 = arith.constant 32 : index
    %c0_278 = arith.constant 0 : index
    %1496 = vector.load %arg13[%c32_277, %c0_278] : memref<64x256xbf16, #tpu.memory_space<vmem>>, vector<4x128xbf16>
    %1497 = arith.extf %1496 : vector<4x128xbf16> to vector<4x128xf32>
    %1498 = vector.extract_strided_slice %1495 {offsets = [0, 0], sizes = [4, 128], strides = [1, 1]} : vector<8x256xf32> to vector<4x128xf32>
    %1499 = arith.addf %1497, %1498 : vector<4x128xf32>
    %c28_279 = arith.constant 28 : index
    %c128_280 = arith.constant 128 : index
    %1500 = vector.load %arg13[%c28_279, %c128_280] : memref<64x256xbf16, #tpu.memory_space<vmem>>, vector<4x128xbf16>
    %1501 = arith.extf %1500 : vector<4x128xbf16> to vector<4x128xf32>
    %1502 = vector.extract_strided_slice %1495 {offsets = [4, 128], sizes = [4, 128], strides = [1, 1]} : vector<8x256xf32> to vector<4x128xf32>
    %1503 = arith.addf %1501, %1502 : vector<4x128xf32>
    %1504 = vector.extract_strided_slice %1499 {offsets = [0, 0], sizes = [4, 32], strides = [1, 1]} : vector<4x128xf32> to vector<4x32xf32>
    %1505 = arith.negf %1504 : vector<4x32xf32>
    %1506 = math.exp %1505 : vector<4x32xf32>
    %cst_281 = arith.constant 1.000000e+00 : f32
    %1507 = vector.broadcast %cst_281 : f32 to vector<4x32xf32>
    %1508 = arith.addf %1507, %1506 : vector<4x32xf32>
    %1509 = arith.divf %1507, %1508 : vector<4x32xf32>
    %1510 = vector.extract_strided_slice %1499 {offsets = [0, 32], sizes = [4, 32], strides = [1, 1]} : vector<4x128xf32> to vector<4x32xf32>
    %1511 = arith.negf %1510 : vector<4x32xf32>
    %1512 = math.exp %1511 : vector<4x32xf32>
    %cst_282 = arith.constant 1.000000e+00 : f32
    %1513 = vector.broadcast %cst_282 : f32 to vector<4x32xf32>
    %1514 = arith.addf %1513, %1512 : vector<4x32xf32>
    %1515 = arith.divf %1513, %1514 : vector<4x32xf32>
    %1516 = vector.extract_strided_slice %1499 {offsets = [0, 64], sizes = [4, 32], strides = [1, 1]} : vector<4x128xf32> to vector<4x32xf32>
    %1517 = math.tanh %1516 : vector<4x32xf32>
    %1518 = vector.extract_strided_slice %1499 {offsets = [0, 96], sizes = [4, 32], strides = [1, 1]} : vector<4x128xf32> to vector<4x32xf32>
    %1519 = arith.negf %1518 : vector<4x32xf32>
    %1520 = math.exp %1519 : vector<4x32xf32>
    %cst_283 = arith.constant 1.000000e+00 : f32
    %1521 = vector.broadcast %cst_283 : f32 to vector<4x32xf32>
    %1522 = arith.addf %1521, %1520 : vector<4x32xf32>
    %1523 = arith.divf %1521, %1522 : vector<4x32xf32>
    %1524 = arith.mulf %1515, %1465 : vector<4x32xf32>
    %1525 = arith.mulf %1509, %1517 : vector<4x32xf32>
    %1526 = arith.addf %1524, %1525 : vector<4x32xf32>
    %1527 = math.tanh %1526 : vector<4x32xf32>
    %1528 = arith.mulf %1523, %1527 : vector<4x32xf32>
    %1529 = vector.extract_strided_slice %1503 {offsets = [0, 0], sizes = [4, 32], strides = [1, 1]} : vector<4x128xf32> to vector<4x32xf32>
    %1530 = arith.negf %1529 : vector<4x32xf32>
    %1531 = math.exp %1530 : vector<4x32xf32>
    %cst_284 = arith.constant 1.000000e+00 : f32
    %1532 = vector.broadcast %cst_284 : f32 to vector<4x32xf32>
    %1533 = arith.addf %1532, %1531 : vector<4x32xf32>
    %1534 = arith.divf %1532, %1533 : vector<4x32xf32>
    %1535 = vector.extract_strided_slice %1503 {offsets = [0, 32], sizes = [4, 32], strides = [1, 1]} : vector<4x128xf32> to vector<4x32xf32>
    %1536 = arith.negf %1535 : vector<4x32xf32>
    %1537 = math.exp %1536 : vector<4x32xf32>
    %cst_285 = arith.constant 1.000000e+00 : f32
    %1538 = vector.broadcast %cst_285 : f32 to vector<4x32xf32>
    %1539 = arith.addf %1538, %1537 : vector<4x32xf32>
    %1540 = arith.divf %1538, %1539 : vector<4x32xf32>
    %1541 = vector.extract_strided_slice %1503 {offsets = [0, 64], sizes = [4, 32], strides = [1, 1]} : vector<4x128xf32> to vector<4x32xf32>
    %1542 = math.tanh %1541 : vector<4x32xf32>
    %1543 = vector.extract_strided_slice %1503 {offsets = [0, 96], sizes = [4, 32], strides = [1, 1]} : vector<4x128xf32> to vector<4x32xf32>
    %1544 = arith.negf %1543 : vector<4x32xf32>
    %1545 = math.exp %1544 : vector<4x32xf32>
    %cst_286 = arith.constant 1.000000e+00 : f32
    %1546 = vector.broadcast %cst_286 : f32 to vector<4x32xf32>
    %1547 = arith.addf %1546, %1545 : vector<4x32xf32>
    %1548 = arith.divf %1546, %1547 : vector<4x32xf32>
    %1549 = arith.mulf %1540, %1490 : vector<4x32xf32>
    %1550 = arith.mulf %1534, %1542 : vector<4x32xf32>
    %1551 = arith.addf %1549, %1550 : vector<4x32xf32>
    %1552 = math.tanh %1551 : vector<4x32xf32>
    %1553 = arith.mulf %1548, %1552 : vector<4x32xf32>
    %1554 = tpu.concatenate %1528, %1553 in 0 : vector<4x32xf32>, vector<4x32xf32> -> vector<8x32xf32>
    %1555 = arith.truncf %1554 : vector<8x32xf32> to vector<8x32xbf16>
    %cst_287 = arith.constant dense<0.000000e+00> : vector<8x256xf32>
    %1556 = tpu.matmul %1555, %1002, %cst_287 {dimension_numbers = #tpu.dot_dimension_numbers<[1], [0], [0], [1], [0, 0, 1, 1], [], []>} : vector<8x32xbf16>, vector<32x256xbf16>, vector<8x256xf32> -> vector<8x256xf32>
    %c36_288 = arith.constant 36 : index
    %c0_289 = arith.constant 0 : index
    %1557 = vector.load %arg13[%c36_288, %c0_289] : memref<64x256xbf16, #tpu.memory_space<vmem>>, vector<4x128xbf16>
    %1558 = arith.extf %1557 : vector<4x128xbf16> to vector<4x128xf32>
    %1559 = vector.extract_strided_slice %1556 {offsets = [0, 0], sizes = [4, 128], strides = [1, 1]} : vector<8x256xf32> to vector<4x128xf32>
    %1560 = arith.addf %1558, %1559 : vector<4x128xf32>
    %c24_290 = arith.constant 24 : index
    %c128_291 = arith.constant 128 : index
    %1561 = vector.load %arg13[%c24_290, %c128_291] : memref<64x256xbf16, #tpu.memory_space<vmem>>, vector<4x128xbf16>
    %1562 = arith.extf %1561 : vector<4x128xbf16> to vector<4x128xf32>
    %1563 = vector.extract_strided_slice %1556 {offsets = [4, 128], sizes = [4, 128], strides = [1, 1]} : vector<8x256xf32> to vector<4x128xf32>
    %1564 = arith.addf %1562, %1563 : vector<4x128xf32>
    %1565 = vector.extract_strided_slice %1560 {offsets = [0, 0], sizes = [4, 32], strides = [1, 1]} : vector<4x128xf32> to vector<4x32xf32>
    %1566 = arith.negf %1565 : vector<4x32xf32>
    %1567 = math.exp %1566 : vector<4x32xf32>
    %cst_292 = arith.constant 1.000000e+00 : f32
    %1568 = vector.broadcast %cst_292 : f32 to vector<4x32xf32>
    %1569 = arith.addf %1568, %1567 : vector<4x32xf32>
    %1570 = arith.divf %1568, %1569 : vector<4x32xf32>
    %1571 = vector.extract_strided_slice %1560 {offsets = [0, 32], sizes = [4, 32], strides = [1, 1]} : vector<4x128xf32> to vector<4x32xf32>
    %1572 = arith.negf %1571 : vector<4x32xf32>
    %1573 = math.exp %1572 : vector<4x32xf32>
    %cst_293 = arith.constant 1.000000e+00 : f32
    %1574 = vector.broadcast %cst_293 : f32 to vector<4x32xf32>
    %1575 = arith.addf %1574, %1573 : vector<4x32xf32>
    %1576 = arith.divf %1574, %1575 : vector<4x32xf32>
    %1577 = vector.extract_strided_slice %1560 {offsets = [0, 64], sizes = [4, 32], strides = [1, 1]} : vector<4x128xf32> to vector<4x32xf32>
    %1578 = math.tanh %1577 : vector<4x32xf32>
    %1579 = vector.extract_strided_slice %1560 {offsets = [0, 96], sizes = [4, 32], strides = [1, 1]} : vector<4x128xf32> to vector<4x32xf32>
    %1580 = arith.negf %1579 : vector<4x32xf32>
    %1581 = math.exp %1580 : vector<4x32xf32>
    %cst_294 = arith.constant 1.000000e+00 : f32
    %1582 = vector.broadcast %cst_294 : f32 to vector<4x32xf32>
    %1583 = arith.addf %1582, %1581 : vector<4x32xf32>
    %1584 = arith.divf %1582, %1583 : vector<4x32xf32>
    %1585 = arith.mulf %1576, %1526 : vector<4x32xf32>
    %1586 = arith.mulf %1570, %1578 : vector<4x32xf32>
    %1587 = arith.addf %1585, %1586 : vector<4x32xf32>
    %1588 = math.tanh %1587 : vector<4x32xf32>
    %1589 = arith.mulf %1584, %1588 : vector<4x32xf32>
    %1590 = vector.extract_strided_slice %1564 {offsets = [0, 0], sizes = [4, 32], strides = [1, 1]} : vector<4x128xf32> to vector<4x32xf32>
    %1591 = arith.negf %1590 : vector<4x32xf32>
    %1592 = math.exp %1591 : vector<4x32xf32>
    %cst_295 = arith.constant 1.000000e+00 : f32
    %1593 = vector.broadcast %cst_295 : f32 to vector<4x32xf32>
    %1594 = arith.addf %1593, %1592 : vector<4x32xf32>
    %1595 = arith.divf %1593, %1594 : vector<4x32xf32>
    %1596 = vector.extract_strided_slice %1564 {offsets = [0, 32], sizes = [4, 32], strides = [1, 1]} : vector<4x128xf32> to vector<4x32xf32>
    %1597 = arith.negf %1596 : vector<4x32xf32>
    %1598 = math.exp %1597 : vector<4x32xf32>
    %cst_296 = arith.constant 1.000000e+00 : f32
    %1599 = vector.broadcast %cst_296 : f32 to vector<4x32xf32>
    %1600 = arith.addf %1599, %1598 : vector<4x32xf32>
    %1601 = arith.divf %1599, %1600 : vector<4x32xf32>
    %1602 = vector.extract_strided_slice %1564 {offsets = [0, 64], sizes = [4, 32], strides = [1, 1]} : vector<4x128xf32> to vector<4x32xf32>
    %1603 = math.tanh %1602 : vector<4x32xf32>
    %1604 = vector.extract_strided_slice %1564 {offsets = [0, 96], sizes = [4, 32], strides = [1, 1]} : vector<4x128xf32> to vector<4x32xf32>
    %1605 = arith.negf %1604 : vector<4x32xf32>
    %1606 = math.exp %1605 : vector<4x32xf32>
    %cst_297 = arith.constant 1.000000e+00 : f32
    %1607 = vector.broadcast %cst_297 : f32 to vector<4x32xf32>
    %1608 = arith.addf %1607, %1606 : vector<4x32xf32>
    %1609 = arith.divf %1607, %1608 : vector<4x32xf32>
    %1610 = arith.mulf %1601, %1551 : vector<4x32xf32>
    %1611 = arith.mulf %1595, %1603 : vector<4x32xf32>
    %1612 = arith.addf %1610, %1611 : vector<4x32xf32>
    %1613 = math.tanh %1612 : vector<4x32xf32>
    %1614 = arith.mulf %1609, %1613 : vector<4x32xf32>
    %1615 = tpu.concatenate %1589, %1614 in 0 : vector<4x32xf32>, vector<4x32xf32> -> vector<8x32xf32>
    %1616 = arith.truncf %1615 : vector<8x32xf32> to vector<8x32xbf16>
    %cst_298 = arith.constant dense<0.000000e+00> : vector<8x256xf32>
    %1617 = tpu.matmul %1616, %1002, %cst_298 {dimension_numbers = #tpu.dot_dimension_numbers<[1], [0], [0], [1], [0, 0, 1, 1], [], []>} : vector<8x32xbf16>, vector<32x256xbf16>, vector<8x256xf32> -> vector<8x256xf32>
    %c40_299 = arith.constant 40 : index
    %c0_300 = arith.constant 0 : index
    %1618 = vector.load %arg13[%c40_299, %c0_300] : memref<64x256xbf16, #tpu.memory_space<vmem>>, vector<4x128xbf16>
    %1619 = arith.extf %1618 : vector<4x128xbf16> to vector<4x128xf32>
    %1620 = vector.extract_strided_slice %1617 {offsets = [0, 0], sizes = [4, 128], strides = [1, 1]} : vector<8x256xf32> to vector<4x128xf32>
    %1621 = arith.addf %1619, %1620 : vector<4x128xf32>
    %c20_301 = arith.constant 20 : index
    %c128_302 = arith.constant 128 : index
    %1622 = vector.load %arg13[%c20_301, %c128_302] : memref<64x256xbf16, #tpu.memory_space<vmem>>, vector<4x128xbf16>
    %1623 = arith.extf %1622 : vector<4x128xbf16> to vector<4x128xf32>
    %1624 = vector.extract_strided_slice %1617 {offsets = [4, 128], sizes = [4, 128], strides = [1, 1]} : vector<8x256xf32> to vector<4x128xf32>
    %1625 = arith.addf %1623, %1624 : vector<4x128xf32>
    %1626 = vector.extract_strided_slice %1621 {offsets = [0, 0], sizes = [4, 32], strides = [1, 1]} : vector<4x128xf32> to vector<4x32xf32>
    %1627 = arith.negf %1626 : vector<4x32xf32>
    %1628 = math.exp %1627 : vector<4x32xf32>
    %cst_303 = arith.constant 1.000000e+00 : f32
    %1629 = vector.broadcast %cst_303 : f32 to vector<4x32xf32>
    %1630 = arith.addf %1629, %1628 : vector<4x32xf32>
    %1631 = arith.divf %1629, %1630 : vector<4x32xf32>
    %1632 = vector.extract_strided_slice %1621 {offsets = [0, 32], sizes = [4, 32], strides = [1, 1]} : vector<4x128xf32> to vector<4x32xf32>
    %1633 = arith.negf %1632 : vector<4x32xf32>
    %1634 = math.exp %1633 : vector<4x32xf32>
    %cst_304 = arith.constant 1.000000e+00 : f32
    %1635 = vector.broadcast %cst_304 : f32 to vector<4x32xf32>
    %1636 = arith.addf %1635, %1634 : vector<4x32xf32>
    %1637 = arith.divf %1635, %1636 : vector<4x32xf32>
    %1638 = vector.extract_strided_slice %1621 {offsets = [0, 64], sizes = [4, 32], strides = [1, 1]} : vector<4x128xf32> to vector<4x32xf32>
    %1639 = math.tanh %1638 : vector<4x32xf32>
    %1640 = vector.extract_strided_slice %1621 {offsets = [0, 96], sizes = [4, 32], strides = [1, 1]} : vector<4x128xf32> to vector<4x32xf32>
    %1641 = arith.negf %1640 : vector<4x32xf32>
    %1642 = math.exp %1641 : vector<4x32xf32>
    %cst_305 = arith.constant 1.000000e+00 : f32
    %1643 = vector.broadcast %cst_305 : f32 to vector<4x32xf32>
    %1644 = arith.addf %1643, %1642 : vector<4x32xf32>
    %1645 = arith.divf %1643, %1644 : vector<4x32xf32>
    %1646 = arith.mulf %1637, %1587 : vector<4x32xf32>
    %1647 = arith.mulf %1631, %1639 : vector<4x32xf32>
    %1648 = arith.addf %1646, %1647 : vector<4x32xf32>
    %1649 = math.tanh %1648 : vector<4x32xf32>
    %1650 = arith.mulf %1645, %1649 : vector<4x32xf32>
    %1651 = vector.extract_strided_slice %1625 {offsets = [0, 0], sizes = [4, 32], strides = [1, 1]} : vector<4x128xf32> to vector<4x32xf32>
    %1652 = arith.negf %1651 : vector<4x32xf32>
    %1653 = math.exp %1652 : vector<4x32xf32>
    %cst_306 = arith.constant 1.000000e+00 : f32
    %1654 = vector.broadcast %cst_306 : f32 to vector<4x32xf32>
    %1655 = arith.addf %1654, %1653 : vector<4x32xf32>
    %1656 = arith.divf %1654, %1655 : vector<4x32xf32>
    %1657 = vector.extract_strided_slice %1625 {offsets = [0, 32], sizes = [4, 32], strides = [1, 1]} : vector<4x128xf32> to vector<4x32xf32>
    %1658 = arith.negf %1657 : vector<4x32xf32>
    %1659 = math.exp %1658 : vector<4x32xf32>
    %cst_307 = arith.constant 1.000000e+00 : f32
    %1660 = vector.broadcast %cst_307 : f32 to vector<4x32xf32>
    %1661 = arith.addf %1660, %1659 : vector<4x32xf32>
    %1662 = arith.divf %1660, %1661 : vector<4x32xf32>
    %1663 = vector.extract_strided_slice %1625 {offsets = [0, 64], sizes = [4, 32], strides = [1, 1]} : vector<4x128xf32> to vector<4x32xf32>
    %1664 = math.tanh %1663 : vector<4x32xf32>
    %1665 = vector.extract_strided_slice %1625 {offsets = [0, 96], sizes = [4, 32], strides = [1, 1]} : vector<4x128xf32> to vector<4x32xf32>
    %1666 = arith.negf %1665 : vector<4x32xf32>
    %1667 = math.exp %1666 : vector<4x32xf32>
    %cst_308 = arith.constant 1.000000e+00 : f32
    %1668 = vector.broadcast %cst_308 : f32 to vector<4x32xf32>
    %1669 = arith.addf %1668, %1667 : vector<4x32xf32>
    %1670 = arith.divf %1668, %1669 : vector<4x32xf32>
    %1671 = arith.mulf %1662, %1612 : vector<4x32xf32>
    %1672 = arith.mulf %1656, %1664 : vector<4x32xf32>
    %1673 = arith.addf %1671, %1672 : vector<4x32xf32>
    %1674 = math.tanh %1673 : vector<4x32xf32>
    %1675 = arith.mulf %1670, %1674 : vector<4x32xf32>
    %1676 = tpu.concatenate %1650, %1675 in 0 : vector<4x32xf32>, vector<4x32xf32> -> vector<8x32xf32>
    %1677 = arith.truncf %1676 : vector<8x32xf32> to vector<8x32xbf16>
    %cst_309 = arith.constant dense<0.000000e+00> : vector<8x256xf32>
    %1678 = tpu.matmul %1677, %1002, %cst_309 {dimension_numbers = #tpu.dot_dimension_numbers<[1], [0], [0], [1], [0, 0, 1, 1], [], []>} : vector<8x32xbf16>, vector<32x256xbf16>, vector<8x256xf32> -> vector<8x256xf32>
    %c44_310 = arith.constant 44 : index
    %c0_311 = arith.constant 0 : index
    %1679 = vector.load %arg13[%c44_310, %c0_311] : memref<64x256xbf16, #tpu.memory_space<vmem>>, vector<4x128xbf16>
    %1680 = arith.extf %1679 : vector<4x128xbf16> to vector<4x128xf32>
    %1681 = vector.extract_strided_slice %1678 {offsets = [0, 0], sizes = [4, 128], strides = [1, 1]} : vector<8x256xf32> to vector<4x128xf32>
    %1682 = arith.addf %1680, %1681 : vector<4x128xf32>
    %c16_312 = arith.constant 16 : index
    %c128_313 = arith.constant 128 : index
    %1683 = vector.load %arg13[%c16_312, %c128_313] : memref<64x256xbf16, #tpu.memory_space<vmem>>, vector<4x128xbf16>
    %1684 = arith.extf %1683 : vector<4x128xbf16> to vector<4x128xf32>
    %1685 = vector.extract_strided_slice %1678 {offsets = [4, 128], sizes = [4, 128], strides = [1, 1]} : vector<8x256xf32> to vector<4x128xf32>
    %1686 = arith.addf %1684, %1685 : vector<4x128xf32>
    %1687 = vector.extract_strided_slice %1682 {offsets = [0, 0], sizes = [4, 32], strides = [1, 1]} : vector<4x128xf32> to vector<4x32xf32>
    %1688 = arith.negf %1687 : vector<4x32xf32>
    %1689 = math.exp %1688 : vector<4x32xf32>
    %cst_314 = arith.constant 1.000000e+00 : f32
    %1690 = vector.broadcast %cst_314 : f32 to vector<4x32xf32>
    %1691 = arith.addf %1690, %1689 : vector<4x32xf32>
    %1692 = arith.divf %1690, %1691 : vector<4x32xf32>
    %1693 = vector.extract_strided_slice %1682 {offsets = [0, 32], sizes = [4, 32], strides = [1, 1]} : vector<4x128xf32> to vector<4x32xf32>
    %1694 = arith.negf %1693 : vector<4x32xf32>
    %1695 = math.exp %1694 : vector<4x32xf32>
    %cst_315 = arith.constant 1.000000e+00 : f32
    %1696 = vector.broadcast %cst_315 : f32 to vector<4x32xf32>
    %1697 = arith.addf %1696, %1695 : vector<4x32xf32>
    %1698 = arith.divf %1696, %1697 : vector<4x32xf32>
    %1699 = vector.extract_strided_slice %1682 {offsets = [0, 64], sizes = [4, 32], strides = [1, 1]} : vector<4x128xf32> to vector<4x32xf32>
    %1700 = math.tanh %1699 : vector<4x32xf32>
    %1701 = vector.extract_strided_slice %1682 {offsets = [0, 96], sizes = [4, 32], strides = [1, 1]} : vector<4x128xf32> to vector<4x32xf32>
    %1702 = arith.negf %1701 : vector<4x32xf32>
    %1703 = math.exp %1702 : vector<4x32xf32>
    %cst_316 = arith.constant 1.000000e+00 : f32
    %1704 = vector.broadcast %cst_316 : f32 to vector<4x32xf32>
    %1705 = arith.addf %1704, %1703 : vector<4x32xf32>
    %1706 = arith.divf %1704, %1705 : vector<4x32xf32>
    %1707 = arith.mulf %1698, %1648 : vector<4x32xf32>
    %1708 = arith.mulf %1692, %1700 : vector<4x32xf32>
    %1709 = arith.addf %1707, %1708 : vector<4x32xf32>
    %1710 = math.tanh %1709 : vector<4x32xf32>
    %1711 = arith.mulf %1706, %1710 : vector<4x32xf32>
    %1712 = vector.extract_strided_slice %1686 {offsets = [0, 0], sizes = [4, 32], strides = [1, 1]} : vector<4x128xf32> to vector<4x32xf32>
    %1713 = arith.negf %1712 : vector<4x32xf32>
    %1714 = math.exp %1713 : vector<4x32xf32>
    %cst_317 = arith.constant 1.000000e+00 : f32
    %1715 = vector.broadcast %cst_317 : f32 to vector<4x32xf32>
    %1716 = arith.addf %1715, %1714 : vector<4x32xf32>
    %1717 = arith.divf %1715, %1716 : vector<4x32xf32>
    %1718 = vector.extract_strided_slice %1686 {offsets = [0, 32], sizes = [4, 32], strides = [1, 1]} : vector<4x128xf32> to vector<4x32xf32>
    %1719 = arith.negf %1718 : vector<4x32xf32>
    %1720 = math.exp %1719 : vector<4x32xf32>
    %cst_318 = arith.constant 1.000000e+00 : f32
    %1721 = vector.broadcast %cst_318 : f32 to vector<4x32xf32>
    %1722 = arith.addf %1721, %1720 : vector<4x32xf32>
    %1723 = arith.divf %1721, %1722 : vector<4x32xf32>
    %1724 = vector.extract_strided_slice %1686 {offsets = [0, 64], sizes = [4, 32], strides = [1, 1]} : vector<4x128xf32> to vector<4x32xf32>
    %1725 = math.tanh %1724 : vector<4x32xf32>
    %1726 = vector.extract_strided_slice %1686 {offsets = [0, 96], sizes = [4, 32], strides = [1, 1]} : vector<4x128xf32> to vector<4x32xf32>
    %1727 = arith.negf %1726 : vector<4x32xf32>
    %1728 = math.exp %1727 : vector<4x32xf32>
    %cst_319 = arith.constant 1.000000e+00 : f32
    %1729 = vector.broadcast %cst_319 : f32 to vector<4x32xf32>
    %1730 = arith.addf %1729, %1728 : vector<4x32xf32>
    %1731 = arith.divf %1729, %1730 : vector<4x32xf32>
    %1732 = arith.mulf %1723, %1673 : vector<4x32xf32>
    %1733 = arith.mulf %1717, %1725 : vector<4x32xf32>
    %1734 = arith.addf %1732, %1733 : vector<4x32xf32>
    %1735 = math.tanh %1734 : vector<4x32xf32>
    %1736 = arith.mulf %1731, %1735 : vector<4x32xf32>
    %1737 = tpu.concatenate %1711, %1736 in 0 : vector<4x32xf32>, vector<4x32xf32> -> vector<8x32xf32>
    %1738 = arith.truncf %1737 : vector<8x32xf32> to vector<8x32xbf16>
    %cst_320 = arith.constant dense<0.000000e+00> : vector<8x256xf32>
    %1739 = tpu.matmul %1738, %1002, %cst_320 {dimension_numbers = #tpu.dot_dimension_numbers<[1], [0], [0], [1], [0, 0, 1, 1], [], []>} : vector<8x32xbf16>, vector<32x256xbf16>, vector<8x256xf32> -> vector<8x256xf32>
    %c48_321 = arith.constant 48 : index
    %c0_322 = arith.constant 0 : index
    %1740 = vector.load %arg13[%c48_321, %c0_322] : memref<64x256xbf16, #tpu.memory_space<vmem>>, vector<4x128xbf16>
    %1741 = arith.extf %1740 : vector<4x128xbf16> to vector<4x128xf32>
    %1742 = vector.extract_strided_slice %1739 {offsets = [0, 0], sizes = [4, 128], strides = [1, 1]} : vector<8x256xf32> to vector<4x128xf32>
    %1743 = arith.addf %1741, %1742 : vector<4x128xf32>
    %c12_323 = arith.constant 12 : index
    %c128_324 = arith.constant 128 : index
    %1744 = vector.load %arg13[%c12_323, %c128_324] : memref<64x256xbf16, #tpu.memory_space<vmem>>, vector<4x128xbf16>
    %1745 = arith.extf %1744 : vector<4x128xbf16> to vector<4x128xf32>
    %1746 = vector.extract_strided_slice %1739 {offsets = [4, 128], sizes = [4, 128], strides = [1, 1]} : vector<8x256xf32> to vector<4x128xf32>
    %1747 = arith.addf %1745, %1746 : vector<4x128xf32>
    %1748 = vector.extract_strided_slice %1743 {offsets = [0, 0], sizes = [4, 32], strides = [1, 1]} : vector<4x128xf32> to vector<4x32xf32>
    %1749 = arith.negf %1748 : vector<4x32xf32>
    %1750 = math.exp %1749 : vector<4x32xf32>
    %cst_325 = arith.constant 1.000000e+00 : f32
    %1751 = vector.broadcast %cst_325 : f32 to vector<4x32xf32>
    %1752 = arith.addf %1751, %1750 : vector<4x32xf32>
    %1753 = arith.divf %1751, %1752 : vector<4x32xf32>
    %1754 = vector.extract_strided_slice %1743 {offsets = [0, 32], sizes = [4, 32], strides = [1, 1]} : vector<4x128xf32> to vector<4x32xf32>
    %1755 = arith.negf %1754 : vector<4x32xf32>
    %1756 = math.exp %1755 : vector<4x32xf32>
    %cst_326 = arith.constant 1.000000e+00 : f32
    %1757 = vector.broadcast %cst_326 : f32 to vector<4x32xf32>
    %1758 = arith.addf %1757, %1756 : vector<4x32xf32>
    %1759 = arith.divf %1757, %1758 : vector<4x32xf32>
    %1760 = vector.extract_strided_slice %1743 {offsets = [0, 64], sizes = [4, 32], strides = [1, 1]} : vector<4x128xf32> to vector<4x32xf32>
    %1761 = math.tanh %1760 : vector<4x32xf32>
    %1762 = vector.extract_strided_slice %1743 {offsets = [0, 96], sizes = [4, 32], strides = [1, 1]} : vector<4x128xf32> to vector<4x32xf32>
    %1763 = arith.negf %1762 : vector<4x32xf32>
    %1764 = math.exp %1763 : vector<4x32xf32>
    %cst_327 = arith.constant 1.000000e+00 : f32
    %1765 = vector.broadcast %cst_327 : f32 to vector<4x32xf32>
    %1766 = arith.addf %1765, %1764 : vector<4x32xf32>
    %1767 = arith.divf %1765, %1766 : vector<4x32xf32>
    %1768 = arith.mulf %1759, %1709 : vector<4x32xf32>
    %1769 = arith.mulf %1753, %1761 : vector<4x32xf32>
    %1770 = arith.addf %1768, %1769 : vector<4x32xf32>
    %1771 = math.tanh %1770 : vector<4x32xf32>
    %1772 = arith.mulf %1767, %1771 : vector<4x32xf32>
    %1773 = vector.extract_strided_slice %1747 {offsets = [0, 0], sizes = [4, 32], strides = [1, 1]} : vector<4x128xf32> to vector<4x32xf32>
    %1774 = arith.negf %1773 : vector<4x32xf32>
    %1775 = math.exp %1774 : vector<4x32xf32>
    %cst_328 = arith.constant 1.000000e+00 : f32
    %1776 = vector.broadcast %cst_328 : f32 to vector<4x32xf32>
    %1777 = arith.addf %1776, %1775 : vector<4x32xf32>
    %1778 = arith.divf %1776, %1777 : vector<4x32xf32>
    %1779 = vector.extract_strided_slice %1747 {offsets = [0, 32], sizes = [4, 32], strides = [1, 1]} : vector<4x128xf32> to vector<4x32xf32>
    %1780 = arith.negf %1779 : vector<4x32xf32>
    %1781 = math.exp %1780 : vector<4x32xf32>
    %cst_329 = arith.constant 1.000000e+00 : f32
    %1782 = vector.broadcast %cst_329 : f32 to vector<4x32xf32>
    %1783 = arith.addf %1782, %1781 : vector<4x32xf32>
    %1784 = arith.divf %1782, %1783 : vector<4x32xf32>
    %1785 = vector.extract_strided_slice %1747 {offsets = [0, 64], sizes = [4, 32], strides = [1, 1]} : vector<4x128xf32> to vector<4x32xf32>
    %1786 = math.tanh %1785 : vector<4x32xf32>
    %1787 = vector.extract_strided_slice %1747 {offsets = [0, 96], sizes = [4, 32], strides = [1, 1]} : vector<4x128xf32> to vector<4x32xf32>
    %1788 = arith.negf %1787 : vector<4x32xf32>
    %1789 = math.exp %1788 : vector<4x32xf32>
    %cst_330 = arith.constant 1.000000e+00 : f32
    %1790 = vector.broadcast %cst_330 : f32 to vector<4x32xf32>
    %1791 = arith.addf %1790, %1789 : vector<4x32xf32>
    %1792 = arith.divf %1790, %1791 : vector<4x32xf32>
    %1793 = arith.mulf %1784, %1734 : vector<4x32xf32>
    %1794 = arith.mulf %1778, %1786 : vector<4x32xf32>
    %1795 = arith.addf %1793, %1794 : vector<4x32xf32>
    %1796 = math.tanh %1795 : vector<4x32xf32>
    %1797 = arith.mulf %1792, %1796 : vector<4x32xf32>
    %1798 = tpu.concatenate %1772, %1797 in 0 : vector<4x32xf32>, vector<4x32xf32> -> vector<8x32xf32>
    %1799 = arith.truncf %1798 : vector<8x32xf32> to vector<8x32xbf16>
    %cst_331 = arith.constant dense<0.000000e+00> : vector<8x256xf32>
    %1800 = tpu.matmul %1799, %1002, %cst_331 {dimension_numbers = #tpu.dot_dimension_numbers<[1], [0], [0], [1], [0, 0, 1, 1], [], []>} : vector<8x32xbf16>, vector<32x256xbf16>, vector<8x256xf32> -> vector<8x256xf32>
    %c52_332 = arith.constant 52 : index
    %c0_333 = arith.constant 0 : index
    %1801 = vector.load %arg13[%c52_332, %c0_333] : memref<64x256xbf16, #tpu.memory_space<vmem>>, vector<4x128xbf16>
    %1802 = arith.extf %1801 : vector<4x128xbf16> to vector<4x128xf32>
    %1803 = vector.extract_strided_slice %1800 {offsets = [0, 0], sizes = [4, 128], strides = [1, 1]} : vector<8x256xf32> to vector<4x128xf32>
    %1804 = arith.addf %1802, %1803 : vector<4x128xf32>
    %c8_334 = arith.constant 8 : index
    %c128_335 = arith.constant 128 : index
    %1805 = vector.load %arg13[%c8_334, %c128_335] : memref<64x256xbf16, #tpu.memory_space<vmem>>, vector<4x128xbf16>
    %1806 = arith.extf %1805 : vector<4x128xbf16> to vector<4x128xf32>
    %1807 = vector.extract_strided_slice %1800 {offsets = [4, 128], sizes = [4, 128], strides = [1, 1]} : vector<8x256xf32> to vector<4x128xf32>
    %1808 = arith.addf %1806, %1807 : vector<4x128xf32>
    %1809 = vector.extract_strided_slice %1804 {offsets = [0, 0], sizes = [4, 32], strides = [1, 1]} : vector<4x128xf32> to vector<4x32xf32>
    %1810 = arith.negf %1809 : vector<4x32xf32>
    %1811 = math.exp %1810 : vector<4x32xf32>
    %cst_336 = arith.constant 1.000000e+00 : f32
    %1812 = vector.broadcast %cst_336 : f32 to vector<4x32xf32>
    %1813 = arith.addf %1812, %1811 : vector<4x32xf32>
    %1814 = arith.divf %1812, %1813 : vector<4x32xf32>
    %1815 = vector.extract_strided_slice %1804 {offsets = [0, 32], sizes = [4, 32], strides = [1, 1]} : vector<4x128xf32> to vector<4x32xf32>
    %1816 = arith.negf %1815 : vector<4x32xf32>
    %1817 = math.exp %1816 : vector<4x32xf32>
    %cst_337 = arith.constant 1.000000e+00 : f32
    %1818 = vector.broadcast %cst_337 : f32 to vector<4x32xf32>
    %1819 = arith.addf %1818, %1817 : vector<4x32xf32>
    %1820 = arith.divf %1818, %1819 : vector<4x32xf32>
    %1821 = vector.extract_strided_slice %1804 {offsets = [0, 64], sizes = [4, 32], strides = [1, 1]} : vector<4x128xf32> to vector<4x32xf32>
    %1822 = math.tanh %1821 : vector<4x32xf32>
    %1823 = vector.extract_strided_slice %1804 {offsets = [0, 96], sizes = [4, 32], strides = [1, 1]} : vector<4x128xf32> to vector<4x32xf32>
    %1824 = arith.negf %1823 : vector<4x32xf32>
    %1825 = math.exp %1824 : vector<4x32xf32>
    %cst_338 = arith.constant 1.000000e+00 : f32
    %1826 = vector.broadcast %cst_338 : f32 to vector<4x32xf32>
    %1827 = arith.addf %1826, %1825 : vector<4x32xf32>
    %1828 = arith.divf %1826, %1827 : vector<4x32xf32>
    %1829 = arith.mulf %1820, %1770 : vector<4x32xf32>
    %1830 = arith.mulf %1814, %1822 : vector<4x32xf32>
    %1831 = arith.addf %1829, %1830 : vector<4x32xf32>
    %1832 = math.tanh %1831 : vector<4x32xf32>
    %1833 = arith.mulf %1828, %1832 : vector<4x32xf32>
    %1834 = vector.extract_strided_slice %1808 {offsets = [0, 0], sizes = [4, 32], strides = [1, 1]} : vector<4x128xf32> to vector<4x32xf32>
    %1835 = arith.negf %1834 : vector<4x32xf32>
    %1836 = math.exp %1835 : vector<4x32xf32>
    %cst_339 = arith.constant 1.000000e+00 : f32
    %1837 = vector.broadcast %cst_339 : f32 to vector<4x32xf32>
    %1838 = arith.addf %1837, %1836 : vector<4x32xf32>
    %1839 = arith.divf %1837, %1838 : vector<4x32xf32>
    %1840 = vector.extract_strided_slice %1808 {offsets = [0, 32], sizes = [4, 32], strides = [1, 1]} : vector<4x128xf32> to vector<4x32xf32>
    %1841 = arith.negf %1840 : vector<4x32xf32>
    %1842 = math.exp %1841 : vector<4x32xf32>
    %cst_340 = arith.constant 1.000000e+00 : f32
    %1843 = vector.broadcast %cst_340 : f32 to vector<4x32xf32>
    %1844 = arith.addf %1843, %1842 : vector<4x32xf32>
    %1845 = arith.divf %1843, %1844 : vector<4x32xf32>
    %1846 = vector.extract_strided_slice %1808 {offsets = [0, 64], sizes = [4, 32], strides = [1, 1]} : vector<4x128xf32> to vector<4x32xf32>
    %1847 = math.tanh %1846 : vector<4x32xf32>
    %1848 = vector.extract_strided_slice %1808 {offsets = [0, 96], sizes = [4, 32], strides = [1, 1]} : vector<4x128xf32> to vector<4x32xf32>
    %1849 = arith.negf %1848 : vector<4x32xf32>
    %1850 = math.exp %1849 : vector<4x32xf32>
    %cst_341 = arith.constant 1.000000e+00 : f32
    %1851 = vector.broadcast %cst_341 : f32 to vector<4x32xf32>
    %1852 = arith.addf %1851, %1850 : vector<4x32xf32>
    %1853 = arith.divf %1851, %1852 : vector<4x32xf32>
    %1854 = arith.mulf %1845, %1795 : vector<4x32xf32>
    %1855 = arith.mulf %1839, %1847 : vector<4x32xf32>
    %1856 = arith.addf %1854, %1855 : vector<4x32xf32>
    %1857 = math.tanh %1856 : vector<4x32xf32>
    %1858 = arith.mulf %1853, %1857 : vector<4x32xf32>
    %1859 = tpu.concatenate %1833, %1858 in 0 : vector<4x32xf32>, vector<4x32xf32> -> vector<8x32xf32>
    %1860 = arith.truncf %1859 : vector<8x32xf32> to vector<8x32xbf16>
    %cst_342 = arith.constant dense<0.000000e+00> : vector<8x256xf32>
    %1861 = tpu.matmul %1860, %1002, %cst_342 {dimension_numbers = #tpu.dot_dimension_numbers<[1], [0], [0], [1], [0, 0, 1, 1], [], []>} : vector<8x32xbf16>, vector<32x256xbf16>, vector<8x256xf32> -> vector<8x256xf32>
    %c56_343 = arith.constant 56 : index
    %c0_344 = arith.constant 0 : index
    %1862 = vector.load %arg13[%c56_343, %c0_344] : memref<64x256xbf16, #tpu.memory_space<vmem>>, vector<4x128xbf16>
    %1863 = arith.extf %1862 : vector<4x128xbf16> to vector<4x128xf32>
    %1864 = vector.extract_strided_slice %1861 {offsets = [0, 0], sizes = [4, 128], strides = [1, 1]} : vector<8x256xf32> to vector<4x128xf32>
    %1865 = arith.addf %1863, %1864 : vector<4x128xf32>
    %c4_345 = arith.constant 4 : index
    %c128_346 = arith.constant 128 : index
    %1866 = vector.load %arg13[%c4_345, %c128_346] : memref<64x256xbf16, #tpu.memory_space<vmem>>, vector<4x128xbf16>
    %1867 = arith.extf %1866 : vector<4x128xbf16> to vector<4x128xf32>
    %1868 = vector.extract_strided_slice %1861 {offsets = [4, 128], sizes = [4, 128], strides = [1, 1]} : vector<8x256xf32> to vector<4x128xf32>
    %1869 = arith.addf %1867, %1868 : vector<4x128xf32>
    %1870 = vector.extract_strided_slice %1865 {offsets = [0, 0], sizes = [4, 32], strides = [1, 1]} : vector<4x128xf32> to vector<4x32xf32>
    %1871 = arith.negf %1870 : vector<4x32xf32>
    %1872 = math.exp %1871 : vector<4x32xf32>
    %cst_347 = arith.constant 1.000000e+00 : f32
    %1873 = vector.broadcast %cst_347 : f32 to vector<4x32xf32>
    %1874 = arith.addf %1873, %1872 : vector<4x32xf32>
    %1875 = arith.divf %1873, %1874 : vector<4x32xf32>
    %1876 = vector.extract_strided_slice %1865 {offsets = [0, 32], sizes = [4, 32], strides = [1, 1]} : vector<4x128xf32> to vector<4x32xf32>
    %1877 = arith.negf %1876 : vector<4x32xf32>
    %1878 = math.exp %1877 : vector<4x32xf32>
    %cst_348 = arith.constant 1.000000e+00 : f32
    %1879 = vector.broadcast %cst_348 : f32 to vector<4x32xf32>
    %1880 = arith.addf %1879, %1878 : vector<4x32xf32>
    %1881 = arith.divf %1879, %1880 : vector<4x32xf32>
    %1882 = vector.extract_strided_slice %1865 {offsets = [0, 64], sizes = [4, 32], strides = [1, 1]} : vector<4x128xf32> to vector<4x32xf32>
    %1883 = math.tanh %1882 : vector<4x32xf32>
    %1884 = vector.extract_strided_slice %1865 {offsets = [0, 96], sizes = [4, 32], strides = [1, 1]} : vector<4x128xf32> to vector<4x32xf32>
    %1885 = arith.negf %1884 : vector<4x32xf32>
    %1886 = math.exp %1885 : vector<4x32xf32>
    %cst_349 = arith.constant 1.000000e+00 : f32
    %1887 = vector.broadcast %cst_349 : f32 to vector<4x32xf32>
    %1888 = arith.addf %1887, %1886 : vector<4x32xf32>
    %1889 = arith.divf %1887, %1888 : vector<4x32xf32>
    %1890 = arith.mulf %1881, %1831 : vector<4x32xf32>
    %1891 = arith.mulf %1875, %1883 : vector<4x32xf32>
    %1892 = arith.addf %1890, %1891 : vector<4x32xf32>
    %1893 = math.tanh %1892 : vector<4x32xf32>
    %1894 = arith.mulf %1889, %1893 : vector<4x32xf32>
    %1895 = vector.extract_strided_slice %1869 {offsets = [0, 0], sizes = [4, 32], strides = [1, 1]} : vector<4x128xf32> to vector<4x32xf32>
    %1896 = arith.negf %1895 : vector<4x32xf32>
    %1897 = math.exp %1896 : vector<4x32xf32>
    %cst_350 = arith.constant 1.000000e+00 : f32
    %1898 = vector.broadcast %cst_350 : f32 to vector<4x32xf32>
    %1899 = arith.addf %1898, %1897 : vector<4x32xf32>
    %1900 = arith.divf %1898, %1899 : vector<4x32xf32>
    %1901 = vector.extract_strided_slice %1869 {offsets = [0, 32], sizes = [4, 32], strides = [1, 1]} : vector<4x128xf32> to vector<4x32xf32>
    %1902 = arith.negf %1901 : vector<4x32xf32>
    %1903 = math.exp %1902 : vector<4x32xf32>
    %cst_351 = arith.constant 1.000000e+00 : f32
    %1904 = vector.broadcast %cst_351 : f32 to vector<4x32xf32>
    %1905 = arith.addf %1904, %1903 : vector<4x32xf32>
    %1906 = arith.divf %1904, %1905 : vector<4x32xf32>
    %1907 = vector.extract_strided_slice %1869 {offsets = [0, 64], sizes = [4, 32], strides = [1, 1]} : vector<4x128xf32> to vector<4x32xf32>
    %1908 = math.tanh %1907 : vector<4x32xf32>
    %1909 = vector.extract_strided_slice %1869 {offsets = [0, 96], sizes = [4, 32], strides = [1, 1]} : vector<4x128xf32> to vector<4x32xf32>
    %1910 = arith.negf %1909 : vector<4x32xf32>
    %1911 = math.exp %1910 : vector<4x32xf32>
    %cst_352 = arith.constant 1.000000e+00 : f32
    %1912 = vector.broadcast %cst_352 : f32 to vector<4x32xf32>
    %1913 = arith.addf %1912, %1911 : vector<4x32xf32>
    %1914 = arith.divf %1912, %1913 : vector<4x32xf32>
    %1915 = arith.mulf %1906, %1856 : vector<4x32xf32>
    %1916 = arith.mulf %1900, %1908 : vector<4x32xf32>
    %1917 = arith.addf %1915, %1916 : vector<4x32xf32>
    %1918 = math.tanh %1917 : vector<4x32xf32>
    %1919 = arith.mulf %1914, %1918 : vector<4x32xf32>
    %1920 = tpu.concatenate %1894, %1919 in 0 : vector<4x32xf32>, vector<4x32xf32> -> vector<8x32xf32>
    %1921 = arith.truncf %1920 : vector<8x32xf32> to vector<8x32xbf16>
    %cst_353 = arith.constant dense<0.000000e+00> : vector<8x256xf32>
    %1922 = tpu.matmul %1921, %1002, %cst_353 {dimension_numbers = #tpu.dot_dimension_numbers<[1], [0], [0], [1], [0, 0, 1, 1], [], []>} : vector<8x32xbf16>, vector<32x256xbf16>, vector<8x256xf32> -> vector<8x256xf32>
    %c60_354 = arith.constant 60 : index
    %c0_355 = arith.constant 0 : index
    %1923 = vector.load %arg13[%c60_354, %c0_355] : memref<64x256xbf16, #tpu.memory_space<vmem>>, vector<4x128xbf16>
    %1924 = arith.extf %1923 : vector<4x128xbf16> to vector<4x128xf32>
    %1925 = vector.extract_strided_slice %1922 {offsets = [0, 0], sizes = [4, 128], strides = [1, 1]} : vector<8x256xf32> to vector<4x128xf32>
    %1926 = arith.addf %1924, %1925 : vector<4x128xf32>
    %c0_356 = arith.constant 0 : index
    %c128_357 = arith.constant 128 : index
    %1927 = vector.load %arg13[%c0_356, %c128_357] : memref<64x256xbf16, #tpu.memory_space<vmem>>, vector<4x128xbf16>
    %1928 = arith.extf %1927 : vector<4x128xbf16> to vector<4x128xf32>
    %1929 = vector.extract_strided_slice %1922 {offsets = [4, 128], sizes = [4, 128], strides = [1, 1]} : vector<8x256xf32> to vector<4x128xf32>
    %1930 = arith.addf %1928, %1929 : vector<4x128xf32>
    %1931 = vector.extract_strided_slice %1926 {offsets = [0, 0], sizes = [4, 32], strides = [1, 1]} : vector<4x128xf32> to vector<4x32xf32>
    %1932 = arith.negf %1931 : vector<4x32xf32>
    %1933 = math.exp %1932 : vector<4x32xf32>
    %cst_358 = arith.constant 1.000000e+00 : f32
    %1934 = vector.broadcast %cst_358 : f32 to vector<4x32xf32>
    %1935 = arith.addf %1934, %1933 : vector<4x32xf32>
    %1936 = arith.divf %1934, %1935 : vector<4x32xf32>
    %1937 = vector.extract_strided_slice %1926 {offsets = [0, 32], sizes = [4, 32], strides = [1, 1]} : vector<4x128xf32> to vector<4x32xf32>
    %1938 = arith.negf %1937 : vector<4x32xf32>
    %1939 = math.exp %1938 : vector<4x32xf32>
    %cst_359 = arith.constant 1.000000e+00 : f32
    %1940 = vector.broadcast %cst_359 : f32 to vector<4x32xf32>
    %1941 = arith.addf %1940, %1939 : vector<4x32xf32>
    %1942 = arith.divf %1940, %1941 : vector<4x32xf32>
    %1943 = vector.extract_strided_slice %1926 {offsets = [0, 64], sizes = [4, 32], strides = [1, 1]} : vector<4x128xf32> to vector<4x32xf32>
    %1944 = math.tanh %1943 : vector<4x32xf32>
    %1945 = vector.extract_strided_slice %1926 {offsets = [0, 96], sizes = [4, 32], strides = [1, 1]} : vector<4x128xf32> to vector<4x32xf32>
    %1946 = arith.negf %1945 : vector<4x32xf32>
    %1947 = math.exp %1946 : vector<4x32xf32>
    %cst_360 = arith.constant 1.000000e+00 : f32
    %1948 = vector.broadcast %cst_360 : f32 to vector<4x32xf32>
    %1949 = arith.addf %1948, %1947 : vector<4x32xf32>
    %1950 = arith.divf %1948, %1949 : vector<4x32xf32>
    %1951 = arith.mulf %1942, %1892 : vector<4x32xf32>
    %1952 = arith.mulf %1936, %1944 : vector<4x32xf32>
    %1953 = arith.addf %1951, %1952 : vector<4x32xf32>
    %1954 = math.tanh %1953 : vector<4x32xf32>
    %1955 = arith.mulf %1950, %1954 : vector<4x32xf32>
    %1956 = vector.extract_strided_slice %1930 {offsets = [0, 0], sizes = [4, 32], strides = [1, 1]} : vector<4x128xf32> to vector<4x32xf32>
    %1957 = arith.negf %1956 : vector<4x32xf32>
    %1958 = math.exp %1957 : vector<4x32xf32>
    %cst_361 = arith.constant 1.000000e+00 : f32
    %1959 = vector.broadcast %cst_361 : f32 to vector<4x32xf32>
    %1960 = arith.addf %1959, %1958 : vector<4x32xf32>
    %1961 = arith.divf %1959, %1960 : vector<4x32xf32>
    %1962 = vector.extract_strided_slice %1930 {offsets = [0, 32], sizes = [4, 32], strides = [1, 1]} : vector<4x128xf32> to vector<4x32xf32>
    %1963 = arith.negf %1962 : vector<4x32xf32>
    %1964 = math.exp %1963 : vector<4x32xf32>
    %cst_362 = arith.constant 1.000000e+00 : f32
    %1965 = vector.broadcast %cst_362 : f32 to vector<4x32xf32>
    %1966 = arith.addf %1965, %1964 : vector<4x32xf32>
    %1967 = arith.divf %1965, %1966 : vector<4x32xf32>
    %1968 = vector.extract_strided_slice %1930 {offsets = [0, 64], sizes = [4, 32], strides = [1, 1]} : vector<4x128xf32> to vector<4x32xf32>
    %1969 = math.tanh %1968 : vector<4x32xf32>
    %1970 = vector.extract_strided_slice %1930 {offsets = [0, 96], sizes = [4, 32], strides = [1, 1]} : vector<4x128xf32> to vector<4x32xf32>
    %1971 = arith.negf %1970 : vector<4x32xf32>
    %1972 = math.exp %1971 : vector<4x32xf32>
    %cst_363 = arith.constant 1.000000e+00 : f32
    %1973 = vector.broadcast %cst_363 : f32 to vector<4x32xf32>
    %1974 = arith.addf %1973, %1972 : vector<4x32xf32>
    %1975 = arith.divf %1973, %1974 : vector<4x32xf32>
    %1976 = arith.mulf %1967, %1917 : vector<4x32xf32>
    %1977 = arith.mulf %1961, %1969 : vector<4x32xf32>
    %1978 = arith.addf %1976, %1977 : vector<4x32xf32>
    %1979 = math.tanh %1978 : vector<4x32xf32>
    %1980 = arith.mulf %1975, %1979 : vector<4x32xf32>
    %1981 = tpu.concatenate %1040, %1101, %1162, %1223, %1284, %1345, %1406, %1467, %1528, %1589, %1650, %1711, %1772, %1833, %1894, %1955 in 0 : vector<4x32xf32>, vector<4x32xf32>, vector<4x32xf32>, vector<4x32xf32>, vector<4x32xf32>, vector<4x32xf32>, vector<4x32xf32>, vector<4x32xf32>, vector<4x32xf32>, vector<4x32xf32>, vector<4x32xf32>, vector<4x32xf32>, vector<4x32xf32>, vector<4x32xf32>, vector<4x32xf32>, vector<4x32xf32> -> vector<64x32xf32>
    %1982 = tpu.concatenate %1980, %1919, %1858, %1797, %1736, %1675, %1614, %1553, %1492, %1431, %1370, %1309, %1248, %1187, %1126, %1065 in 0 : vector<4x32xf32>, vector<4x32xf32>, vector<4x32xf32>, vector<4x32xf32>, vector<4x32xf32>, vector<4x32xf32>, vector<4x32xf32>, vector<4x32xf32>, vector<4x32xf32>, vector<4x32xf32>, vector<4x32xf32>, vector<4x32xf32>, vector<4x32xf32>, vector<4x32xf32>, vector<4x32xf32>, vector<4x32xf32> -> vector<64x32xf32>
    %1983 = arith.truncf %1981 : vector<64x32xf32> to vector<64x32xbf16>
    %c0_364 = arith.constant 0 : index
    %c0_365 = arith.constant 0 : index
    %1984 = vector.load %arg9[%c0_364, %c0_365] : memref<32x128xbf16, #tpu.memory_space<vmem>>, vector<32x128xbf16>
    %cst_366 = arith.constant dense<0.000000e+00> : vector<64x128xf32>
    %1985 = tpu.matmul %1983, %1984, %cst_366 {dimension_numbers = #tpu.dot_dimension_numbers<[1], [0], [0], [1], [0, 0, 1, 1], [], []>} : vector<64x32xbf16>, vector<32x128xbf16>, vector<64x128xf32> -> vector<64x128xf32>
    %1986 = arith.truncf %1982 : vector<64x32xf32> to vector<64x32xbf16>
    %c0_367 = arith.constant 0 : index
    %c0_368 = arith.constant 0 : index
    %1987 = vector.load %arg10[%c0_367, %c0_368] : memref<32x128xbf16, #tpu.memory_space<vmem>>, vector<32x128xbf16>
    %cst_369 = arith.constant dense<0.000000e+00> : vector<64x128xf32>
    %1988 = tpu.matmul %1986, %1987, %cst_369 {dimension_numbers = #tpu.dot_dimension_numbers<[1], [0], [0], [1], [0, 0, 1, 1], [], []>} : vector<64x32xbf16>, vector<32x128xbf16>, vector<64x128xf32> -> vector<64x128xf32>
    %1989 = arith.addf %1985, %1988 : vector<64x128xf32>
    %c0_370 = arith.constant 0 : index
    %c0_371 = arith.constant 0 : index
    %1990 = vector.load %arg11[%c0_370, %c0_371] : memref<1x128xf32, #tpu.memory_space<vmem>>, vector<1x128xf32>
    %1991 = vector.broadcast %1990 : vector<1x128xf32> to vector<64x128xf32>
    %1992 = arith.addf %1989, %1991 : vector<64x128xf32>
    %cst_372 = arith.constant dense<0xFF800000> : vector<64xf32>
    %1993 = vector.multi_reduction <maximumf>, %1992, %cst_372 [1] : vector<64x128xf32> to vector<64xf32>
    %1994 = vector.shape_cast %1993 : vector<64xf32> to vector<64x1xf32>
    %1995 = vector.broadcast %1994 : vector<64x1xf32> to vector<64x128xf32>
    %1996 = arith.subf %1992, %1995 : vector<64x128xf32>
    %1997 = math.exp %1996 : vector<64x128xf32>
    %cst_373 = arith.constant dense<0.000000e+00> : vector<64xf32>
    %1998 = vector.multi_reduction <add>, %1997, %cst_373 [1] : vector<64x128xf32> to vector<64xf32>
    %1999 = vector.shape_cast %1998 : vector<64xf32> to vector<64x1xf32>
    %2000 = math.log %1999 : vector<64x1xf32>
    %2001 = vector.broadcast %2000 : vector<64x1xf32> to vector<64x128xf32>
    %2002 = arith.subf %1996, %2001 : vector<64x128xf32>
    %c0_374 = arith.constant 0 : index
    %c0_375 = arith.constant 0 : index
    %c0_376 = arith.constant 0 : index
    %2003 = vector.load %arg12[%c0_374, %c0_375, %c0_376] : memref<1x64x128xf32, #tpu.memory_space<vmem>>, vector<1x64x128xf32>
    %2004 = vector.shape_cast %2003 : vector<1x64x128xf32> to vector<64x128xf32>
    %2005 = vector.shape_cast %2002 : vector<64x128xf32> to vector<1x64x128xf32>
    tpu.vector_store %arg12[%c0_374, %c0_375, %c0_376], %2005 {strides = array<i32>} : memref<1x64x128xf32, #tpu.memory_space<vmem>>, vector<1x64x128xf32>,
    return
  }
  func.func @transform_0(%arg0: i32) -> (i32, i32, i32) {
    %c0_i32 = arith.constant 0 : i32
    %c0_i32_0 = arith.constant 0 : i32
    %c0_i32_1 = arith.constant 0 : i32
    return %arg0, %c0_i32, %c0_i32_0 : i32, i32, i32
  }
  func.func @transform_1(%arg0: i32) -> (i32, i32) {
    %c0_i32 = arith.constant 0 : i32
    %c0_i32_0 = arith.constant 0 : i32
    %c0_i32_1 = arith.constant 0 : i32
    return %c0_i32, %c0_i32_0 : i32, i32
  }
  func.func @transform_2(%arg0: i32) -> (i32, i32) {
    %c0_i32 = arith.constant 0 : i32
    %c0_i32_0 = arith.constant 0 : i32
    %c0_i32_1 = arith.constant 0 : i32
    return %c0_i32, %c0_i32_0 : i32, i32
  }
  func.func @transform_3(%arg0: i32) -> (i32, i32) {
    %c0_i32 = arith.constant 0 : i32
    %c0_i32_0 = arith.constant 0 : i32
    %c0_i32_1 = arith.constant 0 : i32
    return %c0_i32, %c0_i32_0 : i32, i32
  }
  func.func @transform_4(%arg0: i32) -> (i32, i32) {
    %c0_i32 = arith.constant 0 : i32
    %c0_i32_0 = arith.constant 0 : i32
    %c0_i32_1 = arith.constant 0 : i32
    return %c0_i32, %c0_i32_0 : i32, i32
  }
  func.func @transform_5(%arg0: i32) -> (i32, i32) {
    %c0_i32 = arith.constant 0 : i32
    %c0_i32_0 = arith.constant 0 : i32
    %c0_i32_1 = arith.constant 0 : i32
    return %c0_i32, %c0_i32_0 : i32, i32
  }
  func.func @transform_6(%arg0: i32) -> (i32, i32) {
    %c0_i32 = arith.constant 0 : i32
    %c0_i32_0 = arith.constant 0 : i32
    %c0_i32_1 = arith.constant 0 : i32
    return %c0_i32, %c0_i32_0 : i32, i32
  }
  func.func @transform_7(%arg0: i32) -> (i32, i32) {
    %c0_i32 = arith.constant 0 : i32
    %c0_i32_0 = arith.constant 0 : i32
    %c0_i32_1 = arith.constant 0 : i32
    return %c0_i32, %c0_i32_0 : i32, i32
  }
  func.func @transform_8(%arg0: i32) -> (i32, i32) {
    %c0_i32 = arith.constant 0 : i32
    %c0_i32_0 = arith.constant 0 : i32
    %c0_i32_1 = arith.constant 0 : i32
    return %c0_i32, %c0_i32_0 : i32, i32
  }
  func.func @transform_9(%arg0: i32) -> (i32, i32) {
    %c0_i32 = arith.constant 0 : i32
    %c0_i32_0 = arith.constant 0 : i32
    %c0_i32_1 = arith.constant 0 : i32
    return %c0_i32, %c0_i32_0 : i32, i32
  }
  func.func @transform_10(%arg0: i32) -> (i32, i32) {
    %c0_i32 = arith.constant 0 : i32
    %c0_i32_0 = arith.constant 0 : i32
    %c0_i32_1 = arith.constant 0 : i32
    return %c0_i32, %c0_i32_0 : i32, i32
  }
  func.func @transform_11(%arg0: i32) -> (i32, i32, i32) {
    %c0_i32 = arith.constant 0 : i32
    %c0_i32_0 = arith.constant 0 : i32
    %c0_i32_1 = arith.constant 0 : i32
    return %arg0, %c0_i32, %c0_i32_0 : i32, i32, i32
  }
}

</mosaic_0001>

<bundles_post_ra>
// kernel: codec_for_ctc_forward.1
= control target key start
LH: loop header
LB: loop body
LE: loop exit
PB: predicated region body
PF: predicated region fallthrough
CT: control target
= control target key end

     0   :  { %s5770_s17 = smov 0   ;;  %s6965_s0 = inlined_call_operand.vmem [shape: bf16[2,32,16], index: 0, kind: input, shape index: {}]   ;;  %s6966_s1 = inlined_call_operand.vmem [shape: bf16[16,256], index: 1, kind: input, shape index: {}]   ;;  %s6967_s2 = inlined_call_operand.vmem [shape: f32[1,256], index: 2, kind: input, shape index: {}]   ;;  %s6968_s3 = inlined_call_operand.vmem [shape: bf16[32,256], index: 3, kind: input, shape index: {}]   ;;  %s6969_s4 = inlined_call_operand.vmem [shape: bf16[32,256], index: 4, kind: input, shape index: {}]   ;;  %s6970_s5 = inlined_call_operand.vmem [shape: bf16[32,256], index: 5, kind: input, shape index: {}]   ;;  %s6971_s6 = inlined_call_operand.vmem [shape: f32[1,256], index: 6, kind: input, shape index: {}]   ;;  %s6972_s7 = inlined_call_operand.vmem [shape: bf16[32,256], index: 7, kind: input, shape index: {}]   ;;  %s6973_s8 = inlined_call_operand.vmem [shape: bf16[32,128], index: 8, kind: input, shape index: {}]   ;;  %s6974_s9 = inlined_call_operand.vmem [shape: bf16[32,128], index: 9, kind: input, shape index: {}]   ;;  %s6975_s10 = inlined_call_operand.vmem [shape: f32[1,128], index: 10, kind: input, shape index: {}]   ;;  %s6976_s11 = inlined_call_operand.vmem [shape: f32[2,64,128], index: 11, kind: output, shape index: {}]  }
   0x1 LB: > { %s4893_s18 = sadd.s32 4294967295, %s5705_s17   ;;  %p4897_p0 = scmp.ge.s32.totalorder %s5705_s17, 1  ;;  %s5705_s17 = sphi %s5770_s17, %s21_s17  }
   0x2   : > { %p337_p1 = scmp.lt.s32.totalorder %s5705_s17, 3 }
   0x4   : > { %p338_p2 = pnand %p4897_p0, %p337_p1 }
   0x5   : > { %p377_p3 = scmp.lt.s32.totalorder (!%p338_p2), %s4893_s18, 1  ;;  %s5708_s20 = smov (!%p338_p2), 64  }
   0x6   : > { %341 = sbr.rel (%p338_p2) target bundleno = 22889 (0x5969), region = 64  ;;  %s5709_s21 = smov (!%p338_p2), 32  }
   0xb   : > { %v5114_v0 = vld [vmem:[%s6966_s1 + $0x4] ss:$8 sps:$4 sm:$0xff]   ;;  %v5116_v1 = vld [vmem:[%s6966_s1] ss:$8 sps:$4 sm:$0xff]   ;;  %v5707_v2 = vmov 0   ;;  %s6978_s18 = smov (!%p377_p3, %s4893_s18), 1  ;;  %v396_v9 = vlaneseq }
   0xc   : > { %465 = vmatprep.mubr.bf16.mxu0 %v5707_v2  ;;  %574 = vmatprep.mubr.bf16.mxu1 %v5707_v2  ;;  %v5791_v3 = vld [vmem:[%s6968_s3 + $0x14] ss:$8 sps:$4 sm:$0xff]   ;;  %v5796_v4 = vld [vmem:[%s6968_s3 + $0x10] ss:$8 sps:$4 sm:$0xff]   ;;  %v5801_v5 = vld [vmem:[%s6968_s3 + $0x4] ss:$8 sps:$4 sm:$0xff]  }
   0xd   : > { %447 = vmatprep.subr.bf16.mxu0 %v5114_v0  ;;  %s5053_s29 = sshll.u32 %s6978_s18, 4  ;;  %554 = vmatprep.subr.bf16.mxu1 %v5791_v3  ;;  %v5808_v6 = vld [vmem:[%s6968_s3] ss:$8 sps:$4 sm:$0xff]   ;;  %vm426_vm0 = vcmask 130048   ;;  %v5832_v10 = vshrl.u32 %v396_v9, 7  ;;  %vm637_vm1 = vcmask 1043456  }
   0xe   : > { %448 = vmatpush1.bf16.msra.mxu0 %v5116_v1  ;;  %s381_s15 = scalar_lea.vmem %s6965_s0, %s5053_s29  ;;  %555 = vmatpush1.bf16.msra.mxu1 %v5796_v4  ;;  %v394_v13 = vld [vmem:[%s6967_s2] sm:$0x3]  ;;  %vm538_vm2 = vcmask 261120   ;;  %s5054_s27 = sshll.u32 %s6978_s18, 6 }
   0xf   : > { %757 = vmatprep.subr.bf16.mxu0 %v5791_v3  ;;  %v5117_v7 = vld [vmem:[%s381_s15] sm:$0xff]   ;;  %556 = vmatprep.subr.bf16.mxu1 %v5801_v5  ;;  %v5118_v8 = vld [vmem:[%s381_s15 + $0x8] sm:$0xff]   ;;  %v398_v11 = vsub.s32 0, %v5832_v10  ;;  %v402_v12 = vsub.s32 1, %v5832_v10  ;;  %s6944_s30 = scalar_lea.vmem %s6976_s11, %s5054_s27 }
  0x11   : > { %4906 = vmatmul.mubr.msk.bf16.vlgmr.msra.gmra.mxu0 %vm426_vm0, %v5117_v7  ;;  %v399_v14 = vrot.slane %v394_v13, %v398_v11  ;;  %v403_v15 = vrot.slane %v394_v13, %v402_v12 }
  0x12   : > { %475 = vmatprep.mubr.bf16.mxu0 %v5707_v2  ;;  %557 = vmatpush1.bf16.msra.mxu1 %v5808_v6 }
  0x13   : > { %658 = vmatprep.subr.bf16.mxu1 %v5791_v3  ;;  %758 = vmatpush1.bf16.msra.mxu0 %v5796_v4 }
  0x14   : > { %759 = vmatprep.subr.bf16.mxu0 %v5801_v5 }
  0x15   : > { %575 = vmatmul.mubr.bf16.vlgmr.msra.gmra.mxu1 %v5707_v2 }
  0x16   : > { %659 = vmatpush1.bf16.msra.mxu1 %v5796_v4  ;;  %678 = vmatprep.mubr.bf16.mxu1 %v5707_v2 }
  0x17   : > { %660 = vmatprep.subr.bf16.mxu1 %v5801_v5  ;;  %760 = vmatpush1.bf16.msra.mxu0 %v5808_v6 }
  0x18   : > { %989 = vmatprep.subr.bf16.mxu0 %v5791_v3 }
  0x19   : > { %4907 = vmatmul.mubr.msk.bf16.gmra.mxu0 %vm426_vm0, %v5118_v8 }
  0x1a   : > { %661 = vmatpush1.bf16.msra.mxu1 %v5808_v6  ;;  %777 = vmatprep.mubr.bf16.mxu0 %v5707_v2 }
  0x1b   : > { %878 = vmatprep.subr.bf16.mxu1 %v5791_v3 }
  0xd1   : > { %v467_v16 = vpop.f32.mrf.mxu0 }
  0xd2   : > { %v468_v18 = vadd.f32 %v467_v16, %v399_v14 }
  0xd3   : > { %v469_v17 = vpop.f32.mrf.mxu0 }
  0xd4   : > { %v470_v19 = vadd.f32 %v469_v17, %v403_v15 }
  0xd5   : > { %v471_v20 = vpop.f32.mrf.mxu0  ;;  %v576_v21 = vpop.f32.mrf.mxu1 }
  0xd6   : > { %v5055_v22 = vpack.c.bf16 %v470_v19, %v468_v18  ;;  %v472_v25 = vadd.f32 %v471_v20, %v399_v14 }
  0xd7   : > { %v473_v23 = vpop.f32.mrf.mxu0  ;;  %v578_v24 = vpop.f32.mrf.mxu1 }
  0xd8   : > { %510 = vst [vmem:[#allocation2] sm:$0xff] %v5055_v22  ;;  %v474_v26 = vadd.f32 %v473_v23, %v403_v15 }
  0xd9   : > { %v477_v27 = vpop.f32.mrf.mxu0  ;;  %v580_v28 = vpop.f32.mrf.mxu1 }
  0xda   : > { %v5056_v29 = vpack.c.bf16 %v474_v26, %v472_v25  ;;  %v478_v32 = vadd.f32 %v477_v27, %v399_v14 }
  0xdb   : > { %v479_v30 = vpop.f32.mrf.mxu0  ;;  %v581_v31 = vpop.f32.mrf.mxu1 }
  0xdc   : > { %511 = vst [vmem:[#allocation2 + $0x8] sm:$0xff] %v5056_v29  ;;  %v480_v33 = vadd.f32 %v479_v30, %v403_v15 }
  0xdd   : > { %v481_v34 = vpop.f32.mrf.mxu0 }
  0xde   : > { %v5057_v35 = vpack.c.bf16 %v480_v33, %v478_v32  ;;  %v482_v38 = vadd.f32 %v481_v34, %v399_v14 }
  0xdf   : > { %v483_v36 = vpop.f32.mrf.mxu0  ;;  %v5843_v37 = vld [vmem:[#allocation2] sm:$0x3] }
  0xe0   : > { %512 = vst [vmem:[#allocation2 + $0x10] sm:$0xff] %v5057_v35  ;;  %v484_v39 = vadd.f32 %v483_v36, %v403_v15  ;;  %v584_v40 = vunpack.c.l.bf16 %v5843_v37 }
  0xe2   : > { %v5058_v41 = vpack.c.bf16 %v484_v39, %v482_v38  ;;  %v585_v42 = vadd.f32 %v584_v40, %v576_v21 }
  0xe4   : > { %513 = vst [vmem:[#allocation2 + $0x18] sm:$0xff] %v5058_v41  ;;  %5147 = vtanh.f32 %v585_v42  ;;  %v4916_v48 = vmul.f32 -1.442695, %v585_v42 }
  0xeb   : > { %v586_v43 = vld [vmem:[#allocation2 + $0x1c] sm:$0xc] }
  0xec   : > { %v587_v44 = vunpack.c.l.bf16 %v586_v43 }
  0xee   : > { %v588_v45 = vadd.f32 %v587_v44, %v578_v24 }
  0xf0   : > { %5149 = vtanh.f32 %v588_v45  ;;  %v4917_v49 = vmul.f32 -1.442695, %v588_v45 }
  0xf1   : > { %v5148_v46 = vpop.eup %5147  ;;  %5151 = vpow2.f32 %v4916_v48 }
  0xf2   : > { %598 = vrot.lane.b32.xlu0 %v5148_v46, %s5708_s20  ;;  %5153 = vpow2.f32 %v4917_v49 }
  0xfd   : > { %v5150_v47 = vpop.eup %5149 }
  0xfe   : > { %622 = vrot.lane.b32.xlu0 %v5150_v47, %s5708_s20  ;;  %v5152_v50 = vpop.eup %5151 }
  0xff   : > { %v592_v51 = vadd.f32 1.0, %v5152_v50  ;;  %v5154_v52 = vpop.eup %5153 }
 0x100   : > { %v616_v53 = vadd.f32 1.0, %v5154_v52 }
 0x101   : > { %5155 = vrcp.f32 %v592_v51 }
 0x102   : > { %5157 = vrcp.f32 %v616_v53 }
 0x10e   : > { %v5156_v54 = vpop.eup %5155 }
 0x10f   : > { %v5158_v57 = vpop.eup %5157  ;;  %v596_v60 = vmul.f32 0.0, %v5156_v54 }
 0x110   : > { %v620_v63 = vmul.f32 0.0, %v5158_v57 }
 0x164   : > { %v599_v55 = vpop.permute.xlu0 %598 }
 0x165   : > { %v601_v56 = vmul.f32 %v5156_v54, %v599_v55 }
 0x167   : > { %603 = vrot.lane.b32.xlu1 %v601_v56, %s5709_s21  ;;  %v5888_v56 = vld [vmem:[#allocation2 + $0x1c] sm:$0x3] }
 0x170   : > { %v623_v58 = vpop.permute.xlu0 %622 }
 0x171   : > { %v625_v59 = vmul.f32 %v5158_v57, %v623_v58 }
 0x173   : > { %627 = vrot.lane.b32.xlu1 %v625_v59, %s5709_s21 }
 0x1d9   : > { %v604_v61 = vpop.permute.xlu1 %603 }
 0x1da   : > { %v606_v62 = vadd.f32 %v604_v61, %v596_v60  ;;  %v793_v61 = vunpack.c.l.bf16 %v5888_v56 }
 0x1dc   : > { %5159 = vtanh.f32 %v606_v62 }
 0x1e5   : > { %v628_v0 = vpop.permute.xlu1 %627 }
 0x1e6   : > { %v630_v1 = vadd.f32 %v628_v0, %v620_v63 }
 0x1e8   : > { %5161 = vtanh.f32 %v630_v1 }
 0x1e9   : > { %v5160_v7 = vpop.eup %5159 }
 0x1ea   : > { %609 = vrot.lane.b32.xlu0 %v5160_v7, %s5708_s20 }
 0x1f5   : > { %v5162_v8 = vpop.eup %5161 }
 0x1f6   : > { %633 = vrot.lane.b32.xlu1 %v5162_v8, %s5708_s20 }
 0x25c   : > { %v610_v9 = vpop.permute.xlu0 %609 }
 0x25d   : > { %v5852_v14 = vmul.f32 %v5156_v54, %v610_v9  ;;  %v5886_v54 = vld [vmem:[#allocation2] sm:$0xc] }
 0x268   : > { %v634_v13 = vpop.permute.xlu1 %633 }
 0x269   : > { %v5854_v15 = vmul.f32 %v5158_v57, %v634_v13  ;;  %v787_v57 = vunpack.c.l.bf16 %v5886_v54 }
 0x26b   : > { %v638_v16 = vsel %vm637_vm1, %v5852_v14, %v5854_v15 }
 0x26c   : > { %v639_v17 = vpack.c.bf16 %v638_v16, %v638_v16 }
 0x26e   : > { %641 = vrot.lane.b32.xlu0 %v639_v17, %s5709_s21 }
 0x2e0   : > { %v642_v18 = vpop.permute.xlu0 %641 }
 0x2e1   : > { %4918 = vmatmul.mubr.msk.bf16.vlgmr.msra.gmra.mxu1 %vm538_vm2, %v642_v18 }
 0x2e2   : > { %879 = vmatpush1.bf16.msra.mxu1 %v5796_v4  ;;  %898 = vmatprep.mubr.bf16.mxu1 %v5707_v2 }
 0x2e3   : > { %880 = vmatprep.subr.bf16.mxu1 %v5801_v5 }
 0x2e6   : > { %881 = vmatpush1.bf16.msra.mxu1 %v5808_v6 }
 0x2e7   : > { %1098 = vmatprep.subr.bf16.mxu1 %v5791_v3 }
 0x3a1   : > { %v680_v19 = vpop.f32.mrf.mxu1 }
 0x3a2   : > { %v687_v20 = vadd.f32 %v680_v19, %v584_v40 }
 0x3a3   : > { %v682_v21 = vpop.f32.mrf.mxu1 }
 0x3a4   : > { %5163 = vtanh.f32 %v687_v20  ;;  %v688_v22 = vadd.f32 %v682_v21, %v587_v44  ;;  %v4919_v27 = vmul.f32 -1.442695, %v687_v20 }
 0x3a5   : > { %v684_v23 = vpop.f32.mrf.mxu1 }
 0x3a6   : > { %5165 = vtanh.f32 %v688_v22  ;;  %v4920_v28 = vmul.f32 -1.442695, %v688_v22 }
 0x3a7   : > { %v685_v24 = vpop.f32.mrf.mxu1  ;;  %5167 = vpow2.f32 %v4919_v27 }
 0x3a8   : > { %5169 = vpow2.f32 %v4920_v28 }
 0x3b1   : > { %v5164_v25 = vpop.eup %5163 }
 0x3b2   : > { %698 = vrot.lane.b32.xlu1 %v5164_v25, %s5708_s20 }
 0x3b3   : > { %v5166_v26 = vpop.eup %5165 }
 0x3b4   : > { %722 = vrot.lane.b32.xlu0 %v5166_v26, %s5708_s20  ;;  %v5168_v29 = vpop.eup %5167 }
 0x3b5   : > { %v5170_v30 = vpop.eup %5169  ;;  %v692_v31 = vadd.f32 1.0, %v5168_v29 }
 0x3b6   : > { %v716_v32 = vadd.f32 1.0, %v5170_v30 }
 0x3b7   : > { %5171 = vrcp.f32 %v692_v31 }
 0x3b8   : > { %5173 = vrcp.f32 %v716_v32 }
 0x3c4   : > { %v5172_v33 = vpop.eup %5171 }
 0x3c5   : > { %v5174_v36 = vpop.eup %5173  ;;  %v696_v39 = vmul.f32 %v5172_v33, %v606_v62 }
 0x3c6   : > { %v720_v42 = vmul.f32 %v5174_v36, %v630_v1 }
 0x424   : > { %v699_v34 = vpop.permute.xlu1 %698 }
 0x425   : > { %v701_v35 = vmul.f32 %v5172_v33, %v699_v34 }
 0x426   : > { %v723_v37 = vpop.permute.xlu0 %722 }
 0x427   : > { %703 = vrot.lane.b32.xlu1 %v701_v35, %s5709_s21  ;;  %v725_v38 = vmul.f32 %v5174_v36, %v723_v37 }
 0x429   : > { %727 = vrot.lane.b32.xlu0 %v725_v38, %s5709_s21 }
 0x499   : > { %v704_v40 = vpop.permute.xlu1 %703 }
 0x49a   : > { %v706_v41 = vadd.f32 %v704_v40, %v696_v39 }
 0x49b   : > { %v728_v43 = vpop.permute.xlu0 %727 }
 0x49c   : > { %5175 = vtanh.f32 %v706_v41  ;;  %v730_v44 = vadd.f32 %v728_v43, %v720_v42  ;;  %v806_v26 = vrot.slane %v706_v41, 4 }
 0x49e   : > { %5177 = vtanh.f32 %v730_v44  ;;  %v833_v28 = vrot.slane %v730_v44, 4 }
 0x4a9   : > { %v5176_v45 = vpop.eup %5175 }
 0x4aa   : > { %709 = vrot.lane.b32.xlu1 %v5176_v45, %s5708_s20 }
 0x4ab   : > { %v5178_v46 = vpop.eup %5177 }
 0x4ac   : > { %733 = vrot.lane.b32.xlu0 %v5178_v46, %s5708_s20 }
 0x51c   : > { %v710_v47 = vpop.permute.xlu1 %709 }
 0x51d   : > { %v5872_v49 = vmul.f32 %v5172_v33, %v710_v47 }
 0x51e   : > { %v734_v48 = vpop.permute.xlu0 %733 }
 0x51f   : > { %v5874_v50 = vmul.f32 %v5174_v36, %v734_v48 }
 0x521   : > { %v737_v51 = vsel %vm637_vm1, %v5872_v49, %v5874_v50 }
 0x522   : > { %v738_v52 = vpack.c.bf16 %v737_v51, %v737_v51 }
 0x524   : > { %740 = vrot.lane.b32.xlu1 %v738_v52, %s5709_s21 }
 0x596   : > { %v741_v53 = vpop.permute.xlu1 %740 }
 0x597   : > { %4921 = vmatmul.mubr.msk.bf16.vlgmr.msra.gmra.mxu0 %vm538_vm2, %v741_v53 }
 0x598   : > { %990 = vmatpush1.bf16.msra.mxu0 %v5796_v4  ;;  %1009 = vmatprep.mubr.bf16.mxu0 %v5707_v2 }
 0x599   : > { %991 = vmatprep.subr.bf16.mxu0 %v5801_v5 }
 0x59c   : > { %992 = vmatpush1.bf16.msra.mxu0 %v5808_v6 }
 0x59d   : > { %1197 = vmatprep.subr.bf16.mxu0 %v5791_v3 }
 0x657   : > { %v779_v55 = vpop.f32.mrf.mxu0 }
 0x658   : > { %v789_v58 = vrot.slane %v779_v55, 4 }
 0x659   : > { %v781_v59 = vpop.f32.mrf.mxu0 }
 0x65a   : > { %v791_v60 = vadd.f32 %v789_v58, %v787_v57  ;;  %v795_v62 = vrot.slane %v781_v59, 4 }
 0x65b   : > { %v783_v63 = vpop.f32.mrf.mxu0 }
 0x65c   : > { %5179 = vtanh.f32 %v791_v60  ;;  %v797_v0 = vadd.f32 %v795_v62, %v793_v61  ;;  %v4922_v9 = vmul.f32 -1.442695, %v791_v60 }
 0x65d   : > { %v784_v1 = vpop.f32.mrf.mxu0 }
 0x65e   : > { %5181 = vtanh.f32 %v797_v0  ;;  %v4923_v13 = vmul.f32 -1.442695, %v797_v0 }
 0x65f   : > { %5183 = vpow2.f32 %v4922_v9 }
 0x660   : > { %5185 = vpow2.f32 %v4923_v13 }
 0x669   : > { %v5180_v7 = vpop.eup %5179 }
 0x66a   : > { %810 = vrot.lane.b32.xlu0 %v5180_v7, %s5708_s20 }
 0x66b   : > { %v5182_v8 = vpop.eup %5181 }
 0x66c   : > { %837 = vrot.lane.b32.xlu1 %v5182_v8, %s5708_s20  ;;  %v5184_v16 = vpop.eup %5183 }
 0x66d   : > { %v5186_v17 = vpop.eup %5185  ;;  %v801_v18 = vadd.f32 1.0, %v5184_v16 }
 0x66e   : > { %v828_v19 = vadd.f32 1.0, %v5186_v17 }
 0x66f   : > { %5187 = vrcp.f32 %v801_v18 }
 0x670   : > { %5189 = vrcp.f32 %v828_v19 }
 0x67c   : > { %v5188_v20 = vpop.eup %5187 }
 0x67d   : > { %v5190_v23 = vpop.eup %5189  ;;  %v808_v27 = vmul.f32 %v5188_v20, %v806_v26  ;;  %v2313_v26 = vrot.slane %v5874_v50, 4 }
 0x67e   : > { %v835_v31 = vmul.f32 %v5190_v23, %v833_v28 }
 0x6dc   : > { %v811_v21 = vpop.permute.xlu0 %810 }
 0x6dd   : > { %v813_v22 = vmul.f32 %v5188_v20, %v811_v21 }
 0x6de   : > { %v838_v24 = vpop.permute.xlu1 %837 }
 0x6df   : > { %815 = vrot.lane.b32.xlu0 %v813_v22, %s5709_s21  ;;  %v840_v25 = vmul.f32 %v5190_v23, %v838_v24 }
 0x6e1   : > { %842 = vrot.lane.b32.xlu1 %v840_v25, %s5709_s21 }
 0x751   : > { %v816_v29 = vpop.permute.xlu0 %815 }
 0x752   : > { %v818_v30 = vadd.f32 %v816_v29, %v808_v27 }
 0x753   : > { %v843_v32 = vpop.permute.xlu1 %842 }
 0x754   : > { %5191 = vtanh.f32 %v818_v30  ;;  %v845_v33 = vadd.f32 %v843_v32, %v835_v31 }
 0x756   : > { %5193 = vtanh.f32 %v845_v33 }
 0x761   : > { %v5192_v34 = vpop.eup %5191 }
 0x762   : > { %821 = vrot.lane.b32.xlu0 %v5192_v34, %s5708_s20 }
 0x763   : > { %v5194_v35 = vpop.eup %5193 }
 0x764   : > { %848 = vrot.lane.b32.xlu1 %v5194_v35, %s5708_s20 }
 0x7d4   : > { %v822_v36 = vpop.permute.xlu0 %821 }
 0x7d5   : > { %v5902_v37 = vmul.f32 %v5188_v20, %v822_v36 }
 0x7d6   : > { %v849_v38 = vpop.permute.xlu1 %848 }
 0x7d7   : > { %v5904_v39 = vmul.f32 %v5190_v23, %v849_v38  ;;  %v853_v40 = vrot.slane %v5902_v37, 4  ;;  %v2284_v23 = vrot.slane %v5872_v49, 4  ;;  %v5947_v49 = vsel %vm637_vm1, %v2313_v26, %v5854_v15  ;;  %v5964_v15 = vld [vmem:[#allocation2 + $0x8] sm:$0x3]  ;;  %v5966_v37 = vld [vmem:[#allocation2 + $0x14] sm:$0xc] }
 0x7d8   : > { %v1019_v38 = vunpack.c.l.bf16 %v5964_v15 }
 0x7d9   : > { %v856_v41 = vrot.slane %v5904_v39, 4  ;;  %v5938_v27 = vsel %vm637_vm1, %v5852_v14, %v2284_v23 }
 0x7db   : > { %v858_v42 = vsel %vm637_vm1, %v853_v40, %v856_v41 }
 0x7dc   : > { %v859_v43 = vpack.c.bf16 %v858_v42, %v858_v42 }
 0x7de   : > { %861 = vrot.lane.b32.xlu0 %v859_v43, %s5709_s21 }
 0x850   : > { %v862_v44 = vpop.permute.xlu0 %861 }
 0x851   : > { %4924 = vmatmul.mubr.msk.bf16.vlgmr.msra.gmra.mxu1 %vm538_vm2, %v862_v44 }
 0x852   : > { %1099 = vmatpush1.bf16.msra.mxu1 %v5796_v4  ;;  %1118 = vmatprep.mubr.bf16.mxu1 %v5707_v2 }
 0x853   : > { %1100 = vmatprep.subr.bf16.mxu1 %v5801_v5 }
 0x856   : > { %1101 = vmatpush1.bf16.msra.mxu1 %v5808_v6 }
 0x857   : > { %1318 = vmatprep.subr.bf16.mxu1 %v5791_v3 }
 0x911   : > { %v900_v45 = vpop.f32.mrf.mxu1 }
 0x912   : > { %v908_v46 = vrot.slane %v900_v45, 4 }
 0x913   : > { %v902_v47 = vpop.f32.mrf.mxu1 }
 0x914   : > { %v910_v48 = vadd.f32 %v908_v46, %v787_v57  ;;  %v912_v51 = vrot.slane %v902_v47, 4 }
 0x915   : > { %v904_v52 = vpop.f32.mrf.mxu1 }
 0x916   : > { %5195 = vtanh.f32 %v910_v48  ;;  %v914_v53 = vadd.f32 %v912_v51, %v793_v61  ;;  %v4925_v60 = vmul.f32 -1.442695, %v910_v48 }
 0x917   : > { %v905_v55 = vpop.f32.mrf.mxu1 }
 0x918   : > { %5197 = vtanh.f32 %v914_v53  ;;  %v4926_v62 = vmul.f32 -1.442695, %v914_v53 }
 0x919   : > { %5199 = vpow2.f32 %v4925_v60 }
 0x91a   : > { %5201 = vpow2.f32 %v4926_v62 }
 0x923   : > { %v5196_v58 = vpop.eup %5195 }
 0x924   : > { %924 = vrot.lane.b32.xlu1 %v5196_v58, %s5708_s20 }
 0x925   : > { %v5198_v59 = vpop.eup %5197 }
 0x926   : > { %948 = vrot.lane.b32.xlu0 %v5198_v59, %s5708_s20  ;;  %v5200_v54 = vpop.eup %5199 }
 0x927   : > { %v5202_v57 = vpop.eup %5201  ;;  %v918_v63 = vadd.f32 1.0, %v5200_v54 }
 0x928   : > { %v942_v0 = vadd.f32 1.0, %v5202_v57 }
 0x929   : > { %5203 = vrcp.f32 %v918_v63 }
 0x92a   : > { %5205 = vrcp.f32 %v942_v0 }
 0x936   : > { %v5204_v56 = vpop.eup %5203 }
 0x937   : > { %v5206_v7 = vpop.eup %5205  ;;  %v922_v13 = vmul.f32 %v5204_v56, %v818_v30 }
 0x938   : > { %v946_v18 = vmul.f32 %v5206_v7, %v845_v33 }
 0x996   : > { %v925_v61 = vpop.permute.xlu1 %924 }
 0x997   : > { %v927_v1 = vmul.f32 %v5204_v56, %v925_v61 }
 0x998   : > { %v949_v8 = vpop.permute.xlu0 %948 }
 0x999   : > { %929 = vrot.lane.b32.xlu1 %v927_v1, %s5709_s21  ;;  %v951_v9 = vmul.f32 %v5206_v7, %v949_v8 }
 0x99b   : > { %953 = vrot.lane.b32.xlu0 %v951_v9, %s5709_s21 }
 0xa0b   : > { %v930_v16 = vpop.permute.xlu1 %929 }
 0xa0c   : > { %v5926_v17 = vadd.f32 %v930_v16, %v922_v13 }
 0xa0d   : > { %v954_v19 = vpop.permute.xlu0 %953 }
 0xa0e   : > { %5207 = vtanh.f32 %v5926_v17  ;;  %v5929_v20 = vadd.f32 %v954_v19, %v946_v18  ;;  %v1032_v0 = vrot.slane %v5926_v17, 4 }
 0xa10   : > { %5209 = vtanh.f32 %v5929_v20  ;;  %v1059_v61 = vrot.slane %v5929_v20, 4 }
 0xa1b   : > { %v5208_v21 = vpop.eup %5207 }
 0xa1c   : > { %935 = vrot.lane.b32.xlu1 %v5208_v21, %s5708_s20 }
 0xa1d   : > { %v5210_v22 = vpop.eup %5209 }
 0xa1e   : > { %959 = vrot.lane.b32.xlu0 %v5210_v22, %s5708_s20 }
 0xa8e   : > { %v936_v24 = vpop.permute.xlu1 %935 }
 0xa8f   : > { %v938_v25 = vmul.f32 %v5204_v56, %v936_v24 }
 0xa90   : > { %v960_v29 = vpop.permute.xlu0 %959 }
 0xa91   : > { %v5941_v28 = vsel %vm637_vm1, %v853_v40, %v938_v25  ;;  %v962_v31 = vmul.f32 %v5206_v7, %v960_v29  ;;  %v964_v32 = vrot.slane %v938_v25, 4 }
 0xa92   : > { %v2323_v30 = vpack.c.bf16 %v5941_v28, %v5938_v27  ;;  %v5134_v27 = vld [vmem:[%s6970_s5] ss:$8 sps:$4 sm:$0xff]  }
 0xa93   : > { %v967_v33 = vrot.slane %v962_v31, 4  ;;  %v5952_v50 = vsel %vm637_vm1, %v962_v31, %v856_v41  ;;  %v1022_v41 = vunpack.c.l.bf16 %v5966_v37 }
 0xa94   : > { %v2334_v14 = vpack.c.bf16 %v5947_v49, %v5952_v50 }
 0xa95   : > { %v969_v34 = vsel %vm637_vm1, %v964_v32, %v967_v33 }
 0xa96   : > { %v970_v35 = vpack.c.bf16 %v969_v34, %v969_v34 }
 0xa98   : > { %972 = vrot.lane.b32.xlu1 %v970_v35, %s5709_s21 }
 0xb0a   : > { %v973_v36 = vpop.permute.xlu1 %972 }
 0xb0b   : > { %4927 = vmatmul.mubr.msk.bf16.vlgmr.msra.gmra.mxu0 %vm538_vm2, %v973_v36 }
 0xb0c   : > { %1198 = vmatpush1.bf16.msra.mxu0 %v5796_v4  ;;  %1217 = vmatprep.mubr.bf16.mxu0 %v5707_v2 }
 0xb0d   : > { %1199 = vmatprep.subr.bf16.mxu0 %v5801_v5 }
 0xb10   : > { %1200 = vmatpush1.bf16.msra.mxu0 %v5808_v6 }
 0xb11   : > { %1429 = vmatprep.subr.bf16.mxu0 %v5791_v3 }
 0xbcb   : > { %v1011_v39 = vpop.f32.mrf.mxu0 }
 0xbcc   : > { %v1020_v40 = vadd.f32 %v1019_v38, %v1011_v39 }
 0xbcd   : > { %v1013_v42 = vpop.f32.mrf.mxu0 }
 0xbce   : > { %5211 = vtanh.f32 %v1020_v40  ;;  %v1023_v43 = vadd.f32 %v1022_v41, %v1013_v42  ;;  %v4928_v48 = vmul.f32 -1.442695, %v1020_v40 }
 0xbcf   : > { %v1015_v44 = vpop.f32.mrf.mxu0 }
 0xbd0   : > { %5213 = vtanh.f32 %v1023_v43  ;;  %v4929_v51 = vmul.f32 -1.442695, %v1023_v43 }
 0xbd1   : > { %v1016_v45 = vpop.f32.mrf.mxu0  ;;  %5215 = vpow2.f32 %v4928_v48 }
 0xbd2   : > { %5217 = vpow2.f32 %v4929_v51 }
 0xbdb   : > { %v5212_v46 = vpop.eup %5211 }
 0xbdc   : > { %1036 = vrot.lane.b32.xlu0 %v5212_v46, %s5708_s20 }
 0xbdd   : > { %v5214_v47 = vpop.eup %5213 }
 0xbde   : > { %1063 = vrot.lane.b32.xlu1 %v5214_v47, %s5708_s20  ;;  %v5216_v52 = vpop.eup %5215 }
 0xbdf   : > { %v5218_v53 = vpop.eup %5217  ;;  %v1027_v55 = vadd.f32 1.0, %v5216_v52 }
 0xbe0   : > { %v1054_v58 = vadd.f32 1.0, %v5218_v53 }
 0xbe1   : > { %5219 = vrcp.f32 %v1027_v55 }
 0xbe2   : > { %5221 = vrcp.f32 %v1054_v58 }
 0xbee   : > { %v5220_v59 = vpop.eup %5219 }
 0xbef   : > { %v5222_v54 = vpop.eup %5221  ;;  %v1034_v56 = vmul.f32 %v5220_v59, %v1032_v0 }
 0xbf0   : > { %v1061_v8 = vmul.f32 %v5222_v54, %v1059_v61  ;;  %v6012_v61 = vld [vmem:[#allocation2 + $0x8] sm:$0xc] }
 0xc4e   : > { %v1037_v60 = vpop.permute.xlu0 %1036 }
 0xc4f   : > { %v1039_v62 = vmul.f32 %v5220_v59, %v1037_v60 }
 0xc50   : > { %v1064_v57 = vpop.permute.xlu1 %1063 }
 0xc51   : > { %1041 = vrot.lane.b32.xlu0 %v1039_v62, %s5709_s21  ;;  %v1066_v63 = vmul.f32 %v5222_v54, %v1064_v57 }
 0xc53   : > { %1068 = vrot.lane.b32.xlu1 %v1066_v63, %s5709_s21 }
 0xcc3   : > { %v1042_v1 = vpop.permute.xlu0 %1041 }
 0xcc4   : > { %v1044_v7 = vadd.f32 %v1042_v1, %v1034_v56 }
 0xcc5   : > { %v1069_v9 = vpop.permute.xlu1 %1068 }
 0xcc6   : > { %5223 = vtanh.f32 %v1044_v7  ;;  %v1071_v13 = vadd.f32 %v1069_v9, %v1061_v8  ;;  %v1227_v8 = vunpack.c.l.bf16 %v6012_v61 }
 0xcc8   : > { %5225 = vtanh.f32 %v1071_v13 }
 0xcd3   : > { %v5224_v16 = vpop.eup %5223 }
 0xcd4   : > { %1047 = vrot.lane.b32.xlu0 %v5224_v16, %s5708_s20 }
 0xcd5   : > { %v5226_v18 = vpop.eup %5225 }
 0xcd6   : > { %1074 = vrot.lane.b32.xlu1 %v5226_v18, %s5708_s20 }
 0xd46   : > { %v1048_v19 = vpop.permute.xlu0 %1047 }
 0xd47   : > { %v5978_v22 = vmul.f32 %v5220_v59, %v1048_v19 }
 0xd48   : > { %v1075_v21 = vpop.permute.xlu1 %1074 }
 0xd49   : > { %v5980_v17 = vmul.f32 %v5222_v54, %v1075_v21 }
 0xd4b   : > { %v1078_v20 = vsel %vm637_vm1, %v5978_v22, %v5980_v17 }
 0xd4c   : > { %v1079_v23 = vpack.c.bf16 %v1078_v20, %v1078_v20 }
 0xd4e   : > { %1081 = vrot.lane.b32.xlu0 %v1079_v23, %s5709_s21 }
 0xdc0   : > { %v1082_v24 = vpop.permute.xlu0 %1081 }
 0xdc1   : > { %4930 = vmatmul.mubr.msk.bf16.vlgmr.msra.gmra.mxu1 %vm538_vm2, %v1082_v24 }
 0xdc2   : > { %1319 = vmatpush1.bf16.msra.mxu1 %v5796_v4  ;;  %1338 = vmatprep.mubr.bf16.mxu1 %v5707_v2 }
 0xdc3   : > { %1320 = vmatprep.subr.bf16.mxu1 %v5801_v5 }
 0xdc6   : > { %1321 = vmatpush1.bf16.msra.mxu1 %v5808_v6 }
 0xdc7   : > { %1538 = vmatprep.subr.bf16.mxu1 %v5791_v3 }
 0xe81   : > { %v1120_v25 = vpop.f32.mrf.mxu1 }
 0xe82   : > { %v1127_v26 = vadd.f32 %v1120_v25, %v1019_v38 }
 0xe83   : > { %v1122_v29 = vpop.f32.mrf.mxu1 }
 0xe84   : > { %5227 = vtanh.f32 %v1127_v26  ;;  %v1128_v31 = vadd.f32 %v1122_v29, %v1022_v41  ;;  %v4931_v36 = vmul.f32 -1.442695, %v1127_v26 }
 0xe85   : > { %v1124_v32 = vpop.f32.mrf.mxu1 }
 0xe86   : > { %5229 = vtanh.f32 %v1128_v31  ;;  %v4932_v15 = vmul.f32 -1.442695, %v1128_v31 }
 0xe87   : > { %v1125_v33 = vpop.f32.mrf.mxu1  ;;  %5231 = vpow2.f32 %v4931_v36 }
 0xe88   : > { %5233 = vpow2.f32 %v4932_v15 }
 0xe91   : > { %v5228_v34 = vpop.eup %5227 }
 0xe92   : > { %1138 = vrot.lane.b32.xlu1 %v5228_v34, %s5708_s20 }
 0xe93   : > { %v5230_v35 = vpop.eup %5229 }
 0xe94   : > { %1162 = vrot.lane.b32.xlu0 %v5230_v35, %s5708_s20  ;;  %v5232_v37 = vpop.eup %5231 }
 0xe95   : > { %v5234_v39 = vpop.eup %5233  ;;  %v1132_v40 = vadd.f32 1.0, %v5232_v37 }
 0xe96   : > { %v1156_v38 = vadd.f32 1.0, %v5234_v39 }
 0xe97   : > { %5235 = vrcp.f32 %v1132_v40 }
 0xe98   : > { %5237 = vrcp.f32 %v1156_v38 }
 0xea4   : > { %v5236_v41 = vpop.eup %5235 }
 0xea5   : > { %v5238_v44 = vpop.eup %5237  ;;  %v1136_v47 = vmul.f32 %v5236_v41, %v1044_v7  ;;  %v6014_v7 = vld [vmem:[#allocation2 + $0x14] sm:$0x3] }
 0xea6   : > { %v1160_v52 = vmul.f32 %v5238_v44, %v1071_v13  ;;  %v1233_v16 = vunpack.c.l.bf16 %v6014_v7 }
 0xf04   : > { %v1139_v42 = vpop.permute.xlu1 %1138 }
 0xf05   : > { %v1141_v43 = vmul.f32 %v5236_v41, %v1139_v42 }
 0xf06   : > { %v1163_v45 = vpop.permute.xlu0 %1162 }
 0xf07   : > { %1143 = vrot.lane.b32.xlu1 %v1141_v43, %s5709_s21  ;;  %v1165_v46 = vmul.f32 %v5238_v44, %v1163_v45 }
 0xf09   : > { %1167 = vrot.lane.b32.xlu0 %v1165_v46, %s5709_s21 }
 0xf79   : > { %v1144_v48 = vpop.permute.xlu1 %1143 }
 0xf7a   : > { %v1146_v51 = vadd.f32 %v1144_v48, %v1136_v47 }
 0xf7b   : > { %v1168_v53 = vpop.permute.xlu0 %1167 }
 0xf7c   : > { %5239 = vtanh.f32 %v1146_v51  ;;  %v1170_v55 = vadd.f32 %v1168_v53, %v1160_v52  ;;  %v1246_v15 = vrot.slane %v1146_v51, 4 }
 0xf7e   : > { %5241 = vtanh.f32 %v1170_v55  ;;  %v1273_v39 = vrot.slane %v1170_v55, 4 }
 0xf89   : > { %v5240_v58 = vpop.eup %5239 }
 0xf8a   : > { %1149 = vrot.lane.b32.xlu1 %v5240_v58, %s5708_s20 }
 0xf8b   : > { %v5242_v59 = vpop.eup %5241 }
 0xf8c   : > { %1173 = vrot.lane.b32.xlu0 %v5242_v59, %s5708_s20 }
 0xffc   : > { %v1150_v60 = vpop.permute.xlu1 %1149 }
 0xffd   : > { %v5998_v54 = vmul.f32 %v5236_v41, %v1150_v60  ;;  %v6044_v60 = vld [vmem:[%s6968_s3 + $0x10] ss:$8 sps:$4 sm:$0xff]  }
 0xffe   : > { %v1174_v62 = vpop.permute.xlu0 %1173 }
 0xfff   : > { %v6000_v57 = vmul.f32 %v5238_v44, %v1174_v62  ;;  %v6051_v62 = vld [vmem:[%s6968_s3 + $0x4] ss:$8 sps:$4 sm:$0xff]  }
0x1001   : > { %v1177_v63 = vsel %vm637_vm1, %v5998_v54, %v6000_v57 }
0x1002   : > { %v1178_v0 = vpack.c.bf16 %v1177_v63, %v1177_v63  ;;  %v6057_v63 = vld [vmem:[%s6968_s3] ss:$8 sps:$4 sm:$0xff]  }
0x1004   : > { %1180 = vrot.lane.b32.xlu1 %v1178_v0, %s5709_s21  ;;  %v6063_v0 = vld [vmem:[%s6968_s3 + $0x14] ss:$8 sps:$4 sm:$0xff]  }
0x1076   : > { %v1181_v56 = vpop.permute.xlu1 %1180 }
0x1077   : > { %4933 = vmatmul.mubr.msk.bf16.vlgmr.msra.gmra.mxu0 %vm538_vm2, %v1181_v56 }
0x1078   : > { %1430 = vmatpush1.bf16.msra.mxu0 %v5796_v4  ;;  %1449 = vmatprep.mubr.bf16.mxu0 %v5707_v2 }
0x1079   : > { %1431 = vmatprep.subr.bf16.mxu0 %v5801_v5 }
0x107c   : > { %1432 = vmatpush1.bf16.msra.mxu0 %v5808_v6 }
0x107d   : > { %1637 = vmatprep.subr.bf16.mxu0 %v5791_v3 }
0x1137   : > { %v1219_v1 = vpop.f32.mrf.mxu0 }
0x1138   : > { %v1229_v9 = vrot.slane %v1219_v1, 4 }
0x1139   : > { %v1221_v13 = vpop.f32.mrf.mxu0 }
0x113a   : > { %v1231_v4 = vadd.f32 %v1229_v9, %v1227_v8  ;;  %v1235_v18 = vrot.slane %v1221_v13, 4 }
0x113b   : > { %v1223_v5 = vpop.f32.mrf.mxu0 }
0x113c   : > { %5243 = vtanh.f32 %v1231_v4  ;;  %v1237_v3 = vadd.f32 %v1235_v18, %v1233_v16  ;;  %v4934_v20 = vmul.f32 -1.442695, %v1231_v4 }
0x113d   : > { %v1224_v6 = vpop.f32.mrf.mxu0 }
0x113e   : > { %5245 = vtanh.f32 %v1237_v3  ;;  %v4935_v23 = vmul.f32 -1.442695, %v1237_v3 }
0x113f   : > { %5247 = vpow2.f32 %v4934_v20 }
0x1140   : > { %5249 = vpow2.f32 %v4935_v23 }
0x1149   : > { %v5244_v19 = vpop.eup %5243 }
0x114a   : > { %1250 = vrot.lane.b32.xlu0 %v5244_v19, %s5708_s20 }
0x114b   : > { %v5246_v21 = vpop.eup %5245 }
0x114c   : > { %1277 = vrot.lane.b32.xlu1 %v5246_v21, %s5708_s20  ;;  %v5248_v24 = vpop.eup %5247 }
0x114d   : > { %v5250_v25 = vpop.eup %5249  ;;  %v1241_v26 = vadd.f32 1.0, %v5248_v24 }
0x114e   : > { %v1268_v29 = vadd.f32 1.0, %v5250_v25 }
0x114f   : > { %5251 = vrcp.f32 %v1241_v26 }
0x1150   : > { %5253 = vrcp.f32 %v1268_v29 }
0x115c   : > { %v5252_v31 = vpop.eup %5251 }
0x115d   : > { %v5254_v34 = vpop.eup %5253  ;;  %v1248_v37 = vmul.f32 %v5252_v31, %v1246_v15 }
0x115e   : > { %v1275_v41 = vmul.f32 %v5254_v34, %v1273_v39 }
0x11bc   : > { %v1251_v32 = vpop.permute.xlu0 %1250 }
0x11bd   : > { %v1253_v33 = vmul.f32 %v5252_v31, %v1251_v32 }
0x11be   : > { %v1278_v35 = vpop.permute.xlu1 %1277 }
0x11bf   : > { %1255 = vrot.lane.b32.xlu0 %v1253_v33, %s5709_s21  ;;  %v1280_v36 = vmul.f32 %v5254_v34, %v1278_v35 }
0x11c1   : > { %1282 = vrot.lane.b32.xlu1 %v1280_v36, %s5709_s21 }
0x1231   : > { %v1256_v40 = vpop.permute.xlu0 %1255 }
0x1232   : > { %v1258_v38 = vadd.f32 %v1256_v40, %v1248_v37  ;;  %v2287_v40 = vrot.slane %v5998_v54, 4 }
0x1233   : > { %v1283_v42 = vpop.permute.xlu1 %1282 }
0x1234   : > { %5255 = vtanh.f32 %v1258_v38  ;;  %v1285_v43 = vadd.f32 %v1283_v42, %v1275_v41  ;;  %v2310_v42 = vrot.slane %v6000_v57, 4 }
0x1236   : > { %5257 = vtanh.f32 %v1285_v43  ;;  %v6097_v54 = vsel %vm637_vm1, %v2310_v42, %v5980_v17  ;;  %v6114_v17 = vld [vmem:[#allocation2 + $0x10] sm:$0x3] }
0x1241   : > { %v5256_v44 = vpop.eup %5255 }
0x1242   : > { %1261 = vrot.lane.b32.xlu0 %v5256_v44, %s5708_s20 }
0x1243   : > { %v5258_v45 = vpop.eup %5257 }
0x1244   : > { %1288 = vrot.lane.b32.xlu1 %v5258_v45, %s5708_s20 }
0x12b4   : > { %v1262_v46 = vpop.permute.xlu0 %1261 }
0x12b5   : > { %v6028_v47 = vmul.f32 %v5252_v31, %v1262_v46 }
0x12b6   : > { %v1289_v48 = vpop.permute.xlu1 %1288 }
0x12b7   : > { %v6030_v51 = vmul.f32 %v5254_v34, %v1289_v48  ;;  %v1293_v52 = vrot.slane %v6028_v47, 4 }
0x12b9   : > { %v1296_v53 = vrot.slane %v6030_v51, 4  ;;  %v6116_v51 = vld [vmem:[#allocation2 + $0xc] sm:$0xc] }
0x12bb   : > { %v1298_v55 = vsel %vm637_vm1, %v1293_v52, %v1296_v53 }
0x12bc   : > { %v1299_v58 = vpack.c.bf16 %v1298_v55, %v1298_v55 }
0x12be   : > { %1301 = vrot.lane.b32.xlu0 %v1299_v58, %s5709_s21 }
0x1330   : > { %v1302_v59 = vpop.permute.xlu0 %1301 }
0x1331   : > { %4936 = vmatmul.mubr.msk.bf16.vlgmr.msra.gmra.mxu1 %vm538_vm2, %v1302_v59 }
0x1332   : > { %1539 = vmatpush1.bf16.msra.mxu1 %v6044_v60  ;;  %1558 = vmatprep.mubr.bf16.mxu1 %v5707_v2 }
0x1333   : > { %1540 = vmatprep.subr.bf16.mxu1 %v6051_v62 }
0x1336   : > { %1541 = vmatpush1.bf16.msra.mxu1 %v6057_v63 }
0x1337   : > { %1758 = vmatprep.subr.bf16.mxu1 %v6063_v0 }
0x13f1   : > { %v1340_v56 = vpop.f32.mrf.mxu1 }
0x13f2   : > { %v1348_v1 = vrot.slane %v1340_v56, 4 }
0x13f3   : > { %v1342_v9 = vpop.f32.mrf.mxu1 }
0x13f4   : > { %v1350_v13 = vadd.f32 %v1348_v1, %v1227_v8  ;;  %v1352_v4 = vrot.slane %v1342_v9, 4  ;;  %v1462_v9 = vunpack.c.l.bf16 %v6116_v51 }
0x13f5   : > { %v1344_v18 = vpop.f32.mrf.mxu1 }
0x13f6   : > { %5259 = vtanh.f32 %v1350_v13  ;;  %v1354_v5 = vadd.f32 %v1352_v4, %v1233_v16  ;;  %v4937_v21 = vmul.f32 -1.442695, %v1350_v13 }
0x13f7   : > { %v1345_v3 = vpop.f32.mrf.mxu1 }
0x13f8   : > { %5261 = vtanh.f32 %v1354_v5  ;;  %v4938_v20 = vmul.f32 -1.442695, %v1354_v5 }
0x13f9   : > { %5263 = vpow2.f32 %v4937_v21 }
0x13fa   : > { %5265 = vpow2.f32 %v4938_v20 }
0x1403   : > { %v5260_v6 = vpop.eup %5259 }
0x1404   : > { %1364 = vrot.lane.b32.xlu1 %v5260_v6, %s5708_s20 }
0x1405   : > { %v5262_v19 = vpop.eup %5261 }
0x1406   : > { %1388 = vrot.lane.b32.xlu0 %v5262_v19, %s5708_s20  ;;  %v5264_v61 = vpop.eup %5263 }
0x1407   : > { %v5266_v8 = vpop.eup %5265  ;;  %v1358_v23 = vadd.f32 1.0, %v5264_v61 }
0x1408   : > { %v1382_v24 = vadd.f32 1.0, %v5266_v8 }
0x1409   : > { %5267 = vrcp.f32 %v1358_v23 }
0x140a   : > { %5269 = vrcp.f32 %v1382_v24 }
0x1416   : > { %v5268_v7 = vpop.eup %5267 }
0x1417   : > { %v5270_v26 = vpop.eup %5269  ;;  %v1362_v32 = vmul.f32 %v5268_v7, %v1258_v38 }
0x1418   : > { %v1386_v35 = vmul.f32 %v5270_v26, %v1285_v43  ;;  %v6086_v43 = vsel %vm637_vm1, %v5978_v22, %v2287_v40 }
0x1476   : > { %v1365_v16 = vpop.permute.xlu1 %1364 }
0x1477   : > { %v1367_v25 = vmul.f32 %v5268_v7, %v1365_v16 }
0x1478   : > { %v1389_v29 = vpop.permute.xlu0 %1388 }
0x1479   : > { %1369 = vrot.lane.b32.xlu1 %v1367_v25, %s5709_s21  ;;  %v1391_v31 = vmul.f32 %v5270_v26, %v1389_v29 }
0x147b   : > { %1393 = vrot.lane.b32.xlu0 %v1391_v31, %s5709_s21 }
0x14eb   : > { %v1370_v33 = vpop.permute.xlu1 %1369 }
0x14ec   : > { %v6074_v34 = vadd.f32 %v1370_v33, %v1362_v32 }
0x14ed   : > { %v1394_v36 = vpop.permute.xlu0 %1393 }
0x14ee   : > { %5271 = vtanh.f32 %v6074_v34  ;;  %v6077_v15 = vadd.f32 %v1394_v36, %v1386_v35  ;;  %v1472_v31 = vrot.slane %v6074_v34, 4 }
0x14f0   : > { %5273 = vtanh.f32 %v6077_v15  ;;  %v1499_v33 = vrot.slane %v6077_v15, 4 }
0x14fb   : > { %v5272_v37 = vpop.eup %5271 }
0x14fc   : > { %1375 = vrot.lane.b32.xlu1 %v5272_v37, %s5708_s20 }
0x14fd   : > { %v5274_v39 = vpop.eup %5273 }
0x14fe   : > { %1399 = vrot.lane.b32.xlu0 %v5274_v39, %s5708_s20 }
0x156e   : > { %v1376_v38 = vpop.permute.xlu1 %1375 }
0x156f   : > { %v1378_v41 = vmul.f32 %v5268_v7, %v1376_v38 }
0x1570   : > { %v1400_v45 = vpop.permute.xlu0 %1399 }
0x1571   : > { %v6091_v44 = vsel %vm637_vm1, %v1293_v52, %v1378_v41  ;;  %v1402_v48 = vmul.f32 %v5270_v26, %v1400_v45  ;;  %v1404_v55 = vrot.slane %v1378_v41, 4 }
0x1572   : > { %v2324_v46 = vpack.c.bf16 %v6091_v44, %v6086_v43 }
0x1573   : > { %v1407_v57 = vrot.slane %v1402_v48, 4  ;;  %v6102_v22 = vsel %vm637_vm1, %v1402_v48, %v1296_v53  ;;  %v1459_v53 = vunpack.c.l.bf16 %v6114_v17 }
0x1574   : > { %v2333_v47 = vpack.c.bf16 %v6097_v54, %v6102_v22 }
0x1575   : > { %v1409_v52 = vsel %vm637_vm1, %v1404_v55, %v1407_v57 }
0x1576   : > { %v1410_v58 = vpack.c.bf16 %v1409_v52, %v1409_v52 }
0x1578   : > { %1412 = vrot.lane.b32.xlu1 %v1410_v58, %s5709_s21 }
0x15ea   : > { %v1413_v59 = vpop.permute.xlu1 %1412 }
0x15eb   : > { %4939 = vmatmul.mubr.msk.bf16.vlgmr.msra.gmra.mxu0 %vm538_vm2, %v1413_v59 }
0x15ec   : > { %1638 = vmatpush1.bf16.msra.mxu0 %v6044_v60  ;;  %1657 = vmatprep.mubr.bf16.mxu0 %v5707_v2 }
0x15ed   : > { %1639 = vmatprep.subr.bf16.mxu0 %v6051_v62 }
0x15f0   : > { %1640 = vmatpush1.bf16.msra.mxu0 %v6057_v63 }
0x15f1   : > { %1869 = vmatprep.subr.bf16.mxu0 %v6063_v0 }
0x16ab   : > { %v1451_v56 = vpop.f32.mrf.mxu0 }
0x16ac   : > { %v1460_v1 = vadd.f32 %v1459_v53, %v1451_v56 }
0x16ad   : > { %v1453_v13 = vpop.f32.mrf.mxu0 }
0x16ae   : > { %5275 = vtanh.f32 %v1460_v1  ;;  %v1463_v4 = vadd.f32 %v1462_v9, %v1453_v13  ;;  %v4940_v19 = vmul.f32 -1.442695, %v1460_v1 }
0x16af   : > { %v1455_v18 = vpop.f32.mrf.mxu0 }
0x16b0   : > { %5277 = vtanh.f32 %v1463_v4  ;;  %v4941_v21 = vmul.f32 -1.442695, %v1463_v4 }
0x16b1   : > { %v1456_v5 = vpop.f32.mrf.mxu0  ;;  %5279 = vpow2.f32 %v4940_v19 }
0x16b2   : > { %5281 = vpow2.f32 %v4941_v21 }
0x16bb   : > { %v5276_v3 = vpop.eup %5275 }
0x16bc   : > { %1476 = vrot.lane.b32.xlu0 %v5276_v3, %s5708_s20 }
0x16bd   : > { %v5278_v6 = vpop.eup %5277 }
0x16be   : > { %1503 = vrot.lane.b32.xlu1 %v5278_v6, %s5708_s20  ;;  %v5280_v20 = vpop.eup %5279 }
0x16bf   : > { %v5282_v61 = vpop.eup %5281  ;;  %v1467_v8 = vadd.f32 1.0, %v5280_v20 }
0x16c0   : > { %v1494_v23 = vadd.f32 1.0, %v5282_v61 }
0x16c1   : > { %5283 = vrcp.f32 %v1467_v8 }
0x16c2   : > { %5285 = vrcp.f32 %v1494_v23 }
0x16ce   : > { %v5284_v24 = vpop.eup %5283 }
0x16cf   : > { %v5286_v25 = vpop.eup %5285  ;;  %v1474_v32 = vmul.f32 %v5284_v24, %v1472_v31 }
0x16d0   : > { %v1501_v37 = vmul.f32 %v5286_v25, %v1499_v33 }
0x172e   : > { %v1477_v7 = vpop.permute.xlu0 %1476 }
0x172f   : > { %v1479_v16 = vmul.f32 %v5284_v24, %v1477_v7 }
0x1730   : > { %v1504_v26 = vpop.permute.xlu1 %1503 }
0x1731   : > { %1481 = vrot.lane.b32.xlu0 %v1479_v16, %s5709_s21  ;;  %v1506_v29 = vmul.f32 %v5286_v25, %v1504_v26 }
0x1733   : > { %1508 = vrot.lane.b32.xlu1 %v1506_v29, %s5709_s21 }
0x17a3   : > { %v1482_v35 = vpop.permute.xlu0 %1481 }
0x17a4   : > { %v1484_v36 = vadd.f32 %v1482_v35, %v1474_v32 }
0x17a5   : > { %v1509_v39 = vpop.permute.xlu1 %1508 }
0x17a6   : > { %5287 = vtanh.f32 %v1484_v36  ;;  %v1511_v40 = vadd.f32 %v1509_v39, %v1501_v37 }
0x17a8   : > { %5289 = vtanh.f32 %v1511_v40 }
0x17b3   : > { %v5288_v38 = vpop.eup %5287 }
0x17b4   : > { %1487 = vrot.lane.b32.xlu0 %v5288_v38, %s5708_s20  ;;  %v6162_v38 = vld [vmem:[#allocation2 + $0x10] sm:$0xc] }
0x17b5   : > { %v5290_v41 = vpop.eup %5289 }
0x17b6   : > { %1514 = vrot.lane.b32.xlu1 %v5290_v41, %s5708_s20 }
0x1826   : > { %v1488_v42 = vpop.permute.xlu0 %1487 }
0x1827   : > { %v6128_v48 = vmul.f32 %v5284_v24, %v1488_v42  ;;  %v6164_v42 = vld [vmem:[#allocation2 + $0xc] sm:$0x3] }
0x1828   : > { %v1515_v45 = vpop.permute.xlu1 %1514 }
0x1829   : > { %v6130_v34 = vmul.f32 %v5286_v25, %v1515_v45  ;;  %v1667_v45 = vunpack.c.l.bf16 %v6162_v38 }
0x182b   : > { %v1518_v15 = vsel %vm637_vm1, %v6128_v48, %v6130_v34 }
0x182c   : > { %v1519_v55 = vpack.c.bf16 %v1518_v15, %v1518_v15 }
0x182e   : > { %1521 = vrot.lane.b32.xlu0 %v1519_v55, %s5709_s21 }
0x18a0   : > { %v1522_v57 = vpop.permute.xlu0 %1521 }
0x18a1   : > { %4942 = vmatmul.mubr.msk.bf16.vlgmr.msra.gmra.mxu1 %vm538_vm2, %v1522_v57 }
0x18a2   : > { %1759 = vmatpush1.bf16.msra.mxu1 %v6044_v60  ;;  %1778 = vmatprep.mubr.bf16.mxu1 %v5707_v2 }
0x18a3   : > { %1760 = vmatprep.subr.bf16.mxu1 %v6051_v62 }
0x18a6   : > { %1761 = vmatpush1.bf16.msra.mxu1 %v6057_v63 }
0x18a7   : > { %1978 = vmatprep.subr.bf16.mxu1 %v6063_v0 }
0x1961   : > { %v1560_v52 = vpop.f32.mrf.mxu1 }
0x1962   : > { %v1567_v58 = vadd.f32 %v1560_v52, %v1459_v53  ;;  %v1673_v52 = vunpack.c.l.bf16 %v6164_v42 }
0x1963   : > { %v1562_v59 = vpop.f32.mrf.mxu1 }
0x1964   : > { %5291 = vtanh.f32 %v1567_v58  ;;  %v1568_v17 = vadd.f32 %v1562_v59, %v1462_v9  ;;  %v4943_v4 = vmul.f32 -1.442695, %v1567_v58 }
0x1965   : > { %v1564_v51 = vpop.f32.mrf.mxu1 }
0x1966   : > { %5293 = vtanh.f32 %v1568_v17  ;;  %v4944_v18 = vmul.f32 -1.442695, %v1568_v17 }
0x1967   : > { %v1565_v56 = vpop.f32.mrf.mxu1  ;;  %5295 = vpow2.f32 %v4943_v4 }
0x1968   : > { %5297 = vpow2.f32 %v4944_v18 }
0x1971   : > { %v5292_v1 = vpop.eup %5291 }
0x1972   : > { %1578 = vrot.lane.b32.xlu1 %v5292_v1, %s5708_s20 }
0x1973   : > { %v5294_v13 = vpop.eup %5293 }
0x1974   : > { %1602 = vrot.lane.b32.xlu0 %v5294_v13, %s5708_s20  ;;  %v5296_v5 = vpop.eup %5295 }
0x1975   : > { %v5298_v3 = vpop.eup %5297  ;;  %v1572_v6 = vadd.f32 1.0, %v5296_v5 }
0x1976   : > { %v1596_v53 = vadd.f32 1.0, %v5298_v3 }
0x1977   : > { %5299 = vrcp.f32 %v1572_v6 }
0x1978   : > { %5301 = vrcp.f32 %v1596_v53 }
0x1984   : > { %v5300_v9 = vpop.eup %5299 }
0x1985   : > { %v5302_v20 = vpop.eup %5301  ;;  %v1576_v23 = vmul.f32 %v5300_v9, %v1484_v36 }
0x1986   : > { %v1600_v16 = vmul.f32 %v5302_v20, %v1511_v40 }
0x19e4   : > { %v1579_v19 = vpop.permute.xlu1 %1578 }
0x19e5   : > { %v1581_v21 = vmul.f32 %v5300_v9, %v1579_v19 }
0x19e6   : > { %v1603_v61 = vpop.permute.xlu0 %1602 }
0x19e7   : > { %1583 = vrot.lane.b32.xlu1 %v1581_v21, %s5709_s21  ;;  %v1605_v8 = vmul.f32 %v5302_v20, %v1603_v61 }
0x19e9   : > { %1607 = vrot.lane.b32.xlu0 %v1605_v8, %s5709_s21 }
0x1a59   : > { %v1584_v24 = vpop.permute.xlu1 %1583 }
0x1a5a   : > { %v1586_v7 = vadd.f32 %v1584_v24, %v1576_v23 }
0x1a5b   : > { %v1608_v25 = vpop.permute.xlu0 %1607 }
0x1a5c   : > { %5303 = vtanh.f32 %v1586_v7  ;;  %v1610_v26 = vadd.f32 %v1608_v25, %v1600_v16  ;;  %v1686_v8 = vrot.slane %v1586_v7, 4 }
0x1a5e   : > { %5305 = vtanh.f32 %v1610_v26  ;;  %v1713_v24 = vrot.slane %v1610_v26, 4 }
0x1a69   : > { %v5304_v29 = vpop.eup %5303 }
0x1a6a   : > { %1589 = vrot.lane.b32.xlu1 %v5304_v29, %s5708_s20 }
0x1a6b   : > { %v5306_v31 = vpop.eup %5305 }
0x1a6c   : > { %1613 = vrot.lane.b32.xlu0 %v5306_v31, %s5708_s20 }
0x1adc   : > { %v1590_v32 = vpop.permute.xlu1 %1589 }
0x1add   : > { %v6148_v35 = vmul.f32 %v5300_v9, %v1590_v32 }
0x1ade   : > { %v1614_v33 = vpop.permute.xlu0 %1613 }
0x1adf   : > { %v6150_v37 = vmul.f32 %v5302_v20, %v1614_v33 }
0x1ae1   : > { %v1617_v36 = vsel %vm637_vm1, %v6148_v35, %v6150_v37 }
0x1ae2   : > { %v1618_v39 = vpack.c.bf16 %v1617_v36, %v1617_v36 }
0x1ae4   : > { %1620 = vrot.lane.b32.xlu1 %v1618_v39, %s5709_s21 }
0x1b56   : > { %v1621_v40 = vpop.permute.xlu1 %1620 }
0x1b57   : > { %4945 = vmatmul.mubr.msk.bf16.vlgmr.msra.gmra.mxu0 %vm538_vm2, %v1621_v40 }
0x1b58   : > { %1870 = vmatpush1.bf16.msra.mxu0 %v6044_v60  ;;  %1889 = vmatprep.mubr.bf16.mxu0 %v5707_v2 }
0x1b59   : > { %1871 = vmatprep.subr.bf16.mxu0 %v6051_v62 }
0x1b5c   : > { %1872 = vmatpush1.bf16.msra.mxu0 %v6057_v63 }
0x1b5d   : > { %2077 = vmatprep.subr.bf16.mxu0 %v6063_v0 }
0x1c17   : > { %v1659_v41 = vpop.f32.mrf.mxu0 }
0x1c18   : > { %v1669_v15 = vrot.slane %v1659_v41, 4 }
0x1c19   : > { %v1661_v55 = vpop.f32.mrf.mxu0 }
0x1c1a   : > { %v1671_v57 = vadd.f32 %v1669_v15, %v1667_v45  ;;  %v1675_v58 = vrot.slane %v1661_v55, 4 }
0x1c1b   : > { %v1663_v59 = vpop.f32.mrf.mxu0 }
0x1c1c   : > { %5307 = vtanh.f32 %v1671_v57  ;;  %v1677_v17 = vadd.f32 %v1675_v58, %v1673_v52  ;;  %v4946_v13 = vmul.f32 -1.442695, %v1671_v57 }
0x1c1d   : > { %v1664_v51 = vpop.f32.mrf.mxu0 }
0x1c1e   : > { %5309 = vtanh.f32 %v1677_v17  ;;  %v4947_v4 = vmul.f32 -1.442695, %v1677_v17 }
0x1c1f   : > { %5311 = vpow2.f32 %v4946_v13 }
0x1c20   : > { %5313 = vpow2.f32 %v4947_v4 }
0x1c29   : > { %v5308_v56 = vpop.eup %5307 }
0x1c2a   : > { %1690 = vrot.lane.b32.xlu0 %v5308_v56, %s5708_s20 }
0x1c2b   : > { %v5310_v1 = vpop.eup %5309 }
0x1c2c   : > { %1717 = vrot.lane.b32.xlu1 %v5310_v1, %s5708_s20  ;;  %v5312_v18 = vpop.eup %5311 }
0x1c2d   : > { %v5314_v5 = vpop.eup %5313  ;;  %v1681_v3 = vadd.f32 1.0, %v5312_v18 }
0x1c2e   : > { %v1708_v6 = vadd.f32 1.0, %v5314_v5 }
0x1c2f   : > { %5315 = vrcp.f32 %v1681_v3 }
0x1c30   : > { %5317 = vrcp.f32 %v1708_v6 }
0x1c3c   : > { %v5316_v53 = vpop.eup %5315 }
0x1c3d   : > { %v5318_v21 = vpop.eup %5317  ;;  %v1688_v23 = vmul.f32 %v5316_v53, %v1686_v8 }
0x1c3e   : > { %v1715_v29 = vmul.f32 %v5318_v21, %v1713_v24 }
0x1c9c   : > { %v1691_v9 = vpop.permute.xlu0 %1690 }
0x1c9d   : > { %v1693_v19 = vmul.f32 %v5316_v53, %v1691_v9 }
0x1c9e   : > { %v1718_v20 = vpop.permute.xlu1 %1717 }
0x1c9f   : > { %1695 = vrot.lane.b32.xlu0 %v1693_v19, %s5709_s21  ;;  %v1720_v61 = vmul.f32 %v5318_v21, %v1718_v20 }
0x1ca1   : > { %1722 = vrot.lane.b32.xlu1 %v1720_v61, %s5709_s21 }
0x1d11   : > { %v1696_v16 = vpop.permute.xlu0 %1695 }
0x1d12   : > { %v1698_v25 = vadd.f32 %v1696_v16, %v1688_v23 }
0x1d13   : > { %v1723_v31 = vpop.permute.xlu1 %1722 }
0x1d14   : > { %5319 = vtanh.f32 %v1698_v25  ;;  %v1725_v32 = vadd.f32 %v1723_v31, %v1715_v29 }
0x1d16   : > { %5321 = vtanh.f32 %v1725_v32 }
0x1d21   : > { %v5320_v33 = vpop.eup %5319 }
0x1d22   : > { %1701 = vrot.lane.b32.xlu0 %v5320_v33, %s5708_s20 }
0x1d23   : > { %v5322_v36 = vpop.eup %5321 }
0x1d24   : > { %1728 = vrot.lane.b32.xlu1 %v5322_v36, %s5708_s20 }
0x1d94   : > { %v1702_v39 = vpop.permute.xlu0 %1701 }
0x1d95   : > { %v6178_v40 = vmul.f32 %v5316_v53, %v1702_v39  ;;  %v2290_v39 = vrot.slane %v6148_v35, 4 }
0x1d96   : > { %v1729_v41 = vpop.permute.xlu1 %1728 }
0x1d97   : > { %v6180_v7 = vmul.f32 %v5318_v21, %v1729_v41  ;;  %v1733_v26 = vrot.slane %v6178_v40, 4  ;;  %v2307_v41 = vrot.slane %v6150_v37, 4 }
0x1d99   : > { %v1736_v15 = vrot.slane %v6180_v7, 4  ;;  %v6223_v35 = vsel %vm637_vm1, %v2307_v41, %v6130_v34  ;;  %v6239_v34 = vld [vmem:[#allocation2 + $0x18] sm:$0x3]  ;;  %v6241_v7 = vld [vmem:[#allocation2 + $0x4] sm:$0xc] }
0x1d9b   : > { %v1738_v55 = vsel %vm637_vm1, %v1733_v26, %v1736_v15 }
0x1d9c   : > { %v1739_v57 = vpack.c.bf16 %v1738_v55, %v1738_v55 }
0x1d9e   : > { %1741 = vrot.lane.b32.xlu0 %v1739_v57, %s5709_s21 }
0x1e10   : > { %v1742_v58 = vpop.permute.xlu0 %1741 }
0x1e11   : > { %4948 = vmatmul.mubr.msk.bf16.vlgmr.msra.gmra.mxu1 %vm538_vm2, %v1742_v58 }
0x1e12   : > { %1979 = vmatpush1.bf16.msra.mxu1 %v6044_v60  ;;  %1998 = vmatprep.mubr.bf16.mxu1 %v5707_v2 }
0x1e13   : > { %1980 = vmatprep.subr.bf16.mxu1 %v6051_v62 }
0x1e16   : > { %1981 = vmatpush1.bf16.msra.mxu1 %v6057_v63 }
0x1e17   : > { %2198 = vmatprep.subr.bf16.mxu1 %v6063_v0 }
0x1ed1   : > { %v1780_v59 = vpop.f32.mrf.mxu1 }
0x1ed2   : > { %v1788_v17 = vrot.slane %v1780_v59, 4 }
0x1ed3   : > { %v1782_v51 = vpop.f32.mrf.mxu1 }
0x1ed4   : > { %v1790_v56 = vadd.f32 %v1788_v17, %v1667_v45  ;;  %v1792_v1 = vrot.slane %v1782_v51, 4 }
0x1ed5   : > { %v1784_v13 = vpop.f32.mrf.mxu1 }
0x1ed6   : > { %5323 = vtanh.f32 %v1790_v56  ;;  %v1794_v4 = vadd.f32 %v1792_v1, %v1673_v52  ;;  %v4949_v0 = vmul.f32 -1.442695, %v1790_v56 }
0x1ed7   : > { %v1785_v18 = vpop.f32.mrf.mxu1 }
0x1ed8   : > { %5325 = vtanh.f32 %v1794_v4  ;;  %v4950_v6 = vmul.f32 -1.442695, %v1794_v4  ;;  %v1902_v18 = vunpack.c.l.bf16 %v6241_v7 }
0x1ed9   : > { %5327 = vpow2.f32 %v4949_v0 }
0x1eda   : > { %5329 = vpow2.f32 %v4950_v6 }
0x1ee3   : > { %v5324_v5 = vpop.eup %5323 }
0x1ee4   : > { %1804 = vrot.lane.b32.xlu1 %v5324_v5, %s5708_s20 }
0x1ee5   : > { %v5326_v3 = vpop.eup %5325 }
0x1ee6   : > { %1828 = vrot.lane.b32.xlu0 %v5326_v3, %s5708_s20  ;;  %v5328_v38 = vpop.eup %5327 }
0x1ee7   : > { %v5330_v45 = vpop.eup %5329  ;;  %v1798_v53 = vadd.f32 1.0, %v5328_v38 }
0x1ee8   : > { %v1822_v9 = vadd.f32 1.0, %v5330_v45 }
0x1ee9   : > { %5331 = vrcp.f32 %v1798_v53 }
0x1eea   : > { %5333 = vrcp.f32 %v1822_v9 }
0x1ef6   : > { %v5332_v42 = vpop.eup %5331 }
0x1ef7   : > { %v5334_v21 = vpop.eup %5333  ;;  %v1802_v8 = vmul.f32 %v5332_v42, %v1698_v25 }
0x1ef8   : > { %v1826_v16 = vmul.f32 %v5334_v21, %v1725_v32  ;;  %v6214_v32 = vsel %vm637_vm1, %v6128_v48, %v2290_v39 }
0x1f56   : > { %v1805_v52 = vpop.permute.xlu1 %1804 }
0x1f57   : > { %v1807_v19 = vmul.f32 %v5332_v42, %v1805_v52 }
0x1f58   : > { %v1829_v20 = vpop.permute.xlu0 %1828 }
0x1f59   : > { %1809 = vrot.lane.b32.xlu1 %v1807_v19, %s5709_s21  ;;  %v1831_v61 = vmul.f32 %v5334_v21, %v1829_v20 }
0x1f5b   : > { %1833 = vrot.lane.b32.xlu0 %v1831_v61, %s5709_s21 }
0x1fcb   : > { %v1810_v23 = vpop.permute.xlu1 %1809 }
0x1fcc   : > { %v6202_v24 = vadd.f32 %v1810_v23, %v1802_v8 }
0x1fcd   : > { %v1834_v29 = vpop.permute.xlu0 %1833 }
0x1fce   : > { %5335 = vtanh.f32 %v6202_v24  ;;  %v6205_v31 = vadd.f32 %v1834_v29, %v1826_v16 }
0x1fd0   : > { %5337 = vtanh.f32 %v6205_v31  ;;  %v1939_v39 = vrot.slane %v6205_v31, 4 }
0x1fdb   : > { %v5336_v33 = vpop.eup %5335 }
0x1fdc   : > { %1815 = vrot.lane.b32.xlu1 %v5336_v33, %s5708_s20  ;;  %v1912_v33 = vrot.slane %v6202_v24, 4 }
0x1fdd   : > { %v5338_v36 = vpop.eup %5337 }
0x1fde   : > { %1839 = vrot.lane.b32.xlu0 %v5338_v36, %s5708_s20 }
0x204e   : > { %v1816_v25 = vpop.permute.xlu1 %1815 }
0x204f   : > { %v1818_v40 = vmul.f32 %v5332_v42, %v1816_v25 }
0x2050   : > { %v1840_v57 = vpop.permute.xlu0 %1839 }
0x2051   : > { %v6217_v55 = vsel %vm637_vm1, %v1733_v26, %v1818_v40  ;;  %v1842_v59 = vmul.f32 %v5334_v21, %v1840_v57  ;;  %v1844_v17 = vrot.slane %v1818_v40, 4 }
0x2052   : > { %v2325_v58 = vpack.c.bf16 %v6217_v55, %v6214_v32  ;;  %v6360_v32 = vld [vmem:[%s6972_s7 + $0x14] ss:$8 sps:$4 sm:$0xff]  }
0x2053   : > { %v1847_v51 = vrot.slane %v1842_v59, 4  ;;  %v6228_v37 = vsel %vm637_vm1, %v1842_v59, %v1736_v15  ;;  %v1899_v15 = vunpack.c.l.bf16 %v6239_v34 }
0x2054   : > { %v2332_v48 = vpack.c.bf16 %v6223_v35, %v6228_v37  ;;  %v6402_v35 = vld [vmem:[%s6972_s7] ss:$8 sps:$4 sm:$0xff]  }
0x2055   : > { %v1849_v26 = vsel %vm637_vm1, %v1844_v17, %v1847_v51 }
0x2056   : > { %v1850_v56 = vpack.c.bf16 %v1849_v26, %v1849_v26 }
0x2058   : > { %1852 = vrot.lane.b32.xlu1 %v1850_v56, %s5709_s21 }
0x20ca   : > { %v1853_v1 = vpop.permute.xlu1 %1852 }
0x20cb   : > { %4951 = vmatmul.mubr.msk.bf16.vlgmr.msra.gmra.mxu0 %vm538_vm2, %v1853_v1 }
0x20cc   : > { %2078 = vmatpush1.bf16.msra.mxu0 %v6044_v60  ;;  %2097 = vmatprep.mubr.bf16.mxu0 %v5707_v2 }
0x20cd   : > { %2079 = vmatprep.subr.bf16.mxu0 %v6051_v62 }
0x20d0   : > { %2080 = vmatpush1.bf16.msra.mxu0 %v6057_v63 }
0x218b   : > { %v1891_v13 = vpop.f32.mrf.mxu0 }
0x218c   : > { %v1900_v4 = vadd.f32 %v1899_v15, %v1891_v13 }
0x218d   : > { %v1893_v5 = vpop.f32.mrf.mxu0 }
0x218e   : > { %5339 = vtanh.f32 %v1900_v4  ;;  %v1903_v3 = vadd.f32 %v1902_v18, %v1893_v5  ;;  %v4952_v53 = vmul.f32 -1.442695, %v1900_v4 }
0x218f   : > { %v1895_v0 = vpop.f32.mrf.mxu0 }
0x2190   : > { %5341 = vtanh.f32 %v1903_v3  ;;  %v4953_v9 = vmul.f32 -1.442695, %v1903_v3 }
0x2191   : > { %v1896_v6 = vpop.f32.mrf.mxu0  ;;  %5343 = vpow2.f32 %v4952_v53 }
0x2192   : > { %5345 = vpow2.f32 %v4953_v9 }
0x219b   : > { %v5340_v38 = vpop.eup %5339 }
0x219c   : > { %1916 = vrot.lane.b32.xlu0 %v5340_v38, %s5708_s20 }
0x219d   : > { %v5342_v45 = vpop.eup %5341 }
0x219e   : > { %1943 = vrot.lane.b32.xlu1 %v5342_v45, %s5708_s20  ;;  %v5344_v42 = vpop.eup %5343 }
0x219f   : > { %v5346_v52 = vpop.eup %5345  ;;  %v1907_v19 = vadd.f32 1.0, %v5344_v42 }
0x21a0   : > { %v1934_v21 = vadd.f32 1.0, %v5346_v52 }
0x21a1   : > { %5347 = vrcp.f32 %v1907_v19 }
0x21a2   : > { %5349 = vrcp.f32 %v1934_v21 }
0x21ae   : > { %v5348_v20 = vpop.eup %5347 }
0x21af   : > { %v5350_v23 = vpop.eup %5349  ;;  %v1914_v36 = vmul.f32 %v5348_v20, %v1912_v33 }
0x21b0   : > { %v1941_v41 = vmul.f32 %v5350_v23, %v1939_v39 }
0x220e   : > { %v1917_v61 = vpop.permute.xlu0 %1916 }
0x220f   : > { %v1919_v8 = vmul.f32 %v5348_v20, %v1917_v61 }
0x2210   : > { %v1944_v16 = vpop.permute.xlu1 %1943 }
0x2211   : > { %1921 = vrot.lane.b32.xlu0 %v1919_v8, %s5709_s21  ;;  %v1946_v29 = vmul.f32 %v5350_v23, %v1944_v16 }
0x2213   : > { %1948 = vrot.lane.b32.xlu1 %v1946_v29, %s5709_s21 }
0x2283   : > { %v1922_v25 = vpop.permute.xlu0 %1921 }
0x2284   : > { %v1924_v40 = vadd.f32 %v1922_v25, %v1914_v36 }
0x2285   : > { %v1949_v57 = vpop.permute.xlu1 %1948 }
0x2286   : > { %5351 = vtanh.f32 %v1924_v40  ;;  %v1951_v59 = vadd.f32 %v1949_v57, %v1941_v41 }
0x2288   : > { %5353 = vtanh.f32 %v1951_v59 }
0x2293   : > { %v5352_v17 = vpop.eup %5351 }
0x2294   : > { %1927 = vrot.lane.b32.xlu0 %v5352_v17, %s5708_s20 }
0x2295   : > { %v5354_v51 = vpop.eup %5353 }
0x2296   : > { %1954 = vrot.lane.b32.xlu1 %v5354_v51, %s5708_s20 }
0x2306   : > { %v1928_v26 = vpop.permute.xlu0 %1927 }
0x2307   : > { %v6253_v1 = vmul.f32 %v5348_v20, %v1928_v26  ;;  %v6282_v26 = vld [vmem:[#allocation2 + $0x18] sm:$0xc] }
0x2308   : > { %v1955_v56 = vpop.permute.xlu1 %1954 }
0x2309   : > { %v6255_v24 = vmul.f32 %v5350_v23, %v1955_v56 }
0x230b   : > { %v1958_v31 = vsel %vm637_vm1, %v6253_v1, %v6255_v24 }
0x230c   : > { %v1959_v34 = vpack.c.bf16 %v1958_v31, %v1958_v31  ;;  %v6284_v31 = vld [vmem:[#allocation2 + $0x4] sm:$0x3] }
0x230e   : > { %1961 = vrot.lane.b32.xlu0 %v1959_v34, %s5709_s21  ;;  %v2107_v34 = vunpack.c.l.bf16 %v6282_v26 }
0x2380   : > { %v1962_v7 = vpop.permute.xlu0 %1961 }
0x2381   : > { %4954 = vmatmul.mubr.msk.bf16.vlgmr.msra.gmra.mxu1 %vm538_vm2, %v1962_v7 }
0x2382   : > { %2199 = vmatpush1.bf16.msra.mxu1 %v6044_v60  ;;  %2218 = vmatprep.mubr.bf16.mxu1 %v5707_v2 }
0x2383   : > { %2200 = vmatprep.subr.bf16.mxu1 %v6051_v62 }
0x2386   : > { %2201 = vmatpush1.bf16.msra.mxu1 %v6057_v63 }
0x2441   : > { %v2000_v13 = vpop.f32.mrf.mxu1 }
0x2442   : > { %v2007_v4 = vadd.f32 %v2000_v13, %v1899_v15 }
0x2443   : > { %v2002_v5 = vpop.f32.mrf.mxu1 }
0x2444   : > { %5355 = vtanh.f32 %v2007_v4  ;;  %v2008_v3 = vadd.f32 %v2002_v5, %v1902_v18  ;;  %v4955_v60 = vmul.f32 -1.442695, %v2007_v4  ;;  %v2113_v5 = vunpack.c.l.bf16 %v6284_v31 }
0x2445   : > { %v2004_v0 = vpop.f32.mrf.mxu1 }
0x2446   : > { %5357 = vtanh.f32 %v2008_v3  ;;  %v4956_v53 = vmul.f32 -1.442695, %v2008_v3 }
0x2447   : > { %v2005_v6 = vpop.f32.mrf.mxu1  ;;  %5359 = vpow2.f32 %v4955_v60 }
0x2448   : > { %5361 = vpow2.f32 %v4956_v53 }
0x2451   : > { %v5356_v38 = vpop.eup %5355 }
0x2452   : > { %2018 = vrot.lane.b32.xlu1 %v5356_v38, %s5708_s20 }
0x2453   : > { %v5358_v45 = vpop.eup %5357 }
0x2454   : > { %2042 = vrot.lane.b32.xlu0 %v5358_v45, %s5708_s20  ;;  %v5360_v62 = vpop.eup %5359 }
0x2455   : > { %v5362_v63 = vpop.eup %5361  ;;  %v2012_v9 = vadd.f32 1.0, %v5360_v62 }
0x2456   : > { %v2036_v15 = vadd.f32 1.0, %v5362_v63 }
0x2457   : > { %5363 = vrcp.f32 %v2012_v9 }
0x2458   : > { %5365 = vrcp.f32 %v2036_v15 }
0x2464   : > { %v5364_v18 = vpop.eup %5363 }
0x2465   : > { %v5366_v19 = vpop.eup %5365  ;;  %v2016_v61 = vmul.f32 %v5364_v18, %v1924_v40 }
0x2466   : > { %v2040_v16 = vmul.f32 %v5366_v19, %v1951_v59 }
0x24c4   : > { %v2019_v42 = vpop.permute.xlu1 %2018 }
0x24c5   : > { %v2021_v52 = vmul.f32 %v5364_v18, %v2019_v42 }
0x24c6   : > { %v2043_v21 = vpop.permute.xlu0 %2042 }
0x24c7   : > { %2023 = vrot.lane.b32.xlu1 %v2021_v52, %s5709_s21  ;;  %v2045_v20 = vmul.f32 %v5366_v19, %v2043_v21 }
0x24c9   : > { %2047 = vrot.lane.b32.xlu0 %v2045_v20, %s5709_s21 }
0x2539   : > { %v2024_v8 = vpop.permute.xlu1 %2023 }
0x253a   : > { %v2026_v23 = vadd.f32 %v2024_v8, %v2016_v61 }
0x253b   : > { %v2048_v29 = vpop.permute.xlu0 %2047 }
0x253c   : > { %5367 = vtanh.f32 %v2026_v23  ;;  %v2050_v33 = vadd.f32 %v2048_v29, %v2040_v16  ;;  %v2126_v8 = vrot.slane %v2026_v23, 4 }
0x253e   : > { %5369 = vtanh.f32 %v2050_v33  ;;  %v2153_v29 = vrot.slane %v2050_v33, 4 }
0x2549   : > { %v5368_v36 = vpop.eup %5367 }
0x254a   : > { %2029 = vrot.lane.b32.xlu1 %v5368_v36, %s5708_s20 }
0x254b   : > { %v5370_v39 = vpop.eup %5369 }
0x254c   : > { %2053 = vrot.lane.b32.xlu0 %v5370_v39, %s5708_s20 }
0x25bc   : > { %v2030_v25 = vpop.permute.xlu1 %2029 }
0x25bd   : > { %v6272_v57 = vmul.f32 %v5364_v18, %v2030_v25 }
0x25be   : > { %v2054_v41 = vpop.permute.xlu0 %2053 }
0x25bf   : > { %v6274_v17 = vmul.f32 %v5366_v19, %v2054_v41  ;;  %v2293_v28 = vrot.slane %v6272_v57, 4 }
0x25c1   : > { %v2057_v40 = vsel %vm637_vm1, %v6272_v57, %v6274_v17  ;;  %v2304_v44 = vrot.slane %v6274_v17, 4  ;;  %v6374_v57 = vld [vmem:[%s6972_s7 + $0x10] ss:$8 sps:$4 sm:$0xff]  }
0x25c2   : > { %v2058_v59 = vpack.c.bf16 %v2057_v40, %v2057_v40 }
0x25c3   : > { %v2316_v55 = vsel %vm637_vm1, %v2304_v44, %v6255_v24 }
0x25c4   : > { %2060 = vrot.lane.b32.xlu1 %v2058_v59, %s5709_s21 }
0x2636   : > { %v2061_v51 = vpop.permute.xlu1 %2060 }
0x2637   : > { %4957 = vmatmul.mubr.msk.bf16.vlgmr.msra.gmra.mxu0 %vm538_vm2, %v2061_v51 }
0x2638   : > { %2415 = vmatprep.mubr.bf16.mxu0 %v5707_v2 }
0x26f7   : > { %v2099_v56 = vpop.f32.mrf.mxu0 }
0x26f8   : > { %v2109_v7 = vrot.slane %v2099_v56, 4 }
0x26f9   : > { %v2101_v13 = vpop.f32.mrf.mxu0 }
0x26fa   : > { %v2111_v4 = vadd.f32 %v2109_v7, %v2107_v34  ;;  %v2115_v3 = vrot.slane %v2101_v13, 4 }
0x26fb   : > { %v2103_v0 = vpop.f32.mrf.mxu0 }
0x26fc   : > { %5371 = vtanh.f32 %v2111_v4  ;;  %v2117_v6 = vadd.f32 %v2115_v3, %v2113_v5  ;;  %v4958_v53 = vmul.f32 -1.442695, %v2111_v4 }
0x26fd   : > { %v2104_v38 = vpop.f32.mrf.mxu0 }
0x26fe   : > { %5373 = vtanh.f32 %v2117_v6  ;;  %v4959_v62 = vmul.f32 -1.442695, %v2117_v6 }
0x26ff   : > { %5375 = vpow2.f32 %v4958_v53 }
0x2700   : > { %5377 = vpow2.f32 %v4959_v62 }
0x2709   : > { %v5372_v45 = vpop.eup %5371 }
0x270a   : > { %2130 = vrot.lane.b32.xlu0 %v5372_v45, %s5708_s20 }
0x270b   : > { %v5374_v60 = vpop.eup %5373 }
0x270c   : > { %2157 = vrot.lane.b32.xlu1 %v5374_v60, %s5708_s20  ;;  %v5376_v63 = vpop.eup %5375 }
0x270d   : > { %v5378_v9 = vpop.eup %5377  ;;  %v2121_v15 = vadd.f32 1.0, %v5376_v63 }
0x270e   : > { %v2148_v18 = vadd.f32 1.0, %v5378_v9 }
0x270f   : > { %5379 = vrcp.f32 %v2121_v15 }
0x2710   : > { %5381 = vrcp.f32 %v2148_v18 }
0x271c   : > { %v5380_v42 = vpop.eup %5379 }
0x271d   : > { %v5382_v21 = vpop.eup %5381  ;;  %v2128_v16 = vmul.f32 %v5380_v42, %v2126_v8 }
0x271e   : > { %v2155_v25 = vmul.f32 %v5382_v21, %v2153_v29 }
0x277c   : > { %v2131_v52 = vpop.permute.xlu0 %2130 }
0x277d   : > { %v2133_v19 = vmul.f32 %v5380_v42, %v2131_v52 }
0x277e   : > { %v2158_v20 = vpop.permute.xlu1 %2157 }
0x277f   : > { %2135 = vrot.lane.b32.xlu0 %v2133_v19, %s5709_s21  ;;  %v2160_v61 = vmul.f32 %v5382_v21, %v2158_v20 }
0x2781   : > { %2162 = vrot.lane.b32.xlu1 %v2160_v61, %s5709_s21 }
0x27f1   : > { %v2136_v36 = vpop.permute.xlu0 %2135 }
0x27f2   : > { %v2138_v39 = vadd.f32 %v2136_v36, %v2128_v16  ;;  %v5125_v36 = vld [vmem:[%s6969_s4 + $0x10] ss:$8 sps:$4 sm:$0xff]  }
0x27f3   : > { %v2163_v41 = vpop.permute.xlu1 %2162 }
0x27f4   : > { %5383 = vtanh.f32 %v2138_v39  ;;  %v2165_v40 = vadd.f32 %v2163_v41, %v2155_v25  ;;  %v5127_v25 = vld [vmem:[%s6969_s4 + $0x14] ss:$8 sps:$4 sm:$0xff]  }
0x27f5   : > { %2512 = vmatprep.subr.bf16.mxu1 %v5127_v25 }
0x27f6   : > { %5385 = vtanh.f32 %v2165_v40 }
0x2801   : > { %v5384_v59 = vpop.eup %5383 }
0x2802   : > { %2141 = vrot.lane.b32.xlu0 %v5384_v59, %s5708_s20 }
0x2803   : > { %v5386_v51 = vpop.eup %5385 }
0x2804   : > { %2168 = vrot.lane.b32.xlu1 %v5386_v51, %s5708_s20 }
0x2874   : > { %v2142_v26 = vpop.permute.xlu0 %2141 }
0x2875   : > { %v6294_v56 = vmul.f32 %v5380_v42, %v2142_v26 }
0x2876   : > { %v2169_v31 = vpop.permute.xlu1 %2168 }
0x2877   : > { %v6296_v23 = vmul.f32 %v5382_v21, %v2169_v31  ;;  %v2173_v33 = vrot.slane %v6294_v56, 4  ;;  %v6392_v56 = vld [vmem:[%s6972_s7 + $0x4] ss:$8 sps:$4 sm:$0xff]  }
0x2879   : > { %v2176_v7 = vrot.slane %v6296_v23, 4 }
0x287b   : > { %v2178_v13 = vsel %vm637_vm1, %v2173_v33, %v2176_v7 }
0x287c   : > { %v2179_v4 = vpack.c.bf16 %v2178_v13, %v2178_v13  ;;  %v5130_v13 = vld [vmem:[%s6969_s4 + $0x4] ss:$8 sps:$4 sm:$0xff]  }
0x287e   : > { %2181 = vrot.lane.b32.xlu0 %v2179_v4, %s5709_s21 }
0x28f0   : > { %v2182_v3 = vpop.permute.xlu0 %2181 }
0x28f1   : > { %4960 = vmatmul.mubr.msk.bf16.vlgmr.msra.gmra.mxu1 %vm538_vm2, %v2182_v3  ;;  %v5128_v3 = vld [vmem:[%s6969_s4] ss:$8 sps:$4 sm:$0xff]  }
0x28f2   : > { %2532 = vmatprep.mubr.bf16.mxu1 %v5707_v2  ;;  %2513 = vmatpush1.bf16.msra.mxu1 %v5125_v36 }
0x28f3   : > { %2514 = vmatprep.subr.bf16.mxu1 %v5130_v13 }
0x28f6   : > { %2515 = vmatpush1.bf16.msra.mxu1 %v5128_v3 }
0x28f7   : > { %2796 = vmatprep.subr.bf16.mxu1 %v6360_v32 }
0x29b1   : > { %v2220_v0 = vpop.f32.mrf.mxu1 }
0x29b2   : > { %v2228_v6 = vrot.slane %v2220_v0, 4 }
0x29b3   : > { %v2222_v38 = vpop.f32.mrf.mxu1 }
0x29b4   : > { %v2230_v45 = vadd.f32 %v2228_v6, %v2107_v34  ;;  %v2232_v60 = vrot.slane %v2222_v38, 4  ;;  %v5133_v6 = vld [vmem:[%s6970_s5 + $0x14] ss:$8 sps:$4 sm:$0xff]   ;;  %v5136_v38 = vld [vmem:[%s6970_s5 + $0x4] ss:$8 sps:$4 sm:$0xff]  }
0x29b5   : > { %v2224_v53 = vpop.f32.mrf.mxu1  ;;  %2395 = vmatprep.subr.bf16.mxu0 %v5133_v6 }
0x29b6   : > { %5387 = vtanh.f32 %v2230_v45  ;;  %v2234_v62 = vadd.f32 %v2232_v60, %v2113_v5  ;;  %v4961_v18 = vmul.f32 -1.442695, %v2230_v45 }
0x29b7   : > { %v2225_v63 = vpop.f32.mrf.mxu1 }
0x29b8   : > { %5389 = vtanh.f32 %v2234_v62  ;;  %v4962_v42 = vmul.f32 -1.442695, %v2234_v62 }
0x29b9   : > { %5391 = vpow2.f32 %v4961_v18 }
0x29ba   : > { %5393 = vpow2.f32 %v4962_v42 }
0x29c3   : > { %v5388_v9 = vpop.eup %5387 }
0x29c4   : > { %2244 = vrot.lane.b32.xlu0 %v5388_v9, %s5708_s20 }
0x29c5   : > { %v5390_v15 = vpop.eup %5389 }
0x29c6   : > { %2268 = vrot.lane.b32.xlu1 %v5390_v15, %s5708_s20  ;;  %v5392_v52 = vpop.eup %5391  ;;  %v2573_v15 = vld [vmem:[%s6971_s6] sm:$0x3] }
0x29c7   : > { %v5394_v19 = vpop.eup %5393  ;;  %v2238_v21 = vadd.f32 1.0, %v5392_v52  ;;  %v6433_v52 = vrot.slane %v2573_v15, %v398_v11 }
0x29c8   : > { %v2262_v34 = vadd.f32 1.0, %v5394_v19  ;;  %v6437_v19 = vrot.slane %v2573_v15, %v402_v12 }
0x29c9   : > { %5395 = vrcp.f32 %v2238_v21 }
0x29ca   : > { %5397 = vrcp.f32 %v2262_v34 }
0x29d6   : > { %v5396_v20 = vpop.eup %5395 }
0x29d7   : > { %v5398_v8 = vpop.eup %5397  ;;  %v2242_v41 = vmul.f32 %v5396_v20, %v2138_v39 }
0x29d8   : > { %v2266_v26 = vmul.f32 %v5398_v8, %v2165_v40  ;;  %v5131_v40 = vld [vmem:[%s6970_s5 + $0x10] ss:$8 sps:$4 sm:$0xff]  }
0x29d9   : > { %2396 = vmatpush1.bf16.msra.mxu0 %v5131_v40 }
0x29da   : > { %2397 = vmatprep.subr.bf16.mxu0 %v5136_v38 }
0x29dd   : > { %2398 = vmatpush1.bf16.msra.mxu0 %v5134_v27 }
0x29de   : > { %2693 = vmatprep.subr.bf16.mxu0 %v6360_v32 }
0x2a36   : > { %v2245_v5 = vpop.permute.xlu0 %2244 }
0x2a37   : > { %v2247_v61 = vmul.f32 %v5396_v20, %v2245_v5 }
0x2a38   : > { %v2269_v16 = vpop.permute.xlu1 %2268 }
0x2a39   : > { %2249 = vrot.lane.b32.xlu0 %v2247_v61, %s5709_s21  ;;  %v2271_v29 = vmul.f32 %v5398_v8, %v2269_v16 }
0x2a3b   : > { %2273 = vrot.lane.b32.xlu1 %v2271_v29, %s5709_s21 }
0x2aab   : > { %v2250_v59 = vpop.permute.xlu0 %2249 }
0x2aac   : > { %v2252_v51 = vadd.f32 %v2250_v59, %v2242_v41 }
0x2aad   : > { %v2274_v31 = vpop.permute.xlu1 %2273 }
0x2aae   : > { %5399 = vtanh.f32 %v2252_v51  ;;  %v2276_v4 = vadd.f32 %v2274_v31, %v2266_v26 }
0x2ab0   : > { %5401 = vtanh.f32 %v2276_v4 }
0x2abb   : > { %v5400_v0 = vpop.eup %5399 }
0x2abc   : > { %2255 = vrot.lane.b32.xlu0 %v5400_v0, %s5708_s20 }
0x2abd   : > { %v5402_v39 = vpop.eup %5401 }
0x2abe   : > { %2279 = vrot.lane.b32.xlu1 %v5402_v39, %s5708_s20 }
0x2ac0   : > { %2460 = vrot.lane.b32.xlu0 %v2323_v30, %s5709_s21 }
0x2ac4   : > { %2462 = vrot.lane.b32.xlu0 %v2324_v46, %s5709_s21  ;;  %v2301_v46 = vsel %vm637_vm1, %v6253_v1, %v2293_v28 }
0x2ac8   : > { %2464 = vrot.lane.b32.xlu0 %v2325_v58, %s5709_s21 }
0x2b2e   : > { %v2256_v30 = vpop.permute.xlu0 %2255 }
0x2b2f   : > { %v2258_v43 = vmul.f32 %v5396_v20, %v2256_v30 }
0x2b30   : > { %v2280_v60 = vpop.permute.xlu1 %2279 }
0x2b31   : > { %v2302_v45 = vsel %vm637_vm1, %v2173_v33, %v2258_v43  ;;  %v2282_v62 = vmul.f32 %v5398_v8, %v2280_v60 }
0x2b32   : > { %v2326_v53 = vpack.c.bf16 %v2302_v45, %v2301_v46  ;;  %v2461_v63 = vpop.permute.xlu0 %2460 }
0x2b33   : > { %4975 = vmatmul.mubr.msk.bf16.vlgmr.msra.gmra.mxu1 %vm538_vm2, %v2461_v63  ;;  %v2315_v58 = vsel %vm637_vm1, %v2282_v62, %v2176_v7 }
0x2b34   : > { %2466 = vrot.lane.b32.xlu0 %v2326_v53, %s5709_s21  ;;  %2542 = vmatprep.mubr.bf16.mxu1 %v5707_v2  ;;  %v2331_v1 = vpack.c.bf16 %v2316_v55, %v2315_v58 }
0x2b35   : > { %2797 = vmatpush1.bf16.msra.mxu1 %v6374_v57 }
0x2b36   : > { %2343 = vrot.lane.b32.xlu1 %v2331_v1, %s5709_s21  ;;  %v2463_v24 = vpop.permute.xlu0 %2462  ;;  %2798 = vmatprep.subr.bf16.mxu1 %v6392_v56 }
0x2b39   : > { %2799 = vmatpush1.bf16.msra.mxu1 %v6402_v35 }
0x2b3a   : > { %2345 = vrot.lane.b32.xlu1 %v2332_v48, %s5709_s21  ;;  %v2465_v17 = vpop.permute.xlu0 %2464  ;;  %3026 = vmatprep.subr.bf16.mxu1 %v6360_v32 }
0x2b3b   : > { %4976 = vmatmul.mubr.msk.bf16.gmra.mxu1 %vm538_vm2, %v2463_v24 }
0x2b3c   : > { %2552 = vmatprep.mubr.bf16.mxu1 %v5707_v2 }
0x2b3e   : > { %2347 = vrot.lane.b32.xlu1 %v2333_v47, %s5709_s21 }
0x2b42   : > { %2349 = vrot.lane.b32.xlu1 %v2334_v14, %s5709_s21 }
0x2b43   : > { %4977 = vmatmul.mubr.msk.bf16.gmra.mxu1 %vm538_vm2, %v2465_v17 }
0x2b44   : > { %2562 = vmatprep.mubr.bf16.mxu1 %v5707_v2 }
0x2ba6   : > { %v2467_v54 = vpop.permute.xlu0 %2466 }
0x2ba7   : > { %4978 = vmatmul.mubr.msk.bf16.gmra.mxu1 %vm538_vm2, %v2467_v54 }
0x2ba8   : > { %2816 = vmatprep.mubr.bf16.mxu1 %v5707_v2  ;;  %v2344_v49 = vpop.permute.xlu1 %2343 }
0x2ba9   : > { %4967 = vmatmul.mubr.msk.bf16.vlgmr.msra.gmra.mxu0 %vm538_vm2, %v2344_v49 }
0x2baa   : > { %2425 = vmatprep.mubr.bf16.mxu0 %v5707_v2  ;;  %2694 = vmatpush1.bf16.msra.mxu0 %v6374_v57 }
0x2bab   : > { %2695 = vmatprep.subr.bf16.mxu0 %v6392_v56 }
0x2bac   : > { %v2346_v50 = vpop.permute.xlu1 %2345 }
0x2bae   : > { %2696 = vmatpush1.bf16.msra.mxu0 %v6402_v35 }
0x2baf   : > { %2917 = vmatprep.subr.bf16.mxu0 %v6360_v32 }
0x2bb0   : > { %v2348_v14 = vpop.permute.xlu1 %2347 }
0x2bb1   : > { %4968 = vmatmul.mubr.msk.bf16.gmra.mxu0 %vm538_vm2, %v2346_v50 }
0x2bb2   : > { %2435 = vmatprep.mubr.bf16.mxu0 %v5707_v2 }
0x2bb4   : > { %v2350_v22 = vpop.permute.xlu1 %2349 }
0x2bb9   : > { %4969 = vmatmul.mubr.msk.bf16.gmra.mxu0 %vm538_vm2, %v2348_v14 }
0x2bba   : > { %2445 = vmatprep.mubr.bf16.mxu0 %v5707_v2 }
0x2bc1   : > { %4970 = vmatmul.mubr.msk.bf16.gmra.mxu0 %vm538_vm2, %v2350_v22 }
0x2bc2   : > { %2713 = vmatprep.mubr.bf16.mxu0 %v5707_v2 }
0x2bc9   : > { %2714 = vmatmul.mubr.bf16.vlgmr.msra.gmra.mxu0 %v5707_v2 }
0x2bca   : > { %2918 = vmatpush1.bf16.msra.mxu0 %v6374_v57  ;;  %2937 = vmatprep.mubr.bf16.mxu0 %v5707_v2 }
0x2bcb   : > { %2919 = vmatprep.subr.bf16.mxu0 %v6392_v56 }
0x2bce   : > { %2920 = vmatpush1.bf16.msra.mxu0 %v6402_v35 }
0x2bcf   : > { %3147 = vmatprep.subr.bf16.mxu0 %v6360_v32 }
0x2bf3   : > { %v2534_v47 = vpop.f32.mrf.mxu1 }
0x2bf5   : > { %v2536_v37 = vpop.f32.mrf.mxu1 }
0x2bf7   : > { %v2538_v48 = vpop.f32.mrf.mxu1 }
0x2bf9   : > { %v2540_v23 = vpop.f32.mrf.mxu1 }
0x2bfb   : > { %v2544_v33 = vpop.f32.mrf.mxu1 }
0x2bfd   : > { %v2546_v7 = vpop.f32.mrf.mxu1 }
0x2bff   : > { %v2548_v9 = vpop.f32.mrf.mxu1 }
0x2c01   : > { %v2550_v18 = vpop.f32.mrf.mxu1 }
0x2c03   : > { %v2554_v5 = vpop.f32.mrf.mxu1 }
0x2c05   : > { %v2556_v59 = vpop.f32.mrf.mxu1 }
0x2c07   : > { %v2558_v4 = vpop.f32.mrf.mxu1 }
0x2c09   : > { %v2560_v28 = vpop.f32.mrf.mxu1 }
0x2c67   : > { %v2564_v45 = vpop.f32.mrf.mxu1 }
0x2c69   : > { %v2417_v42 = vpop.f32.mrf.mxu0  ;;  %v2566_v24 = vpop.f32.mrf.mxu1 }
0x2c6a   : > { %v2535_v21 = vadd.f32 %v2534_v47, %v2417_v42 }
0x2c6b   : > { %v2419_v34 = vpop.f32.mrf.mxu0 }
0x2c6c   : > { %v2537_v20 = vadd.f32 %v2536_v37, %v2419_v34  ;;  %v2585_v8 = vadd.f32 %v6433_v52, %v2535_v21  ;;  %v2568_v37 = vpop.f32.mrf.mxu1 }
0x2c6d   : > { %v2421_v61 = vpop.f32.mrf.mxu0 }
0x2c6e   : > { %v2586_v16 = vadd.f32 %v6437_v19, %v2537_v20  ;;  %v2539_v29 = vadd.f32 %v2538_v48, %v2421_v61  ;;  %v2570_v21 = vpop.f32.mrf.mxu1 }
0x2c6f   : > { %v2423_v36 = vpop.f32.mrf.mxu0 }
0x2c70   : > { %v5059_v25 = vpack.c.bf16 %v2586_v16, %v2585_v8  ;;  %v2541_v41 = vadd.f32 %v2540_v23, %v2423_v36  ;;  %v2587_v10 = vadd.f32 %v6433_v52, %v2539_v29 }
0x2c71   : > { %v2427_v11 = vpop.f32.mrf.mxu0 }
0x2c72   : > { %2649 = vst [vmem:[#allocation2] sm:$0xff] %v5059_v25  ;;  %v2588_v12 = vadd.f32 %v6437_v19, %v2541_v41  ;;  %v2545_v51 = vadd.f32 %v2544_v33, %v2427_v11 }
0x2c73   : > { %v2429_v26 = vpop.f32.mrf.mxu0 }
0x2c74   : > { %v5060_v31 = vpack.c.bf16 %v2588_v12, %v2587_v10  ;;  %v2547_v13 = vadd.f32 %v2546_v7, %v2429_v26  ;;  %v2589_v0 = vadd.f32 %v6433_v52, %v2545_v51 }
0x2c75   : > { %v2431_v3 = vpop.f32.mrf.mxu0 }
0x2c76   : > { %2650 = vst [vmem:[#allocation2 + $0x8] sm:$0xff] %v5060_v31  ;;  %v2590_v39 = vadd.f32 %v6437_v19, %v2547_v13  ;;  %v2549_v40 = vadd.f32 %v2548_v9, %v2431_v3 }
0x2c77   : > { %v2433_v6 = vpop.f32.mrf.mxu0 }
0x2c78   : > { %v5061_v38 = vpack.c.bf16 %v2590_v39, %v2589_v0  ;;  %v2551_v27 = vadd.f32 %v2550_v18, %v2433_v6  ;;  %v2591_v43 = vadd.f32 %v6433_v52, %v2549_v40 }
0x2c79   : > { %v2437_v30 = vpop.f32.mrf.mxu0  ;;  %v2722_v9 = vld [vmem:[#allocation2] sm:$0x3] }
0x2c7a   : > { %2651 = vst [vmem:[#allocation2 + $0x10] sm:$0xff] %v5061_v38  ;;  %v2592_v44 = vadd.f32 %v6437_v19, %v2551_v27  ;;  %v2555_v46 = vadd.f32 %v2554_v5, %v2437_v30  ;;  %v2723_v61 = vunpack.c.l.bf16 %v2722_v9 }
0x2c7b   : > { %v2439_v60 = vpop.f32.mrf.mxu0 }
0x2c7c   : > { %v5062_v53 = vpack.c.bf16 %v2592_v44, %v2591_v43  ;;  %v2557_v62 = vadd.f32 %v2556_v59, %v2439_v60  ;;  %v2593_v55 = vadd.f32 %v6433_v52, %v2555_v46 }
0x2c7d   : > { %v2441_v63 = vpop.f32.mrf.mxu0 }
0x2c7e   : > { %2652 = vst [vmem:[#allocation2 + $0x18] sm:$0xff] %v5062_v53  ;;  %v2594_v58 = vadd.f32 %v6437_v19, %v2557_v62  ;;  %v2559_v1 = vadd.f32 %v2558_v4, %v2441_v63 }
0x2c7f   : > { %v2443_v17 = vpop.f32.mrf.mxu0 }
0x2c80   : > { %v5063_v54 = vpack.c.bf16 %v2594_v58, %v2593_v55  ;;  %v2561_v49 = vadd.f32 %v2560_v28, %v2443_v17  ;;  %v2595_v14 = vadd.f32 %v6433_v52, %v2559_v1 }
0x2c81   : > { %v2447_v50 = vpop.f32.mrf.mxu0 }
0x2c82   : > { %2653 = vst [vmem:[#allocation2 + $0x20] sm:$0xff] %v5063_v54  ;;  %v2596_v22 = vadd.f32 %v6437_v19, %v2561_v49  ;;  %v2565_v47 = vadd.f32 %v2564_v45, %v2447_v50  ;;  %v2825_v49 = vld [vmem:[#allocation2] sm:$0xc] }
0x2c83   : > { %v2449_v48 = vpop.f32.mrf.mxu0 }
0x2c84   : > { %v5064_v23 = vpack.c.bf16 %v2596_v22, %v2595_v14  ;;  %v2567_v33 = vadd.f32 %v2566_v24, %v2449_v48  ;;  %v2597_v15 = vadd.f32 %v6433_v52, %v2565_v47  ;;  %v2826_v22 = vunpack.c.l.bf16 %v2825_v49 }
0x2c85   : > { %v2451_v7 = vpop.f32.mrf.mxu0 }
0x2c86   : > { %2654 = vst [vmem:[#allocation2 + $0x28] sm:$0xff] %v5064_v23  ;;  %v2598_v18 = vadd.f32 %v6437_v19, %v2567_v33  ;;  %v2569_v42 = vadd.f32 %v2568_v37, %v2451_v7 }
0x2c87   : > { %v2453_v34 = vpop.f32.mrf.mxu0 }
0x2c88   : > { %v5065_v20 = vpack.c.bf16 %v2598_v18, %v2597_v15  ;;  %v2571_v5 = vadd.f32 %v2570_v21, %v2453_v34  ;;  %v2599_v16 = vadd.f32 %v6433_v52, %v2569_v42 }
0x2c89   : > { %v2715_v8 = vpop.f32.mrf.mxu0 }
0x2c8a   : > { %2655 = vst [vmem:[#allocation2 + $0x30] sm:$0xff] %v5065_v20  ;;  %v2600_v29 = vadd.f32 %v6437_v19, %v2571_v5  ;;  %v2724_v36 = vadd.f32 %v2723_v61, %v2715_v8 }
0x2c8b   : > { %v2717_v25 = vpop.f32.mrf.mxu0 }
0x2c8c   : > { %v5066_v41 = vpack.c.bf16 %v2600_v29, %v2599_v16  ;;  %5403 = vtanh.f32 %v2724_v36  ;;  %v4991_v52 = vmul.f32 -1.442695, %v2724_v36 }
0x2c8d   : > { %v2719_v59 = vpop.f32.mrf.mxu0 }
0x2c8e   : > { %2656 = vst [vmem:[#allocation2 + $0x38] sm:$0xff] %v5066_v41 }
0x2c8f   : > { %v2720_v11 = vpop.f32.mrf.mxu0 }
0x2c95   : > { %v2725_v10 = vld [vmem:[#allocation2 + $0x3c] sm:$0xc]  ;;  %v2831_v14 = vld [vmem:[#allocation2 + $0x3c] sm:$0x3] }
0x2c96   : > { %v2726_v12 = vunpack.c.l.bf16 %v2725_v10  ;;  %v2832_v23 = vunpack.c.l.bf16 %v2831_v14 }
0x2c98   : > { %v2727_v51 = vadd.f32 %v2726_v12, %v2717_v25 }
0x2c99   : > { %v5404_v26 = vpop.eup %5403 }
0x2c9a   : > { %5405 = vtanh.f32 %v2727_v51  ;;  %2737 = vrot.lane.b32.xlu1 %v5404_v26, %s5708_s20  ;;  %v4992_v19 = vmul.f32 -1.442695, %v2727_v51 }
0x2c9b   : > { %5407 = vpow2.f32 %v4991_v52 }
0x2c9c   : > { %5409 = vpow2.f32 %v4992_v19 }
0x2ca7   : > { %v5406_v31 = vpop.eup %5405 }
0x2ca8   : > { %2761 = vrot.lane.b32.xlu0 %v5406_v31, %s5708_s20  ;;  %v5408_v13 = vpop.eup %5407 }
0x2ca9   : > { %v2731_v4 = vadd.f32 1.0, %v5408_v13  ;;  %v5410_v3 = vpop.eup %5409 }
0x2caa   : > { %v2755_v0 = vadd.f32 1.0, %v5410_v3 }
0x2cab   : > { %5411 = vrcp.f32 %v2731_v4 }
0x2cac   : > { %5413 = vrcp.f32 %v2755_v0 }
0x2cb8   : > { %v5412_v39 = vpop.eup %5411 }
0x2cb9   : > { %v5414_v38 = vpop.eup %5413  ;;  %v2735_v30 = vmul.f32 0.0, %v5412_v39 }
0x2cba   : > { %v2759_v46 = vmul.f32 0.0, %v5414_v38 }
0x2d0c   : > { %v2738_v40 = vpop.permute.xlu1 %2737 }
0x2d0d   : > { %v2740_v6 = vmul.f32 %v5412_v39, %v2738_v40 }
0x2d0f   : > { %2742 = vrot.lane.b32.xlu1 %v2740_v6, %s5709_s21 }
0x2d1a   : > { %v2762_v27 = vpop.permute.xlu0 %2761 }
0x2d1b   : > { %v2764_v28 = vmul.f32 %v5414_v38, %v2762_v27 }
0x2d1d   : > { %2766 = vrot.lane.b32.xlu0 %v2764_v28, %s5709_s21 }
0x2d81   : > { %v2743_v43 = vpop.permute.xlu1 %2742 }
0x2d82   : > { %v2745_v44 = vadd.f32 %v2743_v43, %v2735_v30  ;;  %v2946_v43 = vld [vmem:[#allocation2 + $0x8] sm:$0x3] }
0x2d84   : > { %5415 = vtanh.f32 %v2745_v44  ;;  %v2845_v11 = vrot.slane %v2745_v44, 4  ;;  %v2949_v44 = vld [vmem:[#allocation2 + $0x34] sm:$0xc] }
0x2d8f   : > { %v2767_v45 = vpop.permute.xlu0 %2766 }
0x2d90   : > { %v2769_v60 = vadd.f32 %v2767_v45, %v2759_v46  ;;  %v2947_v46 = vunpack.c.l.bf16 %v2946_v43 }
0x2d91   : > { %v5416_v53 = vpop.eup %5415 }
0x2d92   : > { %5417 = vtanh.f32 %v2769_v60  ;;  %2748 = vrot.lane.b32.xlu1 %v5416_v53, %s5708_s20  ;;  %v2872_v12 = vrot.slane %v2769_v60, 4  ;;  %v2950_v53 = vunpack.c.l.bf16 %v2949_v44 }
0x2d9f   : > { %v5418_v62 = vpop.eup %5417 }
0x2da0   : > { %2772 = vrot.lane.b32.xlu0 %v5418_v62, %s5708_s20 }
0x2e04   : > { %v2749_v63 = vpop.permute.xlu1 %2748 }
0x2e05   : > { %v6461_v58 = vmul.f32 %v5412_v39, %v2749_v63 }
0x2e12   : > { %v2773_v55 = vpop.permute.xlu0 %2772 }
0x2e13   : > { %v6463_v1 = vmul.f32 %v5414_v38, %v2773_v55 }
0x2e15   : > { %v2776_v24 = vsel %vm637_vm1, %v6461_v58, %v6463_v1 }
0x2e16   : > { %v2777_v17 = vpack.c.bf16 %v2776_v24, %v2776_v24 }
0x2e18   : > { %2779 = vrot.lane.b32.xlu1 %v2777_v17, %s5709_s21 }
0x2e8a   : > { %v2780_v54 = vpop.permute.xlu1 %2779 }
0x2e8b   : > { %4993 = vmatmul.mubr.msk.bf16.vlgmr.msra.gmra.mxu1 %vm538_vm2, %v2780_v54 }
0x2e8c   : > { %3027 = vmatpush1.bf16.msra.mxu1 %v6374_v57  ;;  %3046 = vmatprep.mubr.bf16.mxu1 %v5707_v2 }
0x2e8d   : > { %3028 = vmatprep.subr.bf16.mxu1 %v6392_v56 }
0x2e90   : > { %3029 = vmatpush1.bf16.msra.mxu1 %v6402_v35 }
0x2e91   : > { %3256 = vmatprep.subr.bf16.mxu1 %v6360_v32 }
0x2f4b   : > { %v2818_v50 = vpop.f32.mrf.mxu1 }
0x2f4c   : > { %v2828_v47 = vrot.slane %v2818_v50, 4 }
0x2f4d   : > { %v2820_v37 = vpop.f32.mrf.mxu1 }
0x2f4e   : > { %v2830_v48 = vadd.f32 %v2828_v47, %v2826_v22  ;;  %v2834_v33 = vrot.slane %v2820_v37, 4 }
0x2f4f   : > { %v2822_v7 = vpop.f32.mrf.mxu1 }
0x2f50   : > { %5419 = vtanh.f32 %v2830_v48  ;;  %v2836_v9 = vadd.f32 %v2834_v33, %v2832_v23  ;;  %v4994_v21 = vmul.f32 -1.442695, %v2830_v48 }
0x2f51   : > { %v2823_v15 = vpop.f32.mrf.mxu1 }
0x2f52   : > { %5421 = vtanh.f32 %v2836_v9  ;;  %v4995_v34 = vmul.f32 -1.442695, %v2836_v9 }
0x2f53   : > { %5423 = vpow2.f32 %v4994_v21 }
0x2f54   : > { %5425 = vpow2.f32 %v4995_v34 }
0x2f5d   : > { %v5420_v18 = vpop.eup %5419 }
0x2f5e   : > { %2849 = vrot.lane.b32.xlu0 %v5420_v18, %s5708_s20 }
0x2f5f   : > { %v5422_v42 = vpop.eup %5421 }
0x2f60   : > { %2876 = vrot.lane.b32.xlu1 %v5422_v42, %s5708_s20  ;;  %v5424_v20 = vpop.eup %5423 }
0x2f61   : > { %v5426_v5 = vpop.eup %5425  ;;  %v2840_v61 = vadd.f32 1.0, %v5424_v20 }
0x2f62   : > { %v2867_v8 = vadd.f32 1.0, %v5426_v5 }
0x2f63   : > { %5427 = vrcp.f32 %v2840_v61 }
0x2f64   : > { %5429 = vrcp.f32 %v2867_v8 }
0x2f70   : > { %v5428_v16 = vpop.eup %5427 }
0x2f71   : > { %v5430_v25 = vpop.eup %5429  ;;  %v2847_v10 = vmul.f32 %v5428_v16, %v2845_v11 }
0x2f72   : > { %v2874_v31 = vmul.f32 %v5430_v25, %v2872_v12 }
0x2fd0   : > { %v2850_v29 = vpop.permute.xlu0 %2849 }
0x2fd1   : > { %v2852_v36 = vmul.f32 %v5428_v16, %v2850_v29 }
0x2fd2   : > { %v2877_v41 = vpop.permute.xlu1 %2876 }
0x2fd3   : > { %2854 = vrot.lane.b32.xlu0 %v2852_v36, %s5709_s21  ;;  %v2879_v59 = vmul.f32 %v5430_v25, %v2877_v41 }
0x2fd5   : > { %2881 = vrot.lane.b32.xlu1 %v2879_v59, %s5709_s21 }
0x3045   : > { %v2855_v51 = vpop.permute.xlu0 %2854 }
0x3046   : > { %v2857_v26 = vadd.f32 %v2855_v51, %v2847_v10  ;;  %v3055_v51 = vld [vmem:[#allocation2 + $0x8] sm:$0xc] }
0x3047   : > { %v2882_v52 = vpop.permute.xlu1 %2881 }
0x3048   : > { %5431 = vtanh.f32 %v2857_v26  ;;  %v2884_v19 = vadd.f32 %v2882_v52, %v2874_v31  ;;  %v2960_v18 = vrot.slane %v2857_v26, 4  ;;  %v3061_v31 = vld [vmem:[#allocation2 + $0x34] sm:$0x3]  ;;  %v3056_v52 = vunpack.c.l.bf16 %v3055_v51 }
0x304a   : > { %5433 = vtanh.f32 %v2884_v19  ;;  %v2987_v21 = vrot.slane %v2884_v19, 4 }
0x3055   : > { %v5432_v13 = vpop.eup %5431 }
0x3056   : > { %2860 = vrot.lane.b32.xlu0 %v5432_v13, %s5708_s20 }
0x3057   : > { %v5434_v4 = vpop.eup %5433 }
0x3058   : > { %2887 = vrot.lane.b32.xlu1 %v5434_v4, %s5708_s20 }
0x30c8   : > { %v2861_v3 = vpop.permute.xlu0 %2860 }
0x30c9   : > { %v6481_v0 = vmul.f32 %v5428_v16, %v2861_v3  ;;  %v3062_v3 = vunpack.c.l.bf16 %v3061_v31 }
0x30ca   : > { %v2888_v39 = vpop.permute.xlu1 %2887 }
0x30cb   : > { %v6483_v40 = vmul.f32 %v5430_v25, %v2888_v39  ;;  %v2892_v6 = vrot.slane %v6481_v0, 4 }
0x30cd   : > { %v2895_v38 = vrot.slane %v6483_v40, 4 }
0x30cf   : > { %v2897_v27 = vsel %vm637_vm1, %v2892_v6, %v2895_v38 }
0x30d0   : > { %v2898_v28 = vpack.c.bf16 %v2897_v27, %v2897_v27 }
0x30d2   : > { %2900 = vrot.lane.b32.xlu0 %v2898_v28, %s5709_s21 }
0x3144   : > { %v2901_v30 = vpop.permute.xlu0 %2900 }
0x3145   : > { %4996 = vmatmul.mubr.msk.bf16.vlgmr.msra.gmra.mxu0 %vm538_vm2, %v2901_v30 }
0x3146   : > { %3148 = vmatpush1.bf16.msra.mxu0 %v6374_v57  ;;  %3167 = vmatprep.mubr.bf16.mxu0 %v5707_v2 }
0x3147   : > { %3149 = vmatprep.subr.bf16.mxu0 %v6392_v56 }
0x314a   : > { %3150 = vmatpush1.bf16.msra.mxu0 %v6402_v35 }
0x314b   : > { %3377 = vmatprep.subr.bf16.mxu0 %v6360_v32 }
0x3205   : > { %v2939_v45 = vpop.f32.mrf.mxu0 }
0x3206   : > { %v2948_v60 = vadd.f32 %v2947_v46, %v2939_v45 }
0x3207   : > { %v2941_v62 = vpop.f32.mrf.mxu0 }
0x3208   : > { %5435 = vtanh.f32 %v2948_v60  ;;  %v2951_v63 = vadd.f32 %v2950_v53, %v2941_v62  ;;  %v4997_v49 = vmul.f32 -1.442695, %v2948_v60 }
0x3209   : > { %v2943_v55 = vpop.f32.mrf.mxu0 }
0x320a   : > { %5437 = vtanh.f32 %v2951_v63  ;;  %v4998_v50 = vmul.f32 -1.442695, %v2951_v63 }
0x320b   : > { %v2944_v24 = vpop.f32.mrf.mxu0  ;;  %5439 = vpow2.f32 %v4997_v49 }
0x320c   : > { %5441 = vpow2.f32 %v4998_v50 }
0x3215   : > { %v5436_v17 = vpop.eup %5435 }
0x3216   : > { %2964 = vrot.lane.b32.xlu1 %v5436_v17, %s5708_s20 }
0x3217   : > { %v5438_v54 = vpop.eup %5437 }
0x3218   : > { %2991 = vrot.lane.b32.xlu0 %v5438_v54, %s5708_s20  ;;  %v5440_v14 = vpop.eup %5439 }
0x3219   : > { %v5442_v22 = vpop.eup %5441  ;;  %v2955_v47 = vadd.f32 1.0, %v5440_v14 }
0x321a   : > { %v2982_v37 = vadd.f32 1.0, %v5442_v22 }
0x321b   : > { %5443 = vrcp.f32 %v2955_v47 }
0x321c   : > { %5445 = vrcp.f32 %v2982_v37 }
0x3228   : > { %v5444_v48 = vpop.eup %5443 }
0x3229   : > { %v5446_v7 = vpop.eup %5445  ;;  %v2962_v42 = vmul.f32 %v5444_v48, %v2960_v18  ;;  %v6530_v18 = vsel %vm637_vm1, %v6461_v58, %v6481_v0 }
0x322a   : > { %v2989_v5 = vmul.f32 %v5446_v7, %v2987_v21 }
0x3288   : > { %v2965_v23 = vpop.permute.xlu1 %2964 }
0x3289   : > { %v2967_v33 = vmul.f32 %v5444_v48, %v2965_v23 }
0x328a   : > { %v2992_v9 = vpop.permute.xlu0 %2991 }
0x328b   : > { %2969 = vrot.lane.b32.xlu1 %v2967_v33, %s5709_s21  ;;  %v2994_v15 = vmul.f32 %v5446_v7, %v2992_v9 }
0x328d   : > { %2996 = vrot.lane.b32.xlu0 %v2994_v15, %s5709_s21 }
0x32fd   : > { %v2970_v34 = vpop.permute.xlu1 %2969 }
0x32fe   : > { %v2972_v20 = vadd.f32 %v2970_v34, %v2962_v42 }
0x32ff   : > { %v2997_v61 = vpop.permute.xlu0 %2996 }
0x3300   : > { %5447 = vtanh.f32 %v2972_v20  ;;  %v2999_v8 = vadd.f32 %v2997_v61, %v2989_v5  ;;  %v3075_v49 = vrot.slane %v2972_v20, 4  ;;  %v6541_v5 = vsel %vm637_vm1, %v6483_v40, %v6463_v1  ;;  %v3176_v1 = vld [vmem:[#allocation2 + $0x10] sm:$0x3]  ;;  %v3179_v40 = vld [vmem:[#allocation2 + $0x2c] sm:$0xc] }
0x3302   : > { %5449 = vtanh.f32 %v2999_v8  ;;  %v3102_v14 = vrot.slane %v2999_v8, 4 }
0x330d   : > { %v5448_v16 = vpop.eup %5447 }
0x330e   : > { %2975 = vrot.lane.b32.xlu1 %v5448_v16, %s5708_s20 }
0x330f   : > { %v5450_v29 = vpop.eup %5449 }
0x3310   : > { %3002 = vrot.lane.b32.xlu0 %v5450_v29, %s5708_s20 }
0x3380   : > { %v2976_v36 = vpop.permute.xlu1 %2975 }
0x3381   : > { %v6501_v41 = vmul.f32 %v5444_v48, %v2976_v36 }
0x3382   : > { %v3003_v25 = vpop.permute.xlu0 %3002 }
0x3383   : > { %v6503_v59 = vmul.f32 %v5446_v7, %v3003_v25  ;;  %v3177_v25 = vunpack.c.l.bf16 %v3176_v1 }
0x3385   : > { %v3006_v11 = vsel %vm637_vm1, %v6501_v41, %v6503_v59 }
0x3386   : > { %v3007_v10 = vpack.c.bf16 %v3006_v11, %v3006_v11  ;;  %v3180_v11 = vunpack.c.l.bf16 %v3179_v40 }
0x3388   : > { %3009 = vrot.lane.b32.xlu1 %v3007_v10, %s5709_s21 }
0x33fa   : > { %v3010_v12 = vpop.permute.xlu1 %3009 }
0x33fb   : > { %4999 = vmatmul.mubr.msk.bf16.vlgmr.msra.gmra.mxu1 %vm538_vm2, %v3010_v12 }
0x33fc   : > { %3257 = vmatpush1.bf16.msra.mxu1 %v6374_v57  ;;  %3276 = vmatprep.mubr.bf16.mxu1 %v5707_v2 }
0x33fd   : > { %3258 = vmatprep.subr.bf16.mxu1 %v6392_v56 }
0x3400   : > { %3259 = vmatpush1.bf16.msra.mxu1 %v6402_v35 }
0x3401   : > { %3486 = vmatprep.subr.bf16.mxu1 %v6360_v32 }
0x34bb   : > { %v3048_v26 = vpop.f32.mrf.mxu1 }
0x34bc   : > { %v3058_v19 = vrot.slane %v3048_v26, 4 }
0x34bd   : > { %v3050_v13 = vpop.f32.mrf.mxu1 }
0x34be   : > { %v3060_v4 = vadd.f32 %v3058_v19, %v3056_v52  ;;  %v3064_v39 = vrot.slane %v3050_v13, 4 }
0x34bf   : > { %v3052_v6 = vpop.f32.mrf.mxu1 }
0x34c0   : > { %5451 = vtanh.f32 %v3060_v4  ;;  %v3066_v38 = vadd.f32 %v3064_v39, %v3062_v3  ;;  %v5000_v43 = vmul.f32 -1.442695, %v3060_v4 }
0x34c1   : > { %v3053_v27 = vpop.f32.mrf.mxu1 }
0x34c2   : > { %5453 = vtanh.f32 %v3066_v38  ;;  %v5001_v44 = vmul.f32 -1.442695, %v3066_v38 }
0x34c3   : > { %5455 = vpow2.f32 %v5000_v43 }
0x34c4   : > { %5457 = vpow2.f32 %v5001_v44 }
0x34cd   : > { %v5452_v28 = vpop.eup %5451 }
0x34ce   : > { %3079 = vrot.lane.b32.xlu0 %v5452_v28, %s5708_s20 }
0x34cf   : > { %v5454_v30 = vpop.eup %5453 }
0x34d0   : > { %3106 = vrot.lane.b32.xlu1 %v5454_v30, %s5708_s20  ;;  %v5456_v46 = vpop.eup %5455 }
0x34d1   : > { %v5458_v45 = vpop.eup %5457  ;;  %v3070_v60 = vadd.f32 1.0, %v5456_v46 }
0x34d2   : > { %v3097_v53 = vadd.f32 1.0, %v5458_v45 }
0x34d3   : > { %5459 = vrcp.f32 %v3070_v60 }
0x34d4   : > { %5461 = vrcp.f32 %v3097_v53 }
0x34e0   : > { %v5460_v62 = vpop.eup %5459 }
0x34e1   : > { %v5462_v24 = vpop.eup %5461  ;;  %v3077_v50 = vmul.f32 %v5460_v62, %v3075_v49 }
0x34e2   : > { %v3104_v37 = vmul.f32 %v5462_v24, %v3102_v14 }
0x3540   : > { %v3080_v63 = vpop.permute.xlu0 %3079 }
0x3541   : > { %v3082_v55 = vmul.f32 %v5460_v62, %v3080_v63 }
0x3542   : > { %v3107_v17 = vpop.permute.xlu1 %3106 }
0x3543   : > { %3084 = vrot.lane.b32.xlu0 %v3082_v55, %s5709_s21  ;;  %v3109_v54 = vmul.f32 %v5462_v24, %v3107_v17 }
0x3545   : > { %3111 = vrot.lane.b32.xlu1 %v3109_v54, %s5709_s21 }
0x35b5   : > { %v3085_v22 = vpop.permute.xlu0 %3084 }
0x35b6   : > { %v6519_v47 = vadd.f32 %v3085_v22, %v3077_v50 }
0x35b7   : > { %v3112_v48 = vpop.permute.xlu1 %3111 }
0x35b8   : > { %5463 = vtanh.f32 %v6519_v47  ;;  %v6522_v23 = vadd.f32 %v3112_v48, %v3104_v37  ;;  %v3190_v46 = vrot.slane %v6519_v47, 4 }
0x35ba   : > { %5465 = vtanh.f32 %v6522_v23  ;;  %v3217_v60 = vrot.slane %v6522_v23, 4  ;;  %v3285_v23 = vld [vmem:[#allocation2 + $0x10] sm:$0xc] }
0x35c5   : > { %v5464_v33 = vpop.eup %5463 }
0x35c6   : > { %3090 = vrot.lane.b32.xlu0 %v5464_v33, %s5708_s20 }
0x35c7   : > { %v5466_v7 = vpop.eup %5465 }
0x35c8   : > { %3117 = vrot.lane.b32.xlu1 %v5466_v7, %s5708_s20  ;;  %v3291_v7 = vld [vmem:[#allocation2 + $0x2c] sm:$0x3] }
0x3638   : > { %v3091_v9 = vpop.permute.xlu0 %3090 }
0x3639   : > { %v3093_v15 = vmul.f32 %v5460_v62, %v3091_v9  ;;  %v3286_v9 = vunpack.c.l.bf16 %v3285_v23 }
0x363a   : > { %v3118_v21 = vpop.permute.xlu1 %3117 }
0x363b   : > { %v6534_v42 = vsel %vm637_vm1, %v6501_v41, %v3093_v15  ;;  %v3120_v20 = vmul.f32 %v5462_v24, %v3118_v21  ;;  %v3122_v61 = vrot.slane %v3093_v15, 4 }
0x363c   : > { %v4517_v34 = vpack.c.bf16 %v6534_v42, %v6530_v18  ;;  %v5146_v18 = vld [vmem:[%s6974_s9] sm:$0xff]  }
0x363d   : > { %v3125_v8 = vrot.slane %v3120_v20, 4  ;;  %v6545_v58 = vsel %vm637_vm1, %v3120_v20, %v6503_v59 }
0x363e   : > { %v4528_v0 = vpack.c.bf16 %v6541_v5, %v6545_v58 }
0x363f   : > { %v3127_v16 = vsel %vm637_vm1, %v3122_v61, %v3125_v8  ;;  %v3292_v61 = vunpack.c.l.bf16 %v3291_v7 }
0x3640   : > { %v3128_v29 = vpack.c.bf16 %v3127_v16, %v3127_v16 }
0x3642   : > { %3130 = vrot.lane.b32.xlu0 %v3128_v29, %s5709_s21 }
0x36b4   : > { %v3131_v36 = vpop.permute.xlu0 %3130 }
0x36b5   : > { %5002 = vmatmul.mubr.msk.bf16.vlgmr.msra.gmra.mxu0 %vm538_vm2, %v3131_v36 }
0x36b6   : > { %3378 = vmatpush1.bf16.msra.mxu0 %v6374_v57  ;;  %3397 = vmatprep.mubr.bf16.mxu0 %v5707_v2 }
0x36b7   : > { %3379 = vmatprep.subr.bf16.mxu0 %v6392_v56 }
0x36ba   : > { %3380 = vmatpush1.bf16.msra.mxu0 %v6402_v35 }
0x36bb   : > { %3607 = vmatprep.subr.bf16.mxu0 %v6360_v32 }
0x3775   : > { %v3169_v41 = vpop.f32.mrf.mxu0 }
0x3776   : > { %v3178_v59 = vadd.f32 %v3177_v25, %v3169_v41 }
0x3777   : > { %v3171_v10 = vpop.f32.mrf.mxu0 }
0x3778   : > { %5467 = vtanh.f32 %v3178_v59  ;;  %v3181_v12 = vadd.f32 %v3180_v11, %v3171_v10  ;;  %v5003_v19 = vmul.f32 -1.442695, %v3178_v59 }
0x3779   : > { %v3173_v51 = vpop.f32.mrf.mxu0 }
0x377a   : > { %5469 = vtanh.f32 %v3181_v12  ;;  %v5004_v13 = vmul.f32 -1.442695, %v3181_v12 }
0x377b   : > { %v3174_v26 = vpop.f32.mrf.mxu0  ;;  %5471 = vpow2.f32 %v5003_v19 }
0x377c   : > { %5473 = vpow2.f32 %v5004_v13 }
0x3785   : > { %v5468_v31 = vpop.eup %5467 }
0x3786   : > { %3194 = vrot.lane.b32.xlu1 %v5468_v31, %s5708_s20 }
0x3787   : > { %v5470_v52 = vpop.eup %5469 }
0x3788   : > { %3221 = vrot.lane.b32.xlu0 %v5470_v52, %s5708_s20  ;;  %v5472_v4 = vpop.eup %5471 }
0x3789   : > { %v5474_v3 = vpop.eup %5473  ;;  %v3185_v39 = vadd.f32 1.0, %v5472_v4 }
0x378a   : > { %v3212_v6 = vadd.f32 1.0, %v5474_v3 }
0x378b   : > { %5475 = vrcp.f32 %v3185_v39 }
0x378c   : > { %5477 = vrcp.f32 %v3212_v6 }
0x3798   : > { %v5476_v38 = vpop.eup %5475 }
0x3799   : > { %v5478_v30 = vpop.eup %5477  ;;  %v3192_v45 = vmul.f32 %v5476_v38, %v3190_v46 }
0x379a   : > { %v3219_v63 = vmul.f32 %v5478_v30, %v3217_v60 }
0x37f8   : > { %v3195_v27 = vpop.permute.xlu1 %3194 }
0x37f9   : > { %v3197_v28 = vmul.f32 %v5476_v38, %v3195_v27 }
0x37fa   : > { %v3222_v43 = vpop.permute.xlu0 %3221 }
0x37fb   : > { %3199 = vrot.lane.b32.xlu1 %v3197_v28, %s5709_s21  ;;  %v3224_v44 = vmul.f32 %v5478_v30, %v3222_v43 }
0x37fd   : > { %3226 = vrot.lane.b32.xlu0 %v3224_v44, %s5709_s21 }
0x386d   : > { %v3200_v53 = vpop.permute.xlu1 %3199 }
0x386e   : > { %v3202_v62 = vadd.f32 %v3200_v53, %v3192_v45 }
0x386f   : > { %v3227_v55 = vpop.permute.xlu0 %3226 }
0x3870   : > { %5479 = vtanh.f32 %v3202_v62  ;;  %v3229_v24 = vadd.f32 %v3227_v55, %v3219_v63  ;;  %v3305_v13 = vrot.slane %v3202_v62, 4 }
0x3872   : > { %5481 = vtanh.f32 %v3229_v24  ;;  %v3332_v3 = vrot.slane %v3229_v24, 4 }
0x387d   : > { %v5480_v17 = vpop.eup %5479 }
0x387e   : > { %3205 = vrot.lane.b32.xlu1 %v5480_v17, %s5708_s20  ;;  %v6607_v17 = vld [vmem:[%s6972_s7 + $0x14] ss:$8 sps:$4 sm:$0xff]  }
0x387f   : > { %v5482_v54 = vpop.eup %5481 }
0x3880   : > { %3232 = vrot.lane.b32.xlu0 %v5482_v54, %s5708_s20  ;;  %v3406_v54 = vld [vmem:[#allocation2 + $0x18] sm:$0x3] }
0x38f0   : > { %v3206_v49 = vpop.permute.xlu1 %3205 }
0x38f1   : > { %v6565_v14 = vmul.f32 %v5476_v38, %v3206_v49  ;;  %v3409_v49 = vld [vmem:[#allocation2 + $0x24] sm:$0xc] }
0x38f2   : > { %v3233_v50 = vpop.permute.xlu0 %3232 }
0x38f3   : > { %v6567_v22 = vmul.f32 %v5478_v30, %v3233_v50  ;;  %v3407_v50 = vunpack.c.l.bf16 %v3406_v54 }
0x38f5   : > { %v3236_v47 = vsel %vm637_vm1, %v6565_v14, %v6567_v22 }
0x38f6   : > { %v3237_v37 = vpack.c.bf16 %v3236_v47, %v3236_v47 }
0x38f8   : > { %3239 = vrot.lane.b32.xlu1 %v3237_v37, %s5709_s21 }
0x396a   : > { %v3240_v48 = vpop.permute.xlu1 %3239 }
0x396b   : > { %5005 = vmatmul.mubr.msk.bf16.vlgmr.msra.gmra.mxu1 %vm538_vm2, %v3240_v48  ;;  %v3410_v48 = vunpack.c.l.bf16 %v3409_v49 }
0x396c   : > { %3487 = vmatpush1.bf16.msra.mxu1 %v6374_v57  ;;  %3506 = vmatprep.mubr.bf16.mxu1 %v5707_v2 }
0x396d   : > { %3488 = vmatprep.subr.bf16.mxu1 %v6392_v56 }
0x3970   : > { %3489 = vmatpush1.bf16.msra.mxu1 %v6402_v35 }
0x3971   : > { %3716 = vmatprep.subr.bf16.mxu1 %v6360_v32 }
0x3a2b   : > { %v3278_v33 = vpop.f32.mrf.mxu1 }
0x3a2c   : > { %v3288_v15 = vrot.slane %v3278_v33, 4 }
0x3a2d   : > { %v3280_v21 = vpop.f32.mrf.mxu1 }
0x3a2e   : > { %v3290_v20 = vadd.f32 %v3288_v15, %v3286_v9  ;;  %v3294_v8 = vrot.slane %v3280_v21, 4 }
0x3a2f   : > { %v3282_v16 = vpop.f32.mrf.mxu1 }
0x3a30   : > { %5483 = vtanh.f32 %v3290_v20  ;;  %v3296_v29 = vadd.f32 %v3294_v8, %v3292_v61  ;;  %v5006_v32 = vmul.f32 -1.442695, %v3290_v20 }
0x3a31   : > { %v3283_v36 = vpop.f32.mrf.mxu1 }
0x3a32   : > { %5485 = vtanh.f32 %v3296_v29  ;;  %v5007_v25 = vmul.f32 -1.442695, %v3296_v29 }
0x3a33   : > { %5487 = vpow2.f32 %v5006_v32 }
0x3a34   : > { %5489 = vpow2.f32 %v5007_v25 }
0x3a3d   : > { %v5484_v1 = vpop.eup %5483 }
0x3a3e   : > { %3309 = vrot.lane.b32.xlu0 %v5484_v1, %s5708_s20 }
0x3a3f   : > { %v5486_v40 = vpop.eup %5485 }
0x3a40   : > { %3336 = vrot.lane.b32.xlu1 %v5486_v40, %s5708_s20  ;;  %v5488_v41 = vpop.eup %5487 }
0x3a41   : > { %v5490_v59 = vpop.eup %5489  ;;  %v3300_v11 = vadd.f32 1.0, %v5488_v41 }
0x3a42   : > { %v3327_v10 = vadd.f32 1.0, %v5490_v59 }
0x3a43   : > { %5491 = vrcp.f32 %v3300_v11 }
0x3a44   : > { %5493 = vrcp.f32 %v3327_v10 }
0x3a50   : > { %v5492_v12 = vpop.eup %5491 }
0x3a51   : > { %v5494_v31 = vpop.eup %5493  ;;  %v3307_v4 = vmul.f32 %v5492_v12, %v3305_v13 }
0x3a52   : > { %v3334_v38 = vmul.f32 %v5494_v31, %v3332_v3 }
0x3ab0   : > { %v3310_v51 = vpop.permute.xlu0 %3309 }
0x3ab1   : > { %v3312_v26 = vmul.f32 %v5492_v12, %v3310_v51 }
0x3ab2   : > { %v3337_v52 = vpop.permute.xlu1 %3336 }
0x3ab3   : > { %3314 = vrot.lane.b32.xlu0 %v3312_v26, %s5709_s21  ;;  %v3339_v19 = vmul.f32 %v5494_v31, %v3337_v52 }
0x3ab5   : > { %3341 = vrot.lane.b32.xlu1 %v3339_v19, %s5709_s21 }
0x3b25   : > { %v3315_v39 = vpop.permute.xlu0 %3314 }
0x3b26   : > { %v6583_v6 = vadd.f32 %v3315_v39, %v3307_v4 }
0x3b27   : > { %v3342_v27 = vpop.permute.xlu1 %3341 }
0x3b28   : > { %5495 = vtanh.f32 %v6583_v6  ;;  %v6586_v28 = vadd.f32 %v3342_v27, %v3334_v38  ;;  %v3420_v25 = vrot.slane %v6583_v6, 4  ;;  %v6636_v27 = vld [vmem:[%s6972_s7 + $0x10] ss:$8 sps:$4 sm:$0xff]  }
0x3b2a   : > { %5497 = vtanh.f32 %v6586_v28  ;;  %v3447_v59 = vrot.slane %v6586_v28, 4  ;;  %v6643_v28 = vld [vmem:[%s6972_s7 + $0x4] ss:$8 sps:$4 sm:$0xff]  }
0x3b35   : > { %v5496_v30 = vpop.eup %5495 }
0x3b36   : > { %3320 = vrot.lane.b32.xlu0 %v5496_v30, %s5708_s20  ;;  %v6649_v30 = vld [vmem:[%s6972_s7] ss:$8 sps:$4 sm:$0xff]  }
0x3b37   : > { %v5498_v43 = vpop.eup %5497 }
0x3b38   : > { %3347 = vrot.lane.b32.xlu1 %v5498_v43, %s5708_s20  ;;  %v3515_v43 = vld [vmem:[#allocation2 + $0x18] sm:$0xc] }
0x3ba8   : > { %v3321_v44 = vpop.permute.xlu0 %3320 }
0x3ba9   : > { %v6591_v46 = vmul.f32 %v5492_v12, %v3321_v44 }
0x3baa   : > { %v3348_v45 = vpop.permute.xlu1 %3347 }
0x3bab   : > { %v6593_v60 = vmul.f32 %v5494_v31, %v3348_v45  ;;  %v3352_v53 = vrot.slane %v6591_v46, 4  ;;  %v3521_v45 = vld [vmem:[#allocation2 + $0x24] sm:$0x3] }
0x3bad   : > { %v3355_v62 = vrot.slane %v6593_v60, 4 }
0x3baf   : > { %v3357_v63 = vsel %vm637_vm1, %v3352_v53, %v3355_v62  ;;  %v3516_v53 = vunpack.c.l.bf16 %v3515_v43 }
0x3bb0   : > { %v3358_v55 = vpack.c.bf16 %v3357_v63, %v3357_v63 }
0x3bb2   : > { %3360 = vrot.lane.b32.xlu0 %v3358_v55, %s5709_s21 }
0x3c24   : > { %v3361_v24 = vpop.permute.xlu0 %3360 }
0x3c25   : > { %5008 = vmatmul.mubr.msk.bf16.vlgmr.msra.gmra.mxu0 %vm538_vm2, %v3361_v24  ;;  %v3522_v24 = vunpack.c.l.bf16 %v3521_v45 }
0x3c26   : > { %3608 = vmatpush1.bf16.msra.mxu0 %v6374_v57  ;;  %3627 = vmatprep.mubr.bf16.mxu0 %v5707_v2 }
0x3c27   : > { %3609 = vmatprep.subr.bf16.mxu0 %v6392_v56 }
0x3c2a   : > { %3610 = vmatpush1.bf16.msra.mxu0 %v6402_v35 }
0x3c2b   : > { %3837 = vmatprep.subr.bf16.mxu0 %v6607_v17 }
0x3ce5   : > { %v3399_v47 = vpop.f32.mrf.mxu0 }
0x3ce6   : > { %v3408_v37 = vadd.f32 %v3407_v50, %v3399_v47 }
0x3ce7   : > { %v3401_v57 = vpop.f32.mrf.mxu0 }
0x3ce8   : > { %5499 = vtanh.f32 %v3408_v37  ;;  %v3411_v23 = vadd.f32 %v3410_v48, %v3401_v57  ;;  %v5009_v9 = vmul.f32 -1.442695, %v3408_v37 }
0x3ce9   : > { %v3403_v33 = vpop.f32.mrf.mxu0 }
0x3cea   : > { %5501 = vtanh.f32 %v3411_v23  ;;  %v5010_v15 = vmul.f32 -1.442695, %v3411_v23 }
0x3ceb   : > { %v3404_v56 = vpop.f32.mrf.mxu0  ;;  %5503 = vpow2.f32 %v5009_v9 }
0x3cec   : > { %5505 = vpow2.f32 %v5010_v15 }
0x3cf5   : > { %v5500_v35 = vpop.eup %5499 }
0x3cf6   : > { %3424 = vrot.lane.b32.xlu1 %v5500_v35, %s5708_s20 }
0x3cf7   : > { %v5502_v7 = vpop.eup %5501 }
0x3cf8   : > { %3451 = vrot.lane.b32.xlu0 %v5502_v7, %s5708_s20  ;;  %v5504_v21 = vpop.eup %5503 }
0x3cf9   : > { %v5506_v20 = vpop.eup %5505  ;;  %v3415_v61 = vadd.f32 1.0, %v5504_v21 }
0x3cfa   : > { %v3442_v8 = vadd.f32 1.0, %v5506_v20 }
0x3cfb   : > { %5507 = vrcp.f32 %v3415_v61 }
0x3cfc   : > { %5509 = vrcp.f32 %v3442_v8 }
0x3d08   : > { %v5508_v16 = vpop.eup %5507 }
0x3d09   : > { %v5510_v1 = vpop.eup %5509  ;;  %v3422_v41 = vmul.f32 %v5508_v16, %v3420_v25 }
0x3d0a   : > { %v3449_v12 = vmul.f32 %v5510_v1, %v3447_v59 }
0x3d68   : > { %v3425_v29 = vpop.permute.xlu1 %3424 }
0x3d69   : > { %v3427_v36 = vmul.f32 %v5508_v16, %v3425_v29 }
0x3d6a   : > { %v3452_v40 = vpop.permute.xlu0 %3451 }
0x3d6b   : > { %3429 = vrot.lane.b32.xlu1 %v3427_v36, %s5709_s21  ;;  %v3454_v32 = vmul.f32 %v5510_v1, %v3452_v40 }
0x3d6d   : > { %3456 = vrot.lane.b32.xlu0 %v3454_v32, %s5709_s21 }
0x3ddd   : > { %v3430_v11 = vpop.permute.xlu1 %3429 }
0x3dde   : > { %v6616_v10 = vadd.f32 %v3430_v11, %v3422_v41 }
0x3ddf   : > { %v3457_v51 = vpop.permute.xlu0 %3456 }
0x3de0   : > { %5511 = vtanh.f32 %v6616_v10  ;;  %v6619_v26 = vadd.f32 %v3457_v51, %v3449_v12  ;;  %v6670_v51 = vsel %vm637_vm1, %v6565_v14, %v6591_v46 }
0x3de2   : > { %5513 = vtanh.f32 %v6619_v26  ;;  %v3562_v36 = vrot.slane %v6619_v26, 4 }
0x3ded   : > { %v5512_v31 = vpop.eup %5511 }
0x3dee   : > { %3435 = vrot.lane.b32.xlu1 %v5512_v31, %s5708_s20 }
0x3def   : > { %v5514_v52 = vpop.eup %5513 }
0x3df0   : > { %3462 = vrot.lane.b32.xlu0 %v5514_v52, %s5708_s20 }
0x3e60   : > { %v3436_v19 = vpop.permute.xlu1 %3435 }
0x3e61   : > { %v6624_v4 = vmul.f32 %v5508_v16, %v3436_v19  ;;  %v3535_v16 = vrot.slane %v6616_v10, 4 }
0x3e62   : > { %v3463_v13 = vpop.permute.xlu0 %3462 }
0x3e63   : > { %v6626_v3 = vmul.f32 %v5510_v1, %v3463_v13  ;;  %v6681_v13 = vsel %vm637_vm1, %v6593_v60, %v6567_v22  ;;  %v3636_v22 = vld [vmem:[#allocation2 + $0x20] sm:$0x3]  ;;  %v3639_v60 = vld [vmem:[#allocation2 + $0x1c] sm:$0xc] }
0x3e65   : > { %v3466_v39 = vsel %vm637_vm1, %v6624_v4, %v6626_v3 }
0x3e66   : > { %v3467_v6 = vpack.c.bf16 %v3466_v39, %v3466_v39 }
0x3e68   : > { %3469 = vrot.lane.b32.xlu1 %v3467_v6, %s5709_s21 }
0x3eda   : > { %v3470_v38 = vpop.permute.xlu1 %3469 }
0x3edb   : > { %5011 = vmatmul.mubr.msk.bf16.vlgmr.msra.gmra.mxu1 %vm538_vm2, %v3470_v38 }
0x3edc   : > { %3717 = vmatpush1.bf16.msra.mxu1 %v6636_v27  ;;  %3736 = vmatprep.mubr.bf16.mxu1 %v5707_v2 }
0x3edd   : > { %3718 = vmatprep.subr.bf16.mxu1 %v6643_v28 }
0x3ee0   : > { %3719 = vmatpush1.bf16.msra.mxu1 %v6649_v30 }
0x3ee1   : > { %3946 = vmatprep.subr.bf16.mxu1 %v6607_v17 }
0x3f9b   : > { %v3508_v44 = vpop.f32.mrf.mxu1 }
0x3f9c   : > { %v3518_v62 = vrot.slane %v3508_v44, 4 }
0x3f9d   : > { %v3510_v63 = vpop.f32.mrf.mxu1 }
0x3f9e   : > { %v3520_v55 = vadd.f32 %v3518_v62, %v3516_v53  ;;  %v3524_v54 = vrot.slane %v3510_v63, 4  ;;  %v3640_v53 = vunpack.c.l.bf16 %v3639_v60 }
0x3f9f   : > { %v3512_v49 = vpop.f32.mrf.mxu1 }
0x3fa0   : > { %5515 = vtanh.f32 %v3520_v55  ;;  %v3526_v50 = vadd.f32 %v3524_v54, %v3522_v24  ;;  %v5012_v57 = vmul.f32 -1.442695, %v3520_v55 }
0x3fa1   : > { %v3513_v47 = vpop.f32.mrf.mxu1 }
0x3fa2   : > { %5517 = vtanh.f32 %v3526_v50  ;;  %v5013_v23 = vmul.f32 -1.442695, %v3526_v50 }
0x3fa3   : > { %5519 = vpow2.f32 %v5012_v57 }
0x3fa4   : > { %5521 = vpow2.f32 %v5013_v23 }
0x3fad   : > { %v5516_v37 = vpop.eup %5515 }
0x3fae   : > { %3539 = vrot.lane.b32.xlu0 %v5516_v37, %s5708_s20 }
0x3faf   : > { %v5518_v48 = vpop.eup %5517 }
0x3fb0   : > { %3566 = vrot.lane.b32.xlu1 %v5518_v48, %s5708_s20  ;;  %v5520_v33 = vpop.eup %5519 }
0x3fb1   : > { %v5522_v56 = vpop.eup %5521  ;;  %v3530_v35 = vadd.f32 1.0, %v5520_v33 }
0x3fb2   : > { %v3557_v7 = vadd.f32 1.0, %v5522_v56 }
0x3fb3   : > { %5523 = vrcp.f32 %v3530_v35 }
0x3fb4   : > { %5525 = vrcp.f32 %v3557_v7 }
0x3fc0   : > { %v5524_v9 = vpop.eup %5523 }
0x3fc1   : > { %v5526_v20 = vpop.eup %5525  ;;  %v3537_v29 = vmul.f32 %v5524_v9, %v3535_v16 }
0x3fc2   : > { %v3564_v32 = vmul.f32 %v5526_v20, %v3562_v36 }
0x4020   : > { %v3540_v15 = vpop.permute.xlu0 %3539 }
0x4021   : > { %v3542_v21 = vmul.f32 %v5524_v9, %v3540_v15 }
0x4022   : > { %v3567_v61 = vpop.permute.xlu1 %3566 }
0x4023   : > { %3544 = vrot.lane.b32.xlu0 %v3542_v21, %s5709_s21  ;;  %v3569_v8 = vmul.f32 %v5526_v20, %v3567_v61 }
0x4025   : > { %3571 = vrot.lane.b32.xlu1 %v3569_v8, %s5709_s21 }
0x4095   : > { %v3545_v1 = vpop.permute.xlu0 %3544 }
0x4096   : > { %v6659_v40 = vadd.f32 %v3545_v1, %v3537_v29 }
0x4097   : > { %v3572_v25 = vpop.permute.xlu1 %3571 }
0x4098   : > { %5527 = vtanh.f32 %v6659_v40  ;;  %v6662_v41 = vadd.f32 %v3572_v25, %v3564_v32  ;;  %v3650_v21 = vrot.slane %v6659_v40, 4 }
0x409a   : > { %5529 = vtanh.f32 %v6662_v41  ;;  %v3677_v61 = vrot.slane %v6662_v41, 4 }
0x40a5   : > { %v5528_v59 = vpop.eup %5527 }
0x40a6   : > { %3550 = vrot.lane.b32.xlu0 %v5528_v59, %s5708_s20 }
0x40a7   : > { %v5530_v11 = vpop.eup %5529 }
0x40a8   : > { %3577 = vrot.lane.b32.xlu1 %v5530_v11, %s5708_s20 }
0x4118   : > { %v3551_v10 = vpop.permute.xlu0 %3550 }
0x4119   : > { %v3553_v12 = vmul.f32 %v5524_v9, %v3551_v10 }
0x411a   : > { %v3578_v31 = vpop.permute.xlu1 %3577 }
0x411b   : > { %v6674_v26 = vsel %vm637_vm1, %v6624_v4, %v3553_v12  ;;  %v3580_v19 = vmul.f32 %v5526_v20, %v3578_v31  ;;  %v3582_v39 = vrot.slane %v3553_v12, 4 }
0x411c   : > { %v4518_v52 = vpack.c.bf16 %v6674_v26, %v6670_v51 }
0x411d   : > { %v3585_v6 = vrot.slane %v3580_v19, 4  ;;  %v6685_v14 = vsel %vm637_vm1, %v3580_v19, %v6626_v3  ;;  %v3637_v3 = vunpack.c.l.bf16 %v3636_v22  ;;  %v3745_v19 = vld [vmem:[#allocation2 + $0x20] sm:$0xc] }
0x411e   : > { %v4527_v46 = vpack.c.bf16 %v6681_v13, %v6685_v14 }
0x411f   : > { %v3587_v4 = vsel %vm637_vm1, %v3582_v39, %v3585_v6  ;;  %v3751_v6 = vld [vmem:[#allocation2 + $0x1c] sm:$0x3] }
0x4120   : > { %v3588_v38 = vpack.c.bf16 %v3587_v4, %v3587_v4  ;;  %v3746_v4 = vunpack.c.l.bf16 %v3745_v19  ;;  %v3752_v60 = vunpack.c.l.bf16 %v3751_v6  ;;  %v3866_v19 = vld [vmem:[#allocation2 + $0x28] sm:$0x3] }
0x4121   : > { %v3867_v6 = vunpack.c.l.bf16 %v3866_v19  ;;  %v3981_v19 = vld [vmem:[#allocation2 + $0x14] sm:$0x3] }
0x4122   : > { %3590 = vrot.lane.b32.xlu0 %v3588_v38, %s5709_s21 }
0x4194   : > { %v3591_v43 = vpop.permute.xlu0 %3590 }
0x4195   : > { %5014 = vmatmul.mubr.msk.bf16.vlgmr.msra.gmra.mxu0 %vm538_vm2, %v3591_v43 }
0x4196   : > { %3838 = vmatpush1.bf16.msra.mxu0 %v6636_v27  ;;  %3857 = vmatprep.mubr.bf16.mxu0 %v5707_v2 }
0x4197   : > { %3839 = vmatprep.subr.bf16.mxu0 %v6643_v28 }
0x419a   : > { %3840 = vmatpush1.bf16.msra.mxu0 %v6649_v30 }
0x419b   : > { %4067 = vmatprep.subr.bf16.mxu0 %v6607_v17 }
0x4255   : > { %v3629_v44 = vpop.f32.mrf.mxu0 }
0x4256   : > { %v3638_v45 = vadd.f32 %v3637_v3, %v3629_v44 }
0x4257   : > { %v3631_v62 = vpop.f32.mrf.mxu0 }
0x4258   : > { %5531 = vtanh.f32 %v3638_v45  ;;  %v3641_v63 = vadd.f32 %v3640_v53, %v3631_v62  ;;  %v5015_v50 = vmul.f32 -1.442695, %v3638_v45 }
0x4259   : > { %v3633_v55 = vpop.f32.mrf.mxu0 }
0x425a   : > { %5533 = vtanh.f32 %v3641_v63  ;;  %v5016_v47 = vmul.f32 -1.442695, %v3641_v63 }
0x425b   : > { %v3634_v24 = vpop.f32.mrf.mxu0  ;;  %5535 = vpow2.f32 %v5015_v50 }
0x425c   : > { %5537 = vpow2.f32 %v5016_v47 }
0x4265   : > { %v5532_v54 = vpop.eup %5531 }
0x4266   : > { %3654 = vrot.lane.b32.xlu1 %v5532_v54, %s5708_s20 }
0x4267   : > { %v5534_v49 = vpop.eup %5533 }
0x4268   : > { %3681 = vrot.lane.b32.xlu0 %v5534_v49, %s5708_s20  ;;  %v5536_v37 = vpop.eup %5535 }
0x4269   : > { %v5538_v48 = vpop.eup %5537  ;;  %v3645_v57 = vadd.f32 1.0, %v5536_v37 }
0x426a   : > { %v3672_v23 = vadd.f32 1.0, %v5538_v48 }
0x426b   : > { %5539 = vrcp.f32 %v3645_v57 }
0x426c   : > { %5541 = vrcp.f32 %v3672_v23 }
0x4278   : > { %v5540_v33 = vpop.eup %5539 }
0x4279   : > { %v5542_v7 = vpop.eup %5541  ;;  %v3652_v20 = vmul.f32 %v5540_v33, %v3650_v21 }
0x427a   : > { %v3679_v29 = vmul.f32 %v5542_v7, %v3677_v61 }
0x42d8   : > { %v3655_v56 = vpop.permute.xlu1 %3654 }
0x42d9   : > { %v3657_v35 = vmul.f32 %v5540_v33, %v3655_v56 }
0x42da   : > { %v3682_v9 = vpop.permute.xlu0 %3681 }
0x42db   : > { %3659 = vrot.lane.b32.xlu1 %v3657_v35, %s5709_s21  ;;  %v3684_v15 = vmul.f32 %v5542_v7, %v3682_v9 }
0x42dd   : > { %3686 = vrot.lane.b32.xlu0 %v3684_v15, %s5709_s21 }
0x434d   : > { %v3660_v8 = vpop.permute.xlu1 %3659 }
0x434e   : > { %v3662_v16 = vadd.f32 %v3660_v8, %v3652_v20 }
0x434f   : > { %v3687_v36 = vpop.permute.xlu0 %3686 }
0x4350   : > { %5543 = vtanh.f32 %v3662_v16  ;;  %v3689_v1 = vadd.f32 %v3687_v36, %v3679_v29  ;;  %v3765_v35 = vrot.slane %v3662_v16, 4 }
0x4352   : > { %5545 = vtanh.f32 %v3689_v1  ;;  %v3792_v9 = vrot.slane %v3689_v1, 4 }
0x435d   : > { %v5544_v32 = vpop.eup %5543 }
0x435e   : > { %3665 = vrot.lane.b32.xlu1 %v5544_v32, %s5708_s20 }
0x435f   : > { %v5546_v25 = vpop.eup %5545 }
0x4360   : > { %3692 = vrot.lane.b32.xlu0 %v5546_v25, %s5708_s20 }
0x43d0   : > { %v3666_v59 = vpop.permute.xlu1 %3665 }
0x43d1   : > { %v6705_v10 = vmul.f32 %v5540_v33, %v3666_v59 }
0x43d2   : > { %v3693_v11 = vpop.permute.xlu0 %3692 }
0x43d3   : > { %v6707_v40 = vmul.f32 %v5542_v7, %v3693_v11 }
0x43d5   : > { %v3696_v41 = vsel %vm637_vm1, %v6705_v10, %v6707_v40 }
0x43d6   : > { %v3697_v12 = vpack.c.bf16 %v3696_v41, %v3696_v41 }
0x43d8   : > { %3699 = vrot.lane.b32.xlu1 %v3697_v12, %s5709_s21 }
0x444a   : > { %v3700_v31 = vpop.permute.xlu1 %3699 }
0x444b   : > { %5017 = vmatmul.mubr.msk.bf16.vlgmr.msra.gmra.mxu1 %vm538_vm2, %v3700_v31 }
0x444c   : > { %3947 = vmatpush1.bf16.msra.mxu1 %v6636_v27  ;;  %3966 = vmatprep.mubr.bf16.mxu1 %v5707_v2 }
0x444d   : > { %3948 = vmatprep.subr.bf16.mxu1 %v6643_v28 }
0x4450   : > { %3949 = vmatpush1.bf16.msra.mxu1 %v6649_v30 }
0x4451   : > { %4176 = vmatprep.subr.bf16.mxu1 %v6607_v17 }
0x450b   : > { %v3738_v39 = vpop.f32.mrf.mxu1 }
0x450c   : > { %v3748_v38 = vrot.slane %v3738_v39, 4  ;;  %v3869_v39 = vld [vmem:[#allocation2 + $0x14] sm:$0xc] }
0x450d   : > { %v3740_v43 = vpop.f32.mrf.mxu1 }
0x450e   : > { %v3750_v22 = vadd.f32 %v3748_v38, %v3746_v4  ;;  %v3754_v3 = vrot.slane %v3740_v43, 4  ;;  %v3870_v43 = vunpack.c.l.bf16 %v3869_v39 }
0x450f   : > { %v3742_v44 = vpop.f32.mrf.mxu1 }
0x4510   : > { %5547 = vtanh.f32 %v3750_v22  ;;  %v3756_v45 = vadd.f32 %v3754_v3, %v3752_v60  ;;  %v5018_v55 = vmul.f32 -1.442695, %v3750_v22 }
0x4511   : > { %v3743_v53 = vpop.f32.mrf.mxu1 }
0x4512   : > { %5549 = vtanh.f32 %v3756_v45  ;;  %v5019_v24 = vmul.f32 -1.442695, %v3756_v45 }
0x4513   : > { %5551 = vpow2.f32 %v5018_v55 }
0x4514   : > { %5553 = vpow2.f32 %v5019_v24 }
0x451d   : > { %v5548_v62 = vpop.eup %5547 }
0x451e   : > { %3769 = vrot.lane.b32.xlu0 %v5548_v62, %s5708_s20 }
0x451f   : > { %v5550_v63 = vpop.eup %5549 }
0x4520   : > { %3796 = vrot.lane.b32.xlu1 %v5550_v63, %s5708_s20  ;;  %v5552_v54 = vpop.eup %5551 }
0x4521   : > { %v5554_v49 = vpop.eup %5553  ;;  %v3760_v50 = vadd.f32 1.0, %v5552_v54 }
0x4522   : > { %v3787_v47 = vadd.f32 1.0, %v5554_v49 }
0x4523   : > { %5555 = vrcp.f32 %v3760_v50 }
0x4524   : > { %5557 = vrcp.f32 %v3787_v47 }
0x4530   : > { %v5556_v37 = vpop.eup %5555 }
0x4531   : > { %v5558_v23 = vpop.eup %5557  ;;  %v3767_v7 = vmul.f32 %v5556_v37, %v3765_v35 }
0x4532   : > { %v3794_v20 = vmul.f32 %v5558_v23, %v3792_v9 }
0x4590   : > { %v3770_v48 = vpop.permute.xlu0 %3769 }
0x4591   : > { %v3772_v57 = vmul.f32 %v5556_v37, %v3770_v48 }
0x4592   : > { %v3797_v33 = vpop.permute.xlu1 %3796 }
0x4593   : > { %3774 = vrot.lane.b32.xlu0 %v3772_v57, %s5709_s21  ;;  %v3799_v56 = vmul.f32 %v5558_v23, %v3797_v33 }
0x4595   : > { %3801 = vrot.lane.b32.xlu1 %v3799_v56, %s5709_s21 }
0x4605   : > { %v3775_v15 = vpop.permute.xlu0 %3774 }
0x4606   : > { %v3777_v21 = vadd.f32 %v3775_v15, %v3767_v7 }
0x4607   : > { %v3802_v61 = vpop.permute.xlu1 %3801 }
0x4608   : > { %5559 = vtanh.f32 %v3777_v21  ;;  %v3804_v8 = vadd.f32 %v3802_v61, %v3794_v20  ;;  %v3880_v33 = vrot.slane %v3777_v21, 4 }
0x460a   : > { %5561 = vtanh.f32 %v3804_v8  ;;  %v3907_v35 = vrot.slane %v3804_v8, 4 }
0x4615   : > { %v5560_v29 = vpop.eup %5559 }
0x4616   : > { %3780 = vrot.lane.b32.xlu0 %v5560_v29, %s5708_s20 }
0x4617   : > { %v5562_v36 = vpop.eup %5561 }
0x4618   : > { %3807 = vrot.lane.b32.xlu1 %v5562_v36, %s5708_s20 }
0x4688   : > { %v3781_v32 = vpop.permute.xlu0 %3780 }
0x4689   : > { %v6725_v25 = vmul.f32 %v5556_v37, %v3781_v32 }
0x468a   : > { %v3808_v59 = vpop.permute.xlu1 %3807 }
0x468b   : > { %v6727_v16 = vmul.f32 %v5558_v23, %v3808_v59  ;;  %v3812_v1 = vrot.slane %v6725_v25, 4 }
0x468d   : > { %v3815_v11 = vrot.slane %v6727_v16, 4 }
0x468f   : > { %v3817_v41 = vsel %vm637_vm1, %v3812_v1, %v3815_v11 }
0x4690   : > { %v3818_v12 = vpack.c.bf16 %v3817_v41, %v3817_v41 }
0x4692   : > { %3820 = vrot.lane.b32.xlu0 %v3818_v12, %s5709_s21  ;;  %v3975_v12 = vld [vmem:[#allocation2 + $0x28] sm:$0xc] }
0x4693   : > { %v3976_v39 = vunpack.c.l.bf16 %v3975_v12 }
0x4704   : > { %v3821_v31 = vpop.permute.xlu0 %3820 }
0x4705   : > { %5020 = vmatmul.mubr.msk.bf16.vlgmr.msra.gmra.mxu0 %vm538_vm2, %v3821_v31 }
0x4706   : > { %4068 = vmatpush1.bf16.msra.mxu0 %v6636_v27  ;;  %4087 = vmatprep.mubr.bf16.mxu0 %v5707_v2 }
0x4707   : > { %4069 = vmatprep.subr.bf16.mxu0 %v6643_v28 }
0x470a   : > { %4070 = vmatpush1.bf16.msra.mxu0 %v6649_v30 }
0x470b   : > { %4297 = vmatprep.subr.bf16.mxu0 %v6607_v17 }
0x47c5   : > { %v3859_v4 = vpop.f32.mrf.mxu0 }
0x47c6   : > { %v3868_v38 = vadd.f32 %v3867_v6, %v3859_v4 }
0x47c7   : > { %v3861_v22 = vpop.f32.mrf.mxu0 }
0x47c8   : > { %5563 = vtanh.f32 %v3868_v38  ;;  %v3871_v60 = vadd.f32 %v3870_v43, %v3861_v22  ;;  %v5021_v62 = vmul.f32 -1.442695, %v3868_v38  ;;  %v3982_v43 = vunpack.c.l.bf16 %v3981_v19 }
0x47c9   : > { %v3863_v3 = vpop.f32.mrf.mxu0 }
0x47ca   : > { %5565 = vtanh.f32 %v3871_v60  ;;  %v5022_v63 = vmul.f32 -1.442695, %v3871_v60 }
0x47cb   : > { %v3864_v44 = vpop.f32.mrf.mxu0  ;;  %5567 = vpow2.f32 %v5021_v62 }
0x47cc   : > { %5569 = vpow2.f32 %v5022_v63 }
0x47d5   : > { %v5564_v45 = vpop.eup %5563 }
0x47d6   : > { %3884 = vrot.lane.b32.xlu1 %v5564_v45, %s5708_s20 }
0x47d7   : > { %v5566_v53 = vpop.eup %5565 }
0x47d8   : > { %3911 = vrot.lane.b32.xlu0 %v5566_v53, %s5708_s20  ;;  %v5568_v55 = vpop.eup %5567 }
0x47d9   : > { %v5570_v24 = vpop.eup %5569  ;;  %v3875_v54 = vadd.f32 1.0, %v5568_v55 }
0x47da   : > { %v3902_v49 = vadd.f32 1.0, %v5570_v24 }
0x47db   : > { %5571 = vrcp.f32 %v3875_v54 }
0x47dc   : > { %5573 = vrcp.f32 %v3902_v49 }
0x47e8   : > { %v5572_v50 = vpop.eup %5571 }
0x47e9   : > { %v5574_v48 = vpop.eup %5573  ;;  %v3882_v56 = vmul.f32 %v5572_v50, %v3880_v33 }
0x47ea   : > { %v3909_v15 = vmul.f32 %v5574_v48, %v3907_v35 }
0x4848   : > { %v3885_v47 = vpop.permute.xlu1 %3884 }
0x4849   : > { %v3887_v37 = vmul.f32 %v5572_v50, %v3885_v47 }
0x484a   : > { %v3912_v57 = vpop.permute.xlu0 %3911 }
0x484b   : > { %3889 = vrot.lane.b32.xlu1 %v3887_v37, %s5709_s21  ;;  %v3914_v23 = vmul.f32 %v5574_v48, %v3912_v57 }
0x484d   : > { %3916 = vrot.lane.b32.xlu0 %v3914_v23, %s5709_s21 }
0x48bd   : > { %v3890_v7 = vpop.permute.xlu1 %3889 }
0x48be   : > { %v3892_v9 = vadd.f32 %v3890_v7, %v3882_v56 }
0x48bf   : > { %v3917_v20 = vpop.permute.xlu0 %3916 }
0x48c0   : > { %5575 = vtanh.f32 %v3892_v9  ;;  %v3919_v61 = vadd.f32 %v3917_v20, %v3909_v15  ;;  %v3995_v23 = vrot.slane %v3892_v9, 4 }
0x48c2   : > { %5577 = vtanh.f32 %v3919_v61  ;;  %v4022_v56 = vrot.slane %v3919_v61, 4  ;;  %v6774_v61 = vsel %vm637_vm1, %v6705_v10, %v6725_v25 }
0x48cd   : > { %v5576_v29 = vpop.eup %5575 }
0x48ce   : > { %3895 = vrot.lane.b32.xlu1 %v5576_v29, %s5708_s20 }
0x48cf   : > { %v5578_v36 = vpop.eup %5577 }
0x48d0   : > { %3922 = vrot.lane.b32.xlu0 %v5578_v36, %s5708_s20 }
0x4940   : > { %v3896_v32 = vpop.permute.xlu1 %3895 }
0x4941   : > { %v6745_v1 = vmul.f32 %v5572_v50, %v3896_v32 }
0x4942   : > { %v3923_v59 = vpop.permute.xlu0 %3922 }
0x4943   : > { %v6747_v21 = vmul.f32 %v5574_v48, %v3923_v59 }
0x4945   : > { %v3926_v8 = vsel %vm637_vm1, %v6745_v1, %v6747_v21 }
0x4946   : > { %v3927_v11 = vpack.c.bf16 %v3926_v8, %v3926_v8 }
0x4948   : > { %3929 = vrot.lane.b32.xlu1 %v3927_v11, %s5709_s21 }
0x49ba   : > { %v3930_v41 = vpop.permute.xlu1 %3929 }
0x49bb   : > { %5023 = vmatmul.mubr.msk.bf16.vlgmr.msra.gmra.mxu1 %vm538_vm2, %v3930_v41 }
0x49bc   : > { %4177 = vmatpush1.bf16.msra.mxu1 %v6636_v27  ;;  %4196 = vmatprep.mubr.bf16.mxu1 %v5707_v2 }
0x49bd   : > { %4178 = vmatprep.subr.bf16.mxu1 %v6643_v28 }
0x49c0   : > { %4179 = vmatpush1.bf16.msra.mxu1 %v6649_v30 }
0x49c1   : > { %4406 = vmatprep.subr.bf16.mxu1 %v6607_v17 }
0x4a7b   : > { %v3968_v31 = vpop.f32.mrf.mxu1 }
0x4a7c   : > { %v3978_v6 = vrot.slane %v3968_v31, 4  ;;  %v6785_v31 = vsel %vm637_vm1, %v6727_v16, %v6707_v40  ;;  %v4096_v40 = vld [vmem:[#allocation2 + $0x30] sm:$0x3]  ;;  %v4099_v16 = vld [vmem:[#allocation2 + $0xc] sm:$0xc] }
0x4a7d   : > { %v3970_v4 = vpop.f32.mrf.mxu1 }
0x4a7e   : > { %v3980_v38 = vadd.f32 %v3978_v6, %v3976_v39  ;;  %v3984_v22 = vrot.slane %v3970_v4, 4 }
0x4a7f   : > { %v3972_v60 = vpop.f32.mrf.mxu1 }
0x4a80   : > { %5579 = vtanh.f32 %v3980_v38  ;;  %v3986_v3 = vadd.f32 %v3984_v22, %v3982_v43  ;;  %v5024_v17 = vmul.f32 -1.442695, %v3980_v38  ;;  %v4100_v22 = vunpack.c.l.bf16 %v4099_v16  ;;  %v4211_v16 = vld [vmem:[#allocation2 + $0xc] sm:$0x3] }
0x4a81   : > { %v3973_v44 = vpop.f32.mrf.mxu1 }
0x4a82   : > { %5581 = vtanh.f32 %v3986_v3  ;;  %v5025_v62 = vmul.f32 -1.442695, %v3986_v3 }
0x4a83   : > { %5583 = vpow2.f32 %v5024_v17 }
0x4a84   : > { %5585 = vpow2.f32 %v5025_v62 }
0x4a8d   : > { %v5580_v45 = vpop.eup %5579 }
0x4a8e   : > { %3999 = vrot.lane.b32.xlu0 %v5580_v45, %s5708_s20 }
0x4a8f   : > { %v5582_v53 = vpop.eup %5581 }
0x4a90   : > { %4026 = vrot.lane.b32.xlu1 %v5582_v53, %s5708_s20  ;;  %v5584_v63 = vpop.eup %5583 }
0x4a91   : > { %v5586_v55 = vpop.eup %5585  ;;  %v3990_v24 = vadd.f32 1.0, %v5584_v63 }
0x4a92   : > { %v4017_v54 = vadd.f32 1.0, %v5586_v55 }
0x4a93   : > { %5587 = vrcp.f32 %v3990_v24 }
0x4a94   : > { %5589 = vrcp.f32 %v4017_v54 }
0x4aa0   : > { %v5588_v49 = vpop.eup %5587 }
0x4aa1   : > { %v5590_v37 = vpop.eup %5589  ;;  %v3997_v33 = vmul.f32 %v5588_v49, %v3995_v23 }
0x4aa2   : > { %v4024_v15 = vmul.f32 %v5590_v37, %v4022_v56 }
0x4b00   : > { %v4000_v50 = vpop.permute.xlu0 %3999 }
0x4b01   : > { %v4002_v47 = vmul.f32 %v5588_v49, %v4000_v50 }
0x4b02   : > { %v4027_v48 = vpop.permute.xlu1 %4026 }
0x4b03   : > { %4004 = vrot.lane.b32.xlu0 %v4002_v47, %s5709_s21  ;;  %v4029_v57 = vmul.f32 %v5590_v37, %v4027_v48 }
0x4b05   : > { %4031 = vrot.lane.b32.xlu1 %v4029_v57, %s5709_s21 }
0x4b75   : > { %v4005_v35 = vpop.permute.xlu0 %4004 }
0x4b76   : > { %v6763_v7 = vadd.f32 %v4005_v35, %v3997_v33 }
0x4b77   : > { %v4032_v20 = vpop.permute.xlu1 %4031 }
0x4b78   : > { %5591 = vtanh.f32 %v6763_v7  ;;  %v6766_v29 = vadd.f32 %v4032_v20, %v4024_v15  ;;  %v4110_v33 = vrot.slane %v6763_v7, 4 }
0x4b7a   : > { %5593 = vtanh.f32 %v6766_v29  ;;  %v4137_v35 = vrot.slane %v6766_v29, 4 }
0x4b85   : > { %v5592_v36 = vpop.eup %5591 }
0x4b86   : > { %4010 = vrot.lane.b32.xlu0 %v5592_v36, %s5708_s20 }
0x4b87   : > { %v5594_v32 = vpop.eup %5593 }
0x4b88   : > { %4037 = vrot.lane.b32.xlu1 %v5594_v32, %s5708_s20 }
0x4bf8   : > { %v4011_v9 = vpop.permute.xlu0 %4010 }
0x4bf9   : > { %v4013_v59 = vmul.f32 %v5588_v49, %v4011_v9 }
0x4bfa   : > { %v4038_v11 = vpop.permute.xlu1 %4037 }
0x4bfb   : > { %v6778_v8 = vsel %vm637_vm1, %v6745_v1, %v4013_v59  ;;  %v4040_v12 = vmul.f32 %v5590_v37, %v4038_v11  ;;  %v4042_v19 = vrot.slane %v4013_v59, 4 }
0x4bfc   : > { %v4519_v41 = vpack.c.bf16 %v6778_v8, %v6774_v61 }
0x4bfd   : > { %v4045_v39 = vrot.slane %v4040_v12, 4  ;;  %v6789_v10 = vsel %vm637_vm1, %v4040_v12, %v6747_v21  ;;  %v4097_v21 = vunpack.c.l.bf16 %v4096_v40 }
0x4bfe   : > { %v4526_v25 = vpack.c.bf16 %v6785_v31, %v6789_v10 }
0x4bff   : > { %v4047_v1 = vsel %vm637_vm1, %v4042_v19, %v4045_v39 }
0x4c00   : > { %v4048_v6 = vpack.c.bf16 %v4047_v1, %v4047_v1 }
0x4c02   : > { %4050 = vrot.lane.b32.xlu0 %v4048_v6, %s5709_s21 }
0x4c74   : > { %v4051_v4 = vpop.permute.xlu0 %4050 }
0x4c75   : > { %5026 = vmatmul.mubr.msk.bf16.vlgmr.msra.gmra.mxu0 %vm538_vm2, %v4051_v4  ;;  %v4205_v4 = vld [vmem:[#allocation2 + $0x30] sm:$0xc] }
0x4c76   : > { %4298 = vmatpush1.bf16.msra.mxu0 %v6636_v27  ;;  %4317 = vmatprep.mubr.bf16.mxu0 %v5707_v2 }
0x4c77   : > { %4299 = vmatprep.subr.bf16.mxu0 %v6643_v28 }
0x4c7a   : > { %4300 = vmatpush1.bf16.msra.mxu0 %v6649_v30 }
0x4d35   : > { %v4089_v38 = vpop.f32.mrf.mxu0 }
0x4d36   : > { %v4098_v43 = vadd.f32 %v4097_v21, %v4089_v38  ;;  %v4206_v21 = vunpack.c.l.bf16 %v4205_v4 }
0x4d37   : > { %v4091_v60 = vpop.f32.mrf.mxu0 }
0x4d38   : > { %5595 = vtanh.f32 %v4098_v43  ;;  %v4101_v3 = vadd.f32 %v4100_v22, %v4091_v60  ;;  %v5027_v62 = vmul.f32 -1.442695, %v4098_v43  ;;  %v4212_v60 = vunpack.c.l.bf16 %v4211_v16  ;;  %v4329_v16 = vld [vmem:[#allocation2 + $0x4] sm:$0xc] }
0x4d39   : > { %v4093_v44 = vpop.f32.mrf.mxu0 }
0x4d3a   : > { %5597 = vtanh.f32 %v4101_v3  ;;  %v5028_v63 = vmul.f32 -1.442695, %v4101_v3 }
0x4d3b   : > { %v4094_v45 = vpop.f32.mrf.mxu0  ;;  %5599 = vpow2.f32 %v5027_v62 }
0x4d3c   : > { %5601 = vpow2.f32 %v5028_v63 }
0x4d45   : > { %v5596_v53 = vpop.eup %5595 }
0x4d46   : > { %4114 = vrot.lane.b32.xlu1 %v5596_v53, %s5708_s20 }
0x4d47   : > { %v5598_v17 = vpop.eup %5597 }
0x4d48   : > { %4141 = vrot.lane.b32.xlu0 %v5598_v17, %s5708_s20  ;;  %v5600_v55 = vpop.eup %5599 }
0x4d49   : > { %v5602_v24 = vpop.eup %5601  ;;  %v4105_v54 = vadd.f32 1.0, %v5600_v55 }
0x4d4a   : > { %v4132_v49 = vadd.f32 1.0, %v5602_v24 }
0x4d4b   : > { %5603 = vrcp.f32 %v4105_v54 }
0x4d4c   : > { %5605 = vrcp.f32 %v4132_v49 }
0x4d58   : > { %v5604_v50 = vpop.eup %5603 }
0x4d59   : > { %v5606_v48 = vpop.eup %5605  ;;  %v4112_v56 = vmul.f32 %v5604_v50, %v4110_v33 }
0x4d5a   : > { %v4139_v36 = vmul.f32 %v5606_v48, %v4137_v35 }
0x4db8   : > { %v4115_v47 = vpop.permute.xlu1 %4114 }
0x4db9   : > { %v4117_v37 = vmul.f32 %v5604_v50, %v4115_v47 }
0x4dba   : > { %v4142_v57 = vpop.permute.xlu0 %4141 }
0x4dbb   : > { %4119 = vrot.lane.b32.xlu1 %v4117_v37, %s5709_s21  ;;  %v4144_v23 = vmul.f32 %v5606_v48, %v4142_v57 }
0x4dbd   : > { %4146 = vrot.lane.b32.xlu0 %v4144_v23, %s5709_s21 }
0x4e2d   : > { %v4120_v15 = vpop.permute.xlu1 %4119 }
0x4e2e   : > { %v4122_v20 = vadd.f32 %v4120_v15, %v4112_v56 }
0x4e2f   : > { %v4147_v32 = vpop.permute.xlu0 %4146 }
0x4e30   : > { %5607 = vtanh.f32 %v4122_v20  ;;  %v4149_v9 = vadd.f32 %v4147_v32, %v4139_v36 }
0x4e32   : > { %5609 = vtanh.f32 %v4149_v9  ;;  %v4252_v23 = vrot.slane %v4149_v9, 4 }
0x4e3d   : > { %v5608_v59 = vpop.eup %5607 }
0x4e3e   : > { %4125 = vrot.lane.b32.xlu1 %v5608_v59, %s5708_s20 }
0x4e3f   : > { %v5610_v11 = vpop.eup %5609 }
0x4e40   : > { %4152 = vrot.lane.b32.xlu0 %v5610_v11, %s5708_s20 }
0x4eb0   : > { %v4126_v12 = vpop.permute.xlu1 %4125 }
0x4eb1   : > { %v6808_v39 = vmul.f32 %v5604_v50, %v4126_v12 }
0x4eb2   : > { %v4153_v19 = vpop.permute.xlu0 %4152 }
0x4eb3   : > { %v6810_v7 = vmul.f32 %v5606_v48, %v4153_v19  ;;  %v4225_v48 = vrot.slane %v4122_v20, 4 }
0x4eb5   : > { %v4156_v29 = vsel %vm637_vm1, %v6808_v39, %v6810_v7 }
0x4eb6   : > { %v4157_v1 = vpack.c.bf16 %v4156_v29, %v4156_v29 }
0x4eb8   : > { %4159 = vrot.lane.b32.xlu1 %v4157_v1, %s5709_s21 }
0x4f2a   : > { %v4160_v6 = vpop.permute.xlu1 %4159 }
0x4f2b   : > { %5029 = vmatmul.mubr.msk.bf16.vlgmr.msra.gmra.mxu1 %vm538_vm2, %v4160_v6 }
0x4f2c   : > { %4407 = vmatpush1.bf16.msra.mxu1 %v6636_v27  ;;  %4426 = vmatprep.mubr.bf16.mxu1 %v5707_v2 }
0x4f2d   : > { %4408 = vmatprep.subr.bf16.mxu1 %v6643_v28 }
0x4f30   : > { %4409 = vmatpush1.bf16.msra.mxu1 %v6649_v30 }
0x4feb   : > { %v4198_v40 = vpop.f32.mrf.mxu1 }
0x4fec   : > { %v4208_v38 = vrot.slane %v4198_v40, 4  ;;  %v4326_v40 = vld [vmem:[#allocation2 + $0x38] sm:$0x3] }
0x4fed   : > { %v4200_v43 = vpop.f32.mrf.mxu1 }
0x4fee   : > { %v4210_v22 = vadd.f32 %v4208_v38, %v4206_v21  ;;  %v4214_v3 = vrot.slane %v4200_v43, 4  ;;  %v4327_v21 = vunpack.c.l.bf16 %v4326_v40 }
0x4fef   : > { %v4202_v44 = vpop.f32.mrf.mxu1 }
0x4ff0   : > { %5611 = vtanh.f32 %v4210_v22  ;;  %v4216_v45 = vadd.f32 %v4214_v3, %v4212_v60  ;;  %v5030_v28 = vmul.f32 -1.442695, %v4210_v22  ;;  %v4330_v22 = vunpack.c.l.bf16 %v4329_v16  ;;  %v4441_v16 = vld [vmem:[#allocation2 + $0x4] sm:$0x3] }
0x4ff1   : > { %v4203_v53 = vpop.f32.mrf.mxu1 }
0x4ff2   : > { %5613 = vtanh.f32 %v4216_v45  ;;  %v5031_v30 = vmul.f32 -1.442695, %v4216_v45 }
0x4ff3   : > { %5615 = vpow2.f32 %v5030_v28 }
0x4ff4   : > { %5617 = vpow2.f32 %v5031_v30 }
0x4ffd   : > { %v5612_v27 = vpop.eup %5611 }
0x4ffe   : > { %4229 = vrot.lane.b32.xlu0 %v5612_v27, %s5708_s20 }
0x4fff   : > { %v5614_v2 = vpop.eup %5613 }
0x5000   : > { %4256 = vrot.lane.b32.xlu1 %v5614_v2, %s5708_s20  ;;  %v5616_v17 = vpop.eup %5615 }
0x5001   : > { %v5618_v62 = vpop.eup %5617  ;;  %v4220_v63 = vadd.f32 1.0, %v5616_v17 }
0x5002   : > { %v4247_v55 = vadd.f32 1.0, %v5618_v62 }
0x5003   : > { %5619 = vrcp.f32 %v4220_v63 }
0x5004   : > { %5621 = vrcp.f32 %v4247_v55 }
0x5010   : > { %v5620_v24 = vpop.eup %5619 }
0x5011   : > { %v5622_v50 = vpop.eup %5621  ;;  %v4227_v57 = vmul.f32 %v5620_v24, %v4225_v48 }
0x5012   : > { %v4254_v35 = vmul.f32 %v5622_v50, %v4252_v23 }
0x5070   : > { %v4230_v54 = vpop.permute.xlu0 %4229 }
0x5071   : > { %v4232_v49 = vmul.f32 %v5620_v24, %v4230_v54 }
0x5072   : > { %v4257_v47 = vpop.permute.xlu1 %4256 }
0x5073   : > { %4234 = vrot.lane.b32.xlu0 %v4232_v49, %s5709_s21  ;;  %v4259_v37 = vmul.f32 %v5622_v50, %v4257_v47 }
0x5075   : > { %4261 = vrot.lane.b32.xlu1 %v4259_v37, %s5709_s21 }
0x50e5   : > { %v4235_v33 = vpop.permute.xlu0 %4234 }
0x50e6   : > { %v4237_v56 = vadd.f32 %v4235_v33, %v4227_v57 }
0x50e7   : > { %v4262_v15 = vpop.permute.xlu1 %4261 }
0x50e8   : > { %5623 = vtanh.f32 %v4237_v56  ;;  %v4264_v36 = vadd.f32 %v4262_v15, %v4254_v35  ;;  %v4340_v37 = vrot.slane %v4237_v56, 4 }
0x50ea   : > { %5625 = vtanh.f32 %v4264_v36  ;;  %v4367_v57 = vrot.slane %v4264_v36, 4 }
0x50f5   : > { %v5624_v32 = vpop.eup %5623 }
0x50f6   : > { %4240 = vrot.lane.b32.xlu0 %v5624_v32, %s5708_s20 }
0x50f7   : > { %v5626_v59 = vpop.eup %5625 }
0x50f8   : > { %4267 = vrot.lane.b32.xlu1 %v5626_v59, %s5708_s20 }
0x5168   : > { %v4241_v11 = vpop.permute.xlu0 %4240 }
0x5169   : > { %v6827_v12 = vmul.f32 %v5620_v24, %v4241_v11 }
0x516a   : > { %v4268_v19 = vpop.permute.xlu1 %4267 }
0x516b   : > { %v6829_v20 = vmul.f32 %v5622_v50, %v4268_v19  ;;  %v4272_v9 = vrot.slane %v6827_v12, 4  ;;  %v4507_v51 = vsel %vm637_vm1, %v6808_v39, %v6827_v12 }
0x516d   : > { %v4275_v29 = vrot.slane %v6829_v20, 4  ;;  %v4510_v8 = vsel %vm637_vm1, %v6829_v20, %v6810_v7 }
0x516f   : > { %v4277_v1 = vsel %vm637_vm1, %v4272_v9, %v4275_v29 }
0x5170   : > { %v4278_v6 = vpack.c.bf16 %v4277_v1, %v4277_v1 }
0x5172   : > { %4280 = vrot.lane.b32.xlu0 %v4278_v6, %s5709_s21 }
0x51e4   : > { %v4281_v4 = vpop.permute.xlu0 %4280 }
0x51e5   : > { %5032 = vmatmul.mubr.msk.bf16.vlgmr.msra.gmra.mxu0 %vm538_vm2, %v4281_v4  ;;  %v4435_v4 = vld [vmem:[#allocation2 + $0x38] sm:$0xc] }
0x52a5   : > { %v4319_v38 = vpop.f32.mrf.mxu0 }
0x52a6   : > { %v4328_v43 = vadd.f32 %v4327_v21, %v4319_v38  ;;  %v4436_v21 = vunpack.c.l.bf16 %v4435_v4 }
0x52a7   : > { %v4321_v60 = vpop.f32.mrf.mxu0 }
0x52a8   : > { %5627 = vtanh.f32 %v4328_v43  ;;  %v4331_v3 = vadd.f32 %v4330_v22, %v4321_v60  ;;  %v5033_v2 = vmul.f32 -1.442695, %v4328_v43  ;;  %v4442_v60 = vunpack.c.l.bf16 %v4441_v16 }
0x52a9   : > { %v4323_v44 = vpop.f32.mrf.mxu0 }
0x52aa   : > { %5629 = vtanh.f32 %v4331_v3  ;;  %v5034_v28 = vmul.f32 -1.442695, %v4331_v3 }
0x52ab   : > { %v4324_v45 = vpop.f32.mrf.mxu0  ;;  %5631 = vpow2.f32 %v5033_v2 }
0x52ac   : > { %5633 = vpow2.f32 %v5034_v28 }
0x52b5   : > { %v5628_v53 = vpop.eup %5627 }
0x52b6   : > { %4344 = vrot.lane.b32.xlu1 %v5628_v53, %s5708_s20 }
0x52b7   : > { %v5630_v27 = vpop.eup %5629 }
0x52b8   : > { %4371 = vrot.lane.b32.xlu0 %v5630_v27, %s5708_s20  ;;  %v5632_v30 = vpop.eup %5631 }
0x52b9   : > { %v5634_v17 = vpop.eup %5633  ;;  %v4335_v62 = vadd.f32 1.0, %v5632_v30 }
0x52ba   : > { %v4362_v63 = vadd.f32 1.0, %v5634_v17 }
0x52bb   : > { %5635 = vrcp.f32 %v4335_v62 }
0x52bc   : > { %5637 = vrcp.f32 %v4362_v63 }
0x52c8   : > { %v5636_v55 = vpop.eup %5635 }
0x52c9   : > { %v5638_v49 = vpop.eup %5637  ;;  %v4342_v48 = vmul.f32 %v5636_v55, %v4340_v37 }
0x52ca   : > { %v4369_v35 = vmul.f32 %v5638_v49, %v4367_v57 }
0x5328   : > { %v4345_v24 = vpop.permute.xlu1 %4344 }
0x5329   : > { %v4347_v54 = vmul.f32 %v5636_v55, %v4345_v24 }
0x532a   : > { %v4372_v50 = vpop.permute.xlu0 %4371 }
0x532b   : > { %4349 = vrot.lane.b32.xlu1 %v4347_v54, %s5709_s21  ;;  %v4374_v47 = vmul.f32 %v5638_v49, %v4372_v50 }
0x532d   : > { %4376 = vrot.lane.b32.xlu0 %v4374_v47, %s5709_s21 }
0x539d   : > { %v4350_v23 = vpop.permute.xlu1 %4349 }
0x539e   : > { %v4352_v33 = vadd.f32 %v4350_v23, %v4342_v48 }
0x539f   : > { %v4377_v15 = vpop.permute.xlu0 %4376 }
0x53a0   : > { %5639 = vtanh.f32 %v4352_v33  ;;  %v4379_v32 = vadd.f32 %v4377_v15, %v4369_v35  ;;  %v4455_v48 = vrot.slane %v4352_v33, 4 }
0x53a2   : > { %5641 = vtanh.f32 %v4379_v32  ;;  %v4482_v23 = vrot.slane %v4379_v32, 4 }
0x53ad   : > { %v5640_v59 = vpop.eup %5639 }
0x53ae   : > { %4355 = vrot.lane.b32.xlu1 %v5640_v59, %s5708_s20 }
0x53af   : > { %v5642_v11 = vpop.eup %5641 }
0x53b0   : > { %4382 = vrot.lane.b32.xlu0 %v5642_v11, %s5708_s20 }
0x5420   : > { %v4356_v19 = vpop.permute.xlu1 %4355 }
0x5421   : > { %v6842_v29 = vmul.f32 %v5636_v55, %v4356_v19  ;;  %v5143_v19 = vld [vmem:[%s6973_s8 + $0x8] sm:$0xff]  }
0x5422   : > { %v4383_v9 = vpop.permute.xlu0 %4382  ;;  %5091 = vmatprep.subr.bf16.mxu1 %v5143_v19 }
0x5423   : > { %v6844_v56 = vmul.f32 %v5638_v49, %v4383_v9 }
0x5425   : > { %v4386_v36 = vsel %vm637_vm1, %v6842_v29, %v6844_v56 }
0x5426   : > { %v4387_v1 = vpack.c.bf16 %v4386_v36, %v4386_v36  ;;  %v5144_v36 = vld [vmem:[%s6973_s8] sm:$0xff]  }
0x5428   : > { %4389 = vrot.lane.b32.xlu1 %v4387_v1, %s5709_s21  ;;  %v5145_v1 = vld [vmem:[%s6974_s9 + $0x8] sm:$0xff]  }
0x5429   : > { %5079 = vmatprep.subr.bf16.mxu0 %v5145_v1 }
0x542a   : > { %5080 = vmatpush3.bf16.msra.mxu0 %v5145_v1 }
0x542b   : > { %5081 = vmatprep.subr.bf16.mxu0 %v5146_v18 }
0x542e   : > { %5082 = vmatpush3.bf16.msra.mxu0 %v5146_v18 }
0x549a   : > { %v4390_v6 = vpop.permute.xlu1 %4389 }
0x549b   : > { %5035 = vmatmul.mubr.msk.bf16.vlgmr.msra.gmra.mxu1 %vm538_vm2, %v4390_v6 }
0x549c   : > { %5092 = vmatpush3.bf16.msra.mxu1 %v5143_v19 }
0x549d   : > { %5093 = vmatprep.subr.bf16.mxu1 %v5144_v36 }
0x54a0   : > { %5094 = vmatpush3.bf16.msra.mxu1 %v5144_v36 }
0x555b   : > { %v4428_v40 = vpop.f32.mrf.mxu1 }
0x555c   : > { %v4438_v38 = vrot.slane %v4428_v40, 4 }
0x555d   : > { %v4430_v43 = vpop.f32.mrf.mxu1 }
0x555e   : > { %v4440_v22 = vadd.f32 %v4438_v38, %v4436_v21  ;;  %v4444_v3 = vrot.slane %v4430_v43, 4 }
0x555f   : > { %v4432_v44 = vpop.f32.mrf.mxu1 }
0x5560   : > { %5643 = vtanh.f32 %v4440_v22  ;;  %v4446_v45 = vadd.f32 %v4444_v3, %v4442_v60  ;;  %v5036_v28 = vmul.f32 -1.442695, %v4440_v22 }
0x5561   : > { %v4433_v53 = vpop.f32.mrf.mxu1 }
0x5562   : > { %5645 = vtanh.f32 %v4446_v45  ;;  %v5037_v30 = vmul.f32 -1.442695, %v4446_v45 }
0x5563   : > { %5647 = vpow2.f32 %v5036_v28 }
0x5564   : > { %5649 = vpow2.f32 %v5037_v30 }
0x556d   : > { %v5644_v27 = vpop.eup %5643 }
0x556e   : > { %4459 = vrot.lane.b32.xlu1 %v5644_v27, %s5708_s20 }
0x556f   : > { %v5646_v2 = vpop.eup %5645 }
0x5570   : > { %4486 = vrot.lane.b32.xlu0 %v5646_v2, %s5708_s20  ;;  %v5648_v17 = vpop.eup %5647 }
0x5571   : > { %v5650_v62 = vpop.eup %5649  ;;  %v4450_v63 = vadd.f32 1.0, %v5648_v17 }
0x5572   : > { %v4477_v55 = vadd.f32 1.0, %v5650_v62 }
0x5573   : > { %5651 = vrcp.f32 %v4450_v63 }
0x5574   : > { %5653 = vrcp.f32 %v4477_v55 }
0x5580   : > { %v5652_v24 = vpop.eup %5651 }
0x5581   : > { %v5654_v50 = vpop.eup %5653  ;;  %v4457_v57 = vmul.f32 %v5652_v24, %v4455_v48 }
0x5582   : > { %v4484_v59 = vmul.f32 %v5654_v50, %v4482_v23 }
0x55e0   : > { %v4460_v54 = vpop.permute.xlu1 %4459 }
0x55e1   : > { %v4462_v49 = vmul.f32 %v5652_v24, %v4460_v54 }
0x55e2   : > { %v4487_v47 = vpop.permute.xlu0 %4486 }
0x55e3   : > { %4464 = vrot.lane.b32.xlu1 %v4462_v49, %s5709_s21  ;;  %v4489_v37 = vmul.f32 %v5654_v50, %v4487_v47 }
0x55e5   : > { %4491 = vrot.lane.b32.xlu0 %v4489_v37, %s5709_s21 }
0x5655   : > { %v4465_v35 = vpop.permute.xlu1 %4464 }
0x5656   : > { %v4467_v15 = vadd.f32 %v4465_v35, %v4457_v57 }
0x5657   : > { %v4492_v11 = vpop.permute.xlu0 %4491 }
0x5658   : > { %5655 = vtanh.f32 %v4467_v15  ;;  %v4494_v9 = vadd.f32 %v4492_v11, %v4484_v59 }
0x565a   : > { %5657 = vtanh.f32 %v4494_v9 }
0x5665   : > { %v5656_v33 = vpop.eup %5655 }
0x5666   : > { %4470 = vrot.lane.b32.xlu1 %v5656_v33, %s5708_s20 }
0x5667   : > { %v5658_v32 = vpop.eup %5657 }
0x5668   : > { %4497 = vrot.lane.b32.xlu0 %v5658_v32, %s5708_s20 }
0x566a   : > { %4638 = vrot.lane.b32.xlu1 %v4517_v34, %s5709_s21 }
0x566e   : > { %4640 = vrot.lane.b32.xlu1 %v4518_v52, %s5709_s21 }
0x5672   : > { %4642 = vrot.lane.b32.xlu1 %v4519_v41, %s5709_s21 }
0x56d8   : > { %v4471_v42 = vpop.permute.xlu1 %4470 }
0x56d9   : > { %v4473_v34 = vmul.f32 %v5652_v24, %v4471_v42 }
0x56da   : > { %v4498_v52 = vpop.permute.xlu0 %4497 }
0x56db   : > { %v4508_v26 = vsel %vm637_vm1, %v6842_v29, %v4473_v34  ;;  %v4500_v4 = vmul.f32 %v5654_v50, %v4498_v52 }
0x56dc   : > { %v4520_v6 = vpack.c.bf16 %v4508_v26, %v4507_v51  ;;  %v4639_v61 = vpop.permute.xlu1 %4638 }
0x56dd   : > { %5095 = vmatprep.mubr.msk.bf16.mxu1 %vm538_vm2, %v4639_v61  ;;  %v4509_v41 = vsel %vm637_vm1, %v4500_v4, %v6844_v56 }
0x56de   : > { %4644 = vrot.lane.b32.xlu1 %v4520_v6, %s5709_s21  ;;  %v4525_v40 = vpack.c.bf16 %v4510_v8, %v4509_v41 }
0x56e0   : > { %v4641_v39 = vpop.permute.xlu1 %4640  ;;  %4537 = vrot.lane.b32.xlu0 %v4525_v40, %s5709_s21 }
0x56e1   : > { %5096 = vmatmul.mubr.msk.bf16.vlgmr.msra.gmra.mxu1 %vm538_vm2, %v4641_v39 }
0x56e4   : > { %v4643_v12 = vpop.permute.xlu1 %4642  ;;  %4539 = vrot.lane.b32.xlu0 %v4526_v25, %s5709_s21 }
0x56e5   : > { %5099 = vmatprep.mubr.msk.bf16.mxu1 %vm538_vm2, %v4643_v12 }
0x56e8   : > { %4541 = vrot.lane.b32.xlu0 %v4527_v46, %s5709_s21 }
0x56ec   : > { %4543 = vrot.lane.b32.xlu0 %v4528_v0, %s5709_s21  ;;  %v5050_v0 = vld [vmem:[%s6975_s10] ss:$0 sm:$0xff] }
0x5750   : > { %v4645_v7 = vpop.permute.xlu1 %4644 }
0x5751   : > { %5100 = vmatmul.mubr.msk.bf16.gmra.mxu1 %vm538_vm2, %v4645_v7 }
0x5752   : > { %v4538_v20 = vpop.permute.xlu0 %4537 }
0x5753   : > { %5083 = vmatprep.mubr.msk.bf16.mxu0 %vm538_vm2, %v4538_v20 }
0x5756   : > { %v4540_v31 = vpop.permute.xlu0 %4539 }
0x5757   : > { %5084 = vmatmul.mubr.msk.bf16.vlgmr.msra.gmra.mxu0 %vm538_vm2, %v4540_v31 }
0x575a   : > { %v4542_v10 = vpop.permute.xlu0 %4541 }
0x575b   : > { %5087 = vmatprep.mubr.msk.bf16.mxu0 %vm538_vm2, %v4542_v10 }
0x575e   : > { %v4544_v25 = vpop.permute.xlu0 %4543 }
0x575f   : > { %5088 = vmatmul.mubr.msk.bf16.gmra.mxu0 %vm538_vm2, %v4544_v25 }
0x57a1   : > { %v5097_v13 = vpop.f32.mrf.mxu1 }
0x57a3   : > { %v4704_v14 = vpop.f32.mrf.mxu1 }
0x57a5   : > { %v5098_v46 = vpop.f32.mrf.mxu1 }
0x57a7   : > { %v4707_v5 = vpop.f32.mrf.mxu1 }
0x5811   : > { %v5101_v56 = vpop.f32.mrf.mxu1 }
0x5813   : > { %v4720_v22 = vpop.f32.mrf.mxu1 }
0x5815   : > { %v5102_v2 = vpop.f32.mrf.mxu1 }
0x5817   : > { %v5085_v58 = vpop.f32.mrf.mxu0  ;;  %v4723_v24 = vpop.f32.mrf.mxu1 }
0x5818   : > { %v4713_v29 = vadd.f32 %v5097_v13, %v5085_v58 }
0x5819   : > { %v4603_v16 = vpop.f32.mrf.mxu0 }
0x581a   : > { %v4744_v21 = vadd.f32 %v5050_v0, %v4713_v29  ;;  %v4705_v38 = vadd.f32 %v4704_v14, %v4603_v16 }
0x581b   : > { %v5086_v43 = vpop.f32.mrf.mxu0 }
0x581c   : > { %4754 = vmax.xlane.f32.xlu0 %v4744_v21  ;;  %v4742_v3 = vadd.f32 %v5050_v0, %v4705_v38  ;;  %v4716_v44 = vadd.f32 %v5098_v46, %v5086_v43 }
0x581d   : > { %v4606_v60 = vpop.f32.mrf.mxu0 }
0x581e   : > { %v4708_v45 = vadd.f32 %v4707_v5, %v4606_v60  ;;  %v4745_v30 = vadd.f32 %v5050_v0, %v4716_v44 }
0x581f   : > { %v5089_v53 = vpop.f32.mrf.mxu0 }
0x5820   : > { %v4743_v27 = vadd.f32 %v5050_v0, %v4708_v45  ;;  %4750 = vmax.xlane.f32.xlu0 %v4742_v3  ;;  %v4729_v63 = vadd.f32 %v5101_v56, %v5089_v53 }
0x5821   : > { %v4619_v28 = vpop.f32.mrf.mxu0 }
0x5822   : > { %v4721_v17 = vadd.f32 %v4720_v22, %v4619_v28  ;;  %4752 = vmax.xlane.f32.xlu1 %v4743_v27  ;;  %v4748_v50 = vadd.f32 %v5050_v0, %v4729_v63 }
0x5823   : > { %v5090_v62 = vpop.f32.mrf.mxu0 }
0x5824   : > { %v4746_v55 = vadd.f32 %v5050_v0, %v4721_v17  ;;  %4756 = vmax.xlane.f32.xlu0 %v4745_v30  ;;  %v4732_v47 = vadd.f32 %v5102_v2, %v5090_v62 }
0x5825   : > { %v4622_v54 = vpop.f32.mrf.mxu0 }
0x5826   : > { %v4724_v49 = vadd.f32 %v4723_v24, %v4622_v54  ;;  %4758 = vmax.xlane.f32.xlu1 %v4746_v55  ;;  %v4749_v48 = vadd.f32 %v5050_v0, %v4732_v47 }
0x5828   : > { %v4747_v37 = vadd.f32 %v5050_v0, %v4724_v49 }
0x582a   : > { %4762 = vmax.xlane.f32.xlu1 %v4748_v50  ;;  %4760 = vmax.xlane.f32.xlu0 %v4747_v37 }
0x582e   : > { %4764 = vmax.xlane.f32.xlu0 %v4749_v48 }
0x58a5   : > { %v4755_v57 = vpop.xlane.xlu0 %4754 }
0x58a6   : > { %v6916_v23 = vsub.f32 %v4744_v21, %v4755_v57 }
0x58a8   : > { %v4778_v35 = vmul.f32 1.442695, %v6916_v23 }
0x58a9   : > { %v4751_v15 = vpop.xlane.xlu0 %4750 }
0x58aa   : > { %5659 = vpow2.f32 %v4778_v35  ;;  %v6919_v59 = vsub.f32 %v4742_v3, %v4751_v15 }
0x58ab   : > { %v4753_v11 = vpop.xlane.xlu1 %4752 }
0x58ac   : > { %v4774_v19 = vmul.f32 1.442695, %v6919_v59  ;;  %v6922_v36 = vsub.f32 %v4743_v27, %v4753_v11 }
0x58ad   : > { %v4757_v9 = vpop.xlane.xlu0 %4756 }
0x58ae   : > { %5661 = vpow2.f32 %v4774_v19  ;;  %v6924_v33 = vsub.f32 %v4745_v30, %v4757_v9  ;;  %v4776_v42 = vmul.f32 1.442695, %v6922_v36 }
0x58af   : > { %v4759_v32 = vpop.xlane.xlu1 %4758 }
0x58b0   : > { %v4780_v1 = vmul.f32 1.442695, %v6924_v33  ;;  %v6927_v18 = vsub.f32 %v4746_v55, %v4759_v32 }
0x58b2   : > { %5663 = vpow2.f32 %v4780_v1  ;;  %v4782_v34 = vmul.f32 1.442695, %v6927_v18 }
0x58b3   : > { %v4763_v51 = vpop.xlane.xlu1 %4762  ;;  %v4761_v26 = vpop.xlane.xlu0 %4760 }
0x58b4   : > { %5665 = vpow2.f32 %v4782_v34  ;;  %v6931_v52 = vsub.f32 %v4748_v50, %v4763_v51  ;;  %v6933_v6 = vsub.f32 %v4747_v37, %v4761_v26 }
0x58b5   : > { %5667 = vpow2.f32 %v4776_v42 }
0x58b6   : > { %v4786_v4 = vmul.f32 1.442695, %v6931_v52  ;;  %v4784_v61 = vmul.f32 1.442695, %v6933_v6 }
0x58b7   : > { %v5660_v8 = vpop.eup %5659  ;;  %v4765_v41 = vpop.xlane.xlu0 %4764 }
0x58b8   : > { %5669 = vpow2.f32 %v4786_v4  ;;  %v6937_v40 = vsub.f32 %v4749_v48, %v4765_v41  ;;  %4794 = vadd.xlane.f32.xlu1 %v5660_v8 }
0x58b9   : > { %5671 = vpow2.f32 %v4784_v61 }
0x58ba   : > { %v4788_v39 = vmul.f32 1.442695, %v6937_v40 }
0x58bb   : > { %v5662_v12 = vpop.eup %5661 }
0x58bc   : > { %4790 = vadd.xlane.f32.xlu1 %v5662_v12  ;;  %5673 = vpow2.f32 %v4788_v39 }
0x58bf   : > { %v5664_v7 = vpop.eup %5663 }
0x58c0   : > { %4796 = vadd.xlane.f32.xlu0 %v5664_v7 }
0x58c1   : > { %v5666_v20 = vpop.eup %5665 }
0x58c2   : > { %4798 = vadd.xlane.f32.xlu1 %v5666_v20  ;;  %v5668_v31 = vpop.eup %5667 }
0x58c4   : > { %4792 = vadd.xlane.f32.xlu0 %v5668_v31 }
0x58c5   : > { %v5670_v10 = vpop.eup %5669 }
0x58c6   : > { %4802 = vadd.xlane.f32.xlu1 %v5670_v10  ;;  %v5672_v25 = vpop.eup %5671 }
0x58c8   : > { %4800 = vadd.xlane.f32.xlu0 %v5672_v25 }
0x58c9   : > { %v5674_v13 = vpop.eup %5673 }
0x58cc   : > { %4804 = vadd.xlane.f32.xlu0 %v5674_v13 }
0x5941   : > { %v4795_v14 = vpop.xlane.xlu1 %4794 }
0x5942   : > { %5675 = vlog2.f32 %v4795_v14 }
0x5945   : > { %v4791_v46 = vpop.xlane.xlu1 %4790 }
0x5946   : > { %5677 = vlog2.f32 %v4791_v46 }
0x5949   : > { %v4797_v5 = vpop.xlane.xlu0 %4796 }
0x594a   : > { %5679 = vlog2.f32 %v4797_v5 }
0x594b   : > { %v4799_v58 = vpop.xlane.xlu1 %4798 }
0x594c   : > { %5681 = vlog2.f32 %v4799_v58 }
0x594d   : > { %v4793_v0 = vpop.xlane.xlu0 %4792 }
0x594e   : > { %5683 = vlog2.f32 %v4793_v0 }
0x594f   : > { %v5676_v29 = vpop.eup %5675  ;;  %v4803_v56 = vpop.xlane.xlu1 %4802 }
0x5950   : > { %v4811_v16 = vmul.f32 0.6931472, %v5676_v29  ;;  %5685 = vlog2.f32 %v4803_v56 }
0x5951   : > { %v4801_v21 = vpop.xlane.xlu0 %4800 }
0x5952   : > { %v4824_v38 = vsub.f32 %v6916_v23, %v4811_v16  ;;  %5687 = vlog2.f32 %v4801_v21 }
0x5953   : > { %v5678_v43 = vpop.eup %5677 }
0x5954   : > { %4832 = vst [vmem:[%s6944_s30 + $0x10] sm:$0xff] %v4824_v38  ;;  %v4807_v22 = vmul.f32 0.6931472, %v5678_v43 }
0x5955   : > { %v4805_v60 = vpop.xlane.xlu0 %4804 }
0x5956   : > { %v4822_v3 = vsub.f32 %v6919_v59, %v4807_v22  ;;  %5689 = vlog2.f32 %v4805_v60 }
0x5957   : > { %v5680_v44 = vpop.eup %5679 }
0x5958   : > { %4830 = vst [vmem:[%s6944_s30] sm:$0xff] %v4822_v3  ;;  %v4813_v45 = vmul.f32 0.6931472, %v5680_v44 }
0x5959   : > { %v5682_v53 = vpop.eup %5681 }
0x595a   : > { %v4825_v27 = vsub.f32 %v6924_v33, %v4813_v45  ;;  %v4815_v2 = vmul.f32 0.6931472, %v5682_v53 }
0x595b   : > { %v5684_v28 = vpop.eup %5683 }
0x595c   : > { %4833 = vst [vmem:[%s6944_s30 + $0x18] sm:$0xff] %v4825_v27  ;;  %v4826_v30 = vsub.f32 %v6927_v18, %v4815_v2  ;;  %v4809_v17 = vmul.f32 0.6931472, %v5684_v28 }
0x595d   : > { %v5686_v62 = vpop.eup %5685 }
0x595e   : > { %4834 = vst [vmem:[%s6944_s30 + $0x20] sm:$0xff] %v4826_v30  ;;  %v4823_v63 = vsub.f32 %v6922_v36, %v4809_v17  ;;  %v4819_v55 = vmul.f32 0.6931472, %v5686_v62 }
0x595f   : > { %v5688_v24 = vpop.eup %5687 }
0x5960   : > { %4831 = vst [vmem:[%s6944_s30 + $0x8] sm:$0xff] %v4823_v63  ;;  %v4828_v54 = vsub.f32 %v6931_v52, %v4819_v55  ;;  %v4817_v49 = vmul.f32 0.6931472, %v5688_v24 }
0x5962   : > { %4836 = vst [vmem:[%s6944_s30 + $0x30] sm:$0xff] %v4828_v54  ;;  %v4827_v50 = vsub.f32 %v6933_v6, %v4817_v49 }
0x5963   : > { %v5690_v47 = vpop.eup %5689 }
0x5964   : > { %4835 = vst [vmem:[%s6944_s30 + $0x28] sm:$0xff] %v4827_v50  ;;  %v4821_v37 = vmul.f32 0.6931472, %v5690_v47 }
0x5966   : > { %v4829_v48 = vsub.f32 %v6937_v40, %v4821_v37 }
0x5968   : > { %4837 = vst [vmem:[%s6944_s30 + $0x38] sm:$0xff] %v4829_v48 }
0x5969 PF: > { %s21_s17 = sadd.s32 1, %s5705_s17  }
0x596a   : > { %p18_p4 = scmp.ge.s32.totalorder %s21_s17, 4  }
0x596c   :  { %20 = sbr.rel (!%p18_p4) target bundleno = 1 (0x1), region = 94 }

</bundles_post_ra>
